<compile_context>
chip_gen: v7x
topology: tpu7x:2x2x1
jax: 0.10.0
libtpu: 0.0.40
codegen_flags: <defaults>
</compile_context>

<pallas_src>
import jax
import jax.numpy as jnp
from jax.experimental import pallas as pl
from jax.experimental.pallas import tpu as pltpu

W1, W2, W3, W4, W5 = 8, 8, 8, 16, 32
NEG_SLOPE = 0.01      # torch.nn.LeakyReLU default negative_slope
B_TILE = 256          # images per grid step (lane-dense output, small VMEM footprint)


def _leaky_relu(x):
    return jnp.where(x >= 0, x, NEG_SLOPE * x)


# ----------------------------------------------------------------------------
# Wrapper-side weight preprocessing (free XLA work, outside the kernel).
# ----------------------------------------------------------------------------
def _conv_as_matmul(w_hwio, hin, win):
    """Dense matrix D with flat_out = flat_in @ D for a VALID, stride-1 conv.

    flat_in  is the row-major (y, x, ci) flatten of the (hin, win, Cin) map,
    flat_out is the row-major (oy, ox, co) flatten of the (hout, wout, Cout) map.
    """
    kh, kw, cin, cout = w_hwio.shape
    hout, wout = hin - kh + 1, win - kw + 1
    # indicator[a, y, p] = 1 iff y == p + a   (input row y feeds output row p via offset a)
    ih = (jnp.arange(hin)[None, :, None] ==
          (jnp.arange(hout)[None, None, :] + jnp.arange(kh)[:, None, None])
          ).astype(jnp.float32)
    iw = (jnp.arange(win)[None, :, None] ==
          (jnp.arange(wout)[None, None, :] + jnp.arange(kw)[:, None, None])
          ).astype(jnp.float32)
    # D[y, x, ci, oy, ox, co] = w[y-oy, x-ox, ci, co] (0 outside the kernel window)
    d = jnp.einsum('abic,ayp,bxq->yxipqc', w_hwio.astype(jnp.float32), ih, iw)
    return d.reshape(hin * win * cin, hout * wout * cout)


def _tile_bias(bias_1c, hout, wout):
    """(1, Cout) -> (1, Hout*Wout*Cout) in (oy, ox, co) column order."""
    return jnp.tile(bias_1c.astype(jnp.float32), (1, hout * wout))


# ----------------------------------------------------------------------------
# Kernel: one grid step processes B_TILE images entirely as 2-D matmuls.
# ----------------------------------------------------------------------------
def _cnn_kernel(x_ref,
                d1, b1, d2, b2, d3, b3, d4, b4,
                wl1, bl1, wl2, bl2,
                o_ref):
    bt = x_ref.shape[0]
    f = x_ref[...].astype(jnp.float32)                                         # (BT, 100)
    f = _leaky_relu(jnp.dot(f, d1[...], preferred_element_type=jnp.float32) + b1[...])   # (BT, 8*8*W1)
    f = _leaky_relu(jnp.dot(f, d2[...], preferred_element_type=jnp.float32) + b2[...])   # (BT, 6*6*W2)
    f = _leaky_relu(jnp.dot(f, d3[...], preferred_element_type=jnp.float32) + b3[...])   # (BT, 4*4*W3)
    f = _leaky_relu(jnp.dot(f, d4[...], preferred_element_type=jnp.float32) + b4[...])   # (BT, W4)  == Flatten()
    f = _leaky_relu(jnp.dot(f, wl1[...], preferred_element_type=jnp.float32) + bl1[...]) # (BT, W5)
    y = jnp.dot(f, wl2[...], preferred_element_type=jnp.float32) + bl2[...]              # (BT, 1)
    # Lane-dense per-block scalars: one result per image along the lane axis.
    o_ref[...] = y.reshape(1, 1, bt).astype(o_ref.dtype)


def homemade_cnn_forward(x, x2, params):
    """x: (B, C, 10, 10) NCHW float32.  x2 is accepted and ignored (as in PyTorch)."""
    del x2
    B = x.shape[0]
    # input[:, 0, :, :].reshape(-1, 1, 10, 10) with the channel dim squeezed,
    # flattened row-major to (B, 100) so the kernel sees lane-dense rows.
    x_flat = x[:, 0, :, :].reshape(B, 100).astype(jnp.float32)

    nb = pl.cdiv(B, B_TILE)
    b_pad = nb * B_TILE
    if b_pad != B:
        x_flat = jnp.pad(x_flat, ((0, b_pad - B), (0, 0)))

    # Pre-fold every conv into a single dense matmul operator + pre-tiled bias.
    d1 = _conv_as_matmul(params['wc1'], 10, 10)      # (100, 512)
    d2 = _conv_as_matmul(params['wc2'], 8, 8)        # (512, 288)
    d3 = _conv_as_matmul(params['wc3'], 6, 6)        # (288, 128)
    d4 = _conv_as_matmul(params['wc4'], 4, 4)        # (128, 16)
    b1 = _tile_bias(params['bc1'], 8, 8)             # (1, 512)
    b2 = _tile_bias(params['bc2'], 6, 6)             # (1, 288)
    b3 = _tile_bias(params['bc3'], 4, 4)             # (1, 128)
    b4 = _tile_bias(params['bc4'], 1, 1)             # (1, 16)

    weight_args = (d1, b1, d2, b2, d3, b3, d4, b4,
                   params['wl1'], params['bl1'], params['wl2'], params['bl2'])

    def full_spec(a):
        # Whole (small) 2-D weight resident in VMEM; block index constant across grid.
        return pl.BlockSpec(a.shape, lambda b: (0, 0))

    in_specs = [pl.BlockSpec((B_TILE, 100), lambda b: (b, 0))]
    in_specs += [full_spec(a) for a in weight_args]

    out = pl.pallas_call(
        _cnn_kernel,
        out_shape=jax.ShapeDtypeStruct((nb, 1, B_TILE), jnp.float32),
        grid=(nb,),
        in_specs=in_specs,
        out_specs=pl.BlockSpec((1, 1, B_TILE), lambda b: (b, 0, 0)),
        compiler_params=pltpu.CompilerParams(dimension_semantics=("parallel",)),
    )(x_flat, *weight_args)

    # Linear(W5, 1) -> (B, 1); Flatten(start_dim=0) -> (B,)
    return out.reshape(b_pad)[:B]


# ----------------------------------------------------------------------------
# Deterministic init + pure-JAX reference for the correctness check.
# ----------------------------------------------------------------------------
def init_params(key):
    """PyTorch-style uniform(-1/sqrt(fan_in), 1/sqrt(fan_in)) init."""
    def u(k, shape, fan_in):
        bound = 1.0 / jnp.sqrt(jnp.float32(fan_in))
        return jax.random.uniform(k, shape, jnp.float32, -bound, bound)

    ks = jax.random.split(key, 12)
    p = {}
    # Conv weights stored HWIO: (kh, kw, Cin, Cout).  Biases stored (1, Cout).
    p['wc1'] = u(ks[0], (3, 3, 1,  W1), 1 * 9)
    p['bc1'] = u(ks[1], (1, W1),        1 * 9)
    p['wc2'] = u(ks[2], (3, 3, W1, W2), W1 * 9)
    p['bc2'] = u(ks[3], (1, W2),        W1 * 9)
    p['wc3'] = u(ks[4], (3, 3, W2, W3), W2 * 9)
    p['bc3'] = u(ks[5], (1, W3),        W2 * 9)
    p['wc4'] = u(ks[6], (4, 4, W3, W4), W3 * 16)
    p['bc4'] = u(ks[7], (1, W4),        W3 * 16)
    # Linear weights stored (in, out) (transposed vs. PyTorch's (out, in)).
    p['wl1'] = u(ks[8],  (W4, W5), W4)
    p['bl1'] = u(ks[9],  (1, W5),  W4)
    p['wl2'] = u(ks[10], (W5, 1),  W5)
    p['bl2'] = u(ks[11], (1, 1),   W5)
    return p


def reference_forward(x, params):
    """Pure-JAX reference of the same forward pass."""
    B = x.shape[0]
    fm = x[:, 0, :, :].reshape(B, 10, 10, 1)   # NHWC

    def conv(fm, w, b):
        out = jax.lax.conv_general_dilated(
            fm, w, window_strides=(1, 1), padding='VALID',
            dimension_numbers=('NHWC', 'HWIO', 'NHWC'),
            precision=jax.lax.Precision.HIGHEST)
        return _leaky_relu(out + b[0][None, None, None, :])

    fm = conv(fm, params['wc1'], params['bc1'])
    fm = conv(fm, params['wc2'], params['bc2'])
    fm = conv(fm, params['wc3'], params['bc3'])
    fm = conv(fm, params['wc4'], params['bc4'])
    feat = fm.reshape(B, W4)
    h = _leaky_relu(feat @ params['wl1'] + params['bl1'])
    y = h @ params['wl2'] + params['bl2']
    return y.reshape(-1)


if __name__ == "__main__":
    key = jax.random.PRNGKey(0)
    kx, kx2, kp = jax.random.split(key, 3)
    x = jax.random.normal(kx, (2, 4, 10, 10), jnp.float32)    # NCHW input
    x2 = jax.random.normal(kx2, (2, 3), jnp.float32)          # unused by forward
    params = init_params(kp)

    out = homemade_cnn_forward(x, x2, params)
    out = jax.block_until_ready(out)

    assert out.shape == (2,), out.shape
    ref = reference_forward(x, params)
    if not jnp.allclose(out, ref, rtol=5e-3, atol=5e-3):
        raise AssertionError(f"mismatch: pallas={out} ref={ref}")
    print("KERNEL_OK")
</pallas_src>

<mosaic_0001>
module attributes {stable_mosaic.version = 11 : i64} {
  func.func @_cnn_kernel(%arg0: i32, %arg1: memref<256x100xf32, #tpu.memory_space<vmem>>, %arg2: memref<100x512xf32, #tpu.memory_space<vmem>>, %arg3: memref<1x512xf32, #tpu.memory_space<vmem>>, %arg4: memref<512x288xf32, #tpu.memory_space<vmem>>, %arg5: memref<1x288xf32, #tpu.memory_space<vmem>>, %arg6: memref<288x128xf32, #tpu.memory_space<vmem>>, %arg7: memref<1x128xf32, #tpu.memory_space<vmem>>, %arg8: memref<128x16xf32, #tpu.memory_space<vmem>>, %arg9: memref<1x16xf32, #tpu.memory_space<vmem>>, %arg10: memref<16x32xf32, #tpu.memory_space<vmem>>, %arg11: memref<1x32xf32, #tpu.memory_space<vmem>>, %arg12: memref<32x1xf32, #tpu.memory_space<vmem>>, %arg13: memref<1x1xf32, #tpu.memory_space<vmem>>, %arg14: memref<1x1x256xf32, #tpu.memory_space<vmem>>) attributes {dimension_semantics = [#tpu.dimension_semantics<parallel>], iteration_bounds = array<i64: 1>, scalar_prefetch = 0 : i64, scratch_operands = 0 : i64, tpu.core_type = #tpu.core_type<tc>, window_params = [{transform_indices = @transform_0, window_bounds = array<i64: 256, 100>}, {pipeline_mode = #tpu.pipeline_mode<synchronous>, transform_indices = @transform_1, window_bounds = array<i64: 100, 512>}, {pipeline_mode = #tpu.pipeline_mode<synchronous>, transform_indices = @transform_2, window_bounds = array<i64: 1, 512>}, {pipeline_mode = #tpu.pipeline_mode<synchronous>, transform_indices = @transform_3, window_bounds = array<i64: 512, 288>}, {pipeline_mode = #tpu.pipeline_mode<synchronous>, transform_indices = @transform_4, window_bounds = array<i64: 1, 288>}, {pipeline_mode = #tpu.pipeline_mode<synchronous>, transform_indices = @transform_5, window_bounds = array<i64: 288, 128>}, {pipeline_mode = #tpu.pipeline_mode<synchronous>, transform_indices = @transform_6, window_bounds = array<i64: 1, 128>}, {pipeline_mode = #tpu.pipeline_mode<synchronous>, transform_indices = @transform_7, window_bounds = array<i64: 128, 16>}, {pipeline_mode = #tpu.pipeline_mode<synchronous>, transform_indices = @transform_8, window_bounds = array<i64: 1, 16>}, {pipeline_mode = #tpu.pipeline_mode<synchronous>, transform_indices = @transform_9, window_bounds = array<i64: 16, 32>}, {pipeline_mode = #tpu.pipeline_mode<synchronous>, transform_indices = @transform_10, window_bounds = array<i64: 1, 32>}, {pipeline_mode = #tpu.pipeline_mode<synchronous>, transform_indices = @transform_11, window_bounds = array<i64: 32, 1>}, {pipeline_mode = #tpu.pipeline_mode<synchronous>, transform_indices = @transform_12, window_bounds = array<i64: 1, 1>}, {transform_indices = @transform_13, window_bounds = array<i64: 1, 1, 256>}]} {
    %c0 = arith.constant 0 : index
    %c0_0 = arith.constant 0 : index
    %0 = vector.load %arg1[%c0, %c0_0] : memref<256x100xf32, #tpu.memory_space<vmem>>, vector<256x100xf32>
    %c0_1 = arith.constant 0 : index
    %c0_2 = arith.constant 0 : index
    %1 = vector.load %arg2[%c0_1, %c0_2] : memref<100x512xf32, #tpu.memory_space<vmem>>, vector<100x512xf32>
    %cst = arith.constant dense<0.000000e+00> : vector<256x512xf32>
    %2 = tpu.matmul %0, %1, %cst {dimension_numbers = #tpu.dot_dimension_numbers<[1], [0], [0], [1], [0, 0, 1, 1], [], []>} : vector<256x100xf32>, vector<100x512xf32>, vector<256x512xf32> -> vector<256x512xf32>
    %c0_3 = arith.constant 0 : index
    %c0_4 = arith.constant 0 : index
    %3 = vector.load %arg3[%c0_3, %c0_4] : memref<1x512xf32, #tpu.memory_space<vmem>>, vector<1x512xf32>
    %4 = vector.broadcast %3 : vector<1x512xf32> to vector<256x512xf32>
    %5 = arith.addf %2, %4 : vector<256x512xf32>
    %cst_5 = arith.constant 0.000000e+00 : f32
    %6 = vector.broadcast %cst_5 : f32 to vector<256x512xf32>
    %7 = arith.cmpf oge, %5, %6 : vector<256x512xf32>
    %cst_6 = arith.constant 0.00999999977 : f32
    %8 = vector.broadcast %cst_6 : f32 to vector<256x512xf32>
    %9 = arith.mulf %8, %5 : vector<256x512xf32>
    %10 = arith.select %7, %5, %9 : vector<256x512xi1>, vector<256x512xf32>
    %c0_7 = arith.constant 0 : index
    %c0_8 = arith.constant 0 : index
    %11 = vector.load %arg4[%c0_7, %c0_8] : memref<512x288xf32, #tpu.memory_space<vmem>>, vector<512x288xf32>
    %cst_9 = arith.constant dense<0.000000e+00> : vector<256x288xf32>
    %12 = tpu.matmul %10, %11, %cst_9 {dimension_numbers = #tpu.dot_dimension_numbers<[1], [0], [0], [1], [0, 0, 1, 1], [], []>} : vector<256x512xf32>, vector<512x288xf32>, vector<256x288xf32> -> vector<256x288xf32>
    %c0_10 = arith.constant 0 : index
    %c0_11 = arith.constant 0 : index
    %13 = vector.load %arg5[%c0_10, %c0_11] : memref<1x288xf32, #tpu.memory_space<vmem>>, vector<1x288xf32>
    %14 = vector.broadcast %13 : vector<1x288xf32> to vector<256x288xf32>
    %15 = arith.addf %12, %14 : vector<256x288xf32>
    %cst_12 = arith.constant 0.000000e+00 : f32
    %16 = vector.broadcast %cst_12 : f32 to vector<256x288xf32>
    %17 = arith.cmpf oge, %15, %16 : vector<256x288xf32>
    %cst_13 = arith.constant 0.00999999977 : f32
    %18 = vector.broadcast %cst_13 : f32 to vector<256x288xf32>
    %19 = arith.mulf %18, %15 : vector<256x288xf32>
    %20 = arith.select %17, %15, %19 : vector<256x288xi1>, vector<256x288xf32>
    %c0_14 = arith.constant 0 : index
    %c0_15 = arith.constant 0 : index
    %21 = vector.load %arg6[%c0_14, %c0_15] : memref<288x128xf32, #tpu.memory_space<vmem>>, vector<288x128xf32>
    %cst_16 = arith.constant dense<0.000000e+00> : vector<256x128xf32>
    %22 = tpu.matmul %20, %21, %cst_16 {dimension_numbers = #tpu.dot_dimension_numbers<[1], [0], [0], [1], [0, 0, 1, 1], [], []>} : vector<256x288xf32>, vector<288x128xf32>, vector<256x128xf32> -> vector<256x128xf32>
    %c0_17 = arith.constant 0 : index
    %c0_18 = arith.constant 0 : index
    %23 = vector.load %arg7[%c0_17, %c0_18] : memref<1x128xf32, #tpu.memory_space<vmem>>, vector<1x128xf32>
    %24 = vector.broadcast %23 : vector<1x128xf32> to vector<256x128xf32>
    %25 = arith.addf %22, %24 : vector<256x128xf32>
    %cst_19 = arith.constant 0.000000e+00 : f32
    %26 = vector.broadcast %cst_19 : f32 to vector<256x128xf32>
    %27 = arith.cmpf oge, %25, %26 : vector<256x128xf32>
    %cst_20 = arith.constant 0.00999999977 : f32
    %28 = vector.broadcast %cst_20 : f32 to vector<256x128xf32>
    %29 = arith.mulf %28, %25 : vector<256x128xf32>
    %30 = arith.select %27, %25, %29 : vector<256x128xi1>, vector<256x128xf32>
    %c0_21 = arith.constant 0 : index
    %c0_22 = arith.constant 0 : index
    %31 = vector.load %arg8[%c0_21, %c0_22] : memref<128x16xf32, #tpu.memory_space<vmem>>, vector<128x16xf32>
    %cst_23 = arith.constant dense<0.000000e+00> : vector<256x16xf32>
    %32 = tpu.matmul %30, %31, %cst_23 {dimension_numbers = #tpu.dot_dimension_numbers<[1], [0], [0], [1], [0, 0, 1, 1], [], []>} : vector<256x128xf32>, vector<128x16xf32>, vector<256x16xf32> -> vector<256x16xf32>
    %c0_24 = arith.constant 0 : index
    %c0_25 = arith.constant 0 : index
    %33 = vector.load %arg9[%c0_24, %c0_25] : memref<1x16xf32, #tpu.memory_space<vmem>>, vector<1x16xf32>
    %34 = vector.broadcast %33 : vector<1x16xf32> to vector<256x16xf32>
    %35 = arith.addf %32, %34 : vector<256x16xf32>
    %cst_26 = arith.constant 0.000000e+00 : f32
    %36 = vector.broadcast %cst_26 : f32 to vector<256x16xf32>
    %37 = arith.cmpf oge, %35, %36 : vector<256x16xf32>
    %cst_27 = arith.constant 0.00999999977 : f32
    %38 = vector.broadcast %cst_27 : f32 to vector<256x16xf32>
    %39 = arith.mulf %38, %35 : vector<256x16xf32>
    %40 = arith.select %37, %35, %39 : vector<256x16xi1>, vector<256x16xf32>
    %c0_28 = arith.constant 0 : index
    %c0_29 = arith.constant 0 : index
    %41 = vector.load %arg10[%c0_28, %c0_29] : memref<16x32xf32, #tpu.memory_space<vmem>>, vector<16x32xf32>
    %cst_30 = arith.constant dense<0.000000e+00> : vector<256x32xf32>
    %42 = tpu.matmul %40, %41, %cst_30 {dimension_numbers = #tpu.dot_dimension_numbers<[1], [0], [0], [1], [0, 0, 1, 1], [], []>} : vector<256x16xf32>, vector<16x32xf32>, vector<256x32xf32> -> vector<256x32xf32>
    %c0_31 = arith.constant 0 : index
    %c0_32 = arith.constant 0 : index
    %43 = vector.load %arg11[%c0_31, %c0_32] : memref<1x32xf32, #tpu.memory_space<vmem>>, vector<1x32xf32>
    %44 = vector.broadcast %43 : vector<1x32xf32> to vector<256x32xf32>
    %45 = arith.addf %42, %44 : vector<256x32xf32>
    %cst_33 = arith.constant 0.000000e+00 : f32
    %46 = vector.broadcast %cst_33 : f32 to vector<256x32xf32>
    %47 = arith.cmpf oge, %45, %46 : vector<256x32xf32>
    %cst_34 = arith.constant 0.00999999977 : f32
    %48 = vector.broadcast %cst_34 : f32 to vector<256x32xf32>
    %49 = arith.mulf %48, %45 : vector<256x32xf32>
    %50 = arith.select %47, %45, %49 : vector<256x32xi1>, vector<256x32xf32>
    %c0_35 = arith.constant 0 : index
    %c0_36 = arith.constant 0 : index
    %51 = vector.load %arg12[%c0_35, %c0_36] : memref<32x1xf32, #tpu.memory_space<vmem>>, vector<32x1xf32>
    %cst_37 = arith.constant dense<0.000000e+00> : vector<256x1xf32>
    %52 = tpu.matmul %50, %51, %cst_37 {dimension_numbers = #tpu.dot_dimension_numbers<[1], [0], [0], [1], [0, 0, 1, 1], [], []>} : vector<256x32xf32>, vector<32x1xf32>, vector<256x1xf32> -> vector<256x1xf32>
    %c0_38 = arith.constant 0 : index
    %c0_39 = arith.constant 0 : index
    %53 = vector.load %arg13[%c0_38, %c0_39] : memref<1x1xf32, #tpu.memory_space<vmem>>, vector<1x1xf32>
    %54 = vector.broadcast %53 : vector<1x1xf32> to vector<256x1xf32>
    %55 = arith.addf %52, %54 : vector<256x1xf32>
    %56 = vector.shape_cast %55 : vector<256x1xf32> to vector<1x1x256xf32>
    %c0_40 = arith.constant 0 : index
    %c0_41 = arith.constant 0 : index
    %c0_42 = arith.constant 0 : index
    %57 = vector.load %arg14[%c0_40, %c0_41, %c0_42] : memref<1x1x256xf32, #tpu.memory_space<vmem>>, vector<1x1x256xf32>
    tpu.vector_store %arg14[%c0_40, %c0_41, %c0_42], %56 {strides = array<i32>} : memref<1x1x256xf32, #tpu.memory_space<vmem>>, vector<1x1x256xf32>,
    return
  }
  func.func @transform_0(%arg0: i32) -> (i32, i32) {
    %c0_i32 = arith.constant 0 : i32
    %c0_i32_0 = arith.constant 0 : i32
    return %arg0, %c0_i32 : i32, i32
  }
  func.func @transform_1(%arg0: i32) -> (i32, i32) {
    %c0_i32 = arith.constant 0 : i32
    %c0_i32_0 = arith.constant 0 : i32
    %c0_i32_1 = arith.constant 0 : i32
    return %c0_i32, %c0_i32_0 : i32, i32
  }
  func.func @transform_2(%arg0: i32) -> (i32, i32) {
    %c0_i32 = arith.constant 0 : i32
    %c0_i32_0 = arith.constant 0 : i32
    %c0_i32_1 = arith.constant 0 : i32
    return %c0_i32, %c0_i32_0 : i32, i32
  }
  func.func @transform_3(%arg0: i32) -> (i32, i32) {
    %c0_i32 = arith.constant 0 : i32
    %c0_i32_0 = arith.constant 0 : i32
    %c0_i32_1 = arith.constant 0 : i32
    return %c0_i32, %c0_i32_0 : i32, i32
  }
  func.func @transform_4(%arg0: i32) -> (i32, i32) {
    %c0_i32 = arith.constant 0 : i32
    %c0_i32_0 = arith.constant 0 : i32
    %c0_i32_1 = arith.constant 0 : i32
    return %c0_i32, %c0_i32_0 : i32, i32
  }
  func.func @transform_5(%arg0: i32) -> (i32, i32) {
    %c0_i32 = arith.constant 0 : i32
    %c0_i32_0 = arith.constant 0 : i32
    %c0_i32_1 = arith.constant 0 : i32
    return %c0_i32, %c0_i32_0 : i32, i32
  }
  func.func @transform_6(%arg0: i32) -> (i32, i32) {
    %c0_i32 = arith.constant 0 : i32
    %c0_i32_0 = arith.constant 0 : i32
    %c0_i32_1 = arith.constant 0 : i32
    return %c0_i32, %c0_i32_0 : i32, i32
  }
  func.func @transform_7(%arg0: i32) -> (i32, i32) {
    %c0_i32 = arith.constant 0 : i32
    %c0_i32_0 = arith.constant 0 : i32
    %c0_i32_1 = arith.constant 0 : i32
    return %c0_i32, %c0_i32_0 : i32, i32
  }
  func.func @transform_8(%arg0: i32) -> (i32, i32) {
    %c0_i32 = arith.constant 0 : i32
    %c0_i32_0 = arith.constant 0 : i32
    %c0_i32_1 = arith.constant 0 : i32
    return %c0_i32, %c0_i32_0 : i32, i32
  }
  func.func @transform_9(%arg0: i32) -> (i32, i32) {
    %c0_i32 = arith.constant 0 : i32
    %c0_i32_0 = arith.constant 0 : i32
    %c0_i32_1 = arith.constant 0 : i32
    return %c0_i32, %c0_i32_0 : i32, i32
  }
  func.func @transform_10(%arg0: i32) -> (i32, i32) {
    %c0_i32 = arith.constant 0 : i32
    %c0_i32_0 = arith.constant 0 : i32
    %c0_i32_1 = arith.constant 0 : i32
    return %c0_i32, %c0_i32_0 : i32, i32
  }
  func.func @transform_11(%arg0: i32) -> (i32, i32) {
    %c0_i32 = arith.constant 0 : i32
    %c0_i32_0 = arith.constant 0 : i32
    %c0_i32_1 = arith.constant 0 : i32
    return %c0_i32, %c0_i32_0 : i32, i32
  }
  func.func @transform_12(%arg0: i32) -> (i32, i32) {
    %c0_i32 = arith.constant 0 : i32
    %c0_i32_0 = arith.constant 0 : i32
    %c0_i32_1 = arith.constant 0 : i32
    return %c0_i32, %c0_i32_0 : i32, i32
  }
  func.func @transform_13(%arg0: i32) -> (i32, i32, i32) {
    %c0_i32 = arith.constant 0 : i32
    %c0_i32_0 = arith.constant 0 : i32
    %c0_i32_1 = arith.constant 0 : i32
    return %arg0, %c0_i32, %c0_i32_0 : i32, i32, i32
  }
}

</mosaic_0001>

<bundles_post_ra>
// kernel: tpu_custom_call.1
= control target key start
LH: loop header
LB: loop body
LE: loop exit
PB: predicated region body
PF: predicated region fallthrough
CT: control target
= control target key end

     0   :  { %s12134_s0 = inlined_call_operand.vmem [shape: f32[256,100], index: 0, kind: input, shape index: {}]   ;;  %s12135_s1 = inlined_call_operand.vmem [shape: f32[100,512], index: 1, kind: input, shape index: {}]   ;;  %s12136_s2 = inlined_call_operand.vmem [shape: f32[1,512], index: 2, kind: input, shape index: {}]   ;;  %s12137_s3 = inlined_call_operand.vmem [shape: f32[512,288], index: 3, kind: input, shape index: {}]   ;;  %s12138_s4 = inlined_call_operand.vmem [shape: f32[1,288], index: 4, kind: input, shape index: {}]   ;;  %s12139_s5 = inlined_call_operand.vmem [shape: f32[288,128], index: 5, kind: input, shape index: {}]   ;;  %s12140_s6 = inlined_call_operand.vmem [shape: f32[1,128], index: 6, kind: input, shape index: {}]   ;;  %s12141_s7 = inlined_call_operand.vmem [shape: f32[128,16], index: 7, kind: input, shape index: {}]   ;;  %s12142_s8 = inlined_call_operand.vmem [shape: f32[1,16], index: 8, kind: input, shape index: {}]   ;;  %s12143_s9 = inlined_call_operand.vmem [shape: f32[16,32], index: 9, kind: input, shape index: {}]   ;;  %s12144_s10 = inlined_call_operand.vmem [shape: f32[1,32], index: 10, kind: input, shape index: {}]   ;;  %s12145_s11 = inlined_call_operand.vmem [shape: f32[32,1], index: 11, kind: input, shape index: {}]   ;;  %s12146_s12 = inlined_call_operand.<no memory space> [shape: f32[1,1], index: 12, kind: input, shape index: {}]   ;;  %s12147_s13 = inlined_call_operand.hbm [shape: f32[1,1,256], index: 13, kind: output, shape index: {}]  }
   0x1   :  { %v18_v0 = vstv %s12146_s12 }
   0x2   :  { %19 = vst [vmem:[#allocation2] sm:$0x1] %v18_v0 }
   0x3   :  { %v80_v1 = vld [vmem:[%s12135_s1 + $0x8] sm:$0xff]  ;;  %v79_v3 = vld [vmem:[%s12135_s1] sm:$0xff]  ;;  %v9159_v8 = vmov 0.0   ;;  %v82_v33 = vld [vmem:[%s12135_s1 + $0x18] sm:$0xff]  ;;  %vm250_vm0 = vcmask 1043456   ;;  %vm153_vm1 = vcmask 818176  }
   0x4   :  { %v84_v2 = vld [vmem:[%s12135_s1 + $0x28] sm:$0xff]  ;;  %v83_v5 = vld [vmem:[%s12135_s1 + $0x20] sm:$0xff]  ;;  %327 = vmatprep.mubr.f32.mxu0 %v9159_v8  ;;  %584 = vmatprep.mubr.f32.mxu1 %v9159_v8  ;;  %v86_v34 = vld [vmem:[%s12135_s1 + $0x38] sm:$0xff] }
   0x5   :  { %v8530_v4 = vpack.c.bf16 %v84_v2, %v80_v1  ;;  %v88_v6 = vld [vmem:[%s12135_s1 + $0x48] sm:$0xff]  ;;  %v8532_v9 = vpack.c.bf16 %v83_v5, %v79_v3  ;;  %v87_v11 = vld [vmem:[%s12135_s1 + $0x40] sm:$0xff]  ;;  %v8554_v36 = vpack.c.bf16 %v86_v34, %v82_v33  ;;  %v81_v37 = vld [vmem:[%s12135_s1 + $0x10] sm:$0xff] }
   0x6   :  { %v92_v7 = vld [vmem:[%s12135_s1 + $0x68] sm:$0xff]  ;;  %v91_v12 = vld [vmem:[%s12135_s1 + $0x60] sm:$0xff]  ;;  %v85_v38 = vld [vmem:[%s12135_s1 + $0x30] sm:$0xff] }
   0x7   :  { %v8534_v10 = vpack.c.bf16 %v92_v7, %v88_v6  ;;  %v96_v13 = vld [vmem:[%s12135_s1 + $0x88] sm:$0xff]  ;;  %8531 = vmatprep.subr.bf16.mxu0 %v8530_v4  ;;  %v8536_v15 = vpack.c.bf16 %v91_v12, %v87_v11  ;;  %v95_v17 = vld [vmem:[%s12135_s1 + $0x80] sm:$0xff]  ;;  %v8556_v40 = vpack.c.bf16 %v85_v38, %v81_v37  ;;  %v90_v41 = vld [vmem:[%s12135_s1 + $0x58] sm:$0xff]  ;;  %8555 = vmatprep.subr.bf16.mxu1 %v8554_v36 }
   0x8   :  { %v100_v14 = vld [vmem:[%s12135_s1 + $0xa8] sm:$0xff]  ;;  %8533 = vmatpush1.bf16.msra.mxu0 %v8532_v9  ;;  %v99_v18 = vld [vmem:[%s12135_s1 + $0xa0] sm:$0xff]  ;;  %v94_v42 = vld [vmem:[%s12135_s1 + $0x78] sm:$0xff] }
   0x9   :  { %8535 = vmatprep.subr.bf16.mxu0 %v8534_v10  ;;  %v8538_v16 = vpack.c.bf16 %v100_v14, %v96_v13  ;;  %v104_v19 = vld [vmem:[%s12135_s1 + $0xc8] sm:$0xff]  ;;  %v8540_v21 = vpack.c.bf16 %v99_v18, %v95_v17  ;;  %v103_v23 = vld [vmem:[%s12135_s1 + $0xc0] sm:$0xff]  ;;  %v89_v43 = vld [vmem:[%s12135_s1 + $0x50] sm:$0xff]  ;;  %v8558_v46 = vpack.c.bf16 %v94_v42, %v90_v41  ;;  %8557 = vmatpush1.bf16.msra.mxu1 %v8556_v40 }
   0xa   :  { %v108_v20 = vld [vmem:[%s12135_s1 + $0xe8] sm:$0xff]  ;;  %v107_v24 = vld [vmem:[%s12135_s1 + $0xe0] sm:$0xff]  ;;  %v93_v47 = vld [vmem:[%s12135_s1 + $0x70] sm:$0xff] }
   0xb   :  { %v8542_v22 = vpack.c.bf16 %v108_v20, %v104_v19  ;;  %v112_v25 = vld [vmem:[%s12135_s1 + $0x108] sm:$0xff]  ;;  %v8544_v27 = vpack.c.bf16 %v107_v24, %v103_v23  ;;  %v111_v29 = vld [vmem:[%s12135_s1 + $0x100] sm:$0xff]  ;;  %v98_v48 = vld [vmem:[%s12135_s1 + $0x98] sm:$0xff]  ;;  %v8560_v49 = vpack.c.bf16 %v93_v47, %v89_v43  ;;  %8559 = vmatprep.subr.bf16.mxu1 %v8558_v46 }
   0xc   :  { %8537 = vmatpush1.bf16.msra.mxu0 %v8536_v15  ;;  %v116_v26 = vld [vmem:[%s12135_s1 + $0x128] sm:$0xff]  ;;  %v115_v30 = vld [vmem:[%s12135_s1 + $0x120] sm:$0xff]  ;;  %v102_v50 = vld [vmem:[%s12135_s1 + $0xb8] sm:$0xff] }
   0xd   :  { %8539 = vmatprep.subr.bf16.mxu0 %v8538_v16  ;;  %v8546_v28 = vpack.c.bf16 %v116_v26, %v112_v25  ;;  %v120_v31 = vld [vmem:[%s12135_s1 + $0x148] sm:$0xff]  ;;  %v119_v35 = vld [vmem:[%s12135_s1 + $0x140] sm:$0xff]  ;;  %v8548_v39 = vpack.c.bf16 %v115_v30, %v111_v29  ;;  %v8562_v51 = vpack.c.bf16 %v102_v50, %v98_v48  ;;  %v97_v52 = vld [vmem:[%s12135_s1 + $0x90] sm:$0xff]  ;;  %8561 = vmatpush1.bf16.msra.mxu1 %v8560_v49 }
   0xe   :  { %v124_v32 = vld [vmem:[%s12135_s1 + $0x168] sm:$0xff]  ;;  %v123_v45 = vld [vmem:[%s12135_s1 + $0x160] sm:$0xff]  ;;  %v101_v53 = vld [vmem:[%s12135_s1 + $0xb0] sm:$0xff] }
   0xf   :  { %v8550_v44 = vpack.c.bf16 %v124_v32, %v120_v31  ;;  %v8552_v54 = vpack.c.bf16 %v123_v45, %v119_v35  ;;  %v106_v55 = vld [vmem:[%s12135_s1 + $0xd8] sm:$0xff]  ;;  %v128_v57 = vld [vmem:[%s12135_s1 + $0x188] sm:$0xf]  ;;  %v8564_v58 = vpack.c.bf16 %v101_v53, %v97_v52  ;;  %v127_v59 = vld [vmem:[%s12135_s1 + $0x180] sm:$0xf]  ;;  %8563 = vmatprep.subr.bf16.mxu1 %v8562_v51  ;;  %v12152_v51 = vmov 0.0|0.0  }
  0x10   :  { %8541 = vmatpush1.bf16.msra.mxu0 %v8540_v21  ;;  %v110_v56 = vld [vmem:[%s12135_s1 + $0xf8] sm:$0xff]  ;;  %v105_v61 = vld [vmem:[%s12135_s1 + $0xd0] sm:$0xff]  ;;  %v9368_v63 = vld [vmem:[%s12134_s0] sm:$0xff] }
  0x11   :  { %8543 = vmatprep.subr.bf16.mxu0 %v8542_v22  ;;  %v8566_v60 = vpack.c.bf16 %v110_v56, %v106_v55  ;;  %v109_v62 = vld [vmem:[%s12135_s1 + $0xf0] sm:$0xff]  ;;  %v114_v0 = vld [vmem:[%s12135_s1 + $0x118] sm:$0xff]  ;;  %v1162_v2 = vld [vmem:[%s12137_s3 + $0x8] sm:$0xff]  ;;  %8565 = vmatpush1.bf16.msra.mxu1 %v8564_v58 }
  0x12   :  { %v118_v1 = vld [vmem:[%s12135_s1 + $0x138] sm:$0xff]  ;;  %v1165_v3 = vld [vmem:[%s12137_s3 + $0x20] sm:$0xff]  ;;  %v8568_v5 = vpack.c.bf16 %v109_v62, %v105_v61  ;;  %v113_v6 = vld [vmem:[%s12135_s1 + $0x110] sm:$0xff] }
  0x13   :  { %v1161_v4 = vld [vmem:[%s12137_s3] sm:$0xff]  ;;  %v117_v7 = vld [vmem:[%s12135_s1 + $0x130] sm:$0xff]  ;;  %v8578_v9 = vpack.c.bf16 %v1165_v3, %v1162_v2  ;;  %v1164_v10 = vld [vmem:[%s12137_s3 + $0x18] sm:$0xff]  ;;  %8567 = vmatprep.subr.bf16.mxu1 %v8566_v60  ;;  %v8570_v11 = vpack.c.bf16 %v118_v1, %v114_v0 }
  0x14   :  { %8545 = vmatpush1.bf16.msra.mxu0 %v8544_v27  ;;  %v122_v12 = vld [vmem:[%s12135_s1 + $0x158] sm:$0xff]  ;;  %v8580_v14 = vpack.c.bf16 %v1164_v10, %v1161_v4  ;;  %v1171_v16 = vld [vmem:[%s12137_s3 + $0x50] sm:$0xff]  ;;  %v1170_v18 = vld [vmem:[%s12137_s3 + $0x48] sm:$0xff]  ;;  %v8572_v21 = vpack.c.bf16 %v117_v7, %v113_v6 }
  0x15   :  { %8547 = vmatprep.subr.bf16.mxu0 %v8546_v28  ;;  %v126_v13 = vld [vmem:[%s12135_s1 + $0x178] sm:$0xff]  ;;  %v1167_v17 = vld [vmem:[%s12137_s3 + $0x30] sm:$0xff]  ;;  %v9420_v20 = vld [vmem:[%s12134_s0 + $0x8] sm:$0xff]  ;;  %8569 = vmatpush1.bf16.msra.mxu1 %v8568_v5 }
  0x16   :  { %v1168_v15 = vld [vmem:[%s12137_s3 + $0x38] sm:$0xff]  ;;  %v1174_v22 = vld [vmem:[%s12137_s3 + $0x68] sm:$0xff]  ;;  %v1177_v23 = vld [vmem:[%s12137_s3 + $0x80] sm:$0xff]  ;;  %8571 = vmatprep.subr.bf16.mxu1 %v8570_v11  ;;  %v8574_v24 = vpack.c.bf16 %v126_v13, %v122_v12  ;;  %v8584_v27 = vpack.c.bf16 %v1170_v18, %v1167_v17 }
  0x17   :  { %v8582_v19 = vpack.c.bf16 %v1171_v16, %v1168_v15  ;;  %v121_v25 = vld [vmem:[%s12135_s1 + $0x150] sm:$0xff]  ;;  %v8586_v28 = vpack.c.bf16 %v1177_v23, %v1174_v22  ;;  %v1173_v29 = vld [vmem:[%s12137_s3 + $0x60] sm:$0xff]  ;;  %v1176_v30 = vld [vmem:[%s12137_s3 + $0x78] sm:$0xff] }
  0x18   :  { %8549 = vmatpush1.bf16.msra.mxu0 %v8548_v39  ;;  %v125_v26 = vld [vmem:[%s12135_s1 + $0x170] sm:$0xff]  ;;  %v1180_v31 = vld [vmem:[%s12137_s3 + $0x98] sm:$0xff]  ;;  %v8588_v35 = vpack.c.bf16 %v1176_v30, %v1173_v29  ;;  %v1166_v39 = vld [vmem:[%s12137_s3 + $0x28] sm:$0xff] }
  0x19   :  { %8551 = vmatprep.subr.bf16.mxu0 %v8550_v44  ;;  %v1183_v32 = vld [vmem:[%s12137_s3 + $0xb0] sm:$0xff]  ;;  %8573 = vmatpush1.bf16.msra.mxu1 %v8572_v21  ;;  %v8576_v34 = vpack.c.bf16 %v125_v26, %v121_v25  ;;  %v130_v36 = vld [vmem:[%s12135_s1 + $0x198] sm:$0xf]  ;;  %v1182_v43 = vld [vmem:[%s12137_s3 + $0xa8] sm:$0xff] }
  0x1a   :  { %v9452_v33 = vld [vmem:[%s12134_s0 + $0x10] sm:$0xff]  ;;  %8575 = vmatprep.subr.bf16.mxu1 %v8574_v24  ;;  %v8590_v37 = vpack.c.bf16 %v1183_v32, %v1180_v31  ;;  %v9469_v40 = vld [vmem:[%s12134_s0 + $0x18] sm:$0xff]  ;;  %v1186_v45 = vld [vmem:[%s12137_s3 + $0xc8] sm:$0xff] }
  0x1b   :  { %v1163_v38 = vld [vmem:[%s12137_s3 + $0x10] sm:$0xff]  ;;  %v1189_v46 = vld [vmem:[%s12137_s3 + $0xe0] sm:$0xff]  ;;  %v1172_v48 = vld [vmem:[%s12137_s3 + $0x58] sm:$0xff] }
  0x1c   :  { %8553 = vmatpush1.bf16.msra.mxu0 %v8552_v54  ;;  %v129_v41 = vld [vmem:[%s12135_s1 + $0x190] sm:$0xf]  ;;  %v8707_v44 = vpack.c.bf16 %v1166_v39, %v1163_v38  ;;  %v1169_v47 = vld [vmem:[%s12137_s3 + $0x40] sm:$0xff]  ;;  %v8594_v52 = vpack.c.bf16 %v1189_v46, %v1186_v45  ;;  %v1188_v54 = vld [vmem:[%s12137_s3 + $0xd8] sm:$0xff] }
  0x1d   :  { %7900 = vmatprep.subr.msk.mxu0 %vm250_vm0, %v128_v57  ;;  %8577 = vmatpush1.bf16.msra.mxu1 %v8576_v34  ;;  %v1179_v42 = vld [vmem:[%s12137_s3 + $0x90] sm:$0xff]  ;;  %v9499_v49 = vld [vmem:[%s12134_s0 + $0x20] sm:$0xff]  ;;  %v8710_v55 = vpack.c.bf16 %v1172_v48, %v1169_v47  ;;  %v1192_v56 = vld [vmem:[%s12137_s3 + $0xf8] sm:$0xff] }
  0x1e   :  { %7934 = vmatprep.subr.msk.mxu1 %vm250_vm0, %v130_v36  ;;  %v8592_v50 = vpack.c.bf16 %v1182_v43, %v1179_v42  ;;  %v1185_v53 = vld [vmem:[%s12137_s3 + $0xc0] sm:$0xff]  ;;  %v1195_v57 = vld [vmem:[%s12137_s3 + $0x110] sm:$0xff]  ;;  %v9531_v60 = vld [vmem:[%s12134_s0 + $0x28] sm:$0xff] }
  0x1f   :  { %v1175_v58 = vld [vmem:[%s12137_s3 + $0x70] sm:$0xff]  ;;  %v8596_v61 = vpack.c.bf16 %v1188_v54, %v1185_v53  ;;  %v8598_v62 = vpack.c.bf16 %v1195_v57, %v1192_v56  ;;  %v1194_v0 = vld [vmem:[%s12137_s3 + $0x108] sm:$0xff]  ;;  %v1201_v3 = vld [vmem:[%s12137_s3 + $0x140] sm:$0xff] }
  0x20   :  { %7901 = vmatpush1.msk.msra.mxu0 %vm250_vm0, %v127_v59  ;;  %v1178_v59 = vld [vmem:[%s12137_s3 + $0x88] sm:$0xff]  ;;  %v1181_v4 = vld [vmem:[%s12137_s3 + $0xa0] sm:$0xff]  ;;  %v1184_v5 = vld [vmem:[%s12137_s3 + $0xb8] sm:$0xff] }
  0x21   :  { %7902 = vmatmul.mubr.msk.f32.vlgmr.msra.gmra.mrb[0].mxu0 %vm153_vm1, %v9368_v63  ;;  %8579 = vmatprep.subr.bf16.mxu0 %v8578_v9  ;;  %v8713_v1 = vpack.c.bf16 %v1178_v59, %v1175_v58  ;;  %v1198_v2 = vld [vmem:[%s12137_s3 + $0x128] sm:$0xff]  ;;  %v9561_v6 = vld [vmem:[%s12134_s0 + $0x30] sm:$0xff]  ;;  %v1197_v10 = vld [vmem:[%s12137_s3 + $0x120] sm:$0xff]  ;;  %v8716_v12 = vpack.c.bf16 %v1184_v5, %v1181_v4 }
  0x22   :  { %333 = vmatprep.mubr.f32.mxu0 %v9159_v8  ;;  %8581 = vmatpush1.bf16.msra.mxu0 %v8580_v14  ;;  %v8602_v9 = vpack.c.bf16 %v1201_v3, %v1198_v2  ;;  %v1200_v11 = vld [vmem:[%s12137_s3 + $0x138] sm:$0xff]  ;;  %v1207_v14 = vld [vmem:[%s12137_s3 + $0x170] sm:$0xff]  ;;  %v1190_v16 = vld [vmem:[%s12137_s3 + $0xe8] sm:$0xff] }
  0x23   :  { %8583 = vmatprep.subr.bf16.mxu0 %v8582_v19  ;;  %7935 = vmatpush1.msk.msra.mxu1 %vm250_vm0, %v129_v41  ;;  %v1204_v13 = vld [vmem:[%s12137_s3 + $0x158] sm:$0xff]  ;;  %v1187_v15 = vld [vmem:[%s12137_s3 + $0xd0] sm:$0xff]  ;;  %v8604_v18 = vpack.c.bf16 %v1200_v11, %v1197_v10  ;;  %v1206_v21 = vld [vmem:[%s12137_s3 + $0x168] sm:$0xff] }
  0x24   :  { %7936 = vmatmul.mubr.msk.f32.vlgmr.msra.gmra.mrb[0].mxu1 %vm153_vm1, %v9368_v63  ;;  %8706 = vmatprep.subr.bf16.mxu1 %v12152_v51  ;;  %v1191_v63 = vld [vmem:[%s12137_s3 + $0xf0] sm:$0xff]  ;;  %v9591_v17 = vld [vmem:[%s12134_s0 + $0x38] sm:$0xff]  ;;  %v8606_v19 = vpack.c.bf16 %v1207_v14, %v1204_v13  ;;  %v8719_v22 = vpack.c.bf16 %v1190_v16, %v1187_v15  ;;  %v1210_v23 = vld [vmem:[%s12137_s3 + $0x188] sm:$0xff] }
  0x25   :  { %7903 = vmatmul.mubr.msk.f32.gmra.mrb[2].mxu0 %vm153_vm1, %v9420_v20  ;;  %590 = vmatprep.mubr.f32.mxu1 %v9159_v8  ;;  %v8600_v7 = vpack.c.bf16 %v1194_v0, %v1191_v63  ;;  %v1213_v24 = vld [vmem:[%s12137_s3 + $0x1a0] sm:$0xff]  ;;  %v1196_v26 = vld [vmem:[%s12137_s3 + $0x118] sm:$0xff] }
  0x26   :  { %339 = vmatprep.mubr.f32.mxu0 %v9159_v8  ;;  %8585 = vmatpush1.bf16.msra.mxu0 %v8584_v27  ;;  %v1193_v25 = vld [vmem:[%s12137_s3 + $0x100] sm:$0xff]  ;;  %v8610_v29 = vpack.c.bf16 %v1213_v24, %v1210_v23  ;;  %v1212_v31 = vld [vmem:[%s12137_s3 + $0x198] sm:$0xff] }
  0x27   :  { %8587 = vmatprep.subr.bf16.mxu0 %v8586_v28  ;;  %8708 = vmatpush1.bf16.msra.mxu1 %v8707_v44  ;;  %v9621_v27 = vld [vmem:[%s12134_s0 + $0x40] sm:$0xff] }
  0x28   :  { %8709 = vmatprep.subr.bf16.mxu1 %v12152_v51  ;;  %7937 = vmatmul.mubr.msk.f32.gmra.mrb[2].mxu1 %vm153_vm1, %v9420_v20  ;;  %v1203_v20 = vld [vmem:[%s12137_s3 + $0x150] sm:$0xff]  ;;  %v1209_v30 = vld [vmem:[%s12137_s3 + $0x180] sm:$0xff] }
  0x29   :  { %7904 = vmatmul.mubr.msk.f32.gmra.mrb[4].mxu0 %vm153_vm1, %v9452_v33  ;;  %596 = vmatprep.mubr.f32.mxu1 %v9159_v8  ;;  %v8608_v28 = vpack.c.bf16 %v1206_v21, %v1203_v20 }
  0x2a   :  { %345 = vmatprep.mubr.f32.mxu0 %v9159_v8  ;;  %8589 = vmatpush1.bf16.msra.mxu0 %v8588_v35 }
  0x2b   :  { %8591 = vmatprep.subr.bf16.mxu0 %v8590_v37  ;;  %8711 = vmatpush1.bf16.msra.mxu1 %v8710_v55 }
  0x2c   :  { %8712 = vmatprep.subr.bf16.mxu1 %v12152_v51  ;;  %7938 = vmatmul.mubr.msk.f32.gmra.mrb[4].mxu1 %vm153_vm1, %v9452_v33 }
  0x2d   :  { %7905 = vmatmul.mubr.msk.f32.gmra.mrb[6].mxu0 %vm153_vm1, %v9469_v40  ;;  %602 = vmatprep.mubr.f32.mxu1 %v9159_v8 }
  0x2e   :  { %351 = vmatprep.mubr.f32.mxu0 %v9159_v8  ;;  %8593 = vmatpush1.bf16.msra.mxu0 %v8592_v50 }
  0x2f   :  { %8595 = vmatprep.subr.bf16.mxu0 %v8594_v52  ;;  %8714 = vmatpush1.bf16.msra.mxu1 %v8713_v1 }
  0x30   :  { %8715 = vmatprep.subr.bf16.mxu1 %v12152_v51  ;;  %7939 = vmatmul.mubr.msk.f32.gmra.mrb[6].mxu1 %vm153_vm1, %v9469_v40 }
  0x31   :  { %7906 = vmatmul.mubr.msk.f32.gmra.mrb[8].mxu0 %vm153_vm1, %v9499_v49  ;;  %608 = vmatprep.mubr.f32.mxu1 %v9159_v8 }
  0x32   :  { %357 = vmatprep.mubr.f32.mxu0 %v9159_v8  ;;  %8597 = vmatpush1.bf16.msra.mxu0 %v8596_v61 }
  0x33   :  { %8599 = vmatprep.subr.bf16.mxu0 %v8598_v62  ;;  %8717 = vmatpush1.bf16.msra.mxu1 %v8716_v12 }
  0x34   :  { %8718 = vmatprep.subr.bf16.mxu1 %v12152_v51  ;;  %7940 = vmatmul.mubr.msk.f32.gmra.mrb[8].mxu1 %vm153_vm1, %v9499_v49 }
  0x35   :  { %7907 = vmatmul.mubr.msk.f32.gmra.mrb[10].mxu0 %vm153_vm1, %v9531_v60 }
  0x36   :  { %363 = vmatprep.mubr.f32.mxu0 %v9159_v8  ;;  %8601 = vmatpush1.bf16.msra.mxu0 %v8600_v7 }
  0x37   :  { %8603 = vmatprep.subr.bf16.mxu0 %v8602_v9 }
  0x39   :  { %7908 = vmatmul.mubr.msk.f32.gmra.mrb[12].mxu0 %vm153_vm1, %v9561_v6 }
  0x3a   :  { %369 = vmatprep.mubr.f32.mxu0 %v9159_v8  ;;  %8605 = vmatpush1.bf16.msra.mxu0 %v8604_v18 }
  0x3b   :  { %8607 = vmatprep.subr.bf16.mxu0 %v8606_v19 }
  0x3d   :  { %7909 = vmatmul.mubr.msk.f32.gmra.mrb[14].mxu0 %vm153_vm1, %v9591_v17 }
  0x3e   :  { %375 = vmatprep.mubr.f32.mxu0 %v9159_v8 }
  0x3f   :  { %20 = vsyncpa [#allocation4], 0  ;;  %614 = vmatprep.mubr.f32.mxu1 %v9159_v8  ;;  %8720 = vmatpush1.bf16.msra.mxu1 %v8719_v22  ;;  %v8722_v32 = vpack.c.bf16 %v1196_v26, %v1193_v25  ;;  %v1216_v33 = vld [vmem:[%s12137_s3 + $0x1b8] sm:$0xff]  ;;  %v1219_v34 = vld [vmem:[%s12137_s3 + $0x1d0] sm:$0xff]  ;;  %v8612_v38 = vpack.c.bf16 %v1212_v31, %v1209_v30 }
  0x40   :  { %8721 = vmatprep.subr.bf16.mxu1 %v12152_v51  ;;  %v1199_v35 = vld [vmem:[%s12137_s3 + $0x130] sm:$0xff]  ;;  %v1202_v36 = vld [vmem:[%s12137_s3 + $0x148] sm:$0xff]  ;;  %8609 = vmatpush1.bf16.msra.mxu0 %v8608_v28  ;;  %v8614_v39 = vpack.c.bf16 %v1219_v34, %v1216_v33  ;;  %v1225_v44 = vld [vmem:[%s12137_s3 + $0x200] sm:$0xff] }
  0x41   :  { %7910 = vmatmul.mubr.msk.f32.gmra.mrb[16].mxu0 %vm153_vm1, %v9621_v27  ;;  %v9651_v37 = vld [vmem:[%s12134_s0 + $0x48] sm:$0xff]  ;;  %7941 = vmatmul.mubr.msk.f32.gmra.mrb[10].mxu1 %vm153_vm1, %v9531_v60  ;;  %v1215_v40 = vld [vmem:[%s12137_s3 + $0x1b0] sm:$0xff]  ;;  %v8725_v42 = vpack.c.bf16 %v1202_v36, %v1199_v35  ;;  %v1205_v45 = vld [vmem:[%s12137_s3 + $0x160] sm:$0xff] }
  0x42   :  { %381 = vmatprep.mubr.f32.mxu0 %v9159_v8  ;;  %8611 = vmatprep.subr.bf16.mxu0 %v8610_v29  ;;  %v1218_v41 = vld [vmem:[%s12137_s3 + $0x1c8] sm:$0xff]  ;;  %v1208_v46 = vld [vmem:[%s12137_s3 + $0x178] sm:$0xff]  ;;  %v9681_v47 = vld [vmem:[%s12134_s0 + $0x50] sm:$0xff] }
  0x43   :  { %620 = vmatprep.mubr.f32.mxu1 %v9159_v8  ;;  %8723 = vmatpush1.bf16.msra.mxu1 %v8722_v32  ;;  %v1222_v43 = vld [vmem:[%s12137_s3 + $0x1e8] sm:$0xff]  ;;  %v8616_v48 = vpack.c.bf16 %v1218_v41, %v1215_v40  ;;  %v1221_v50 = vld [vmem:[%s12137_s3 + $0x1e0] sm:$0xff]  ;;  %v1224_v52 = vld [vmem:[%s12137_s3 + $0x1f8] sm:$0xff]  ;;  %v8728_v53 = vpack.c.bf16 %v1208_v46, %v1205_v45 }
  0x44   :  { %8724 = vmatprep.subr.bf16.mxu1 %v12152_v51  ;;  %8613 = vmatpush1.bf16.msra.mxu0 %v8612_v38  ;;  %v8618_v49 = vpack.c.bf16 %v1225_v44, %v1222_v43  ;;  %v1228_v54 = vld [vmem:[%s12137_s3 + $0x218] sm:$0xff]  ;;  %v1231_v55 = vld [vmem:[%s12137_s3 + $0x230] sm:$0xff]  ;;  %v1214_v57 = vld [vmem:[%s12137_s3 + $0x1a8] sm:$0xff]  ;;  %v8620_v59 = vpack.c.bf16 %v1224_v52, %v1221_v50 }
  0x45   :  { %7911 = vmatmul.mubr.msk.f32.gmra.mrb[18].mxu0 %vm153_vm1, %v9651_v37  ;;  %7942 = vmatmul.mubr.msk.f32.gmra.mrb[12].mxu1 %vm153_vm1, %v9561_v6  ;;  %v1211_v56 = vld [vmem:[%s12137_s3 + $0x190] sm:$0xff]  ;;  %v9711_v58 = vld [vmem:[%s12134_s0 + $0x58] sm:$0xff]  ;;  %v8622_v60 = vpack.c.bf16 %v1231_v55, %v1228_v54  ;;  %v1230_v62 = vld [vmem:[%s12137_s3 + $0x228] sm:$0xff] }
  0x46   :  { %387 = vmatprep.mubr.f32.mxu0 %v9159_v8  ;;  %8615 = vmatprep.subr.bf16.mxu0 %v8614_v39  ;;  %v1227_v61 = vld [vmem:[%s12137_s3 + $0x210] sm:$0xff]  ;;  %v8731_v63 = vpack.c.bf16 %v1214_v57, %v1211_v56  ;;  %v1234_v0 = vld [vmem:[%s12137_s3 + $0x248] sm:$0xff]  ;;  %v1237_v1 = vld [vmem:[%s12137_s3 + $0x260] sm:$0xff] }
  0x47   :  { %626 = vmatprep.mubr.f32.mxu1 %v9159_v8  ;;  %8726 = vmatpush1.bf16.msra.mxu1 %v8725_v42  ;;  %v1217_v2 = vld [vmem:[%s12137_s3 + $0x1c0] sm:$0xff]  ;;  %v1220_v3 = vld [vmem:[%s12137_s3 + $0x1d8] sm:$0xff]  ;;  %v8624_v5 = vpack.c.bf16 %v1230_v62, %v1227_v61  ;;  %v8626_v6 = vpack.c.bf16 %v1237_v1, %v1234_v0  ;;  %v1243_v12 = vld [vmem:[%s12137_s3 + $0x290] sm:$0xff] }
  0x48   :  { %8727 = vmatprep.subr.bf16.mxu1 %v12152_v51  ;;  %8617 = vmatpush1.bf16.msra.mxu0 %v8616_v48  ;;  %v9741_v4 = vld [vmem:[%s12134_s0 + $0x60] sm:$0xff]  ;;  %v1236_v9 = vld [vmem:[%s12137_s3 + $0x258] sm:$0xff]  ;;  %v8734_v10 = vpack.c.bf16 %v1220_v3, %v1217_v2  ;;  %v1223_v13 = vld [vmem:[%s12137_s3 + $0x1f0] sm:$0xff] }
  0x49   :  { %7912 = vmatmul.mubr.msk.f32.gmra.mrb[20].mxu0 %vm153_vm1, %v9681_v47  ;;  %7943 = vmatmul.mubr.msk.f32.gmra.mrb[14].mxu1 %vm153_vm1, %v9591_v17  ;;  %v1233_v7 = vld [vmem:[%s12137_s3 + $0x240] sm:$0xff]  ;;  %v1240_v11 = vld [vmem:[%s12137_s3 + $0x278] sm:$0xff]  ;;  %v1226_v14 = vld [vmem:[%s12137_s3 + $0x208] sm:$0xff] }
  0x4a   :  { %393 = vmatprep.mubr.f32.mxu0 %v9159_v8  ;;  %8619 = vmatprep.subr.bf16.mxu0 %v8618_v49  ;;  %v9771_v15 = vld [vmem:[%s12134_s0 + $0x68] sm:$0xff]  ;;  %v8628_v16 = vpack.c.bf16 %v1236_v9, %v1233_v7  ;;  %v8630_v17 = vpack.c.bf16 %v1243_v12, %v1240_v11  ;;  %v1239_v18 = vld [vmem:[%s12137_s3 + $0x270] sm:$0xff]  ;;  %v8737_v20 = vpack.c.bf16 %v1226_v14, %v1223_v13  ;;  %v1249_v22 = vld [vmem:[%s12137_s3 + $0x2c0] sm:$0xff]  ;;  %v12148_v7 = vlaneseq }
  0x4b   :  { %632 = vmatprep.mubr.f32.mxu1 %v9159_v8  ;;  %8729 = vmatpush1.bf16.msra.mxu1 %v8728_v53  ;;  %v1242_v19 = vld [vmem:[%s12137_s3 + $0x288] sm:$0xff]  ;;  %v1229_v23 = vld [vmem:[%s12137_s3 + $0x220] sm:$0xff]  ;;  %v1232_v24 = vld [vmem:[%s12137_s3 + $0x238] sm:$0xff] }
  0x4c   :  { %8730 = vmatprep.subr.bf16.mxu1 %v12152_v51  ;;  %8621 = vmatpush1.bf16.msra.mxu0 %v8620_v59  ;;  %v1246_v21 = vld [vmem:[%s12137_s3 + $0x2a8] sm:$0xff]  ;;  %v61_v25 = vld [vmem:[%s12134_s0 + $0x70] sm:$0xff]  ;;  %v8632_v26 = vpack.c.bf16 %v1242_v19, %v1239_v18  ;;  %v1245_v28 = vld [vmem:[%s12137_s3 + $0x2a0] sm:$0xff]  ;;  %v8740_v30 = vpack.c.bf16 %v1232_v24, %v1229_v23  ;;  %v9989_v9 = vshrl.u32 %v12148_v7, 7 }
  0x4d   :  { %7913 = vmatmul.mubr.msk.f32.gmra.mrb[22].mxu0 %vm153_vm1, %v9711_v58  ;;  %7944 = vmatmul.mubr.msk.f32.gmra.mrb[16].mxu1 %vm153_vm1, %v9621_v27  ;;  %v8634_v27 = vpack.c.bf16 %v1249_v22, %v1246_v21  ;;  %v1248_v29 = vld [vmem:[%s12137_s3 + $0x2b8] sm:$0xff]  ;;  %v1255_v32 = vld [vmem:[%s12137_s3 + $0x2f0] sm:$0xff]  ;;  %v1238_v34 = vld [vmem:[%s12137_s3 + $0x268] sm:$0xff] }
  0x4e   :  { %399 = vmatprep.mubr.f32.mxu0 %v9159_v8  ;;  %8623 = vmatprep.subr.bf16.mxu0 %v8622_v60  ;;  %v1252_v31 = vld [vmem:[%s12137_s3 + $0x2d8] sm:$0xff]  ;;  %v1235_v33 = vld [vmem:[%s12137_s3 + $0x250] sm:$0xff]  ;;  %v8636_v36 = vpack.c.bf16 %v1248_v29, %v1245_v28  ;;  %v1241_v39 = vld [vmem:[%s12137_s3 + $0x280] sm:$0xff]  ;;  %12156 = vst [vmem:[#allocation6_spill] sm:$0xff] %v9989_v9  ;;  %v12150_v12 = vsub.s32 1, %v9989_v9 }
  0x4f   :  { %638 = vmatprep.mubr.f32.mxu1 %v9159_v8  ;;  %8732 = vmatpush1.bf16.msra.mxu1 %v8731_v63  ;;  %v62_v35 = vld [vmem:[%s12134_s0 + $0x78] sm:$0xff]  ;;  %v8743_v38 = vpack.c.bf16 %v1238_v34, %v1235_v33  ;;  %v63_v41 = vld [vmem:[%s12134_s0 + $0x80] sm:$0xff]  ;;  %v1247_v43 = vld [vmem:[%s12137_s3 + $0x2b0] sm:$0xff] }
  0x50   :  { %8733 = vmatprep.subr.bf16.mxu1 %v12152_v51  ;;  %8625 = vmatpush1.bf16.msra.mxu0 %v8624_v5  ;;  %v1244_v40 = vld [vmem:[%s12137_s3 + $0x298] sm:$0xff]  ;;  %v1250_v44 = vld [vmem:[%s12137_s3 + $0x2c8] sm:$0xff]  ;;  %v67_v49 = vld [vmem:[%s12134_s0 + $0xa0] sm:$0xff] }
  0x51   :  { %7914 = vmatmul.mubr.msk.f32.gmra.mrb[24].mxu0 %vm153_vm1, %v9741_v4  ;;  %7945 = vmatmul.mubr.msk.f32.gmra.mrb[18].mxu1 %vm153_vm1, %v9651_v37  ;;  %v8638_v37 = vpack.c.bf16 %v1255_v32, %v1252_v31  ;;  %v8746_v42 = vpack.c.bf16 %v1244_v40, %v1241_v39  ;;  %v64_v45 = vld [vmem:[%s12134_s0 + $0x88] sm:$0xff]  ;;  %v8749_v46 = vpack.c.bf16 %v1250_v44, %v1247_v43  ;;  %v66_v48 = vld [vmem:[%s12134_s0 + $0x98] sm:$0xff]  ;;  %v69_v52 = vld [vmem:[%s12134_s0 + $0xb0] sm:$0xff] }
  0x52   :  { %405 = vmatprep.mubr.f32.mxu0 %v9159_v8  ;;  %8627 = vmatprep.subr.bf16.mxu0 %v8626_v6  ;;  %v68_v50 = vld [vmem:[%s12134_s0 + $0xa8] sm:$0xff]  ;;  %v1251_v53 = vld [vmem:[%s12137_s3 + $0x2d0] sm:$0xff]  ;;  %v1253_v55 = vld [vmem:[%s12137_s3 + $0x2e0] sm:$0xff] }
  0x53   :  { %644 = vmatprep.mubr.f32.mxu1 %v9159_v8  ;;  %8735 = vmatpush1.bf16.msra.mxu1 %v8734_v10  ;;  %v1254_v54 = vld [vmem:[%s12137_s3 + $0x2e8] sm:$0xff]  ;;  %v1256_v57 = vld [vmem:[%s12137_s3 + $0x2f8] sm:$0xff]  ;;  %v1261_v61 = vld [vmem:[%s12137_s3 + $0x320] sm:$0xff]  ;;  %v12151_v10 = vsub.s32 0, %v9989_v9 }
  0x54   :  { %8736 = vmatprep.subr.bf16.mxu1 %v12152_v51  ;;  %8629 = vmatpush1.bf16.msra.mxu0 %v8628_v16  ;;  %v8640_v56 = vpack.c.bf16 %v1254_v54, %v1251_v53  ;;  %v70_v59 = vld [vmem:[%s12134_s0 + $0xb8] sm:$0xff]  ;;  %v1258_v60 = vld [vmem:[%s12137_s3 + $0x308] sm:$0xff]  ;;  %v71_v63 = vld [vmem:[%s12134_s0 + $0xc0] sm:$0xff] }
  0x55   :  { %7915 = vmatmul.mubr.msk.f32.gmra.mrb[26].mxu0 %vm153_vm1, %v9771_v15  ;;  %7946 = vmatmul.mubr.msk.f32.gmra.mrb[20].mxu1 %vm153_vm1, %v9681_v47  ;;  %v65_v47 = vld [vmem:[%s12134_s0 + $0x90] sm:$0xff]  ;;  %v8642_v62 = vpack.c.bf16 %v1261_v61, %v1258_v60  ;;  %v72_v0 = vld [vmem:[%s12134_s0 + $0xc8] sm:$0xff]  ;;  %v74_v2 = vld [vmem:[%s12134_s0 + $0xd8] sm:$0xff] }
  0x56   :  { %411 = vmatprep.mubr.f32.mxu0 %v9159_v8  ;;  %8631 = vmatprep.subr.bf16.mxu0 %v8630_v17  ;;  %v73_v1 = vld [vmem:[%s12134_s0 + $0xd0] sm:$0xff]  ;;  %v75_v3 = vld [vmem:[%s12134_s0 + $0xe0] sm:$0xff]  ;;  %v78_v6 = vld [vmem:[%s12134_s0 + $0xf8] sm:$0xff] }
  0x57   :  { %650 = vmatprep.mubr.f32.mxu1 %v9159_v8  ;;  %8738 = vmatpush1.bf16.msra.mxu1 %v8737_v20  ;;  %v77_v5 = vld [vmem:[%s12134_s0 + $0xf0] sm:$0xff]  ;;  %v131_v11 = vld [vmem:[%s12136_s2] sm:$0xf]  ;;  %v1260_v19 = vld [vmem:[%s12137_s3 + $0x318] sm:$0xff] }
  0x58   :  { %8739 = vmatprep.subr.bf16.mxu1 %v12152_v51  ;;  %8633 = vmatpush1.bf16.msra.mxu0 %v8632_v26  ;;  %v9998_v13 = vrot.slane %v131_v11, %v12151_v10  ;;  %v1257_v17 = vld [vmem:[%s12137_s3 + $0x300] sm:$0xff]  ;;  %v1259_v20 = vld [vmem:[%s12137_s3 + $0x310] sm:$0xff]  ;;  %v1262_v21 = vld [vmem:[%s12137_s3 + $0x328] sm:$0xff] }
  0x59   :  { %7916 = vmatmul.mubr.msk.f32.gmra.mrb[28].mxu0 %vm153_vm1, %v61_v25  ;;  %7947 = vmatmul.mubr.msk.f32.gmra.mrb[22].mxu1 %vm153_vm1, %v9711_v58  ;;  %v8752_v58 = vpack.c.bf16 %v1256_v57, %v1253_v55  ;;  %v1264_v23 = vld [vmem:[%s12137_s3 + $0x338] sm:$0xff]  ;;  %v1267_v24 = vld [vmem:[%s12137_s3 + $0x350] sm:$0xff]  ;;  %v8644_v29 = vpack.c.bf16 %v1260_v19, %v1257_v17  ;;  %v1270_v40 = vld [vmem:[%s12137_s3 + $0x368] sm:$0xff] }
  0x5a   :  { %417 = vmatprep.mubr.f32.mxu0 %v9159_v8  ;;  %8635 = vmatprep.subr.bf16.mxu0 %v8634_v27  ;;  %v1263_v31 = vld [vmem:[%s12137_s3 + $0x330] sm:$0xff]  ;;  %v8646_v34 = vpack.c.bf16 %v1267_v24, %v1264_v23  ;;  %v1272_v53 = vld [vmem:[%s12137_s3 + $0x378] sm:$0xff]  ;;  %v1274_v55 = vld [vmem:[%s12137_s3 + $0x388] sm:$0xff] }
  0x5b   :  { %656 = vmatprep.mubr.f32.mxu1 %v9159_v8  ;;  %8741 = vmatpush1.bf16.msra.mxu1 %v8740_v30  ;;  %v8755_v30 = vpack.c.bf16 %v1262_v21, %v1259_v20  ;;  %v1271_v54 = vld [vmem:[%s12137_s3 + $0x370] sm:$0xff]  ;;  %v1285_v19 = vld [vmem:[%s12137_s3 + $0x3e0] sm:$0xff] }
  0x5c   :  { %8742 = vmatprep.subr.bf16.mxu1 %v12152_v51  ;;  %8637 = vmatpush1.bf16.msra.mxu0 %v8636_v36  ;;  %v1265_v36 = vld [vmem:[%s12137_s3 + $0x340] sm:$0xff] }
  0x5d   :  { %7917 = vmatmul.mubr.msk.f32.gmra.mrb[30].mxu0 %vm153_vm1, %v62_v35  ;;  %7948 = vmatmul.mubr.msk.f32.gmra.mrb[24].mxu1 %vm153_vm1, %v9741_v4  ;;  %v76_v4 = vld [vmem:[%s12134_s0 + $0xe8] sm:$0xff] }
  0x5e   :  { %423 = vmatprep.mubr.f32.mxu0 %v9159_v8  ;;  %8639 = vmatprep.subr.bf16.mxu0 %v8638_v37  ;;  %v1268_v37 = vld [vmem:[%s12137_s3 + $0x358] sm:$0xff] }
  0x5f   :  { %662 = vmatprep.mubr.f32.mxu1 %v9159_v8  ;;  %8744 = vmatpush1.bf16.msra.mxu1 %v8743_v38 }
  0x60   :  { %8745 = vmatprep.subr.bf16.mxu1 %v12152_v51  ;;  %8641 = vmatpush1.bf16.msra.mxu0 %v8640_v56 }
  0x61   :  { %7918 = vmatmul.mubr.msk.f32.gmra.mrb[32].mxu0 %vm153_vm1, %v63_v41  ;;  %7949 = vmatmul.mubr.msk.f32.gmra.mrb[26].mxu1 %vm153_vm1, %v9771_v15 }
  0x62   :  { %429 = vmatprep.mubr.f32.mxu0 %v9159_v8  ;;  %668 = vmatprep.mubr.f32.mxu1 %v9159_v8 }
  0x63   :  { %8747 = vmatpush1.bf16.msra.mxu1 %v8746_v42  ;;  %8643 = vmatprep.subr.bf16.mxu0 %v8642_v62 }
  0x64   :  { %8748 = vmatprep.subr.bf16.mxu1 %v12152_v51 }
  0x65   :  { %7919 = vmatmul.mubr.msk.f32.gmra.mrb[34].mxu0 %vm153_vm1, %v64_v45  ;;  %7950 = vmatmul.mubr.msk.f32.gmra.mrb[28].mxu1 %vm153_vm1, %v61_v25 }
  0x66   :  { %435 = vmatprep.mubr.f32.mxu0 %v9159_v8  ;;  %674 = vmatprep.mubr.f32.mxu1 %v9159_v8 }
  0x67   :  { %8750 = vmatpush1.bf16.msra.mxu1 %v8749_v46 }
  0x68   :  { %8751 = vmatprep.subr.bf16.mxu1 %v12152_v51 }
  0x69   :  { %7920 = vmatmul.mubr.msk.f32.gmra.mrb[36].mxu0 %vm153_vm1, %v65_v47  ;;  %7951 = vmatmul.mubr.msk.f32.gmra.mrb[30].mxu1 %vm153_vm1, %v62_v35  ;;  %v1266_v35 = vld [vmem:[%s12137_s3 + $0x348] sm:$0xff] }
  0x6a   :  { %441 = vmatprep.mubr.f32.mxu0 %v9159_v8  ;;  %680 = vmatprep.mubr.f32.mxu1 %v9159_v8  ;;  %v8648_v46 = vpack.c.bf16 %v1266_v35, %v1263_v31  ;;  %v1284_v31 = vld [vmem:[%s12137_s3 + $0x3d8] sm:$0xff] }
  0x6b   :  { %8753 = vmatpush1.bf16.msra.mxu1 %v8752_v58  ;;  %v1276_v58 = vld [vmem:[%s12137_s3 + $0x398] sm:$0xff] }
  0x6c   :  { %8754 = vmatprep.subr.bf16.mxu1 %v12152_v51 }
  0x6d   :  { %7921 = vmatmul.mubr.msk.f32.gmra.mrb[38].mxu0 %vm153_vm1, %v66_v48  ;;  %7952 = vmatmul.mubr.msk.f32.gmra.mrb[32].mxu1 %vm153_vm1, %v63_v41  ;;  %v1273_v41 = vld [vmem:[%s12137_s3 + $0x380] sm:$0xff] }
  0x6e   :  { %447 = vmatprep.mubr.f32.mxu0 %v9159_v8  ;;  %686 = vmatprep.mubr.f32.mxu1 %v9159_v8 }
  0x71   :  { %7922 = vmatmul.mubr.msk.f32.gmra.mrb[40].mxu0 %vm153_vm1, %v67_v49  ;;  %7953 = vmatmul.mubr.msk.f32.gmra.mrb[34].mxu1 %vm153_vm1, %v64_v45 }
  0x72   :  { %453 = vmatprep.mubr.f32.mxu0 %v9159_v8  ;;  %692 = vmatprep.mubr.f32.mxu1 %v9159_v8 }
  0x75   :  { %7923 = vmatmul.mubr.msk.f32.gmra.mrb[42].mxu0 %vm153_vm1, %v68_v50  ;;  %7954 = vmatmul.mubr.msk.f32.gmra.mrb[36].mxu1 %vm153_vm1, %v65_v47  ;;  %v8758_v47 = vpack.c.bf16 %v1268_v37, %v1265_v36  ;;  %v1288_v37 = vld [vmem:[%s12137_s3 + $0x3f8] sm:$0xff] }
  0x76   :  { %459 = vmatprep.mubr.f32.mxu0 %v9159_v8  ;;  %698 = vmatprep.mubr.f32.mxu1 %v9159_v8 }
  0x79   :  { %7924 = vmatmul.mubr.msk.f32.gmra.mrb[44].mxu0 %vm153_vm1, %v69_v52  ;;  %7955 = vmatmul.mubr.msk.f32.gmra.mrb[38].mxu1 %vm153_vm1, %v66_v48  ;;  %v1269_v48 = vld [vmem:[%s12137_s3 + $0x360] sm:$0xff] }
  0x7a   :  { %465 = vmatprep.mubr.f32.mxu0 %v9159_v8  ;;  %704 = vmatprep.mubr.f32.mxu1 %v9159_v8 }
  0x7d   :  { %7925 = vmatmul.mubr.msk.f32.gmra.mrb[46].mxu0 %vm153_vm1, %v70_v59  ;;  %7956 = vmatmul.mubr.msk.f32.gmra.mrb[40].mxu1 %vm153_vm1, %v67_v49 }
  0x7e   :  { %471 = vmatprep.mubr.f32.mxu0 %v9159_v8  ;;  %710 = vmatprep.mubr.f32.mxu1 %v9159_v8 }
  0x81   :  { %7926 = vmatmul.mubr.msk.f32.gmra.mrb[48].mxu0 %vm153_vm1, %v71_v63  ;;  %7957 = vmatmul.mubr.msk.f32.gmra.mrb[42].mxu1 %vm153_vm1, %v68_v50 }
  0x82   :  { %477 = vmatprep.mubr.f32.mxu0 %v9159_v8  ;;  %716 = vmatprep.mubr.f32.mxu1 %v9159_v8 }
  0x85   :  { %7927 = vmatmul.mubr.msk.f32.gmra.mrb[50].mxu0 %vm153_vm1, %v72_v0  ;;  %7958 = vmatmul.mubr.msk.f32.gmra.mrb[44].mxu1 %vm153_vm1, %v69_v52  ;;  %v8650_v52 = vpack.c.bf16 %v1273_v41, %v1270_v40 }
  0x86   :  { %483 = vmatprep.mubr.f32.mxu0 %v9159_v8  ;;  %722 = vmatprep.mubr.f32.mxu1 %v9159_v8 }
  0x89   :  { %7928 = vmatmul.mubr.msk.f32.gmra.mrb[52].mxu0 %vm153_vm1, %v73_v1  ;;  %7959 = vmatmul.mubr.msk.f32.gmra.mrb[46].mxu1 %vm153_vm1, %v70_v59  ;;  %v1279_v59 = vld [vmem:[%s12137_s3 + $0x3b0] sm:$0xff] }
  0x8a   :  { %489 = vmatprep.mubr.f32.mxu0 %v9159_v8  ;;  %728 = vmatprep.mubr.f32.mxu1 %v9159_v8 }
  0x8d   :  { %7929 = vmatmul.mubr.msk.f32.gmra.mrb[54].mxu0 %vm153_vm1, %v74_v2  ;;  %7960 = vmatmul.mubr.msk.f32.gmra.mrb[48].mxu1 %vm153_vm1, %v71_v63 }
  0x8e   :  { %495 = vmatprep.mubr.f32.mxu0 %v9159_v8  ;;  %734 = vmatprep.mubr.f32.mxu1 %v9159_v8 }
  0x91   :  { %7930 = vmatmul.mubr.msk.f32.gmra.mrb[56].mxu0 %vm153_vm1, %v75_v3  ;;  %7961 = vmatmul.mubr.msk.f32.gmra.mrb[50].mxu1 %vm153_vm1, %v72_v0  ;;  %v8652_v0 = vpack.c.bf16 %v1272_v53, %v1269_v48  ;;  %v1292_v53 = vld [vmem:[%s12137_s3 + $0x418] sm:$0xff] }
  0x92   :  { %501 = vmatprep.mubr.f32.mxu0 %v9159_v8  ;;  %740 = vmatprep.mubr.f32.mxu1 %v9159_v8 }
  0x95   :  { %7931 = vmatmul.mubr.msk.f32.gmra.mrb[58].mxu0 %vm153_vm1, %v76_v4  ;;  %7962 = vmatmul.mubr.msk.f32.gmra.mrb[52].mxu1 %vm153_vm1, %v73_v1  ;;  %v8761_v1 = vpack.c.bf16 %v1274_v55, %v1271_v54 }
  0x96   :  { %507 = vmatprep.mubr.f32.mxu0 %v9159_v8  ;;  %746 = vmatprep.mubr.f32.mxu1 %v9159_v8 }
  0x99   :  { %7932 = vmatmul.mubr.msk.f32.gmra.mrb[60].mxu0 %vm153_vm1, %v77_v5  ;;  %7963 = vmatmul.mubr.msk.f32.gmra.mrb[54].mxu1 %vm153_vm1, %v74_v2  ;;  %v1275_v2 = vld [vmem:[%s12137_s3 + $0x390] sm:$0xff] }
  0x9a   :  { %513 = vmatprep.mubr.f32.mxu0 %v9159_v8  ;;  %752 = vmatprep.mubr.f32.mxu1 %v9159_v8 }
  0x9d   :  { %7933 = vmatmul.mubr.msk.f32.gmra.mrb[62].mxu0 %vm153_vm1, %v78_v6  ;;  %7964 = vmatmul.mubr.msk.f32.gmra.mrb[56].mxu1 %vm153_vm1, %v75_v3 }
  0x9e   :  { %758 = vmatprep.mubr.f32.mxu1 %v9159_v8 }
  0xa1   :  { %7965 = vmatmul.mubr.msk.f32.gmra.mrb[58].mxu1 %vm153_vm1, %v76_v4 }
  0xa2   :  { %764 = vmatprep.mubr.f32.mxu1 %v9159_v8 }
  0xa5   :  { %7966 = vmatmul.mubr.msk.f32.gmra.mrb[60].mxu1 %vm153_vm1, %v77_v5  ;;  %v8654_v5 = vpack.c.bf16 %v1279_v59, %v1276_v58  ;;  %v1297_v58 = vld [vmem:[%s12137_s3 + $0x440] sm:$0xff] }
  0xa6   :  { %770 = vmatprep.mubr.f32.mxu1 %v9159_v8  ;;  %v10002_v8 = vrot.slane %v131_v11, %v12150_v12  ;;  %v1277_v11 = vld [vmem:[%s12137_s3 + $0x3a0] sm:$0xff] }
  0xa9   :  { %7967 = vmatmul.mubr.msk.f32.gmra.mrb[62].mxu1 %vm153_vm1, %v78_v6  ;;  %v1278_v6 = vld [vmem:[%s12137_s3 + $0x3a8] sm:$0xff] }
  0xf4   :  { %v329_v14 = vpop.f32.mrb[0].mxu0 }
  0xf5   :  { %v330_v15 = vadd.f32 %v329_v14, %v9998_v13  ;;  %v331_v16 = vpop.f32.mrb[1].mxu0  ;;  %v1280_v14 = vld [vmem:[%s12137_s3 + $0x3b8] sm:$0xff] }
  0xf6   :  { %v332_v18 = vadd.f32 %v331_v16, %v10002_v8 }
  0xf7   :  { %v905_v22 = vmul.f32 0.01, %v330_v15  ;;  %vm777_vm2 = vcmp.ge.f32.partialorder %v330_v15, 0.0 }
  0xf8   :  { %v906_v25 = vmul.f32 0.01, %v332_v18  ;;  %v335_v26 = vpop.f32.mrb[2].mxu0  ;;  %vm778_vm3 = vcmp.ge.f32.partialorder %v332_v18, 0.0 }
  0xf9   :  { %v336_v27 = vadd.f32 %v335_v26, %v9998_v13  ;;  %v337_v28 = vpop.f32.mrb[3].mxu0  ;;  %v1033_v38 = vsel %vm777_vm2, %v330_v15, %v905_v22  ;;  %v10081_v15 = vpop.f32.mrb[0].mxu1  ;;  %v8764_v26 = vpack.c.bf16 %v1280_v14, %v1277_v11  ;;  %v1295_v11 = vld [vmem:[%s12137_s3 + $0x430] sm:$0xff]  ;;  %v1298_v14 = vld [vmem:[%s12137_s3 + $0x448] sm:$0xff] }
  0xfa   :  { %v338_v32 = vadd.f32 %v337_v28, %v10002_v8  ;;  %v1034_v33 = vsel %vm778_vm3, %v332_v18, %v906_v25  ;;  %v1282_v18 = vld [vmem:[%s12137_s3 + $0x3c8] sm:$0xff]  ;;  %v10090_v20 = vpop.f32.mrb[1].mxu1  ;;  %v8656_v25 = vpack.c.bf16 %v1278_v6, %v1275_v2  ;;  %v1293_v2 = vld [vmem:[%s12137_s3 + $0x420] sm:$0xff]  ;;  %v1296_v6 = vld [vmem:[%s12137_s3 + $0x438] sm:$0xff] }
  0xfb   :  { %v909_v39 = vmul.f32 0.01, %v336_v27  ;;  %1434 = vmatprep.mubr.f32.mxu0 %v1034_v33  ;;  %1948 = vmatprep.mubr.f32.mxu1 %v1034_v33  ;;  %vm781_vm5 = vcmp.ge.f32.partialorder %v336_v27, 0.0  ;;  %v1286_v33 = vld [vmem:[%s12137_s3 + $0x3e8] sm:$0xff] }
  0xfc   :  { %v910_v42 = vmul.f32 0.01, %v338_v32  ;;  %v341_v43 = vpop.f32.mrb[4].mxu0  ;;  %1435 = vmatmul.mubr.f32.vlgmr.msra.gmra.mrb[64].mxu0 %v1033_v38  ;;  %1949 = vmatmul.mubr.f32.vlgmr.msra.gmra.mrb[64].mxu1 %v1033_v38  ;;  %vm782_vm4 = vcmp.ge.f32.partialorder %v338_v32, 0.0  ;;  %v1291_v38 = vld [vmem:[%s12137_s3 + $0x410] sm:$0xff] }
  0xfd   :  { %v342_v44 = vadd.f32 %v341_v43, %v9998_v13  ;;  %8645 = vmatpush1.bf16.msra.mxu0 %v8644_v29  ;;  %v343_v45 = vpop.f32.mrb[5].mxu0  ;;  %8756 = vmatpush1.bf16.msra.mxu1 %v8755_v30  ;;  %v1037_v57 = vsel %vm781_vm5, %v336_v27, %v909_v39  ;;  %v1281_v27 = vld [vmem:[%s12137_s3 + $0x3c0] sm:$0xff]  ;;  %v8658_v30 = vpack.c.bf16 %v1285_v19, %v1282_v18  ;;  %v1300_v19 = vld [vmem:[%s12137_s3 + $0x458] sm:$0xff] }
  0xfe   :  { %v344_v49 = vadd.f32 %v343_v45, %v10002_v8  ;;  %v1038_v50 = vsel %vm782_vm4, %v338_v32, %v910_v42  ;;  %8647 = vmatprep.subr.bf16.mxu0 %v8646_v34  ;;  %8757 = vmatprep.subr.bf16.mxu1 %v12152_v51  ;;  %v1283_v32 = vld [vmem:[%s12137_s3 + $0x3d0] sm:$0xff]  ;;  %v10107_v34 = vpop.f32.mrb[2].mxu1 }
  0xff   :  { %v913_v56 = vmul.f32 0.01, %v342_v44  ;;  %1440 = vmatprep.mubr.f32.mxu0 %v1038_v50  ;;  %1953 = vmatprep.mubr.f32.mxu1 %v1038_v50  ;;  %vm785_vm7 = vcmp.ge.f32.partialorder %v342_v44, 0.0  ;;  %v10116_v39 = vpop.f32.mrb[3].mxu1  ;;  %v8767_v45 = vpack.c.bf16 %v1286_v33, %v1283_v32  ;;  %v1290_v50 = vld [vmem:[%s12137_s3 + $0x408] sm:$0xff] }
 0x100   :  { %v914_v60 = vmul.f32 0.01, %v344_v49  ;;  %v347_v61 = vpop.f32.mrb[6].mxu0  ;;  %1441 = vmatmul.mubr.f32.gmra.mrb[66].mxu0 %v1037_v57  ;;  %1954 = vmatmul.mubr.f32.gmra.mrb[66].mxu1 %v1037_v57  ;;  %vm786_vm6 = vcmp.ge.f32.partialorder %v344_v49, 0.0  ;;  %v10133_v54 = vpop.f32.mrb[4].mxu1  ;;  %v1294_v57 = vld [vmem:[%s12137_s3 + $0x428] sm:$0xff] }
 0x101   :  { %v348_v62 = vadd.f32 %v347_v61, %v9998_v13  ;;  %v349_v63 = vpop.f32.mrb[7].mxu0  ;;  %8649 = vmatpush1.bf16.msra.mxu0 %v8648_v46  ;;  %8759 = vmatpush1.bf16.msra.mxu1 %v8758_v47  ;;  %v1041_v17 = vsel %vm785_vm7, %v342_v44, %v913_v56  ;;  %v8660_v44 = vpack.c.bf16 %v1284_v31, %v1281_v27  ;;  %v1287_v46 = vld [vmem:[%s12137_s3 + $0x3f0] sm:$0xff]  ;;  %v10142_v59 = vpop.f32.mrb[5].mxu1  ;;  %v1302_v33 = vld [vmem:[%s12137_s3 + $0x468] sm:$0xff] }
 0x102   :  { %v350_v3 = vadd.f32 %v349_v63, %v10002_v8  ;;  %v1042_v4 = vsel %vm786_vm6, %v344_v49, %v914_v60  ;;  %8651 = vmatprep.subr.bf16.mxu0 %v8650_v52  ;;  %8760 = vmatprep.subr.bf16.mxu1 %v12152_v51  ;;  %v8662_v49 = vpack.c.bf16 %v1291_v38, %v1288_v37  ;;  %v1289_v52 = vld [vmem:[%s12137_s3 + $0x400] sm:$0xff] }
 0x103   :  { %v917_v16 = vmul.f32 0.01, %v348_v62  ;;  %1446 = vmatprep.mubr.f32.mxu0 %v1042_v4  ;;  %1958 = vmatprep.mubr.f32.mxu1 %v1042_v4  ;;  %vm789_vm9 = vcmp.ge.f32.partialorder %v348_v62, 0.0  ;;  %v8668_v27 = vpack.c.bf16 %v1296_v6, %v1293_v2 }
 0x104   :  { %v918_v21 = vmul.f32 0.01, %v350_v3  ;;  %v353_v22 = vpop.f32.mrb[8].mxu0  ;;  %1447 = vmatmul.mubr.f32.gmra.mrb[68].mxu0 %v1041_v17  ;;  %1959 = vmatmul.mubr.f32.gmra.mrb[68].mxu1 %v1041_v17  ;;  %vm790_vm8 = vcmp.ge.f32.partialorder %v350_v3, 0.0 }
 0x105   :  { %v354_v23 = vadd.f32 %v353_v22, %v9998_v13  ;;  %v355_v24 = vpop.f32.mrb[9].mxu0  ;;  %8653 = vmatpush1.bf16.msra.mxu0 %v8652_v0  ;;  %8762 = vmatpush1.bf16.msra.mxu1 %v8761_v1  ;;  %v1045_v36 = vsel %vm789_vm9, %v348_v62, %v917_v16  ;;  %v8664_v0 = vpack.c.bf16 %v1290_v50, %v1287_v46  ;;  %v10159_v16 = vpop.f32.mrb[6].mxu1  ;;  %v1305_v50 = vld [vmem:[%s12137_s3 + $0x480] sm:$0xff] }
 0x106   :  { %v356_v28 = vadd.f32 %v355_v24, %v10002_v8  ;;  %v1046_v29 = vsel %vm790_vm8, %v350_v3, %v918_v21  ;;  %8655 = vmatprep.subr.bf16.mxu0 %v8654_v5  ;;  %8763 = vmatprep.subr.bf16.mxu1 %v12152_v51  ;;  %v8770_v1 = vpack.c.bf16 %v1292_v53, %v1289_v52  ;;  %v1303_v21 = vld [vmem:[%s12137_s3 + $0x470] sm:$0xff]  ;;  %v10168_v22 = vpop.f32.mrb[7].mxu1 }
 0x107   :  { %v921_v35 = vmul.f32 0.01, %v354_v23  ;;  %1452 = vmatprep.mubr.f32.mxu0 %v1046_v29  ;;  %1963 = vmatprep.mubr.f32.mxu1 %v1046_v29  ;;  %vm793_vm11 = vcmp.ge.f32.partialorder %v354_v23, 0.0  ;;  %v8666_v5 = vpack.c.bf16 %v1297_v58, %v1294_v57  ;;  %v1299_v29 = vld [vmem:[%s12137_s3 + $0x450] sm:$0xff]  ;;  %v8670_v32 = vpack.c.bf16 %v1303_v21, %v1300_v19  ;;  %v10185_v37 = vpop.f32.mrb[8].mxu1  ;;  %v1310_v58 = vld [vmem:[%s12137_s3 + $0x4a8] sm:$0xff] }
 0x108   :  { %v922_v40 = vmul.f32 0.01, %v356_v28  ;;  %v359_v41 = vpop.f32.mrb[10].mxu0  ;;  %1453 = vmatmul.mubr.f32.gmra.mrb[70].mxu0 %v1045_v36  ;;  %1964 = vmatmul.mubr.f32.gmra.mrb[70].mxu1 %v1045_v36  ;;  %vm794_vm10 = vcmp.ge.f32.partialorder %v356_v28, 0.0  ;;  %v1304_v36 = vld [vmem:[%s12137_s3 + $0x478] sm:$0xff]  ;;  %v1307_v57 = vld [vmem:[%s12137_s3 + $0x490] sm:$0xff] }
 0x109   :  { %v360_v42 = vadd.f32 %v359_v41, %v9998_v13  ;;  %v361_v43 = vpop.f32.mrb[11].mxu0  ;;  %8657 = vmatpush1.bf16.msra.mxu0 %v8656_v25  ;;  %8765 = vmatpush1.bf16.msra.mxu1 %v8764_v26  ;;  %v1049_v56 = vsel %vm793_vm11, %v354_v23, %v921_v35  ;;  %v1301_v35 = vld [vmem:[%s12137_s3 + $0x460] sm:$0xff]  ;;  %v1306_v41 = vld [vmem:[%s12137_s3 + $0x488] sm:$0xff] }
 0x10a   :  { %v362_v47 = vadd.f32 %v361_v43, %v10002_v8  ;;  %v1050_v48 = vsel %vm794_vm10, %v356_v28, %v922_v40  ;;  %8659 = vmatprep.subr.bf16.mxu0 %v8658_v30  ;;  %8766 = vmatprep.subr.bf16.mxu1 %v12152_v51  ;;  %v8773_v28 = vpack.c.bf16 %v1298_v14, %v1295_v11  ;;  %v10194_v43 = vpop.f32.mrb[9].mxu1  ;;  %v1311_v14 = vld [vmem:[%s12137_s3 + $0x4b0] sm:$0xff]  ;;  %v1314_v21 = vld [vmem:[%s12137_s3 + $0x4c8] sm:$0xff] }
 0x10b   :  { %v925_v55 = vmul.f32 0.01, %v360_v42  ;;  %1458 = vmatprep.mubr.f32.mxu0 %v1050_v48  ;;  %1968 = vmatprep.mubr.f32.mxu1 %v1050_v48  ;;  %vm797_vm13 = vcmp.ge.f32.partialorder %v360_v42, 0.0  ;;  %v8672_v48 = vpack.c.bf16 %v1302_v33, %v1299_v29  ;;  %v8779_v11 = vpack.c.bf16 %v1310_v58, %v1307_v57  ;;  %v1321_v29 = vld [vmem:[%s12137_s3 + $0x500] sm:$0xff] }
 0x10c   :  { %v926_v60 = vmul.f32 0.01, %v362_v47  ;;  %v365_v61 = vpop.f32.mrb[12].mxu0  ;;  %1459 = vmatmul.mubr.f32.gmra.mrb[72].mxu0 %v1049_v56  ;;  %1969 = vmatmul.mubr.f32.gmra.mrb[72].mxu1 %v1049_v56  ;;  %vm798_vm12 = vcmp.ge.f32.partialorder %v362_v47, 0.0  ;;  %v1308_v56 = vld [vmem:[%s12137_s3 + $0x498] sm:$0xff] }
 0x10d   :  { %v366_v62 = vadd.f32 %v365_v61, %v9998_v13  ;;  %v367_v63 = vpop.f32.mrb[13].mxu0  ;;  %8661 = vmatpush1.bf16.msra.mxu0 %v8660_v44  ;;  %8768 = vmatpush1.bf16.msra.mxu1 %v8767_v45  ;;  %v1053_v18 = vsel %vm797_vm13, %v360_v42, %v925_v55  ;;  %v1309_v42 = vld [vmem:[%s12137_s3 + $0x4a0] sm:$0xff]  ;;  %v8676_v6 = vpack.c.bf16 %v1308_v56, %v1305_v50 }
 0x10e   :  { %v368_v3 = vadd.f32 %v367_v63, %v10002_v8  ;;  %v1054_v4 = vsel %vm798_vm12, %v362_v47, %v926_v60  ;;  %8663 = vmatprep.subr.bf16.mxu0 %v8662_v49  ;;  %8769 = vmatprep.subr.bf16.mxu1 %v12152_v51  ;;  %v8776_v49 = vpack.c.bf16 %v1304_v36, %v1301_v35  ;;  %v1312_v63 = vld [vmem:[%s12137_s3 + $0x4b8] sm:$0xff] }
 0x10f   :  { %v929_v17 = vmul.f32 0.01, %v366_v62  ;;  %1464 = vmatprep.mubr.f32.mxu0 %v1054_v4  ;;  %1973 = vmatprep.mubr.f32.mxu1 %v1054_v4  ;;  %vm801_vm15 = vcmp.ge.f32.partialorder %v366_v62, 0.0  ;;  %v8674_v55 = vpack.c.bf16 %v1309_v42, %v1306_v41  ;;  %v8680_v36 = vpack.c.bf16 %v1314_v21, %v1311_v14  ;;  %v1333_v21 = vld [vmem:[%s12137_s3 + $0x560] sm:$0xff] }
 0x110   :  { %v930_v23 = vmul.f32 0.01, %v368_v3  ;;  %v371_v24 = vpop.f32.mrb[14].mxu0  ;;  %1465 = vmatmul.mubr.f32.gmra.mrb[74].mxu0 %v1053_v18  ;;  %1974 = vmatmul.mubr.f32.gmra.mrb[74].mxu1 %v1053_v18  ;;  %vm802_vm14 = vcmp.ge.f32.partialorder %v368_v3, 0.0 }
 0x111   :  { %v372_v25 = vadd.f32 %v371_v24, %v9998_v13  ;;  %v373_v26 = vpop.f32.mrb[15].mxu0  ;;  %8665 = vmatpush1.bf16.msra.mxu0 %v8664_v0  ;;  %8771 = vmatpush1.bf16.msra.mxu1 %v8770_v1  ;;  %v1057_v40 = vsel %vm801_vm15, %v366_v62, %v929_v17  ;;  %v1315_v0 = vld [vmem:[%s12137_s3 + $0x4d0] sm:$0xff]  ;;  %v1316_v24 = vld [vmem:[%s12137_s3 + $0x4d8] sm:$0xff] }
 0x112   :  { %v374_v30 = vadd.f32 %v373_v26, %v10002_v8  ;;  %v1058_v31 = vsel %vm802_vm14, %v368_v3, %v930_v23  ;;  %8667 = vmatprep.subr.bf16.mxu0 %v8666_v5  ;;  %8772 = vmatprep.subr.bf16.mxu1 %v12152_v51  ;;  %v8678_v19 = vpack.c.bf16 %v1315_v0, %v1312_v63  ;;  %v1313_v23 = vld [vmem:[%s12137_s3 + $0x4c0] sm:$0xff]  ;;  %v1323_v0 = vld [vmem:[%s12137_s3 + $0x510] sm:$0xff] }
 0x113   :  { %v933_v38 = vmul.f32 0.01, %v372_v25  ;;  %1470 = vmatprep.mubr.f32.mxu0 %v1058_v31  ;;  %1978 = vmatprep.mubr.f32.mxu1 %v1058_v31  ;;  %vm805_vm1 = vcmp.ge.f32.partialorder %v372_v25, 0.0 }
 0x114   :  { %v934_v44 = vmul.f32 0.01, %v374_v30  ;;  %v377_v45 = vpop.f32.mrb[16].mxu0  ;;  %1471 = vmatmul.mubr.f32.gmra.mrb[76].mxu0 %v1057_v40  ;;  %1979 = vmatmul.mubr.f32.gmra.mrb[76].mxu1 %v1057_v40  ;;  %vm806_vm0 = vcmp.ge.f32.partialorder %v374_v30, 0.0  ;;  %v10211_v60 = vpop.f32.mrb[10].mxu1  ;;  %v1317_v40 = vld [vmem:[%s12137_s3 + $0x4e0] sm:$0xff] }
 0x115   :  { %v378_v46 = vadd.f32 %v377_v45, %v9998_v13  ;;  %v379_v47 = vpop.f32.mrb[17].mxu0  ;;  %8669 = vmatpush1.bf16.msra.mxu0 %v8668_v27  ;;  %8774 = vmatpush1.bf16.msra.mxu1 %v8773_v28  ;;  %v1061_v62 = vsel %vm805_vm1, %v372_v25, %v933_v38  ;;  %v10220_v1 = vpop.f32.mrb[11].mxu1  ;;  %v1318_v28 = vld [vmem:[%s12137_s3 + $0x4e8] sm:$0xff]  ;;  %v8782_v38 = vpack.c.bf16 %v1316_v24, %v1313_v23  ;;  %v1320_v45 = vld [vmem:[%s12137_s3 + $0x4f8] sm:$0xff] }
 0x116   :  { %v380_v52 = vadd.f32 %v379_v47, %v10002_v8  ;;  %v1062_v53 = vsel %vm806_vm0, %v374_v30, %v934_v44  ;;  %8671 = vmatprep.subr.bf16.mxu0 %v8670_v32  ;;  %8775 = vmatprep.subr.bf16.mxu1 %v12152_v51  ;;  %v8682_v44 = vpack.c.bf16 %v1321_v29, %v1318_v28  ;;  %v1322_v47 = vld [vmem:[%s12137_s3 + $0x508] sm:$0xff] }
 0x117   :  { %v937_v61 = vmul.f32 0.01, %v378_v46  ;;  %1476 = vmatprep.mubr.f32.mxu0 %v1062_v53  ;;  %1983 = vmatprep.mubr.f32.mxu1 %v1062_v53  ;;  %vm809_vm3 = vcmp.ge.f32.partialorder %v378_v46, 0.0  ;;  %v1327_v53 = vld [vmem:[%s12137_s3 + $0x530] sm:$0xff] }
 0x118   :  { %v938_v2 = vmul.f32 0.01, %v380_v52  ;;  %v383_v3 = vpop.f32.mrb[18].mxu0  ;;  %1477 = vmatmul.mubr.f32.gmra.mrb[78].mxu0 %v1061_v62  ;;  %1984 = vmatmul.mubr.f32.gmra.mrb[78].mxu1 %v1061_v62  ;;  %vm810_vm2 = vcmp.ge.f32.partialorder %v380_v52, 0.0  ;;  %v10237_v25 = vpop.f32.mrb[12].mxu1  ;;  %v8684_v62 = vpack.c.bf16 %v1320_v45, %v1317_v40  ;;  %v1331_v40 = vld [vmem:[%s12137_s3 + $0x550] sm:$0xff] }
 0x119   :  { %v384_v4 = vadd.f32 %v383_v3, %v9998_v13  ;;  %v385_v5 = vpop.f32.mrb[19].mxu0  ;;  %8673 = vmatpush1.bf16.msra.mxu0 %v8672_v48  ;;  %8777 = vmatpush1.bf16.msra.mxu1 %v8776_v49  ;;  %v1065_v27 = vsel %vm809_vm3, %v378_v46, %v937_v61  ;;  %v10246_v30 = vpop.f32.mrb[13].mxu1  ;;  %v1319_v46 = vld [vmem:[%s12137_s3 + $0x4f0] sm:$0xff] }
 0x11a   :  { %v386_v17 = vadd.f32 %v385_v5, %v10002_v8  ;;  %v1066_v18 = vsel %vm810_vm2, %v380_v52, %v938_v2  ;;  %8675 = vmatprep.subr.bf16.mxu0 %v8674_v55  ;;  %8778 = vmatprep.subr.bf16.mxu1 %v12152_v51  ;;  %v1324_v52 = vld [vmem:[%s12137_s3 + $0x518] sm:$0xff]  ;;  %v8785_v63 = vpack.c.bf16 %v1322_v47, %v1319_v46  ;;  %v1326_v5 = vld [vmem:[%s12137_s3 + $0x528] sm:$0xff]  ;;  %v1339_v47 = vld [vmem:[%s12137_s3 + $0x590] sm:$0xff] }
 0x11b   :  { %v941_v26 = vmul.f32 0.01, %v384_v4  ;;  %1482 = vmatprep.mubr.f32.mxu0 %v1066_v18  ;;  %1988 = vmatprep.mubr.f32.mxu1 %v1066_v18  ;;  %vm813_vm5 = vcmp.ge.f32.partialorder %v384_v4, 0.0  ;;  %v8688_v29 = vpack.c.bf16 %v1326_v5, %v1323_v0  ;;  %v1336_v46 = vld [vmem:[%s12137_s3 + $0x578] sm:$0xff] }
 0x11c   :  { %v942_v31 = vmul.f32 0.01, %v386_v17  ;;  %v389_v32 = vpop.f32.mrb[20].mxu0  ;;  %1483 = vmatmul.mubr.f32.gmra.mrb[80].mxu0 %v1065_v27  ;;  %1989 = vmatmul.mubr.f32.gmra.mrb[80].mxu1 %v1065_v27  ;;  %vm814_vm4 = vcmp.ge.f32.partialorder %v386_v17, 0.0  ;;  %v10263_v48 = vpop.f32.mrb[14].mxu1  ;;  %v8694_v0 = vpack.c.bf16 %v1339_v47, %v1336_v46  ;;  %v1348_v46 = vld [vmem:[%s12137_s3 + $0x5d8] sm:$0xff] }
 0x11d   :  { %v390_v33 = vadd.f32 %v389_v32, %v9998_v13  ;;  %v391_v35 = vpop.f32.mrb[21].mxu0  ;;  %8677 = vmatpush1.bf16.msra.mxu0 %v8676_v6  ;;  %8780 = vmatpush1.bf16.msra.mxu1 %v8779_v11  ;;  %v1069_v50 = vsel %vm813_vm5, %v384_v4, %v941_v26  ;;  %v10272_v55 = vpop.f32.mrb[15].mxu1  ;;  %v8686_v4 = vpack.c.bf16 %v1327_v53, %v1324_v52  ;;  %v1325_v6 = vld [vmem:[%s12137_s3 + $0x520] sm:$0xff]  ;;  %v1328_v11 = vld [vmem:[%s12137_s3 + $0x538] sm:$0xff]  ;;  %v1351_v47 = vld [vmem:[%s12137_s3 + $0x5f0] sm:$0xff] }
 0x11e   :  { %v392_v41 = vadd.f32 %v391_v35, %v10002_v8  ;;  %v1070_v42 = vsel %vm814_vm4, %v386_v17, %v942_v31  ;;  %8679 = vmatprep.subr.bf16.mxu0 %v8678_v19  ;;  %8781 = vmatprep.subr.bf16.mxu1 %v12152_v51  ;;  %v1330_v19 = vld [vmem:[%s12137_s3 + $0x548] sm:$0xff]  ;;  %v8788_v31 = vpack.c.bf16 %v1328_v11, %v1325_v6  ;;  %v1329_v32 = vld [vmem:[%s12137_s3 + $0x540] sm:$0xff] }
 0x11f   :  { %v945_v49 = vmul.f32 0.01, %v390_v33  ;;  %1488 = vmatprep.mubr.f32.mxu0 %v1070_v42  ;;  %1993 = vmatprep.mubr.f32.mxu1 %v1070_v42  ;;  %vm817_vm7 = vcmp.ge.f32.partialorder %v390_v33, 0.0 }
 0x120   :  { %v946_v56 = vmul.f32 0.01, %v392_v41  ;;  %v395_v57 = vpop.f32.mrb[22].mxu0  ;;  %1489 = vmatmul.mubr.f32.gmra.mrb[82].mxu0 %v1069_v50  ;;  %1994 = vmatmul.mubr.f32.gmra.mrb[82].mxu1 %v1069_v50  ;;  %vm818_vm6 = vcmp.ge.f32.partialorder %v392_v41, 0.0  ;;  %v10289_v14 = vpop.f32.mrb[16].mxu1 }
 0x121   :  { %v396_v58 = vadd.f32 %v395_v57, %v9998_v13  ;;  %v397_v61 = vpop.f32.mrb[23].mxu0  ;;  %8681 = vmatpush1.bf16.msra.mxu0 %v8680_v36  ;;  %8783 = vmatpush1.bf16.msra.mxu1 %v8782_v38  ;;  %v1073_v18 = vsel %vm817_vm7, %v390_v33, %v945_v49  ;;  %v10298_v23 = vpop.f32.mrb[17].mxu1  ;;  %v8690_v36 = vpack.c.bf16 %v1333_v21, %v1330_v19  ;;  %v1332_v38 = vld [vmem:[%s12137_s3 + $0x558] sm:$0xff] }
 0x122   :  { %v398_v2 = vadd.f32 %v397_v61, %v10002_v8  ;;  %v1074_v3 = vsel %vm818_vm6, %v392_v41, %v946_v56  ;;  %8683 = vmatprep.subr.bf16.mxu0 %v8682_v44  ;;  %8784 = vmatprep.subr.bf16.mxu1 %v12152_v51  ;;  %v1334_v41 = vld [vmem:[%s12137_s3 + $0x568] sm:$0xff]  ;;  %v8692_v57 = vpack.c.bf16 %v1332_v38, %v1329_v32  ;;  %v1335_v61 = vld [vmem:[%s12137_s3 + $0x570] sm:$0xff] }
 0x123   :  { %v949_v17 = vmul.f32 0.01, %v396_v58  ;;  %1494 = vmatprep.mubr.f32.mxu0 %v1074_v3  ;;  %1998 = vmatprep.mubr.f32.mxu1 %v1074_v3  ;;  %vm821_vm9 = vcmp.ge.f32.partialorder %v396_v58, 0.0  ;;  %v1337_v3 = vld [vmem:[%s12137_s3 + $0x580] sm:$0xff]  ;;  %v1343_v38 = vld [vmem:[%s12137_s3 + $0x5b0] sm:$0xff] }
 0x124   :  { %v950_v24 = vmul.f32 0.01, %v398_v2  ;;  %v401_v26 = vpop.f32.mrb[24].mxu0  ;;  %1495 = vmatmul.mubr.f32.gmra.mrb[84].mxu0 %v1073_v18  ;;  %1999 = vmatmul.mubr.f32.gmra.mrb[84].mxu1 %v1073_v18  ;;  %vm822_vm8 = vcmp.ge.f32.partialorder %v398_v2, 0.0  ;;  %v10315_v42 = vpop.f32.mrb[18].mxu1  ;;  %v1345_v18 = vld [vmem:[%s12137_s3 + $0x5c0] sm:$0xff] }
 0x125   :  { %v402_v27 = vadd.f32 %v401_v26, %v9998_v13  ;;  %v403_v28 = vpop.f32.mrb[25].mxu0  ;;  %8685 = vmatpush1.bf16.msra.mxu0 %v8684_v62  ;;  %8786 = vmatpush1.bf16.msra.mxu1 %v8785_v63  ;;  %v1077_v45 = vsel %vm821_vm9, %v396_v58, %v949_v17  ;;  %v10324_v49 = vpop.f32.mrb[19].mxu1  ;;  %v8791_v58 = vpack.c.bf16 %v1334_v41, %v1331_v40  ;;  %v1342_v17 = vld [vmem:[%s12137_s3 + $0x5a8] sm:$0xff] }
 0x126   :  { %v404_v33 = vadd.f32 %v403_v28, %v10002_v8  ;;  %v1078_v35 = vsel %vm822_vm8, %v398_v2, %v950_v24  ;;  %8687 = vmatprep.subr.bf16.mxu0 %v8686_v4  ;;  %8787 = vmatprep.subr.bf16.mxu1 %v12152_v51  ;;  %v1338_v2 = vld [vmem:[%s12137_s3 + $0x588] sm:$0xff]  ;;  %v1340_v4 = vld [vmem:[%s12137_s3 + $0x598] sm:$0xff] }
 0x127   :  { %v953_v44 = vmul.f32 0.01, %v402_v27  ;;  %1500 = vmatprep.mubr.f32.mxu0 %v1078_v35  ;;  %2003 = vmatprep.mubr.f32.mxu1 %v1078_v35  ;;  %vm825_vm11 = vcmp.ge.f32.partialorder %v402_v27, 0.0  ;;  %v8698_v35 = vpack.c.bf16 %v1345_v18, %v1342_v17  ;;  %v1346_v40 = vld [vmem:[%s12137_s3 + $0x5c8] sm:$0xff] }
 0x128   :  { %v954_v50 = vmul.f32 0.01, %v404_v33  ;;  %v407_v52 = vpop.f32.mrb[26].mxu0  ;;  %1501 = vmatmul.mubr.f32.gmra.mrb[86].mxu0 %v1077_v45  ;;  %2004 = vmatmul.mubr.f32.gmra.mrb[86].mxu1 %v1077_v45  ;;  %vm826_vm10 = vcmp.ge.f32.partialorder %v404_v33, 0.0  ;;  %v10341_v5 = vpop.f32.mrb[20].mxu1 }
 0x129   :  { %v408_v53 = vadd.f32 %v407_v52, %v9998_v13  ;;  %v409_v56 = vpop.f32.mrb[27].mxu0  ;;  %8689 = vmatpush1.bf16.msra.mxu0 %v8688_v29  ;;  %8789 = vmatpush1.bf16.msra.mxu1 %v8788_v31  ;;  %v1081_v11 = vsel %vm825_vm11, %v402_v27, %v953_v44  ;;  %v10350_v19 = vpop.f32.mrb[21].mxu1  ;;  %v8696_v27 = vpack.c.bf16 %v1338_v2, %v1335_v61  ;;  %v1341_v31 = vld [vmem:[%s12137_s3 + $0x5a0] sm:$0xff] }
 0x12a   :  { %v410_v62 = vadd.f32 %v409_v56, %v10002_v8  ;;  %v1082_v63 = vsel %vm826_vm10, %v404_v33, %v954_v50  ;;  %8691 = vmatprep.subr.bf16.mxu0 %v8690_v36  ;;  %8790 = vmatprep.subr.bf16.mxu1 %v12152_v51  ;;  %v8794_v29 = vpack.c.bf16 %v1340_v4, %v1337_v3  ;;  %v1344_v36 = vld [vmem:[%s12137_s3 + $0x5b8] sm:$0xff]  ;;  %v1350_v3 = vld [vmem:[%s12137_s3 + $0x5e8] sm:$0xff]  ;;  %v1349_v4 = vld [vmem:[%s12137_s3 + $0x5e0] sm:$0xff] }
 0x12b   :  { %v957_v6 = vmul.f32 0.01, %v408_v53  ;;  %1506 = vmatprep.mubr.f32.mxu0 %v1082_v63  ;;  %2008 = vmatprep.mubr.f32.mxu1 %v1082_v63  ;;  %vm829_vm13 = vcmp.ge.f32.partialorder %v408_v53, 0.0  ;;  %v8797_v61 = vpack.c.bf16 %v1346_v40, %v1343_v38  ;;  %v8702_v2 = vpack.c.bf16 %v1351_v47, %v1348_v46 }
 0x12c   :  { %v958_v21 = vmul.f32 0.01, %v410_v62  ;;  %v413_v24 = vpop.f32.mrb[28].mxu0  ;;  %1507 = vmatmul.mubr.f32.gmra.mrb[88].mxu0 %v1081_v11  ;;  %2009 = vmatmul.mubr.f32.gmra.mrb[88].mxu1 %v1081_v11  ;;  %vm830_vm12 = vcmp.ge.f32.partialorder %v410_v62, 0.0  ;;  %v10367_v41 = vpop.f32.mrb[22].mxu1 }
 0x12d   :  { %v414_v26 = vadd.f32 %v413_v24, %v9998_v13  ;;  %v415_v28 = vpop.f32.mrb[29].mxu0  ;;  %8693 = vmatpush1.bf16.msra.mxu0 %v8692_v57  ;;  %8792 = vmatpush1.bf16.msra.mxu1 %v8791_v58  ;;  %v1085_v45 = vsel %vm829_vm13, %v408_v53, %v957_v6  ;;  %v10376_v50 = vpop.f32.mrb[23].mxu1  ;;  %v8700_v53 = vpack.c.bf16 %v1344_v36, %v1341_v31  ;;  %v1352_v6 = vld [vmem:[%s12137_s3 + $0x5f8] sm:$0xff] }
 0x12e   :  { %v416_v32 = vadd.f32 %v415_v28, %v10002_v8  ;;  %v1086_v33 = vsel %vm830_vm12, %v410_v62, %v958_v21  ;;  %8695 = vmatprep.subr.bf16.mxu0 %v8694_v0  ;;  %8793 = vmatprep.subr.bf16.mxu1 %v12152_v51  ;;  %v1347_v62 = vld [vmem:[%s12137_s3 + $0x5d0] sm:$0xff] }
 0x12f   :  { %v961_v44 = vmul.f32 0.01, %v414_v26  ;;  %1512 = vmatprep.mubr.f32.mxu0 %v1086_v33  ;;  %2013 = vmatprep.mubr.f32.mxu1 %v1086_v33  ;;  %vm833_vm15 = vcmp.ge.f32.partialorder %v414_v26, 0.0  ;;  %v8704_v31 = vpack.c.bf16 %v1350_v3, %v1347_v62 }
 0x130   :  { %v962_v52 = vmul.f32 0.01, %v416_v32  ;;  %v419_v56 = vpop.f32.mrb[30].mxu0  ;;  %1513 = vmatmul.mubr.f32.gmra.mrb[90].mxu0 %v1085_v45  ;;  %2014 = vmatmul.mubr.f32.gmra.mrb[90].mxu1 %v1085_v45  ;;  %vm834_vm14 = vcmp.ge.f32.partialorder %v416_v32, 0.0  ;;  %v10393_v11 = vpop.f32.mrb[24].mxu1 }
 0x131   :  { %v420_v57 = vadd.f32 %v419_v56, %v9998_v13  ;;  %v421_v58 = vpop.f32.mrb[31].mxu0  ;;  %8697 = vmatpush1.bf16.msra.mxu0 %v8696_v27  ;;  %8795 = vmatpush1.bf16.msra.mxu1 %v8794_v29  ;;  %v1089_v18 = vsel %vm833_vm15, %v414_v26, %v961_v44  ;;  %v10396_v21 = vpop.f32.mrb[25].mxu1 }
 0x132   :  { %v422_v63 = vadd.f32 %v421_v58, %v10002_v8  ;;  %v1090_v0 = vsel %vm834_vm14, %v416_v32, %v962_v52  ;;  %8699 = vmatprep.subr.bf16.mxu0 %v8698_v35  ;;  %8796 = vmatprep.subr.bf16.mxu1 %v12152_v51  ;;  %v8800_v32 = vpack.c.bf16 %v1352_v6, %v1349_v4 }
 0x133   :  { %v965_v17 = vmul.f32 0.01, %v420_v57  ;;  %1518 = vmatprep.mubr.f32.mxu0 %v1090_v0  ;;  %2018 = vmatprep.mubr.f32.mxu1 %v1090_v0  ;;  %vm837_vm1 = vcmp.ge.f32.partialorder %v420_v57, 0.0 }
 0x134   :  { %v966_v24 = vmul.f32 0.01, %v422_v63  ;;  %v425_v28 = vpop.f32.mrb[32].mxu0  ;;  %1519 = vmatmul.mubr.f32.gmra.mrb[92].mxu0 %v1089_v18  ;;  %2019 = vmatmul.mubr.f32.gmra.mrb[92].mxu1 %v1089_v18  ;;  %vm838_vm0 = vcmp.ge.f32.partialorder %v422_v63, 0.0  ;;  %v10401_v26 = vpop.f32.mrb[26].mxu1 }
 0x135   :  { %v426_v27 = vadd.f32 %v425_v28, %v9998_v13  ;;  %v427_v29 = vpop.f32.mrb[33].mxu0  ;;  %8701 = vmatpush1.bf16.msra.mxu0 %v8700_v53  ;;  %8798 = vmatpush1.bf16.msra.mxu1 %v8797_v61  ;;  %v1093_v38 = vsel %vm837_vm1, %v420_v57, %v965_v17  ;;  %v10403_v40 = vpop.f32.mrb[27].mxu1 }
 0x136   :  { %v428_v33 = vadd.f32 %v427_v29, %v10002_v8  ;;  %v1094_v35 = vsel %vm838_vm0, %v422_v63, %v966_v24  ;;  %8703 = vmatprep.subr.bf16.mxu0 %v8702_v2  ;;  %8799 = vmatprep.subr.bf16.mxu1 %v12152_v51 }
 0x137   :  { %v969_v36 = vmul.f32 0.01, %v426_v27  ;;  %1524 = vmatprep.mubr.f32.mxu0 %v1094_v35  ;;  %2023 = vmatprep.mubr.f32.mxu1 %v1094_v35  ;;  %vm841_vm3 = vcmp.ge.f32.partialorder %v426_v27, 0.0 }
 0x138   :  { %v970_v44 = vmul.f32 0.01, %v428_v33  ;;  %v431_v45 = vpop.f32.mrb[34].mxu0  ;;  %1525 = vmatmul.mubr.f32.gmra.mrb[94].mxu0 %v1093_v38  ;;  %2024 = vmatmul.mubr.f32.gmra.mrb[94].mxu1 %v1093_v38  ;;  %vm842_vm2 = vcmp.ge.f32.partialorder %v428_v33, 0.0  ;;  %v10407_v58 = vpop.f32.mrb[28].mxu1 }
 0x139   :  { %v432_v46 = vadd.f32 %v431_v45, %v9998_v13  ;;  %v433_v47 = vpop.f32.mrb[35].mxu0  ;;  %8705 = vmatpush1.bf16.msra.mxu0 %v8704_v31  ;;  %8801 = vmatpush1.bf16.msra.mxu1 %v8800_v32  ;;  %v1097_v53 = vsel %vm841_vm3, %v426_v27, %v969_v36  ;;  %v10410_v61 = vpop.f32.mrb[29].mxu1 }
 0x13a   :  { %v434_v52 = vadd.f32 %v433_v47, %v10002_v8  ;;  %v1098_v56 = vsel %vm842_vm2, %v428_v33, %v970_v44  ;;  %8802 = vmatprep.subr.bf16.mxu0 %v12152_v51 }
 0x13b   :  { %v973_v57 = vmul.f32 0.01, %v432_v46  ;;  %1530 = vmatprep.mubr.f32.mxu0 %v1098_v56  ;;  %2028 = vmatprep.mubr.f32.mxu1 %v1098_v56  ;;  %vm845_vm5 = vcmp.ge.f32.partialorder %v432_v46, 0.0 }
 0x13c   :  { %v974_v62 = vmul.f32 0.01, %v434_v52  ;;  %v437_v63 = vpop.f32.mrb[36].mxu0  ;;  %1531 = vmatmul.mubr.f32.gmra.mrb[96].mxu0 %v1097_v53  ;;  %2029 = vmatmul.mubr.f32.gmra.mrb[96].mxu1 %v1097_v53  ;;  %vm846_vm4 = vcmp.ge.f32.partialorder %v434_v52, 0.0  ;;  %v10414_v6 = vpop.f32.mrb[30].mxu1 }
 0x13d   :  { %v438_v0 = vadd.f32 %v437_v63, %v9998_v13  ;;  %v439_v2 = vpop.f32.mrb[37].mxu0  ;;  %v1101_v18 = vsel %vm845_vm5, %v432_v46, %v973_v57  ;;  %v10416_v24 = vpop.f32.mrb[31].mxu1 }
 0x13e   :  { %v440_v3 = vadd.f32 %v439_v2, %v10002_v8  ;;  %v1102_v4 = vsel %vm846_vm4, %v434_v52, %v974_v62 }
 0x13f   :  { %v977_v17 = vmul.f32 0.01, %v438_v0  ;;  %1536 = vmatprep.mubr.f32.mxu0 %v1102_v4  ;;  %2033 = vmatprep.mubr.f32.mxu1 %v1102_v4  ;;  %vm849_vm7 = vcmp.ge.f32.partialorder %v438_v0, 0.0 }
 0x140   :  { %v978_v28 = vmul.f32 0.01, %v440_v3  ;;  %v443_v27 = vpop.f32.mrb[38].mxu0  ;;  %1537 = vmatmul.mubr.f32.gmra.mrb[98].mxu0 %v1101_v18  ;;  %2034 = vmatmul.mubr.f32.gmra.mrb[98].mxu1 %v1101_v18  ;;  %vm850_vm6 = vcmp.ge.f32.partialorder %v440_v3, 0.0  ;;  %v10420_v35 = vpop.f32.mrb[32].mxu1 }
 0x141   :  { %v444_v29 = vadd.f32 %v443_v27, %v9998_v13  ;;  %v445_v31 = vpop.f32.mrb[39].mxu0  ;;  %v1105_v38 = vsel %vm849_vm7, %v438_v0, %v977_v17  ;;  %v10422_v44 = vpop.f32.mrb[33].mxu1 }
 0x142   :  { %v446_v32 = vadd.f32 %v445_v31, %v10002_v8  ;;  %v1106_v33 = vsel %vm850_vm6, %v440_v3, %v978_v28 }
 0x143   :  { %v981_v36 = vmul.f32 0.01, %v444_v29  ;;  %1542 = vmatprep.mubr.f32.mxu0 %v1106_v33  ;;  %2038 = vmatprep.mubr.f32.mxu1 %v1106_v33  ;;  %vm853_vm9 = vcmp.ge.f32.partialorder %v444_v29, 0.0 }
 0x144   :  { %v982_v45 = vmul.f32 0.01, %v446_v32  ;;  %v449_v46 = vpop.f32.mrb[40].mxu0  ;;  %1543 = vmatmul.mubr.f32.gmra.mrb[100].mxu0 %v1105_v38  ;;  %2039 = vmatmul.mubr.f32.gmra.mrb[100].mxu1 %v1105_v38  ;;  %vm854_vm8 = vcmp.ge.f32.partialorder %v446_v32, 0.0  ;;  %v10426_v53 = vpop.f32.mrb[34].mxu1 }
 0x145   :  { %v450_v47 = vadd.f32 %v449_v46, %v9998_v13  ;;  %v451_v52 = vpop.f32.mrb[41].mxu0  ;;  %v1109_v63 = vsel %vm853_vm9, %v444_v29, %v981_v36  ;;  %v10428_v0 = vpop.f32.mrb[35].mxu1 }
 0x146   :  { %v452_v56 = vadd.f32 %v451_v52, %v10002_v8  ;;  %v1110_v57 = vsel %vm854_vm8, %v446_v32, %v982_v45 }
 0x147   :  { %v985_v62 = vmul.f32 0.01, %v450_v47  ;;  %1548 = vmatprep.mubr.f32.mxu0 %v1110_v57  ;;  %2043 = vmatprep.mubr.f32.mxu1 %v1110_v57  ;;  %vm857_vm11 = vcmp.ge.f32.partialorder %v450_v47, 0.0 }
 0x148   :  { %v986_v2 = vmul.f32 0.01, %v452_v56  ;;  %v455_v3 = vpop.f32.mrb[42].mxu0  ;;  %1549 = vmatmul.mubr.f32.gmra.mrb[102].mxu0 %v1109_v63  ;;  %2044 = vmatmul.mubr.f32.gmra.mrb[102].mxu1 %v1109_v63  ;;  %vm858_vm10 = vcmp.ge.f32.partialorder %v452_v56, 0.0  ;;  %v10432_v27 = vpop.f32.mrb[36].mxu1 }
 0x149   :  { %v456_v4 = vadd.f32 %v455_v3, %v9998_v13  ;;  %v457_v17 = vpop.f32.mrb[43].mxu0  ;;  %v1113_v29 = vsel %vm857_vm11, %v450_v47, %v985_v62  ;;  %v10434_v32 = vpop.f32.mrb[37].mxu1 }
 0x14a   :  { %v458_v18 = vadd.f32 %v457_v17, %v10002_v8  ;;  %v1114_v28 = vsel %vm858_vm10, %v452_v56, %v986_v2 }
 0x14b   :  { %v989_v31 = vmul.f32 0.01, %v456_v4  ;;  %1554 = vmatprep.mubr.f32.mxu0 %v1114_v28  ;;  %2048 = vmatprep.mubr.f32.mxu1 %v1114_v28  ;;  %vm861_vm13 = vcmp.ge.f32.partialorder %v456_v4, 0.0 }
 0x14c   :  { %v990_v33 = vmul.f32 0.01, %v458_v18  ;;  %v461_v36 = vpop.f32.mrb[44].mxu0  ;;  %1555 = vmatmul.mubr.f32.gmra.mrb[104].mxu0 %v1113_v29  ;;  %2049 = vmatmul.mubr.f32.gmra.mrb[104].mxu1 %v1113_v29  ;;  %vm862_vm12 = vcmp.ge.f32.partialorder %v458_v18, 0.0  ;;  %v10438_v56 = vpop.f32.mrb[38].mxu1 }
 0x14d   :  { %v462_v38 = vadd.f32 %v461_v36, %v9998_v13  ;;  %v463_v45 = vpop.f32.mrb[45].mxu0  ;;  %v1117_v47 = vsel %vm861_vm13, %v456_v4, %v989_v31  ;;  %v10440_v62 = vpop.f32.mrb[39].mxu1 }
 0x14e   :  { %v464_v46 = vadd.f32 %v463_v45, %v10002_v8  ;;  %v1118_v52 = vsel %vm862_vm12, %v458_v18, %v990_v33 }
 0x14f   :  { %v993_v57 = vmul.f32 0.01, %v462_v38  ;;  %1560 = vmatprep.mubr.f32.mxu0 %v1118_v52  ;;  %2053 = vmatprep.mubr.f32.mxu1 %v1118_v52  ;;  %vm865_vm15 = vcmp.ge.f32.partialorder %v462_v38, 0.0 }
 0x150   :  { %v994_v63 = vmul.f32 0.01, %v464_v46  ;;  %v467_v2 = vpop.f32.mrb[46].mxu0  ;;  %1561 = vmatmul.mubr.f32.gmra.mrb[106].mxu0 %v1117_v47  ;;  %2054 = vmatmul.mubr.f32.gmra.mrb[106].mxu1 %v1117_v47  ;;  %vm866_vm14 = vcmp.ge.f32.partialorder %v464_v46, 0.0  ;;  %v10444_v29 = vpop.f32.mrb[40].mxu1 }
 0x151   :  { %v468_v3 = vadd.f32 %v467_v2, %v9998_v13  ;;  %v469_v17 = vpop.f32.mrb[47].mxu0  ;;  %v1121_v4 = vsel %vm865_vm15, %v462_v38, %v993_v57  ;;  %v10446_v31 = vpop.f32.mrb[41].mxu1 }
 0x152   :  { %v470_v28 = vadd.f32 %v469_v17, %v10002_v8  ;;  %v1122_v18 = vsel %vm866_vm14, %v464_v46, %v994_v63 }
 0x153   :  { %v997_v33 = vmul.f32 0.01, %v468_v3  ;;  %1566 = vmatprep.mubr.f32.mxu0 %v1122_v18  ;;  %2058 = vmatprep.mubr.f32.mxu1 %v1122_v18  ;;  %vm869_vm1 = vcmp.ge.f32.partialorder %v468_v3, 0.0 }
 0x154   :  { %v998_v36 = vmul.f32 0.01, %v470_v28  ;;  %v473_v45 = vpop.f32.mrb[48].mxu0  ;;  %1567 = vmatmul.mubr.f32.gmra.mrb[108].mxu0 %v1121_v4  ;;  %2059 = vmatmul.mubr.f32.gmra.mrb[108].mxu1 %v1121_v4  ;;  %vm870_vm0 = vcmp.ge.f32.partialorder %v470_v28, 0.0  ;;  %v10450_v63 = vpop.f32.mrb[42].mxu1 }
 0x155   :  { %v474_v52 = vadd.f32 %v473_v45, %v9998_v13  ;;  %v475_v47 = vpop.f32.mrb[49].mxu0  ;;  %12157 = vst [vmem:[#allocation7_spill] sm:$0xff] %v10450_v63  ;;  %v1125_v38 = vsel %vm869_vm1, %v468_v3, %v997_v33  ;;  %v10452_v57 = vpop.f32.mrb[43].mxu1 }
 0x156   :  { %v476_v2 = vadd.f32 %v475_v47, %v10002_v8  ;;  %v1126_v46 = vsel %vm870_vm0, %v470_v28, %v998_v36  ;;  %12158 = vst [vmem:[#allocation8_spill] sm:$0xff] %v10452_v57 }
 0x157   :  { %v1001_v17 = vmul.f32 0.01, %v474_v52  ;;  %1572 = vmatprep.mubr.f32.mxu0 %v1126_v46  ;;  %2063 = vmatprep.mubr.f32.mxu1 %v1126_v46  ;;  %vm873_vm3 = vcmp.ge.f32.partialorder %v474_v52, 0.0 }
 0x158   :  { %v1002_v18 = vmul.f32 0.01, %v476_v2  ;;  %v479_v7 = vpop.f32.mrb[50].mxu0  ;;  %1573 = vmatmul.mubr.f32.gmra.mrb[110].mxu0 %v1125_v38  ;;  %2064 = vmatmul.mubr.f32.gmra.mrb[110].mxu1 %v1125_v38  ;;  %vm874_vm2 = vcmp.ge.f32.partialorder %v476_v2, 0.0  ;;  %v10456_v36 = vpop.f32.mrb[44].mxu1 }
 0x159   :  { %v480_v4 = vadd.f32 %v479_v7, %v9998_v13  ;;  %v481_v45 = vpop.f32.mrb[51].mxu0  ;;  %12159 = vst [vmem:[#allocation9_spill] sm:$0xff] %v10456_v36  ;;  %v1129_v3 = vsel %vm873_vm3, %v474_v52, %v1001_v17  ;;  %v10458_v33 = vpop.f32.mrb[45].mxu1 }
 0x15a   :  { %v482_v47 = vadd.f32 %v481_v45, %v10002_v8  ;;  %v1130_v28 = vsel %vm874_vm2, %v476_v2, %v1002_v18  ;;  %12160 = vst [vmem:[#allocation10_spill] sm:$0xff] %v10458_v33 }
 0x15b   :  { %v1005_v12 = vmul.f32 0.01, %v480_v4  ;;  %1578 = vmatprep.mubr.f32.mxu0 %v1130_v28  ;;  %2068 = vmatprep.mubr.f32.mxu1 %v1130_v28  ;;  %vm877_vm5 = vcmp.ge.f32.partialorder %v480_v4, 0.0 }
 0x15c   :  { %v1006_v46 = vmul.f32 0.01, %v482_v47  ;;  %v485_v10 = vpop.f32.mrb[52].mxu0  ;;  %1579 = vmatmul.mubr.f32.gmra.mrb[112].mxu0 %v1129_v3  ;;  %2069 = vmatmul.mubr.f32.gmra.mrb[112].mxu1 %v1129_v3  ;;  %vm878_vm4 = vcmp.ge.f32.partialorder %v482_v47, 0.0  ;;  %v10462_v18 = vpop.f32.mrb[46].mxu1 }
 0x15d   :  { %v486_v7 = vadd.f32 %v485_v10, %v9998_v13  ;;  %v487_v38 = vpop.f32.mrb[53].mxu0  ;;  %12161 = vst [vmem:[#allocation11_spill] sm:$0xff] %v10462_v18  ;;  %v1133_v52 = vsel %vm877_vm5, %v480_v4, %v1005_v12  ;;  %v10464_v17 = vpop.f32.mrb[47].mxu1 }
 0x15e   :  { %v488_v45 = vadd.f32 %v487_v38, %v10002_v8  ;;  %v1134_v2 = vsel %vm878_vm4, %v482_v47, %v1006_v46  ;;  %12162 = vst [vmem:[#allocation12_spill] sm:$0xff] %v10464_v17 }
 0x15f   :  { %v1009_v51 = vmul.f32 0.01, %v486_v7  ;;  %1584 = vmatprep.mubr.f32.mxu0 %v1134_v2  ;;  %2073 = vmatprep.mubr.f32.mxu1 %v1134_v2  ;;  %vm881_vm7 = vcmp.ge.f32.partialorder %v486_v7, 0.0 }
 0x160   :  { %v1010_v28 = vmul.f32 0.01, %v488_v45  ;;  %v491_v36 = vpop.f32.mrb[54].mxu0  ;;  %1585 = vmatmul.mubr.f32.gmra.mrb[114].mxu0 %v1133_v52  ;;  %2074 = vmatmul.mubr.f32.gmra.mrb[114].mxu1 %v1133_v52  ;;  %vm882_vm6 = vcmp.ge.f32.partialorder %v488_v45, 0.0  ;;  %v10468_v46 = vpop.f32.mrb[48].mxu1 }
 0x161   :  { %v492_v10 = vadd.f32 %v491_v36, %v9998_v13  ;;  %v493_v3 = vpop.f32.mrb[55].mxu0  ;;  %12163 = vst [vmem:[#allocation13_spill] sm:$0xff] %v10468_v46  ;;  %v1137_v12 = vsel %vm881_vm7, %v486_v7, %v1009_v51  ;;  %v10470_v4 = vpop.f32.mrb[49].mxu1  ;;  %v147_v46 = vsub.s32 3, %v9989_v9 }
 0x162   :  { %v494_v38 = vadd.f32 %v493_v3, %v10002_v8  ;;  %v1138_v47 = vsel %vm882_vm6, %v488_v45, %v1010_v28  ;;  %12164 = vst [vmem:[#allocation14_spill] sm:$0xff] %v10470_v4 }
 0x163   :  { %v1013_v18 = vmul.f32 0.01, %v492_v10  ;;  %1590 = vmatprep.mubr.f32.mxu0 %v1138_v47  ;;  %2078 = vmatprep.mubr.f32.mxu1 %v1138_v47  ;;  %vm885_vm9 = vcmp.ge.f32.partialorder %v492_v10, 0.0 }
 0x164   :  { %v1014_v2 = vmul.f32 0.01, %v494_v38  ;;  %v497_v17 = vpop.f32.mrb[56].mxu0  ;;  %1591 = vmatmul.mubr.f32.gmra.mrb[116].mxu0 %v1137_v12  ;;  %2079 = vmatmul.mubr.f32.gmra.mrb[116].mxu1 %v1137_v12  ;;  %vm886_vm8 = vcmp.ge.f32.partialorder %v494_v38, 0.0  ;;  %v10474_v28 = vpop.f32.mrb[50].mxu1 }
 0x165   :  { %v498_v36 = vadd.f32 %v497_v17, %v9998_v13  ;;  %v499_v52 = vpop.f32.mrb[57].mxu0  ;;  %12165 = vst [vmem:[#allocation15_spill] sm:$0xff] %v10474_v28  ;;  %v1141_v51 = vsel %vm885_vm9, %v492_v10, %v1013_v18  ;;  %v10477_v7 = vpop.f32.mrb[51].mxu1  ;;  %v9133_v18 = vld [vmem:[%s12136_s2] sm:$0xf] }
 0x166   :  { %v500_v3 = vadd.f32 %v499_v52, %v10002_v8  ;;  %v1142_v45 = vsel %vm886_vm8, %v494_v38, %v1014_v2  ;;  %12166 = vst [vmem:[#allocation16_spill] sm:$0xff] %v10477_v7  ;;  %v10487_v10 = vrot.slane %v9133_v18, %v147_v46 }
 0x167   :  { %v1017_v47 = vmul.f32 0.01, %v498_v36  ;;  %1596 = vmatprep.mubr.f32.mxu0 %v1142_v45  ;;  %2083 = vmatprep.mubr.f32.mxu1 %v1142_v45  ;;  %vm889_vm11 = vcmp.ge.f32.partialorder %v498_v36, 0.0 }
 0x168   :  { %v1018_v4 = vmul.f32 0.01, %v500_v3  ;;  %v503_v12 = vpop.f32.mrb[58].mxu0  ;;  %1597 = vmatmul.mubr.f32.gmra.mrb[118].mxu0 %v1141_v51  ;;  %2084 = vmatmul.mubr.f32.gmra.mrb[118].mxu1 %v1141_v51  ;;  %vm890_vm10 = vcmp.ge.f32.partialorder %v500_v3, 0.0  ;;  %v10481_v28 = vpop.f32.mrb[52].mxu1 }
 0x169   :  { %v504_v17 = vadd.f32 %v503_v12, %v9998_v13  ;;  %v505_v52 = vpop.f32.mrb[59].mxu0  ;;  %12167 = vst [vmem:[#allocation17_spill] sm:$0xff] %v10481_v28  ;;  %v1145_v51 = vsel %vm889_vm11, %v498_v36, %v1017_v47  ;;  %v10489_v7 = vpop.f32.mrb[53].mxu1  ;;  %v12169_v28 = vsub.s32 2, %v9989_v9  ;;  %v589_v36 = vadd.f32 %v10090_v20, %v10487_v10 }
 0x16a   :  { %v506_v38 = vadd.f32 %v505_v52, %v10002_v8  ;;  %v1146_v2 = vsel %vm890_vm10, %v500_v3, %v1018_v4  ;;  %12168 = vst [vmem:[#allocation18_spill] sm:$0xff] %v10489_v7 }
 0x16b   :  { %v1021_v45 = vmul.f32 0.01, %v504_v17  ;;  %1602 = vmatprep.mubr.f32.mxu0 %v1146_v2  ;;  %2088 = vmatprep.mubr.f32.mxu1 %v1146_v2  ;;  %vm893_vm13 = vcmp.ge.f32.partialorder %v504_v17, 0.0  ;;  %v10497_v2 = vrot.slane %v9133_v18, %v12169_v28  ;;  %vm780_vm2 = vcmp.ge.f32.partialorder %v589_v36, 0.0 }
 0x16c   :  { %v1022_v12 = vmul.f32 0.01, %v506_v38  ;;  %v509_v63 = vpop.f32.mrb[60].mxu0  ;;  %1603 = vmatmul.mubr.f32.gmra.mrb[120].mxu0 %v1145_v51  ;;  %2089 = vmatmul.mubr.f32.gmra.mrb[120].mxu1 %v1145_v51  ;;  %vm894_vm12 = vcmp.ge.f32.partialorder %v506_v38, 0.0  ;;  %v10493_v46 = vpop.f32.mrb[54].mxu1 }
 0x16d   :  { %v510_v4 = vadd.f32 %v509_v63, %v9998_v13  ;;  %v511_v3 = vpop.f32.mrb[61].mxu0  ;;  %v1149_v51 = vsel %vm893_vm13, %v504_v17, %v1021_v45  ;;  %v10501_v7 = vpop.f32.mrb[55].mxu1  ;;  %v587_v20 = vadd.f32 %v10081_v15, %v10497_v2 }
 0x16e   :  { %v512_v52 = vadd.f32 %v511_v3, %v10002_v8  ;;  %v1150_v33 = vsel %vm894_vm12, %v506_v38, %v1022_v12 }
 0x16f   :  { %v1025_v47 = vmul.f32 0.01, %v510_v4  ;;  %1608 = vmatprep.mubr.f32.mxu0 %v1150_v33  ;;  %2093 = vmatprep.mubr.f32.mxu1 %v1150_v33  ;;  %vm897_vm15 = vcmp.ge.f32.partialorder %v510_v4, 0.0  ;;  %v908_v33 = vmul.f32 0.01, %v589_v36  ;;  %vm779_vm3 = vcmp.ge.f32.partialorder %v587_v20, 0.0 }
 0x170   :  { %v1026_v63 = vmul.f32 0.01, %v512_v52  ;;  %v515_v57 = vpop.f32.mrb[62].mxu0  ;;  %1609 = vmatmul.mubr.f32.gmra.mrb[122].mxu0 %v1149_v51  ;;  %2094 = vmatmul.mubr.f32.gmra.mrb[122].mxu1 %v1149_v51  ;;  %vm898_vm14 = vcmp.ge.f32.partialorder %v512_v52, 0.0  ;;  %v10505_v3 = vpop.f32.mrb[56].mxu1  ;;  %v595_v51 = vadd.f32 %v10116_v39, %v10487_v10  ;;  %v2622_v39 = vld [vmem:[%s12139_s5] sm:$0xff] }
 0x171   :  { %v516_v38 = vadd.f32 %v515_v57, %v9998_v13  ;;  %v517_v12 = vpop.f32.mrb[63].mxu0  ;;  %v1153_v45 = vsel %vm897_vm15, %v510_v4, %v1025_v47  ;;  %v10509_v9 = vpop.f32.mrb[57].mxu1  ;;  %v907_v15 = vmul.f32 0.01, %v587_v20 }
 0x172   :  { %v518_v28 = vadd.f32 %v517_v12, %v10002_v8  ;;  %v1154_v18 = vsel %vm898_vm14, %v512_v52, %v1026_v63  ;;  %v593_v52 = vadd.f32 %v10107_v34, %v10497_v2  ;;  %v2623_v63 = vld [vmem:[%s12139_s5 + $0x8] sm:$0xff]  ;;  %v912_v12 = vmul.f32 0.01, %v595_v51 }
 0x173   :  { %v1029_v17 = vmul.f32 0.01, %v516_v38  ;;  %1614 = vmatprep.mubr.f32.mxu0 %v1154_v18  ;;  %2098 = vmatprep.mubr.f32.mxu1 %v1154_v18  ;;  %vm901_vm1 = vcmp.ge.f32.partialorder %v516_v38, 0.0  ;;  %v1036_v34 = vsel %vm780_vm2, %v589_v36, %v908_v33  ;;  %vm784_vm4 = vcmp.ge.f32.partialorder %v595_v51, 0.0  ;;  %v2624_v33 = vld [vmem:[%s12139_s5 + $0x10] sm:$0xff] }
 0x174   :  { %v1030_v13 = vmul.f32 0.01, %v518_v28  ;;  %1615 = vmatmul.mubr.f32.gmra.mrb[124].mxu0 %v1153_v45  ;;  %2099 = vmatmul.mubr.f32.gmra.mrb[124].mxu1 %v1153_v45  ;;  %vm902_vm0 = vcmp.ge.f32.partialorder %v518_v28, 0.0  ;;  %v10513_v57 = vpop.f32.mrb[58].mxu1  ;;  %v8803_v18 = vpack.c.bf16 %v2623_v63, %v2622_v39  ;;  %v2655_v45 = vld [vmem:[%s12139_s5 + $0x108] sm:$0xff]  ;;  %vm783_vm5 = vcmp.ge.f32.partialorder %v593_v52, 0.0 }
 0x175   :  { %v1157_v4 = vsel %vm901_vm1, %v516_v38, %v1029_v17  ;;  %v10517_v47 = vpop.f32.mrb[59].mxu1  ;;  %v2654_v17 = vld [vmem:[%s12139_s5 + $0x100] sm:$0xff] }
 0x176   :  { %v1158_v8 = vsel %vm902_vm0, %v518_v28, %v1030_v13  ;;  %v601_v28 = vadd.f32 %v10142_v59, %v10487_v10  ;;  %v1035_v13 = vsel %vm779_vm3, %v587_v20, %v907_v15  ;;  %v911_v59 = vmul.f32 0.01, %v593_v52 }
 0x177   :  { %1620 = vmatprep.mubr.f32.mxu0 %v1158_v8  ;;  %2103 = vmatprep.mubr.f32.mxu1 %v1158_v8  ;;  %v599_v8 = vadd.f32 %v10133_v54, %v10497_v2  ;;  %v8850_v39 = vpack.c.bf16 %v2655_v45, %v2654_v17  ;;  %v1040_v20 = vsel %vm784_vm4, %v595_v51, %v912_v12  ;;  %v2626_v51 = vld [vmem:[%s12139_s5 + $0x20] sm:$0xff]  ;;  %v2627_v12 = vld [vmem:[%s12139_s5 + $0x28] sm:$0xff] }
 0x178   :  { %1621 = vmatmul.mubr.f32.gmra.mrb[126].mxu0 %v1157_v4  ;;  %2104 = vmatmul.mubr.f32.gmra.mrb[126].mxu1 %v1157_v4  ;;  %v10528_v38 = vpop.f32.mrb[60].mxu1  ;;  %v2625_v4 = vld [vmem:[%s12139_s5 + $0x18] sm:$0xff]  ;;  %v916_v63 = vmul.f32 0.01, %v601_v28  ;;  %vm788_vm6 = vcmp.ge.f32.partialorder %v601_v28, 0.0  ;;  %v605_v17 = vadd.f32 %v10159_v16, %v10497_v2  ;;  %v1039_v45 = vsel %vm783_vm5, %v593_v52, %v911_v59 }
 0x179   :  { %1691 = vmatprep.mubr.f32.mxu0 %v1036_v34  ;;  %2173 = vmatprep.mubr.f32.mxu1 %v1036_v34  ;;  %12170 = vst [vmem:[#allocation19_spill] sm:$0xff] %v10528_v38  ;;  %v10538_v36 = vpop.f32.mrb[61].mxu1  ;;  %v607_v34 = vadd.f32 %v10168_v22, %v10487_v10  ;;  %v8806_v15 = vpack.c.bf16 %v2625_v4, %v2624_v33  ;;  %v915_v38 = vmul.f32 0.01, %v599_v8  ;;  %v12172_v22 = vmov 0.0|0.0  }
 0x17a   :  { %12171 = vst [vmem:[#allocation20_spill] sm:$0xff] %v10538_v36  ;;  %8851 = vmatprep.subr.bf16.mxu1 %v8850_v39  ;;  %v1044_v16 = vsel %vm788_vm6, %v601_v28, %v916_v63  ;;  %vm787_vm7 = vcmp.ge.f32.partialorder %v599_v8, 0.0  ;;  %v8809_v52 = vpack.c.bf16 %v2627_v12, %v2626_v51  ;;  %v919_v59 = vmul.f32 0.01, %v605_v17  ;;  %v2629_v28 = vld [vmem:[%s12139_s5 + $0x38] sm:$0xff] }
 0x17b   :  { %vm792_vm8 = vcmp.ge.f32.partialorder %v607_v34, 0.0  ;;  %v611_v33 = vadd.f32 %v10185_v37, %v10497_v2  ;;  %v1043_v4 = vsel %vm787_vm7, %v599_v8, %v915_v38  ;;  %v619_v63 = vadd.f32 %v10220_v1, %v10487_v10  ;;  %v2630_v1 = vld [vmem:[%s12139_s5 + $0x40] sm:$0xff] }
 0x17c   :  { %1692 = vmatmul.mubr.f32.vlgmr.msra.gmra.mrb[64].mxu0 %v1035_v13  ;;  %2174 = vmatmul.mubr.f32.vlgmr.msra.gmra.mrb[64].mxu1 %v1035_v13  ;;  %v10549_v54 = vpop.f32.mrb[62].mxu1  ;;  %v613_v13 = vadd.f32 %v10194_v43, %v10487_v10  ;;  %v2628_v43 = vld [vmem:[%s12139_s5 + $0x30] sm:$0xff]  ;;  %vm791_vm9 = vcmp.ge.f32.partialorder %v605_v17, 0.0  ;;  %v617_v8 = vadd.f32 %v10211_v60, %v10497_v2  ;;  %v625_v51 = vadd.f32 %v10246_v30, %v10487_v10 }
 0x17d   :  { %1697 = vmatprep.mubr.f32.mxu0 %v1040_v20  ;;  %2178 = vmatprep.mubr.f32.mxu1 %v1040_v20  ;;  %v10553_v36 = vpop.f32.mrb[63].mxu1  ;;  %v8812_v37 = vpack.c.bf16 %v2629_v28, %v2628_v43  ;;  %v923_v38 = vmul.f32 0.01, %v611_v33  ;;  %vm795_vm11 = vcmp.ge.f32.partialorder %v611_v33, 0.0  ;;  %vm800_vm12 = vcmp.ge.f32.partialorder %v619_v63, 0.0  ;;  %v2632_v30 = vld [vmem:[%s12139_s5 + $0x50] sm:$0xff] }
 0x17e   :  { %8804 = vmatpush1.bf16.msra.mxu0 %v8803_v18  ;;  %8853 = vmatpush3.bf16.msra.mxu1 %v8850_v39  ;;  %v920_v18 = vmul.f32 0.01, %v607_v34  ;;  %v924_v39 = vmul.f32 0.01, %v613_v13  ;;  %vm796_vm10 = vcmp.ge.f32.partialorder %v613_v13, 0.0  ;;  %vm799_vm13 = vcmp.ge.f32.partialorder %v617_v8, 0.0 }
 0x17f   :  { %8805 = vmatprep.subr.bf16.mxu0 %v12172_v22  ;;  %vm804_vm14 = vcmp.ge.f32.partialorder %v625_v51, 0.0  ;;  %v629_v43 = vadd.f32 %v10263_v48, %v10497_v2 }
 0x180   :  { %1698 = vmatmul.mubr.f32.gmra.mrb[66].mxu0 %v1039_v45  ;;  %2179 = vmatmul.mubr.f32.gmra.mrb[66].mxu1 %v1039_v45  ;;  %v1048_v20 = vsel %vm792_vm8, %v607_v34, %v920_v18  ;;  %v2631_v34 = vld [vmem:[%s12139_s5 + $0x48] sm:$0xff]  ;;  %v928_v45 = vmul.f32 0.01, %v619_v63  ;;  %v1052_v12 = vsel %vm796_vm10, %v613_v13, %v924_v39  ;;  %v623_v18 = vadd.f32 %v10237_v25, %v10497_v2  ;;  %v2633_v13 = vld [vmem:[%s12139_s5 + $0x58] sm:$0xff] }
 0x181   :  { %1703 = vmatprep.mubr.f32.mxu0 %v1044_v16  ;;  %2183 = vmatprep.mubr.f32.mxu1 %v1044_v16  ;;  %v8815_v60 = vpack.c.bf16 %v2631_v34, %v2630_v1  ;;  %v1051_v16 = vsel %vm795_vm11, %v611_v33, %v923_v38  ;;  %v8818_v25 = vpack.c.bf16 %v2633_v13, %v2632_v30  ;;  %v2635_v39 = vld [vmem:[%s12139_s5 + $0x68] sm:$0xff]  ;;  %v935_v38 = vmul.f32 0.01, %v629_v43  ;;  %v2637_v1 = vld [vmem:[%s12139_s5 + $0x78] sm:$0xff] }
 0x182   :  { %8807 = vmatpush1.bf16.msra.mxu0 %v8806_v15  ;;  %v1047_v15 = vsel %vm791_vm9, %v605_v17, %v919_v59  ;;  %v927_v17 = vmul.f32 0.01, %v617_v8  ;;  %v631_v59 = vadd.f32 %v10272_v55, %v10487_v10  ;;  %v931_v33 = vmul.f32 0.01, %v623_v18  ;;  %v2634_v55 = vld [vmem:[%s12139_s5 + $0x60] sm:$0xff] }
 0x183   :  { %8808 = vmatprep.subr.bf16.mxu0 %v12172_v22  ;;  %vm803_vm15 = vcmp.ge.f32.partialorder %v623_v18, 0.0  ;;  %v8821_v48 = vpack.c.bf16 %v2635_v39, %v2634_v55  ;;  %vm807_vm1 = vcmp.ge.f32.partialorder %v629_v43, 0.0  ;;  %v649_v30 = vadd.f32 %v10350_v19, %v10487_v10  ;;  %v2640_v19 = vld [vmem:[%s12139_s5 + $0x90] sm:$0xff] }
 0x184   :  { %1704 = vmatmul.mubr.f32.gmra.mrb[68].mxu0 %v1043_v4  ;;  %2184 = vmatmul.mubr.f32.gmra.mrb[68].mxu1 %v1043_v4  ;;  %v1056_v4 = vsel %vm800_vm12, %v619_v63, %v928_v45  ;;  %v1055_v28 = vsel %vm799_vm13, %v617_v8, %v927_v17  ;;  %v936_v63 = vmul.f32 0.01, %v631_v59  ;;  %vm808_vm0 = vcmp.ge.f32.partialorder %v631_v59, 0.0 }
 0x185   :  { %1709 = vmatprep.mubr.f32.mxu0 %v1048_v20  ;;  %2188 = vmatprep.mubr.f32.mxu1 %v1048_v20  ;;  %v637_v20 = vadd.f32 %v10298_v23, %v10487_v10  ;;  %v635_v8 = vadd.f32 %v10289_v14, %v10497_v2  ;;  %v2636_v23 = vld [vmem:[%s12139_s5 + $0x70] sm:$0xff]  ;;  %v643_v45 = vadd.f32 %v10324_v49, %v10487_v10  ;;  %v2638_v49 = vld [vmem:[%s12139_s5 + $0x80] sm:$0xff]  ;;  %vm820_vm6 = vcmp.ge.f32.partialorder %v649_v30, 0.0 }
 0x186   :  { %8810 = vmatpush1.bf16.msra.mxu0 %v8809_v52  ;;  %v932_v52 = vmul.f32 0.01, %v625_v51  ;;  %v8824_v14 = vpack.c.bf16 %v2637_v1, %v2636_v23  ;;  %v1063_v17 = vsel %vm807_vm1, %v629_v43, %v935_v38  ;;  %v655_v43 = vadd.f32 %v10376_v50, %v10487_v10  ;;  %v2642_v50 = vld [vmem:[%s12139_s5 + $0xa0] sm:$0xff]  ;;  %v2645_v1 = vld [vmem:[%s12139_s5 + $0xb8] sm:$0xff] }
 0x187   :  { %8811 = vmatprep.subr.bf16.mxu0 %v12172_v22  ;;  %v940_v34 = vmul.f32 0.01, %v637_v20  ;;  %vm812_vm2 = vcmp.ge.f32.partialorder %v637_v20, 0.0  ;;  %vm811_vm3 = vcmp.ge.f32.partialorder %v635_v8, 0.0  ;;  %vm816_vm4 = vcmp.ge.f32.partialorder %v643_v45, 0.0 }
 0x188   :  { %1710 = vmatmul.mubr.f32.gmra.mrb[70].mxu0 %v1047_v15  ;;  %2189 = vmatmul.mubr.f32.gmra.mrb[70].mxu1 %v1047_v15  ;;  %v1059_v15 = vsel %vm803_vm15, %v623_v18, %v931_v33  ;;  %v2639_v18 = vld [vmem:[%s12139_s5 + $0x88] sm:$0xff]  ;;  %v948_v33 = vmul.f32 0.01, %v649_v30  ;;  %v653_v39 = vadd.f32 %v10367_v41, %v10497_v2  ;;  %vm824_vm8 = vcmp.ge.f32.partialorder %v655_v43, 0.0 }
 0x189   :  { %1715 = vmatprep.mubr.f32.mxu0 %v1052_v12  ;;  %2193 = vmatprep.mubr.f32.mxu1 %v1052_v12  ;;  %v939_v12 = vmul.f32 0.01, %v635_v8  ;;  %v1068_v13 = vsel %vm812_vm2, %v637_v20, %v940_v34  ;;  %v2643_v20 = vld [vmem:[%s12139_s5 + $0xa8] sm:$0xff] }
 0x18a   :  { %8813 = vmatpush1.bf16.msra.mxu0 %v8812_v37  ;;  %v1060_v37 = vsel %vm804_vm14, %v625_v51, %v932_v52  ;;  %v1064_v51 = vsel %vm808_vm0, %v631_v59, %v936_v63  ;;  %v647_v59 = vadd.f32 %v10341_v5, %v10497_v2  ;;  %v1076_v38 = vsel %vm820_vm6, %v649_v30, %v948_v33 }
 0x18b   :  { %8814 = vmatprep.subr.bf16.mxu0 %v12172_v22  ;;  %v8833_v41 = vpack.c.bf16 %v2643_v20, %v2642_v50  ;;  %vm823_vm9 = vcmp.ge.f32.partialorder %v653_v39, 0.0  ;;  %v677_v33 = vadd.f32 %v10414_v6, %v10497_v2  ;;  %v683_v50 = vadd.f32 %v10420_v35, %v10497_v2 }
 0x18c   :  { %1716 = vmatmul.mubr.f32.gmra.mrb[72].mxu0 %v1051_v16  ;;  %2194 = vmatmul.mubr.f32.gmra.mrb[72].mxu1 %v1051_v16  ;;  %v944_v16 = vmul.f32 0.01, %v643_v45  ;;  %v947_v55 = vmul.f32 0.01, %v647_v59  ;;  %vm819_vm7 = vcmp.ge.f32.partialorder %v647_v59, 0.0 }
 0x18d   :  { %1721 = vmatprep.mubr.f32.mxu0 %v1056_v4  ;;  %2198 = vmatprep.mubr.f32.mxu1 %v1056_v4  ;;  %v1067_v4 = vsel %vm811_vm3, %v635_v8, %v939_v12  ;;  %v951_v8 = vmul.f32 0.01, %v653_v39  ;;  %v665_v12 = vadd.f32 %v10401_v26, %v10497_v2  ;;  %vm839_vm1 = vcmp.ge.f32.partialorder %v677_v33, 0.0 }
 0x18e   :  { %8816 = vmatpush1.bf16.msra.mxu0 %v8815_v60  ;;  %v641_v60 = vadd.f32 %v10315_v42, %v10497_v2  ;;  %v8827_v42 = vpack.c.bf16 %v2639_v18, %v2638_v49  ;;  %v1075_v23 = vsel %vm819_vm7, %v647_v59, %v947_v55  ;;  %v673_v18 = vadd.f32 %v10410_v61, %v10487_v10  ;;  %v2648_v61 = vld [vmem:[%s12139_s5 + $0xd0] sm:$0xff] }
 0x18f   :  { %8817 = vmatprep.subr.bf16.mxu0 %v12172_v22  ;;  %v959_v30 = vmul.f32 0.01, %v665_v12  ;;  %vm831_vm13 = vcmp.ge.f32.partialorder %v665_v12, 0.0  ;;  %v685_v55 = vadd.f32 %v10422_v44, %v10487_v10  ;;  %v691_v44 = vadd.f32 %v10428_v0, %v10487_v10 }
 0x190   :  { %1722 = vmatmul.mubr.f32.gmra.mrb[74].mxu0 %v1055_v28  ;;  %2199 = vmatmul.mubr.f32.gmra.mrb[74].mxu1 %v1055_v28  ;;  %v943_v52 = vmul.f32 0.01, %v641_v60  ;;  %v1072_v28 = vsel %vm816_vm4, %v643_v45, %v944_v16  ;;  %vm815_vm5 = vcmp.ge.f32.partialorder %v641_v60, 0.0  ;;  %v667_v45 = vadd.f32 %v10403_v40, %v10487_v10  ;;  %v2646_v40 = vld [vmem:[%s12139_s5 + $0xc0] sm:$0xff] }
 0x191   :  { %1727 = vmatprep.mubr.f32.mxu0 %v1060_v37  ;;  %2203 = vmatprep.mubr.f32.mxu1 %v1060_v37  ;;  %v952_v37 = vmul.f32 0.01, %v655_v43  ;;  %v964_v59 = vmul.f32 0.01, %v673_v18  ;;  %vm836_vm14 = vcmp.ge.f32.partialorder %v673_v18, 0.0  ;;  %vm844_vm2 = vcmp.ge.f32.partialorder %v685_v55, 0.0 }
 0x192   :  { %8819 = vmatpush1.bf16.msra.mxu0 %v8818_v25  ;;  %v2641_v25 = vld [vmem:[%s12139_s5 + $0x98] sm:$0xff]  ;;  %v1071_v63 = vsel %vm815_vm5, %v641_v60, %v943_v52  ;;  %v1079_v60 = vsel %vm823_vm9, %v653_v39, %v951_v8  ;;  %v960_v49 = vmul.f32 0.01, %v667_v45  ;;  %vm832_vm12 = vcmp.ge.f32.partialorder %v667_v45, 0.0 }
 0x193   :  { %8820 = vmatprep.subr.bf16.mxu0 %v12172_v22  ;;  %v8830_v5 = vpack.c.bf16 %v2641_v25, %v2640_v19  ;;  %v2649_v52 = vld [vmem:[%s12139_s5 + $0xd8] sm:$0xff]  ;;  %v1092_v39 = vsel %vm836_vm14, %v673_v18, %v964_v59  ;;  %v976_v8 = vmul.f32 0.01, %v691_v44  ;;  %vm843_vm3 = vcmp.ge.f32.partialorder %v683_v50, 0.0  ;;  %v12174_v18 = vld [vmem:[#allocation7_spill] sm:$0xff] }
 0x194   :  { %1728 = vmatmul.mubr.f32.gmra.mrb[76].mxu0 %v1059_v15  ;;  %2204 = vmatmul.mubr.f32.gmra.mrb[76].mxu1 %v1059_v15  ;;  %v659_v15 = vadd.f32 %v10393_v11, %v10497_v2  ;;  %v1088_v19 = vsel %vm832_vm12, %v667_v45, %v960_v49  ;;  %vm848_vm4 = vcmp.ge.f32.partialorder %v691_v44, 0.0  ;;  %v701_v45 = vadd.f32 %v10438_v56, %v10497_v2  ;;  %v12173_v56 = vld [vmem:[#allocation8_spill] sm:$0xff] }
 0x195   :  { %1733 = vmatprep.mubr.f32.mxu0 %v1064_v51  ;;  %2208 = vmatprep.mubr.f32.mxu1 %v1064_v51  ;;  %v1080_v51 = vsel %vm824_vm8, %v655_v43, %v952_v37  ;;  %v1087_v43 = vsel %vm831_vm13, %v665_v12, %v959_v30  ;;  %v972_v37 = vmul.f32 0.01, %v685_v55  ;;  %v707_v12 = vadd.f32 %v10444_v29, %v10497_v2  ;;  %v12175_v29 = vld [vmem:[#allocation10_spill] sm:$0xff] }
 0x196   :  { %8822 = vmatpush1.bf16.msra.mxu0 %v8821_v48  ;;  %v661_v48 = vadd.f32 %v10396_v21, %v10487_v10  ;;  %v2644_v21 = vld [vmem:[%s12139_s5 + $0xb0] sm:$0xff]  ;;  %vm827_vm11 = vcmp.ge.f32.partialorder %v659_v15, 0.0  ;;  %vm855_vm9 = vcmp.ge.f32.partialorder %v701_v45, 0.0 }
 0x197   :  { %8823 = vmatprep.subr.bf16.mxu0 %v12172_v22  ;;  %v8836_v11 = vpack.c.bf16 %v2645_v1, %v2644_v21  ;;  %v1100_v0 = vsel %vm844_vm2, %v685_v55, %v972_v37  ;;  %v695_v21 = vadd.f32 %v10432_v27, %v10497_v2  ;;  %v709_v27 = vadd.f32 %v10446_v31, %v10487_v10 }
 0x198   :  { %1734 = vmatmul.mubr.f32.gmra.mrb[78].mxu0 %v1063_v17  ;;  %2209 = vmatmul.mubr.f32.gmra.mrb[78].mxu1 %v1063_v17  ;;  %v956_v34 = vmul.f32 0.01, %v661_v48  ;;  %vm828_vm10 = vcmp.ge.f32.partialorder %v661_v48, 0.0  ;;  %v2647_v17 = vld [vmem:[%s12139_s5 + $0xc8] sm:$0xff]  ;;  %v987_v31 = vmul.f32 0.01, %v707_v12 }
 0x199   :  { %1739 = vmatprep.mubr.f32.mxu0 %v1068_v13  ;;  %2213 = vmatprep.mubr.f32.mxu1 %v1068_v13  ;;  %v8839_v26 = vpack.c.bf16 %v2647_v17, %v2646_v40  ;;  %v671_v13 = vadd.f32 %v10407_v58, %v10497_v2  ;;  %v8842_v58 = vpack.c.bf16 %v2649_v52, %v2648_v61  ;;  %vm851_vm7 = vcmp.ge.f32.partialorder %v695_v21, 0.0  ;;  %v12176_v52 = vld [vmem:[#allocation9_spill] sm:$0xff] }
 0x19a   :  { %8825 = vmatpush1.bf16.msra.mxu0 %v8824_v14  ;;  %v955_v14 = vmul.f32 0.01, %v659_v15  ;;  %v1084_v16 = vsel %vm828_vm10, %v661_v48, %v956_v34  ;;  %v1104_v34 = vsel %vm848_vm4, %v691_v44, %v976_v8  ;;  %v988_v40 = vmul.f32 0.01, %v709_v27  ;;  %v2656_v44 = vld [vmem:[%s12139_s5 + $0x110] sm:$0xff] }
 0x19b   :  { %8826 = vmatprep.subr.bf16.mxu0 %v12172_v22  ;;  %v963_v25 = vmul.f32 0.01, %v671_v13  ;;  %vm835_vm15 = vcmp.ge.f32.partialorder %v671_v13, 0.0  ;;  %v715_v17 = vadd.f32 %v12173_v56, %v10487_v10  ;;  %vm860_vm10 = vcmp.ge.f32.partialorder %v709_v27, 0.0 }
 0x19c   :  { %1740 = vmatmul.mubr.f32.gmra.mrb[80].mxu0 %v1067_v4  ;;  %2214 = vmatmul.mubr.f32.gmra.mrb[80].mxu1 %v1067_v4  ;;  %v679_v4 = vadd.f32 %v10416_v24, %v10487_v10  ;;  %v2650_v24 = vld [vmem:[%s12139_s5 + $0xe0] sm:$0xff]  ;;  %v719_v59 = vadd.f32 %v12176_v52, %v10497_v2  ;;  %v751_v56 = vadd.f32 %v10501_v7, %v10487_v10 }
 0x19d   :  { %1745 = vmatprep.mubr.f32.mxu0 %v1072_v28  ;;  %2218 = vmatprep.mubr.f32.mxu1 %v1072_v28  ;;  %v2651_v28 = vld [vmem:[%s12139_s5 + $0xe8] sm:$0xff]  ;;  %v1091_v20 = vsel %vm835_vm15, %v671_v13, %v963_v25  ;;  %v992_v30 = vmul.f32 0.01, %v715_v17  ;;  %v721_v13 = vadd.f32 %v12175_v29, %v10487_v10  ;;  %vm864_vm12 = vcmp.ge.f32.partialorder %v715_v17, 0.0 }
 0x19e   :  { %8828 = vmatpush1.bf16.msra.mxu0 %v8827_v42  ;;  %v1083_v42 = vsel %vm827_vm11, %v659_v15, %v955_v14  ;;  %vm840_vm0 = vcmp.ge.f32.partialorder %v679_v4, 0.0  ;;  %v8845_v6 = vpack.c.bf16 %v2651_v28, %v2650_v24  ;;  %v697_v15 = vadd.f32 %v10434_v32, %v10487_v10  ;;  %v12178_v24 = vld [vmem:[#allocation11_spill] sm:$0xff] }
 0x19f   :  { %8829 = vmatprep.subr.bf16.mxu0 %v12172_v22  ;;  %v979_v32 = vmul.f32 0.01, %v695_v21  ;;  %vm859_vm11 = vcmp.ge.f32.partialorder %v707_v12, 0.0  ;;  %vm868_vm14 = vcmp.ge.f32.partialorder %v721_v13, 0.0  ;;  %v725_v28 = vadd.f32 %v12178_v24, %v10497_v2 }
 0x1a0   :  { %1746 = vmatmul.mubr.f32.gmra.mrb[82].mxu0 %v1071_v63  ;;  %2219 = vmatmul.mubr.f32.gmra.mrb[82].mxu1 %v1071_v63  ;;  %v967_v63 = vmul.f32 0.01, %v677_v33  ;;  %vm852_vm6 = vcmp.ge.f32.partialorder %v697_v15, 0.0  ;;  %vm867_vm15 = vcmp.ge.f32.partialorder %v719_v59, 0.0  ;;  %v755_v29 = vadd.f32 %v10505_v3, %v10497_v2  ;;  %v12185_v3 = vld [vmem:[#allocation20_spill] sm:$0xff] }
 0x1a1   :  { %1751 = vmatprep.mubr.f32.mxu0 %v1076_v38  ;;  %2223 = vmatprep.mubr.f32.mxu1 %v1076_v38  ;;  %v971_v38 = vmul.f32 0.01, %v683_v50  ;;  %v761_v52 = vadd.f32 %v10513_v57, %v10497_v2  ;;  %v775_v57 = vadd.f32 %v10553_v36, %v10487_v10 }
 0x1a2   :  { %8831 = vmatpush1.bf16.msra.mxu0 %v8830_v5  ;;  %v968_v5 = vmul.f32 0.01, %v679_v4  ;;  %v1095_v35 = vsel %vm839_vm1, %v677_v33, %v967_v63  ;;  %v1120_v33 = vsel %vm864_vm12, %v715_v17, %v992_v30  ;;  %vm871_vm1 = vcmp.ge.f32.partialorder %v725_v28, 0.0 }
 0x1a3   :  { %8832 = vmatprep.subr.bf16.mxu0 %v12172_v22  ;;  %v1099_v1 = vsel %vm843_vm3, %v683_v50, %v971_v38  ;;  %v2652_v50 = vld [vmem:[%s12139_s5 + $0xf0] sm:$0xff]  ;;  %v999_v38 = vmul.f32 0.01, %v725_v28 }
 0x1a4   :  { %1752 = vmatmul.mubr.f32.gmra.mrb[84].mxu0 %v1075_v23  ;;  %2224 = vmatmul.mubr.f32.gmra.mrb[84].mxu1 %v1075_v23  ;;  %v1096_v48 = vsel %vm840_vm0, %v679_v4, %v968_v5  ;;  %v1115_v4 = vsel %vm859_vm11, %v707_v12, %v987_v31  ;;  %v749_v31 = vadd.f32 %v10493_v46, %v10497_v2  ;;  %vm891_vm11 = vcmp.ge.f32.partialorder %v755_v29, 0.0 }
 0x1a5   :  { %1757 = vmatprep.mubr.f32.mxu0 %v1080_v51  ;;  %2228 = vmatprep.mubr.f32.mxu1 %v1080_v51  ;;  %v763_v46 = vadd.f32 %v10517_v47, %v10487_v10  ;;  %v1023_v47 = vmul.f32 0.01, %v761_v52 }
 0x1a6   :  { %8834 = vmatpush1.bf16.msra.mxu0 %v8833_v41  ;;  %v689_v41 = vadd.f32 %v10426_v53, %v10497_v2  ;;  %v980_v53 = vmul.f32 0.01, %v697_v15  ;;  %v1015_v7 = vmul.f32 0.01, %v749_v31 }
 0x1a7   :  { %8835 = vmatprep.subr.bf16.mxu0 %v12172_v22  ;;  %vm896_vm12 = vcmp.ge.f32.partialorder %v763_v46, 0.0 }
 0x1a8   :  { %1758 = vmatmul.mubr.f32.gmra.mrb[86].mxu0 %v1079_v60  ;;  %2229 = vmatmul.mubr.f32.gmra.mrb[86].mxu1 %v1079_v60  ;;  %v975_v23 = vmul.f32 0.01, %v689_v41  ;;  %vm847_vm5 = vcmp.ge.f32.partialorder %v689_v41, 0.0  ;;  %v1108_v14 = vsel %vm852_vm6, %v697_v15, %v980_v53  ;;  %v1107_v60 = vsel %vm851_vm7, %v695_v21, %v979_v32 }
 0x1a9   :  { %1763 = vmatprep.mubr.f32.mxu0 %v1084_v16  ;;  %2233 = vmatprep.mubr.f32.mxu1 %v1084_v16  ;;  %v713_v16 = vadd.f32 %v12174_v18, %v10497_v2  ;;  %v1127_v32 = vsel %vm871_vm1, %v725_v28, %v999_v38 }
 0x1aa   :  { %8837 = vmatpush1.bf16.msra.mxu0 %v8836_v11  ;;  %v1103_v51 = vsel %vm847_vm5, %v689_v41, %v975_v23  ;;  %v12180_v41 = vld [vmem:[#allocation13_spill] sm:$0xff]  ;;  %v12181_v23 = vld [vmem:[#allocation16_spill] sm:$0xff] }
 0x1ab   :  { %8838 = vmatprep.subr.bf16.mxu0 %v12172_v22  ;;  %v991_v61 = vmul.f32 0.01, %v713_v16  ;;  %vm863_vm13 = vcmp.ge.f32.partialorder %v713_v16, 0.0  ;;  %v739_v21 = vadd.f32 %v12181_v23, %v10487_v10 }
 0x1ac   :  { %1764 = vmatmul.mubr.f32.gmra.mrb[88].mxu0 %v1083_v42  ;;  %2234 = vmatmul.mubr.f32.gmra.mrb[88].mxu1 %v1083_v42  ;;  %v1116_v42 = vsel %vm860_vm10, %v709_v27, %v988_v40 }
 0x1ad   :  { %1769 = vmatprep.mubr.f32.mxu0 %v1088_v19  ;;  %2238 = vmatprep.mubr.f32.mxu1 %v1088_v19  ;;  %v996_v19 = vmul.f32 0.01, %v721_v13  ;;  %v1119_v5 = vsel %vm863_vm13, %v713_v16, %v991_v61  ;;  %vm880_vm4 = vcmp.ge.f32.partialorder %v739_v21, 0.0  ;;  %v1016_v16 = vmul.f32 0.01, %v751_v56 }
 0x1ae   :  { %8840 = vmatpush1.bf16.msra.mxu0 %v8839_v26  ;;  %vm895_vm13 = vcmp.ge.f32.partialorder %v761_v52, 0.0 }
 0x1af   :  { %8841 = vmatprep.subr.bf16.mxu0 %v12172_v22  ;;  %v1124_v63 = vsel %vm868_vm14, %v721_v13, %v996_v19  ;;  %v769_v19 = vadd.f32 %v12185_v3, %v10487_v10  ;;  %v3313_v3 = vld [vmem:[%s12141_s7 + $0x28] sm:$0xff] }
 0x1b0   :  { %1770 = vmatmul.mubr.f32.gmra.mrb[90].mxu0 %v1087_v43  ;;  %2239 = vmatmul.mubr.f32.gmra.mrb[90].mxu1 %v1087_v43  ;;  %v995_v43 = vmul.f32 0.01, %v719_v59 }
 0x1b1   :  { %1775 = vmatprep.mubr.f32.mxu0 %v1092_v39  ;;  %2243 = vmatprep.mubr.f32.mxu1 %v1092_v39  ;;  %v12179_v39 = vld [vmem:[#allocation14_spill] sm:$0xff]  ;;  %v1028_v24 = vmul.f32 0.01, %v769_v19  ;;  %vm900_vm14 = vcmp.ge.f32.partialorder %v769_v19, 0.0 }
 0x1b2   :  { %8843 = vmatpush1.bf16.msra.mxu0 %v8842_v58  ;;  %v12177_v58 = vld [vmem:[#allocation12_spill] sm:$0xff]  ;;  %v1123_v8 = vsel %vm867_vm15, %v719_v59, %v995_v43 }
 0x1b3   :  { %8844 = vmatprep.subr.bf16.mxu0 %v12172_v22  ;;  %v727_v25 = vadd.f32 %v12177_v58, %v10487_v10 }
 0x1b4   :  { %1776 = vmatmul.mubr.f32.gmra.mrb[92].mxu0 %v1091_v20  ;;  %2244 = vmatmul.mubr.f32.gmra.mrb[92].mxu1 %v1091_v20  ;;  %v2653_v20 = vld [vmem:[%s12139_s5 + $0xf8] sm:$0xff] }
 0x1b5   :  { %1781 = vmatprep.mubr.f32.mxu0 %v1096_v48  ;;  %2248 = vmatprep.mubr.f32.mxu1 %v1096_v48  ;;  %v1000_v55 = vmul.f32 0.01, %v727_v25  ;;  %vm872_vm0 = vcmp.ge.f32.partialorder %v727_v25, 0.0  ;;  %v8848_v37 = vpack.c.bf16 %v2653_v20, %v2652_v50  ;;  %v2657_v48 = vld [vmem:[%s12139_s5 + $0x118] sm:$0xff] }
 0x1b6   :  { %8846 = vmatpush1.bf16.msra.mxu0 %v8845_v6  ;;  %v733_v6 = vadd.f32 %v12179_v39, %v10487_v10  ;;  %v8854_v15 = vpack.c.bf16 %v2657_v48, %v2656_v44  ;;  %v1151_v39 = vsel %vm895_vm13, %v761_v52, %v1023_v47 }
 0x1b7   :  { %8847 = vmatprep.subr.bf16.mxu0 %v12172_v22  ;;  %v703_v22 = vadd.f32 %v10440_v62, %v10487_v10  ;;  %v983_v62 = vmul.f32 0.01, %v701_v45 }
 0x1b8   :  { %1782 = vmatmul.mubr.f32.gmra.mrb[94].mxu0 %v1095_v35  ;;  %2249 = vmatmul.mubr.f32.gmra.mrb[94].mxu1 %v1095_v35  ;;  %v731_v35 = vadd.f32 %v12180_v41, %v10497_v2  ;;  %vm876_vm2 = vcmp.ge.f32.partialorder %v733_v6, 0.0 }
 0x1b9   :  { %1787 = vmatprep.mubr.f32.mxu0 %v1100_v0  ;;  %2253 = vmatprep.mubr.f32.mxu1 %v1100_v0  ;;  %v984_v11 = vmul.f32 0.01, %v703_v22  ;;  %vm856_vm8 = vcmp.ge.f32.partialorder %v703_v22, 0.0  ;;  %v1111_v26 = vsel %vm855_vm9, %v701_v45, %v983_v62  ;;  %v1004_v0 = vmul.f32 0.01, %v733_v6  ;;  %v12184_v62 = vld [vmem:[#allocation17_spill] sm:$0xff] }
 0x1ba   :  { %8849 = vmatpush1.bf16.msra.mxu0 %v8848_v37  ;;  %8855 = vmatprep.subr.bf16.mxu1 %v8854_v15  ;;  %v1003_v53 = vmul.f32 0.01, %v731_v35  ;;  %v1008_v45 = vmul.f32 0.01, %v739_v21  ;;  %vm875_vm3 = vcmp.ge.f32.partialorder %v731_v35, 0.0  ;;  %v743_v12 = vadd.f32 %v12184_v62, %v10497_v2 }
 0x1bb   :  { %v1112_v49 = vsel %vm856_vm8, %v703_v22, %v984_v11  ;;  %v12182_v22 = vld [vmem:[#allocation15_spill] sm:$0xff]  ;;  %8857 = vmatpush3.bf16.msra.mxu1 %v8854_v15  ;;  %v1132_v27 = vsel %vm876_vm2, %v733_v6, %v1004_v0  ;;  %vm888_vm8 = vcmp.ge.f32.partialorder %v751_v56, 0.0  ;;  %vm887_vm9 = vcmp.ge.f32.partialorder %v749_v31, 0.0 }
 0x1bc   :  { %1788 = vmatmul.mubr.f32.gmra.mrb[96].mxu0 %v1099_v1  ;;  %2254 = vmatmul.mubr.f32.gmra.mrb[96].mxu1 %v1099_v1  ;;  %v1128_v1 = vsel %vm872_vm0, %v727_v25, %v1000_v55  ;;  %v1136_v17 = vsel %vm880_vm4, %v739_v21, %v1008_v45  ;;  %vm883_vm7 = vcmp.ge.f32.partialorder %v743_v12, 0.0  ;;  %v1144_v61 = vsel %vm888_vm8, %v751_v56, %v1016_v16  ;;  %v12186_v25 = vld [vmem:[#allocation19_spill] sm:$0xff] }
 0x1bd   :  { %1793 = vmatprep.mubr.f32.mxu0 %v1104_v34  ;;  %2258 = vmatprep.mubr.f32.mxu1 %v1104_v34  ;;  %v737_v34 = vadd.f32 %v12182_v22, %v10497_v2  ;;  %v1143_v59 = vsel %vm887_vm9, %v749_v31, %v1015_v7  ;;  %v773_v55 = vadd.f32 %v10549_v54, %v10497_v2  ;;  %v1032_v6 = vmul.f32 0.01, %v775_v57  ;;  %v12187_v54 = vld [vmem:[#allocation6_spill] sm:$0xff]  ;;  %v3310_v56 = vld [vmem:[%s12141_s7 + $0x10] sm:$0xff] }
 0x1be   :  { %vm904_vm0 = vcmp.ge.f32.partialorder %v775_v57, 0.0  ;;  %v12188_v37 = vsub.s32 0, %v12187_v54  ;;  %v12189_v48 = vsub.s32 2, %v12187_v54  ;;  %v12190_v41 = vsub.s32 1, %v12187_v54 }
 0x1bf   :  { %vm879_vm5 = vcmp.ge.f32.partialorder %v737_v34, 0.0  ;;  %v1160_v50 = vsel %vm904_vm0, %v775_v57, %v1032_v6  ;;  %vm903_vm1 = vcmp.ge.f32.partialorder %v773_v55, 0.0  ;;  %vm2665_vm2 = vcmask 261120  }
 0x1c0   :  { %1794 = vmatmul.mubr.f32.gmra.mrb[98].mxu0 %v1103_v51  ;;  %2259 = vmatmul.mubr.f32.gmra.mrb[98].mxu1 %v1103_v51  ;;  %v12183_v51 = vld [vmem:[#allocation18_spill] sm:$0xff] }
 0x1c1   :  { %1799 = vmatprep.mubr.f32.mxu0 %v1108_v14  ;;  %2263 = vmatprep.mubr.f32.mxu1 %v1108_v14  ;;  %v745_v11 = vadd.f32 %v12183_v51, %v10487_v10  ;;  %v1007_v14 = vmul.f32 0.01, %v737_v34 }
 0x1c3   :  { %v1012_v40 = vmul.f32 0.01, %v745_v11  ;;  %vm884_vm6 = vcmp.ge.f32.partialorder %v745_v11, 0.0  ;;  %v1135_v18 = vsel %vm879_vm5, %v737_v34, %v1007_v14 }
 0x1c4   :  { %1800 = vmatmul.mubr.f32.gmra.mrb[100].mxu0 %v1107_v60  ;;  %2264 = vmatmul.mubr.f32.gmra.mrb[100].mxu1 %v1107_v60  ;;  %v1131_v60 = vsel %vm875_vm3, %v731_v35, %v1003_v53 }
 0x1c5   :  { %1805 = vmatprep.mubr.f32.mxu0 %v1112_v49  ;;  %2268 = vmatprep.mubr.f32.mxu1 %v1112_v49  ;;  %v1011_v49 = vmul.f32 0.01, %v743_v12  ;;  %v1140_v30 = vsel %vm884_vm6, %v745_v11, %v1012_v40  ;;  %v3308_v11 = vld [vmem:[%s12141_s7] sm:$0xff]  ;;  %v3309_v40 = vld [vmem:[%s12141_s7 + $0x8] sm:$0xff] }
 0x1c6   :  { %v8858_v16 = vpack.c.bf16 %v3309_v40, %v3308_v11 }
 0x1c7   :  { %v1139_v13 = vsel %vm883_vm7, %v743_v12, %v1011_v49 }
 0x1c8   :  { %1806 = vmatmul.mubr.f32.gmra.mrb[102].mxu0 %v1111_v26  ;;  %2269 = vmatmul.mubr.f32.gmra.mrb[102].mxu1 %v1111_v26  ;;  %v757_v26 = vadd.f32 %v10509_v9, %v10487_v10  ;;  %v1019_v9 = vmul.f32 0.01, %v755_v29  ;;  %v1031_v10 = vmul.f32 0.01, %v773_v55 }
 0x1c9   :  { %1811 = vmatprep.mubr.f32.mxu0 %v1116_v42  ;;  %2273 = vmatprep.mubr.f32.mxu1 %v1116_v42 }
 0x1ca   :  { %v1020_v42 = vmul.f32 0.01, %v757_v26  ;;  %vm892_vm10 = vcmp.ge.f32.partialorder %v757_v26, 0.0  ;;  %v1147_v43 = vsel %vm891_vm11, %v755_v29, %v1019_v9  ;;  %v1159_v20 = vsel %vm903_vm1, %v773_v55, %v1031_v10  ;;  %8859 = vmatprep.subr.bf16.mxu1 %v8858_v16  ;;  %v3314_v10 = vld [vmem:[%s12141_s7 + $0x30] sm:$0xff] }
 0x1cc   :  { %1812 = vmatmul.mubr.f32.gmra.mrb[104].mxu0 %v1115_v4  ;;  %2274 = vmatmul.mubr.f32.gmra.mrb[104].mxu1 %v1115_v4  ;;  %v1024_v4 = vmul.f32 0.01, %v763_v46  ;;  %v1148_v58 = vsel %vm892_vm10, %v757_v26, %v1020_v42 }
 0x1cd   :  { %1817 = vmatprep.mubr.f32.mxu0 %v1120_v33  ;;  %2278 = vmatprep.mubr.f32.mxu1 %v1120_v33  ;;  %v767_v33 = vadd.f32 %v12186_v25, %v10497_v2  ;;  %v1353_v2 = vld [vmem:[%s12138_s4] sm:$0x7] }
 0x1ce   :  { %v1152_v28 = vsel %vm896_vm12, %v763_v46, %v1024_v4  ;;  %v10778_v44 = vrot.slane %v1353_v2, %v12188_v37  ;;  %v10782_v38 = vrot.slane %v1353_v2, %v12189_v48  ;;  %v10786_v35 = vrot.slane %v1353_v2, %v12190_v41  ;;  %v3312_v4 = vld [vmem:[%s12141_s7 + $0x20] sm:$0xff] }
 0x1cf   :  { %vm899_vm15 = vcmp.ge.f32.partialorder %v767_v33, 0.0 }
 0x1d0   :  { %1818 = vmatmul.mubr.f32.gmra.mrb[106].mxu0 %v1119_v5  ;;  %2279 = vmatmul.mubr.f32.gmra.mrb[106].mxu1 %v1119_v5  ;;  %v1027_v5 = vmul.f32 0.01, %v767_v33 }
 0x1d1   :  { %1823 = vmatprep.mubr.f32.mxu0 %v1124_v63  ;;  %2283 = vmatprep.mubr.f32.mxu1 %v1124_v63  ;;  %v1156_v63 = vsel %vm900_vm14, %v769_v19, %v1028_v24 }
 0x1d2   :  { %v1155_v36 = vsel %vm899_vm15, %v767_v33, %v1027_v5 }
 0x1d4   :  { %1824 = vmatmul.mubr.f32.gmra.mrb[108].mxu0 %v1123_v8  ;;  %2284 = vmatmul.mubr.f32.gmra.mrb[108].mxu1 %v1123_v8 }
 0x1d5   :  { %1829 = vmatprep.mubr.f32.mxu0 %v1128_v1  ;;  %2288 = vmatprep.mubr.f32.mxu1 %v1128_v1 }
 0x1d8   :  { %1830 = vmatmul.mubr.f32.gmra.mrb[110].mxu0 %v1127_v32  ;;  %2289 = vmatmul.mubr.f32.gmra.mrb[110].mxu1 %v1127_v32 }
 0x1d9   :  { %1835 = vmatprep.mubr.f32.mxu0 %v1132_v27  ;;  %2293 = vmatprep.mubr.f32.mxu1 %v1132_v27 }
 0x1dc   :  { %1836 = vmatmul.mubr.f32.gmra.mrb[112].mxu0 %v1131_v60  ;;  %2294 = vmatmul.mubr.f32.gmra.mrb[112].mxu1 %v1131_v60 }
 0x1dd   :  { %1841 = vmatprep.mubr.f32.mxu0 %v1136_v17  ;;  %2298 = vmatprep.mubr.f32.mxu1 %v1136_v17  ;;  %v3311_v17 = vld [vmem:[%s12141_s7 + $0x18] sm:$0xff] }
 0x1de   :  { %v8862_v42 = vpack.c.bf16 %v3311_v17, %v3310_v56 }
 0x1e0   :  { %1842 = vmatmul.mubr.f32.gmra.mrb[114].mxu0 %v1135_v18  ;;  %2299 = vmatmul.mubr.f32.gmra.mrb[114].mxu1 %v1135_v18 }
 0x1e1   :  { %1847 = vmatprep.mubr.f32.mxu0 %v1140_v30  ;;  %2303 = vmatprep.mubr.f32.mxu1 %v1140_v30 }
 0x1e4   :  { %1848 = vmatmul.mubr.f32.gmra.mrb[116].mxu0 %v1139_v13  ;;  %2304 = vmatmul.mubr.f32.gmra.mrb[116].mxu1 %v1139_v13 }
 0x1e5   :  { %1853 = vmatprep.mubr.f32.mxu0 %v1144_v61  ;;  %2308 = vmatprep.mubr.f32.mxu1 %v1144_v61 }
 0x1e8   :  { %1854 = vmatmul.mubr.f32.gmra.mrb[118].mxu0 %v1143_v59  ;;  %2309 = vmatmul.mubr.f32.gmra.mrb[118].mxu1 %v1143_v59 }
 0x1e9   :  { %1859 = vmatprep.mubr.f32.mxu0 %v1148_v58  ;;  %2313 = vmatprep.mubr.f32.mxu1 %v1148_v58 }
 0x1ec   :  { %1860 = vmatmul.mubr.f32.gmra.mrb[120].mxu0 %v1147_v43  ;;  %2314 = vmatmul.mubr.f32.gmra.mrb[120].mxu1 %v1147_v43 }
 0x1ed   :  { %1865 = vmatprep.mubr.f32.mxu0 %v1152_v28  ;;  %2318 = vmatprep.mubr.f32.mxu1 %v1152_v28  ;;  %v8866_v28 = vpack.c.bf16 %v3313_v3, %v3312_v4 }
 0x1f0   :  { %1866 = vmatmul.mubr.f32.gmra.mrb[122].mxu0 %v1151_v39  ;;  %2319 = vmatmul.mubr.f32.gmra.mrb[122].mxu1 %v1151_v39 }
 0x1f1   :  { %1871 = vmatprep.mubr.f32.mxu0 %v1156_v63  ;;  %2323 = vmatprep.mubr.f32.mxu1 %v1156_v63 }
 0x1f4   :  { %1872 = vmatmul.mubr.f32.gmra.mrb[124].mxu0 %v1155_v36  ;;  %2324 = vmatmul.mubr.f32.gmra.mrb[124].mxu1 %v1155_v36  ;;  %v3315_v36 = vld [vmem:[%s12141_s7 + $0x38] sm:$0xff] }
 0x1f5   :  { %1877 = vmatprep.mubr.f32.mxu0 %v1160_v50  ;;  %2328 = vmatprep.mubr.f32.mxu1 %v1160_v50 }
 0x1f8   :  { %1878 = vmatmul.mubr.f32.gmra.mrb[126].mxu0 %v1159_v20  ;;  %2329 = vmatmul.mubr.f32.gmra.mrb[126].mxu1 %v1159_v20 }
 0x24f   :  { %v1693_v8 = vpop.f32.mrb[64].mxu0  ;;  %v2175_v15 = vpop.f32.mrb[64].mxu1 }
 0x250   :  { %v8902_v0 = vadd.f32 %v1693_v8, %v10778_v44  ;;  %v8966_v23 = vadd.f32 %v2175_v15, %v10782_v38  ;;  %v1695_v21 = vpop.f32.mrb[65].mxu0  ;;  %v2177_v1 = vpop.f32.mrb[65].mxu1 }
 0x251   :  { %v8903_v53 = vadd.f32 %v1695_v21, %v10786_v35 }
 0x252   :  { %vm2334_vm3 = vcmp.ge.f32.partialorder %v8902_v0, 0.0  ;;  %v2430_v22 = vmul.f32 0.01, %v8902_v0  ;;  %vm2336_vm4 = vcmp.ge.f32.partialorder %v8966_v23, 0.0  ;;  %v2432_v34 = vmul.f32 0.01, %v8966_v23 }
 0x253   :  { %v2431_v32 = vmul.f32 0.01, %v8903_v53  ;;  %v1699_v45 = vpop.f32.mrb[66].mxu0  ;;  %v2180_v51 = vpop.f32.mrb[66].mxu1  ;;  %vm2335_vm5 = vcmp.ge.f32.partialorder %v8903_v53, 0.0 }
 0x254   :  { %v8904_v27 = vadd.f32 %v1699_v45, %v10778_v44  ;;  %v8967_v14 = vadd.f32 %v2180_v51, %v10782_v38  ;;  %v1701_v62 = vpop.f32.mrb[67].mxu0  ;;  %v2182_v12 = vpop.f32.mrb[67].mxu1  ;;  %v2528_v60 = vsel %vm2336_vm4, %v8966_v23, %v2432_v34  ;;  %v2526_v49 = vsel %vm2334_vm3, %v8902_v0, %v2430_v22  ;;  %v3316_v34 = vld [vmem:[%s12141_s7 + $0x40] sm:$0xff] }
 0x255   :  { %v8905_v31 = vadd.f32 %v1701_v62, %v10786_v35  ;;  %8294 = vmatprep.mubr.msk.f32.mxu1 %vm2665_vm2, %v2528_v60  ;;  %v2527_v18 = vsel %vm2335_vm5, %v8903_v53, %v2431_v32  ;;  %v8870_v0 = vpack.c.bf16 %v3315_v36, %v3314_v10  ;;  %v3317_v32 = vld [vmem:[%s12141_s7 + $0x48] sm:$0xff] }
 0x256   :  { %v2433_v26 = vmul.f32 0.01, %v8904_v27  ;;  %vm2339_vm6 = vcmp.ge.f32.partialorder %v8967_v14, 0.0  ;;  %v2435_v30 = vmul.f32 0.01, %v8967_v14  ;;  %2826 = vmatprep.mubr.f32.mxu0 %v2527_v18  ;;  %vm2337_vm7 = vcmp.ge.f32.partialorder %v8904_v27, 0.0 }
 0x257   :  { %v2434_v7 = vmul.f32 0.01, %v8905_v31  ;;  %v1705_v29 = vpop.f32.mrb[68].mxu0  ;;  %v2185_v13 = vpop.f32.mrb[68].mxu1  ;;  %2827 = vmatmul.mubr.f32.vlgmr.msra.gmra.mrb[128].mxu0 %v2526_v49  ;;  %vm2338_vm8 = vcmp.ge.f32.partialorder %v8905_v31, 0.0  ;;  %v8874_v40 = vpack.c.bf16 %v3317_v32, %v3316_v34 }
 0x258   :  { %v2531_v46 = vsel %vm2339_vm6, %v8967_v14, %v2435_v30  ;;  %v8906_v61 = vadd.f32 %v1705_v29, %v10778_v44  ;;  %v8968_v9 = vadd.f32 %v2185_v13, %v10782_v38  ;;  %v1707_v52 = vpop.f32.mrb[69].mxu0  ;;  %v2187_v59 = vpop.f32.mrb[69].mxu1  ;;  %v2529_v47 = vsel %vm2337_vm7, %v8904_v27, %v2433_v26 }
 0x259   :  { %v8907_v19 = vadd.f32 %v1707_v52, %v10786_v35  ;;  %8295 = vmatmul.mubr.msk.f32.vlgmr.msra.gmra.mrb[128].mxu1 %vm2665_vm2, %v2531_v46  ;;  %v2530_v58 = vsel %vm2338_vm8, %v8905_v31, %v2434_v7 }
 0x25a   :  { %v2436_v25 = vmul.f32 0.01, %v8906_v61  ;;  %vm2342_vm9 = vcmp.ge.f32.partialorder %v8968_v9, 0.0  ;;  %v2438_v33 = vmul.f32 0.01, %v8968_v9  ;;  %2831 = vmatprep.mubr.f32.mxu0 %v2530_v58  ;;  %vm2340_vm10 = vcmp.ge.f32.partialorder %v8906_v61, 0.0  ;;  %8861 = vmatpush3.bf16.msra.mxu1 %v8858_v16 }
 0x25b   :  { %v2437_v43 = vmul.f32 0.01, %v8907_v19  ;;  %v1711_v24 = vpop.f32.mrb[70].mxu0  ;;  %v2190_v57 = vpop.f32.mrb[70].mxu1  ;;  %2832 = vmatmul.mubr.f32.gmra.mrb[130].mxu0 %v2529_v47  ;;  %vm2341_vm11 = vcmp.ge.f32.partialorder %v8907_v19, 0.0  ;;  %8863 = vmatprep.subr.bf16.mxu1 %v8862_v42 }
 0x25c   :  { %v8908_v5 = vadd.f32 %v1711_v24, %v10778_v44  ;;  %v8969_v55 = vadd.f32 %v2190_v57, %v10782_v38  ;;  %v1713_v39 = vpop.f32.mrb[71].mxu0  ;;  %v2192_v6 = vpop.f32.mrb[71].mxu1  ;;  %v2534_v63 = vsel %vm2342_vm9, %v8968_v9, %v2438_v33  ;;  %v2532_v2 = vsel %vm2340_vm10, %v8906_v61, %v2436_v25 }
 0x25d   :  { %v8909_v50 = vadd.f32 %v1713_v39, %v10786_v35  ;;  %8297 = vmatprep.mubr.msk.f32.mxu1 %vm2665_vm2, %v2534_v63  ;;  %v2533_v20 = vsel %vm2341_vm11, %v8907_v19, %v2437_v43 }
 0x25e   :  { %v2439_v37 = vmul.f32 0.01, %v8908_v5  ;;  %vm2345_vm12 = vcmp.ge.f32.partialorder %v8969_v55, 0.0  ;;  %v2441_v48 = vmul.f32 0.01, %v8969_v55  ;;  %2836 = vmatprep.mubr.f32.mxu0 %v2533_v20  ;;  %vm2343_vm13 = vcmp.ge.f32.partialorder %v8908_v5, 0.0  ;;  %8865 = vmatpush3.bf16.msra.mxu1 %v8862_v42 }
 0x25f   :  { %v2440_v41 = vmul.f32 0.01, %v8909_v50  ;;  %v1717_v8 = vpop.f32.mrb[72].mxu0  ;;  %v2195_v15 = vpop.f32.mrb[72].mxu1  ;;  %2837 = vmatmul.mubr.f32.gmra.mrb[132].mxu0 %v2532_v2  ;;  %vm2344_vm14 = vcmp.ge.f32.partialorder %v8909_v50, 0.0  ;;  %8867 = vmatprep.subr.bf16.mxu1 %v8866_v28 }
 0x260   :  { %v8910_v23 = vadd.f32 %v1717_v8, %v10778_v44  ;;  %v8970_v21 = vadd.f32 %v2195_v15, %v10782_v38  ;;  %v1719_v1 = vpop.f32.mrb[73].mxu0  ;;  %v2197_v53 = vpop.f32.mrb[73].mxu1  ;;  %v2537_v22 = vsel %vm2345_vm12, %v8969_v55, %v2441_v48  ;;  %v2535_v11 = vsel %vm2343_vm13, %v8908_v5, %v2439_v37 }
 0x261   :  { %v8911_v45 = vadd.f32 %v1719_v1, %v10786_v35  ;;  %8298 = vmatmul.mubr.msk.f32.gmra.mrb[130].mxu1 %vm2665_vm2, %v2537_v22  ;;  %v2536_v51 = vsel %vm2344_vm14, %v8909_v50, %v2440_v41 }
 0x262   :  { %v2442_v27 = vmul.f32 0.01, %v8910_v23  ;;  %vm2348_vm15 = vcmp.ge.f32.partialorder %v8970_v21, 0.0  ;;  %v2444_v14 = vmul.f32 0.01, %v8970_v21  ;;  %2841 = vmatprep.mubr.f32.mxu0 %v2536_v51  ;;  %vm2346_vm0 = vcmp.ge.f32.partialorder %v8910_v23, 0.0  ;;  %8869 = vmatpush3.bf16.msra.mxu1 %v8866_v28 }
 0x263   :  { %v2443_v62 = vmul.f32 0.01, %v8911_v45  ;;  %v1723_v12 = vpop.f32.mrb[74].mxu0  ;;  %v2200_v60 = vpop.f32.mrb[74].mxu1  ;;  %2842 = vmatmul.mubr.f32.gmra.mrb[134].mxu0 %v2535_v11  ;;  %vm2347_vm1 = vcmp.ge.f32.partialorder %v8911_v45, 0.0  ;;  %8871 = vmatprep.subr.bf16.mxu1 %v8870_v0 }
 0x264   :  { %v8912_v56 = vadd.f32 %v1723_v12, %v10778_v44  ;;  %v8971_v17 = vadd.f32 %v2200_v60, %v10782_v38  ;;  %v1725_v49 = vpop.f32.mrb[75].mxu0  ;;  %v2202_v31 = vpop.f32.mrb[75].mxu1  ;;  %v2540_v18 = vsel %vm2348_vm15, %v8970_v21, %v2444_v14  ;;  %v2538_v30 = vsel %vm2346_vm0, %v8910_v23, %v2442_v27 }
 0x265   :  { %v8913_v16 = vadd.f32 %v1725_v49, %v10786_v35  ;;  %8300 = vmatprep.mubr.msk.f32.mxu1 %vm2665_vm2, %v2540_v18  ;;  %v2539_v26 = vsel %vm2347_vm1, %v8911_v45, %v2443_v62 }
 0x266   :  { %v2445_v7 = vmul.f32 0.01, %v8912_v56  ;;  %vm2351_vm3 = vcmp.ge.f32.partialorder %v8971_v17, 0.0  ;;  %v2447_v29 = vmul.f32 0.01, %v8971_v17  ;;  %2846 = vmatprep.mubr.f32.mxu0 %v2539_v26  ;;  %vm2349_vm4 = vcmp.ge.f32.partialorder %v8912_v56, 0.0  ;;  %8873 = vmatpush3.bf16.msra.mxu1 %v8870_v0 }
 0x267   :  { %v2446_v13 = vmul.f32 0.01, %v8913_v16  ;;  %v1729_v42 = vpop.f32.mrb[76].mxu0  ;;  %v2205_v46 = vpop.f32.mrb[76].mxu1  ;;  %2847 = vmatmul.mubr.f32.gmra.mrb[136].mxu0 %v2538_v30  ;;  %vm2350_vm5 = vcmp.ge.f32.partialorder %v8913_v16, 0.0  ;;  %8875 = vmatprep.subr.bf16.mxu1 %v8874_v40 }
 0x268   :  { %v8914_v61 = vadd.f32 %v1729_v42, %v10778_v44  ;;  %v8972_v9 = vadd.f32 %v2205_v46, %v10782_v38  ;;  %v1731_v52 = vpop.f32.mrb[77].mxu0  ;;  %v2207_v59 = vpop.f32.mrb[77].mxu1  ;;  %v2543_v4 = vsel %vm2351_vm3, %v8971_v17, %v2447_v29  ;;  %v2541_v58 = vsel %vm2349_vm4, %v8912_v56, %v2445_v7 }
 0x269   :  { %v8915_v3 = vadd.f32 %v1731_v52, %v10786_v35  ;;  %8301 = vmatmul.mubr.msk.f32.gmra.mrb[132].mxu1 %vm2665_vm2, %v2543_v4  ;;  %v2542_v19 = vsel %vm2350_vm5, %v8913_v16, %v2446_v13 }
 0x26a   :  { %v2448_v47 = vmul.f32 0.01, %v8914_v61  ;;  %vm2354_vm6 = vcmp.ge.f32.partialorder %v8972_v9, 0.0  ;;  %v2450_v25 = vmul.f32 0.01, %v8972_v9  ;;  %2851 = vmatprep.mubr.f32.mxu0 %v2542_v19  ;;  %vm2352_vm7 = vcmp.ge.f32.partialorder %v8914_v61, 0.0  ;;  %8877 = vmatpush3.bf16.msra.mxu1 %v8874_v40 }
 0x26b   :  { %v2449_v33 = vmul.f32 0.01, %v8915_v3  ;;  %v1735_v43 = vpop.f32.mrb[78].mxu0  ;;  %v2210_v24 = vpop.f32.mrb[78].mxu1  ;;  %2852 = vmatmul.mubr.f32.gmra.mrb[138].mxu0 %v2541_v58  ;;  %vm2353_vm8 = vcmp.ge.f32.partialorder %v8915_v3, 0.0 }
 0x26c   :  { %v8916_v57 = vadd.f32 %v1735_v43, %v10778_v44  ;;  %v8973_v28 = vadd.f32 %v2210_v24, %v10782_v38  ;;  %v1737_v5 = vpop.f32.mrb[79].mxu0  ;;  %v2212_v55 = vpop.f32.mrb[79].mxu1  ;;  %v2546_v39 = vsel %vm2354_vm6, %v8972_v9, %v2450_v25  ;;  %v2544_v10 = vsel %vm2352_vm7, %v8914_v61, %v2448_v47 }
 0x26d   :  { %v8917_v6 = vadd.f32 %v1737_v5, %v10786_v35  ;;  %8303 = vmatprep.mubr.msk.f32.mxu1 %vm2665_vm2, %v2546_v39  ;;  %v2545_v63 = vsel %vm2353_vm8, %v8915_v3, %v2449_v33 }
 0x26e   :  { %v2451_v36 = vmul.f32 0.01, %v8916_v57  ;;  %vm2357_vm9 = vcmp.ge.f32.partialorder %v8973_v28, 0.0  ;;  %v2453_v50 = vmul.f32 0.01, %v8973_v28  ;;  %2856 = vmatprep.mubr.f32.mxu0 %v2545_v63  ;;  %vm2355_vm10 = vcmp.ge.f32.partialorder %v8916_v57, 0.0 }
 0x26f   :  { %v2452_v20 = vmul.f32 0.01, %v8917_v6  ;;  %v1741_v2 = vpop.f32.mrb[80].mxu0  ;;  %v2215_v37 = vpop.f32.mrb[80].mxu1  ;;  %2857 = vmatmul.mubr.f32.gmra.mrb[140].mxu0 %v2544_v10  ;;  %vm2356_vm11 = vcmp.ge.f32.partialorder %v8917_v6, 0.0 }
 0x270   :  { %v8918_v48 = vadd.f32 %v1741_v2, %v10778_v44  ;;  %v8974_v41 = vadd.f32 %v2215_v37, %v10782_v38  ;;  %v1743_v8 = vpop.f32.mrb[81].mxu0  ;;  %v2217_v15 = vpop.f32.mrb[81].mxu1  ;;  %v2549_v0 = vsel %vm2357_vm9, %v8973_v28, %v2453_v50  ;;  %v2547_v1 = vsel %vm2355_vm10, %v8916_v57, %v2451_v36 }
 0x271   :  { %v8919_v23 = vadd.f32 %v1743_v8, %v10786_v35  ;;  %8304 = vmatmul.mubr.msk.f32.gmra.mrb[134].mxu1 %vm2665_vm2, %v2549_v0  ;;  %v2548_v21 = vsel %vm2356_vm11, %v8917_v6, %v2452_v20 }
 0x272   :  { %v2454_v53 = vmul.f32 0.01, %v8918_v48  ;;  %vm2360_vm12 = vcmp.ge.f32.partialorder %v8974_v41, 0.0  ;;  %v2456_v22 = vmul.f32 0.01, %v8974_v41  ;;  %2861 = vmatprep.mubr.f32.mxu0 %v2548_v21  ;;  %vm2358_vm13 = vcmp.ge.f32.partialorder %v8918_v48, 0.0 }
 0x273   :  { %v2455_v34 = vmul.f32 0.01, %v8919_v23  ;;  %v1747_v32 = vpop.f32.mrb[82].mxu0  ;;  %v2220_v45 = vpop.f32.mrb[82].mxu1  ;;  %2862 = vmatmul.mubr.f32.gmra.mrb[142].mxu0 %v2547_v1  ;;  %vm2359_vm14 = vcmp.ge.f32.partialorder %v8919_v23, 0.0 }
 0x274   :  { %v8920_v51 = vadd.f32 %v1747_v32, %v10778_v44  ;;  %v8975_v11 = vadd.f32 %v2220_v45, %v10782_v38  ;;  %v1749_v27 = vpop.f32.mrb[83].mxu0  ;;  %v2222_v14 = vpop.f32.mrb[83].mxu1  ;;  %v2552_v62 = vsel %vm2360_vm12, %v8974_v41, %v2456_v22  ;;  %v2550_v40 = vsel %vm2358_vm13, %v8918_v48, %v2454_v53 }
 0x275   :  { %v8921_v12 = vadd.f32 %v1749_v27, %v10786_v35  ;;  %8306 = vmatprep.mubr.msk.f32.mxu1 %vm2665_vm2, %v2552_v62  ;;  %v2551_v60 = vsel %vm2359_vm14, %v8919_v23, %v2455_v34 }
 0x276   :  { %v2457_v56 = vmul.f32 0.01, %v8920_v51  ;;  %vm2363_vm15 = vcmp.ge.f32.partialorder %v8975_v11, 0.0  ;;  %v2459_v17 = vmul.f32 0.01, %v8975_v11  ;;  %2866 = vmatprep.mubr.f32.mxu0 %v2551_v60  ;;  %vm2361_vm0 = vcmp.ge.f32.partialorder %v8920_v51, 0.0 }
 0x277   :  { %v2458_v49 = vmul.f32 0.01, %v8921_v12  ;;  %v1753_v31 = vpop.f32.mrb[84].mxu0  ;;  %v2225_v18 = vpop.f32.mrb[84].mxu1  ;;  %2867 = vmatmul.mubr.f32.gmra.mrb[144].mxu0 %v2550_v40  ;;  %vm2362_vm1 = vcmp.ge.f32.partialorder %v8921_v12, 0.0 }
 0x278   :  { %v8922_v16 = vadd.f32 %v1753_v31, %v10778_v44  ;;  %v8976_v26 = vadd.f32 %v2225_v18, %v10782_v38  ;;  %v1755_v30 = vpop.f32.mrb[85].mxu0  ;;  %v2227_v7 = vpop.f32.mrb[85].mxu1  ;;  %v2555_v29 = vsel %vm2363_vm15, %v8975_v11, %v2459_v17  ;;  %v2553_v46 = vsel %vm2361_vm0, %v8920_v51, %v2457_v56 }
 0x279   :  { %v8923_v13 = vadd.f32 %v1755_v30, %v10786_v35  ;;  %8307 = vmatmul.mubr.msk.f32.gmra.mrb[136].mxu1 %vm2665_vm2, %v2555_v29  ;;  %v2554_v42 = vsel %vm2362_vm1, %v8921_v12, %v2458_v49 }
 0x27a   :  { %v2460_v61 = vmul.f32 0.01, %v8922_v16  ;;  %vm2366_vm3 = vcmp.ge.f32.partialorder %v8976_v26, 0.0  ;;  %v2462_v9 = vmul.f32 0.01, %v8976_v26  ;;  %2871 = vmatprep.mubr.f32.mxu0 %v2554_v42  ;;  %vm2364_vm4 = vcmp.ge.f32.partialorder %v8922_v16, 0.0 }
 0x27b   :  { %v2461_v52 = vmul.f32 0.01, %v8923_v13  ;;  %v1759_v59 = vpop.f32.mrb[86].mxu0  ;;  %v2230_v4 = vpop.f32.mrb[86].mxu1  ;;  %2872 = vmatmul.mubr.f32.gmra.mrb[146].mxu0 %v2553_v46  ;;  %vm2365_vm5 = vcmp.ge.f32.partialorder %v8923_v13, 0.0 }
 0x27c   :  { %v8924_v3 = vadd.f32 %v1759_v59, %v10778_v44  ;;  %v8977_v19 = vadd.f32 %v2230_v4, %v10782_v38  ;;  %v1761_v58 = vpop.f32.mrb[87].mxu0  ;;  %v2232_v47 = vpop.f32.mrb[87].mxu1  ;;  %v2558_v25 = vsel %vm2366_vm3, %v8976_v26, %v2462_v9  ;;  %v2556_v24 = vsel %vm2364_vm4, %v8922_v16, %v2460_v61 }
 0x27d   :  { %v8925_v33 = vadd.f32 %v1761_v58, %v10786_v35  ;;  %8309 = vmatprep.mubr.msk.f32.mxu1 %vm2665_vm2, %v2558_v25  ;;  %v2557_v43 = vsel %vm2365_vm5, %v8923_v13, %v2461_v52 }
 0x27e   :  { %v2463_v57 = vmul.f32 0.01, %v8924_v3  ;;  %vm2369_vm6 = vcmp.ge.f32.partialorder %v8977_v19, 0.0  ;;  %v2465_v28 = vmul.f32 0.01, %v8977_v19  ;;  %2876 = vmatprep.mubr.f32.mxu0 %v2557_v43  ;;  %vm2367_vm7 = vcmp.ge.f32.partialorder %v8924_v3, 0.0 }
 0x27f   :  { %v2464_v5 = vmul.f32 0.01, %v8925_v33  ;;  %v1765_v55 = vpop.f32.mrb[88].mxu0  ;;  %v2235_v39 = vpop.f32.mrb[88].mxu1  ;;  %2877 = vmatmul.mubr.f32.gmra.mrb[148].mxu0 %v2556_v24  ;;  %vm2368_vm8 = vcmp.ge.f32.partialorder %v8925_v33, 0.0 }
 0x280   :  { %v8926_v6 = vadd.f32 %v1765_v55, %v10778_v44  ;;  %v8978_v63 = vadd.f32 %v2235_v39, %v10782_v38  ;;  %v1767_v10 = vpop.f32.mrb[89].mxu0  ;;  %v2237_v36 = vpop.f32.mrb[89].mxu1  ;;  %v2561_v50 = vsel %vm2369_vm6, %v8977_v19, %v2465_v28  ;;  %v2559_v37 = vsel %vm2367_vm7, %v8924_v3, %v2463_v57 }
 0x281   :  { %v8927_v20 = vadd.f32 %v1767_v10, %v10786_v35  ;;  %8310 = vmatmul.mubr.msk.f32.gmra.mrb[138].mxu1 %vm2665_vm2, %v2561_v50  ;;  %v2560_v2 = vsel %vm2368_vm8, %v8925_v33, %v2464_v5 }
 0x282   :  { %v2466_v48 = vmul.f32 0.01, %v8926_v6  ;;  %vm2372_vm9 = vcmp.ge.f32.partialorder %v8978_v63, 0.0  ;;  %v2468_v41 = vmul.f32 0.01, %v8978_v63  ;;  %2881 = vmatprep.mubr.f32.mxu0 %v2560_v2  ;;  %vm2370_vm10 = vcmp.ge.f32.partialorder %v8926_v6, 0.0 }
 0x283   :  { %v2467_v8 = vmul.f32 0.01, %v8927_v20  ;;  %v1771_v15 = vpop.f32.mrb[90].mxu0  ;;  %v2240_v0 = vpop.f32.mrb[90].mxu1  ;;  %2882 = vmatmul.mubr.f32.gmra.mrb[150].mxu0 %v2559_v37  ;;  %vm2371_vm11 = vcmp.ge.f32.partialorder %v8927_v20, 0.0 }
 0x284   :  { %v8928_v23 = vadd.f32 %v1771_v15, %v10778_v44  ;;  %v8979_v21 = vadd.f32 %v2240_v0, %v10782_v38  ;;  %v1773_v1 = vpop.f32.mrb[91].mxu0  ;;  %v2242_v53 = vpop.f32.mrb[91].mxu1  ;;  %v2564_v22 = vsel %vm2372_vm9, %v8978_v63, %v2468_v41  ;;  %v2562_v45 = vsel %vm2370_vm10, %v8926_v6, %v2466_v48 }
 0x285   :  { %v8929_v34 = vadd.f32 %v1773_v1, %v10786_v35  ;;  %8312 = vmatprep.mubr.msk.f32.mxu1 %vm2665_vm2, %v2564_v22  ;;  %v2563_v32 = vsel %vm2371_vm11, %v8927_v20, %v2467_v8 }
 0x286   :  { %v2469_v51 = vmul.f32 0.01, %v8928_v23  ;;  %vm2375_vm12 = vcmp.ge.f32.partialorder %v8979_v21, 0.0  ;;  %v2471_v11 = vmul.f32 0.01, %v8979_v21  ;;  %2886 = vmatprep.mubr.f32.mxu0 %v2563_v32  ;;  %vm2373_vm13 = vcmp.ge.f32.partialorder %v8928_v23, 0.0 }
 0x287   :  { %v2470_v27 = vmul.f32 0.01, %v8929_v34  ;;  %v1777_v14 = vpop.f32.mrb[92].mxu0  ;;  %v2245_v62 = vpop.f32.mrb[92].mxu1  ;;  %2887 = vmatmul.mubr.f32.gmra.mrb[152].mxu0 %v2562_v45  ;;  %vm2374_vm14 = vcmp.ge.f32.partialorder %v8929_v34, 0.0 }
 0x288   :  { %v8930_v12 = vadd.f32 %v1777_v14, %v10778_v44  ;;  %v8980_v60 = vadd.f32 %v2245_v62, %v10782_v38  ;;  %v1779_v40 = vpop.f32.mrb[93].mxu0  ;;  %v2247_v56 = vpop.f32.mrb[93].mxu1  ;;  %v2567_v17 = vsel %vm2375_vm12, %v8979_v21, %v2471_v11  ;;  %v2565_v18 = vsel %vm2373_vm13, %v8928_v23, %v2469_v51 }
 0x289   :  { %v8931_v49 = vadd.f32 %v1779_v40, %v10786_v35  ;;  %8313 = vmatmul.mubr.msk.f32.gmra.mrb[140].mxu1 %vm2665_vm2, %v2567_v17  ;;  %v2566_v31 = vsel %vm2374_vm14, %v8929_v34, %v2470_v27 }
 0x28a   :  { %v2472_v16 = vmul.f32 0.01, %v8930_v12  ;;  %vm2378_vm15 = vcmp.ge.f32.partialorder %v8980_v60, 0.0  ;;  %v2474_v26 = vmul.f32 0.01, %v8980_v60  ;;  %2891 = vmatprep.mubr.f32.mxu0 %v2566_v31  ;;  %vm2376_vm0 = vcmp.ge.f32.partialorder %v8930_v12, 0.0 }
 0x28b   :  { %v2473_v30 = vmul.f32 0.01, %v8931_v49  ;;  %v1783_v7 = vpop.f32.mrb[94].mxu0  ;;  %v2250_v29 = vpop.f32.mrb[94].mxu1  ;;  %2892 = vmatmul.mubr.f32.gmra.mrb[154].mxu0 %v2565_v18  ;;  %vm2377_vm1 = vcmp.ge.f32.partialorder %v8931_v49, 0.0 }
 0x28c   :  { %v8932_v13 = vadd.f32 %v1783_v7, %v10778_v44  ;;  %v8981_v42 = vadd.f32 %v2250_v29, %v10782_v38  ;;  %v1785_v46 = vpop.f32.mrb[95].mxu0  ;;  %v2252_v61 = vpop.f32.mrb[95].mxu1  ;;  %v2570_v9 = vsel %vm2378_vm15, %v8980_v60, %v2474_v26  ;;  %v2568_v4 = vsel %vm2376_vm0, %v8930_v12, %v2472_v16 }
 0x28d   :  { %v8933_v52 = vadd.f32 %v1785_v46, %v10786_v35  ;;  %8315 = vmatprep.mubr.msk.f32.mxu1 %vm2665_vm2, %v2570_v9  ;;  %v2569_v59 = vsel %vm2377_vm1, %v8931_v49, %v2473_v30 }
 0x28e   :  { %v2475_v3 = vmul.f32 0.01, %v8932_v13  ;;  %vm2381_vm3 = vcmp.ge.f32.partialorder %v8981_v42, 0.0  ;;  %v2477_v19 = vmul.f32 0.01, %v8981_v42  ;;  %2896 = vmatprep.mubr.f32.mxu0 %v2569_v59  ;;  %vm2379_vm4 = vcmp.ge.f32.partialorder %v8932_v13, 0.0 }
 0x28f   :  { %v2476_v58 = vmul.f32 0.01, %v8933_v52  ;;  %v1789_v47 = vpop.f32.mrb[96].mxu0  ;;  %v2255_v25 = vpop.f32.mrb[96].mxu1  ;;  %2897 = vmatmul.mubr.f32.gmra.mrb[156].mxu0 %v2568_v4  ;;  %vm2380_vm5 = vcmp.ge.f32.partialorder %v8933_v52, 0.0 }
 0x290   :  { %v8934_v33 = vadd.f32 %v1789_v47, %v10778_v44  ;;  %v8982_v43 = vadd.f32 %v2255_v25, %v10782_v38  ;;  %v1791_v24 = vpop.f32.mrb[97].mxu0  ;;  %v2257_v57 = vpop.f32.mrb[97].mxu1  ;;  %v2573_v28 = vsel %vm2381_vm3, %v8981_v42, %v2477_v19  ;;  %v2571_v39 = vsel %vm2379_vm4, %v8932_v13, %v2475_v3 }
 0x291   :  { %v8935_v5 = vadd.f32 %v1791_v24, %v10786_v35  ;;  %8316 = vmatmul.mubr.msk.f32.gmra.mrb[142].mxu1 %vm2665_vm2, %v2573_v28  ;;  %v2572_v55 = vsel %vm2380_vm5, %v8933_v52, %v2476_v58 }
 0x292   :  { %v2478_v6 = vmul.f32 0.01, %v8934_v33  ;;  %vm2384_vm6 = vcmp.ge.f32.partialorder %v8982_v43, 0.0  ;;  %v2480_v63 = vmul.f32 0.01, %v8982_v43  ;;  %2901 = vmatprep.mubr.f32.mxu0 %v2572_v55  ;;  %vm2382_vm7 = vcmp.ge.f32.partialorder %v8934_v33, 0.0 }
 0x293   :  { %v2479_v10 = vmul.f32 0.01, %v8935_v5  ;;  %v1795_v36 = vpop.f32.mrb[98].mxu0  ;;  %v2260_v50 = vpop.f32.mrb[98].mxu1  ;;  %2902 = vmatmul.mubr.f32.gmra.mrb[158].mxu0 %v2571_v39  ;;  %vm2383_vm8 = vcmp.ge.f32.partialorder %v8935_v5, 0.0 }
 0x294   :  { %v8936_v20 = vadd.f32 %v1795_v36, %v10778_v44  ;;  %v8983_v2 = vadd.f32 %v2260_v50, %v10782_v38  ;;  %v1797_v37 = vpop.f32.mrb[99].mxu0  ;;  %v2262_v48 = vpop.f32.mrb[99].mxu1  ;;  %v2576_v41 = vsel %vm2384_vm6, %v8982_v43, %v2480_v63  ;;  %v2574_v0 = vsel %vm2382_vm7, %v8934_v33, %v2478_v6 }
 0x295   :  { %v8937_v8 = vadd.f32 %v1797_v37, %v10786_v35  ;;  %8318 = vmatprep.mubr.msk.f32.mxu1 %vm2665_vm2, %v2576_v41  ;;  %v2575_v15 = vsel %vm2383_vm8, %v8935_v5, %v2479_v10 }
 0x296   :  { %v2481_v23 = vmul.f32 0.01, %v8936_v20  ;;  %vm2387_vm9 = vcmp.ge.f32.partialorder %v8983_v2, 0.0  ;;  %v2483_v21 = vmul.f32 0.01, %v8983_v2  ;;  %2906 = vmatprep.mubr.f32.mxu0 %v2575_v15  ;;  %vm2385_vm10 = vcmp.ge.f32.partialorder %v8936_v20, 0.0 }
 0x297   :  { %v2482_v1 = vmul.f32 0.01, %v8937_v8  ;;  %v1801_v53 = vpop.f32.mrb[100].mxu0  ;;  %v2265_v22 = vpop.f32.mrb[100].mxu1  ;;  %2907 = vmatmul.mubr.f32.gmra.mrb[160].mxu0 %v2574_v0  ;;  %vm2386_vm11 = vcmp.ge.f32.partialorder %v8937_v8, 0.0 }
 0x298   :  { %v8938_v34 = vadd.f32 %v1801_v53, %v10778_v44  ;;  %v8984_v32 = vadd.f32 %v2265_v22, %v10782_v38  ;;  %v1803_v45 = vpop.f32.mrb[101].mxu0  ;;  %v2267_v51 = vpop.f32.mrb[101].mxu1  ;;  %v2579_v11 = vsel %vm2387_vm9, %v8983_v2, %v2483_v21  ;;  %v2577_v62 = vsel %vm2385_vm10, %v8936_v20, %v2481_v23  ;;  %v3319_v53 = vld [vmem:[%s12141_s7 + $0x58] sm:$0xff] }
 0x299   :  { %v8939_v27 = vadd.f32 %v1803_v45, %v10786_v35  ;;  %8319 = vmatmul.mubr.msk.f32.gmra.mrb[144].mxu1 %vm2665_vm2, %v2579_v11  ;;  %v2578_v14 = vsel %vm2386_vm11, %v8937_v8, %v2482_v1  ;;  %v3318_v8 = vld [vmem:[%s12141_s7 + $0x50] sm:$0xff] }
 0x29a   :  { %v2484_v12 = vmul.f32 0.01, %v8938_v34  ;;  %vm2390_vm12 = vcmp.ge.f32.partialorder %v8984_v32, 0.0  ;;  %v2486_v60 = vmul.f32 0.01, %v8984_v32  ;;  %2911 = vmatprep.mubr.f32.mxu0 %v2578_v14  ;;  %vm2388_vm13 = vcmp.ge.f32.partialorder %v8938_v34, 0.0 }
 0x29b   :  { %v2485_v40 = vmul.f32 0.01, %v8939_v27  ;;  %v1807_v56 = vpop.f32.mrb[102].mxu0  ;;  %v2270_v17 = vpop.f32.mrb[102].mxu1  ;;  %2912 = vmatmul.mubr.f32.gmra.mrb[162].mxu0 %v2577_v62  ;;  %vm2389_vm14 = vcmp.ge.f32.partialorder %v8939_v27, 0.0  ;;  %v8878_v45 = vpack.c.bf16 %v3319_v53, %v3318_v8 }
 0x29c   :  { %v8940_v49 = vadd.f32 %v1807_v56, %v10778_v44  ;;  %v8985_v31 = vadd.f32 %v2270_v17, %v10782_v38  ;;  %v1809_v18 = vpop.f32.mrb[103].mxu0  ;;  %v2272_v16 = vpop.f32.mrb[103].mxu1  ;;  %v2582_v26 = vsel %vm2390_vm12, %v8984_v32, %v2486_v60  ;;  %v2580_v29 = vsel %vm2388_vm13, %v8938_v34, %v2484_v12  ;;  %v3320_v12 = vld [vmem:[%s12141_s7 + $0x60] sm:$0xff] }
 0x29d   :  { %v8941_v30 = vadd.f32 %v1809_v18, %v10786_v35  ;;  %8321 = vmatprep.mubr.msk.f32.mxu1 %vm2665_vm2, %v2582_v26  ;;  %v2581_v7 = vsel %vm2389_vm14, %v8939_v27, %v2485_v40  ;;  %8879 = vmatprep.subr.bf16.mxu1 %v8878_v45 }
 0x29e   :  { %v2487_v13 = vmul.f32 0.01, %v8940_v49  ;;  %vm2393_vm15 = vcmp.ge.f32.partialorder %v8985_v31, 0.0  ;;  %v2489_v42 = vmul.f32 0.01, %v8985_v31  ;;  %2916 = vmatprep.mubr.f32.mxu0 %v2581_v7  ;;  %vm2391_vm0 = vcmp.ge.f32.partialorder %v8940_v49, 0.0  ;;  %8881 = vmatpush3.bf16.msra.mxu1 %v8878_v45 }
 0x29f   :  { %v2488_v46 = vmul.f32 0.01, %v8941_v30  ;;  %v1813_v61 = vpop.f32.mrb[104].mxu0  ;;  %v2275_v9 = vpop.f32.mrb[104].mxu1  ;;  %2917 = vmatmul.mubr.f32.gmra.mrb[164].mxu0 %v2580_v29  ;;  %vm2392_vm1 = vcmp.ge.f32.partialorder %v8941_v30, 0.0 }
 0x2a0   :  { %v8942_v52 = vadd.f32 %v1813_v61, %v10778_v44  ;;  %v8986_v59 = vadd.f32 %v2275_v9, %v10782_v38  ;;  %v1815_v4 = vpop.f32.mrb[105].mxu0  ;;  %v2277_v3 = vpop.f32.mrb[105].mxu1  ;;  %v2585_v19 = vsel %vm2393_vm15, %v8985_v31, %v2489_v42  ;;  %v2583_v25 = vsel %vm2391_vm0, %v8940_v49, %v2487_v13  ;;  %v3321_v31 = vld [vmem:[%s12141_s7 + $0x68] sm:$0xff]  ;;  %v3322_v61 = vld [vmem:[%s12141_s7 + $0x70] sm:$0xff] }
 0x2a1   :  { %v8943_v58 = vadd.f32 %v1815_v4, %v10786_v35  ;;  %8322 = vmatmul.mubr.msk.f32.gmra.mrb[146].mxu1 %vm2665_vm2, %v2585_v19  ;;  %v2584_v47 = vsel %vm2392_vm1, %v8941_v30, %v2488_v46  ;;  %v8882_v30 = vpack.c.bf16 %v3321_v31, %v3320_v12  ;;  %v3323_v19 = vld [vmem:[%s12141_s7 + $0x78] sm:$0xff] }
 0x2a2   :  { %v2490_v33 = vmul.f32 0.01, %v8942_v52  ;;  %vm2396_vm3 = vcmp.ge.f32.partialorder %v8986_v59, 0.0  ;;  %v2492_v43 = vmul.f32 0.01, %v8986_v59  ;;  %2921 = vmatprep.mubr.f32.mxu0 %v2584_v47  ;;  %vm2394_vm4 = vcmp.ge.f32.partialorder %v8942_v52, 0.0 }
 0x2a3   :  { %v2491_v24 = vmul.f32 0.01, %v8943_v58  ;;  %v1819_v57 = vpop.f32.mrb[106].mxu0  ;;  %v2280_v28 = vpop.f32.mrb[106].mxu1  ;;  %2922 = vmatmul.mubr.f32.gmra.mrb[166].mxu0 %v2583_v25  ;;  %vm2395_vm5 = vcmp.ge.f32.partialorder %v8943_v58, 0.0  ;;  %8883 = vmatprep.subr.bf16.mxu1 %v8882_v30  ;;  %v8886_v25 = vpack.c.bf16 %v3323_v19, %v3322_v61 }
 0x2a4   :  { %v8944_v5 = vadd.f32 %v1819_v57, %v10778_v44  ;;  %v8987_v55 = vadd.f32 %v2280_v28, %v10782_v38  ;;  %v1821_v39 = vpop.f32.mrb[107].mxu0  ;;  %v2282_v6 = vpop.f32.mrb[107].mxu1  ;;  %v2588_v63 = vsel %vm2396_vm3, %v8986_v59, %v2492_v43  ;;  %v2586_v50 = vsel %vm2394_vm4, %v8942_v52, %v2490_v33  ;;  %8885 = vmatpush3.bf16.msra.mxu1 %v8882_v30 }
 0x2a5   :  { %v8945_v10 = vadd.f32 %v1821_v39, %v10786_v35  ;;  %8324 = vmatprep.mubr.msk.f32.mxu1 %vm2665_vm2, %v2588_v63  ;;  %v2587_v36 = vsel %vm2395_vm5, %v8943_v58, %v2491_v24  ;;  %8887 = vmatprep.subr.bf16.mxu1 %v8886_v25 }
 0x2a6   :  { %v2493_v20 = vmul.f32 0.01, %v8944_v5  ;;  %vm2399_vm6 = vcmp.ge.f32.partialorder %v8987_v55, 0.0  ;;  %v2495_v2 = vmul.f32 0.01, %v8987_v55  ;;  %2926 = vmatprep.mubr.f32.mxu0 %v2587_v36  ;;  %vm2397_vm7 = vcmp.ge.f32.partialorder %v8944_v5, 0.0 }
 0x2a7   :  { %v2494_v37 = vmul.f32 0.01, %v8945_v10  ;;  %v1825_v48 = vpop.f32.mrb[108].mxu0  ;;  %v2285_v41 = vpop.f32.mrb[108].mxu1  ;;  %2927 = vmatmul.mubr.f32.gmra.mrb[168].mxu0 %v2586_v50  ;;  %vm2398_vm8 = vcmp.ge.f32.partialorder %v8945_v10, 0.0 }
 0x2a8   :  { %v8946_v15 = vadd.f32 %v1825_v48, %v10778_v44  ;;  %v8988_v0 = vadd.f32 %v2285_v41, %v10782_v38  ;;  %v1827_v23 = vpop.f32.mrb[109].mxu0  ;;  %v2287_v21 = vpop.f32.mrb[109].mxu1  ;;  %v2591_v1 = vsel %vm2399_vm6, %v8987_v55, %v2495_v2  ;;  %v2589_v32 = vsel %vm2397_vm7, %v8944_v5, %v2493_v20  ;;  %8889 = vmatpush3.bf16.msra.mxu1 %v8886_v25 }
 0x2a9   :  { %v8947_v22 = vadd.f32 %v1827_v23, %v10786_v35  ;;  %8325 = vmatmul.mubr.msk.f32.gmra.mrb[148].mxu1 %vm2665_vm2, %v2591_v1  ;;  %v2590_v34 = vsel %vm2398_vm8, %v8945_v10, %v2494_v37 }
 0x2aa   :  { %v2496_v51 = vmul.f32 0.01, %v8946_v15  ;;  %vm2402_vm9 = vcmp.ge.f32.partialorder %v8988_v0, 0.0  ;;  %v2498_v11 = vmul.f32 0.01, %v8988_v0  ;;  %2931 = vmatprep.mubr.f32.mxu0 %v2590_v34  ;;  %vm2400_vm10 = vcmp.ge.f32.partialorder %v8946_v15, 0.0 }
 0x2ab   :  { %v2497_v27 = vmul.f32 0.01, %v8947_v22  ;;  %v1831_v14 = vpop.f32.mrb[110].mxu0  ;;  %v2290_v62 = vpop.f32.mrb[110].mxu1  ;;  %2932 = vmatmul.mubr.f32.gmra.mrb[170].mxu0 %v2589_v32  ;;  %vm2401_vm11 = vcmp.ge.f32.partialorder %v8947_v22, 0.0 }
 0x2ac   :  { %v8948_v60 = vadd.f32 %v1831_v14, %v10778_v44  ;;  %v8989_v40 = vadd.f32 %v2290_v62, %v10782_v38  ;;  %v1833_v56 = vpop.f32.mrb[111].mxu0  ;;  %v2292_v17 = vpop.f32.mrb[111].mxu1  ;;  %v2594_v49 = vsel %vm2402_vm9, %v8988_v0, %v2498_v11  ;;  %v2592_v26 = vsel %vm2400_vm10, %v8946_v15, %v2496_v51 }
 0x2ad   :  { %v8949_v18 = vadd.f32 %v1833_v56, %v10786_v35  ;;  %8327 = vmatprep.mubr.msk.f32.mxu1 %vm2665_vm2, %v2594_v49  ;;  %v2593_v16 = vsel %vm2401_vm11, %v8947_v22, %v2497_v27 }
 0x2ae   :  { %v2499_v7 = vmul.f32 0.01, %v8948_v60  ;;  %vm2405_vm12 = vcmp.ge.f32.partialorder %v8989_v40, 0.0  ;;  %v2501_v29 = vmul.f32 0.01, %v8989_v40  ;;  %2936 = vmatprep.mubr.f32.mxu0 %v2593_v16  ;;  %vm2403_vm13 = vcmp.ge.f32.partialorder %v8948_v60, 0.0 }
 0x2af   :  { %v2500_v13 = vmul.f32 0.01, %v8949_v18  ;;  %v1837_v42 = vpop.f32.mrb[112].mxu0  ;;  %v2295_v46 = vpop.f32.mrb[112].mxu1  ;;  %2937 = vmatmul.mubr.f32.gmra.mrb[172].mxu0 %v2592_v26  ;;  %vm2404_vm14 = vcmp.ge.f32.partialorder %v8949_v18, 0.0 }
 0x2b0   :  { %v8950_v9 = vadd.f32 %v1837_v42, %v10778_v44  ;;  %v8990_v52 = vadd.f32 %v2295_v46, %v10782_v38  ;;  %v1839_v59 = vpop.f32.mrb[113].mxu0  ;;  %v2297_v4 = vpop.f32.mrb[113].mxu1  ;;  %v2597_v3 = vsel %vm2405_vm12, %v8989_v40, %v2501_v29  ;;  %v2595_v24 = vsel %vm2403_vm13, %v8948_v60, %v2499_v7 }
 0x2b1   :  { %v8951_v58 = vadd.f32 %v1839_v59, %v10786_v35  ;;  %8328 = vmatmul.mubr.msk.f32.gmra.mrb[150].mxu1 %vm2665_vm2, %v2597_v3  ;;  %v2596_v47 = vsel %vm2404_vm14, %v8949_v18, %v2500_v13 }
 0x2b2   :  { %v2502_v33 = vmul.f32 0.01, %v8950_v9  ;;  %vm2408_vm15 = vcmp.ge.f32.partialorder %v8990_v52, 0.0  ;;  %v2504_v43 = vmul.f32 0.01, %v8990_v52  ;;  %2941 = vmatprep.mubr.f32.mxu0 %v2596_v47  ;;  %vm2406_vm1 = vcmp.ge.f32.partialorder %v8950_v9, 0.0 }
 0x2b3   :  { %v2503_v57 = vmul.f32 0.01, %v8951_v58  ;;  %v1843_v28 = vpop.f32.mrb[114].mxu0  ;;  %v2300_v5 = vpop.f32.mrb[114].mxu1  ;;  %2942 = vmatmul.mubr.f32.gmra.mrb[174].mxu0 %v2595_v24  ;;  %vm2407_vm0 = vcmp.ge.f32.partialorder %v8951_v58, 0.0 }
 0x2b4   :  { %v8952_v55 = vadd.f32 %v1843_v28, %v10778_v44  ;;  %v8991_v39 = vadd.f32 %v2300_v5, %v10782_v38  ;;  %v1845_v6 = vpop.f32.mrb[115].mxu0  ;;  %v2302_v63 = vpop.f32.mrb[115].mxu1  ;;  %v2600_v10 = vsel %vm2408_vm15, %v8990_v52, %v2504_v43  ;;  %v2598_v37 = vsel %vm2406_vm1, %v8950_v9, %v2502_v33 }
 0x2b5   :  { %v8953_v36 = vadd.f32 %v1845_v6, %v10786_v35  ;;  %8330 = vmatprep.mubr.msk.f32.mxu1 %vm2665_vm2, %v2600_v10  ;;  %v2599_v50 = vsel %vm2407_vm0, %v8951_v58, %v2503_v57 }
 0x2b6   :  { %v2505_v20 = vmul.f32 0.01, %v8952_v55  ;;  %vm2411_vm3 = vcmp.ge.f32.partialorder %v8991_v39, 0.0  ;;  %v2507_v2 = vmul.f32 0.01, %v8991_v39  ;;  %2946 = vmatprep.mubr.f32.mxu0 %v2599_v50  ;;  %vm2409_vm5 = vcmp.ge.f32.partialorder %v8952_v55, 0.0 }
 0x2b7   :  { %v2506_v48 = vmul.f32 0.01, %v8953_v36  ;;  %v1849_v41 = vpop.f32.mrb[116].mxu0  ;;  %v2305_v8 = vpop.f32.mrb[116].mxu1  ;;  %2947 = vmatmul.mubr.f32.gmra.mrb[176].mxu0 %v2598_v37  ;;  %vm2410_vm4 = vcmp.ge.f32.partialorder %v8953_v36, 0.0 }
 0x2b8   :  { %v8954_v15 = vadd.f32 %v1849_v41, %v10778_v44  ;;  %v8992_v0 = vadd.f32 %v2305_v8, %v10782_v38  ;;  %v1851_v23 = vpop.f32.mrb[117].mxu0  ;;  %v2307_v21 = vpop.f32.mrb[117].mxu1  ;;  %v2603_v1 = vsel %vm2411_vm3, %v8991_v39, %v2507_v2  ;;  %v2601_v45 = vsel %vm2409_vm5, %v8952_v55, %v2505_v20 }
 0x2b9   :  { %v8955_v53 = vadd.f32 %v1851_v23, %v10786_v35  ;;  %8331 = vmatmul.mubr.msk.f32.gmra.mrb[152].mxu1 %vm2665_vm2, %v2603_v1  ;;  %v2602_v22 = vsel %vm2410_vm4, %v8953_v36, %v2506_v48 }
 0x2ba   :  { %v2508_v34 = vmul.f32 0.01, %v8954_v15  ;;  %vm2414_vm6 = vcmp.ge.f32.partialorder %v8992_v0, 0.0  ;;  %v2510_v32 = vmul.f32 0.01, %v8992_v0  ;;  %2951 = vmatprep.mubr.f32.mxu0 %v2602_v22  ;;  %vm2412_vm8 = vcmp.ge.f32.partialorder %v8954_v15, 0.0 }
 0x2bb   :  { %v2509_v51 = vmul.f32 0.01, %v8955_v53  ;;  %v1855_v11 = vpop.f32.mrb[118].mxu0  ;;  %v2310_v27 = vpop.f32.mrb[118].mxu1  ;;  %2952 = vmatmul.mubr.f32.gmra.mrb[178].mxu0 %v2601_v45  ;;  %vm2413_vm7 = vcmp.ge.f32.partialorder %v8955_v53, 0.0 }
 0x2bc   :  { %v8956_v14 = vadd.f32 %v1855_v11, %v10778_v44  ;;  %v8993_v62 = vadd.f32 %v2310_v27, %v10782_v38  ;;  %v1857_v12 = vpop.f32.mrb[119].mxu0  ;;  %v2312_v60 = vpop.f32.mrb[119].mxu1  ;;  %v2606_v40 = vsel %vm2414_vm6, %v8992_v0, %v2510_v32  ;;  %v2604_v18 = vsel %vm2412_vm8, %v8954_v15, %v2508_v34 }
 0x2bd   :  { %v8957_v56 = vadd.f32 %v1857_v12, %v10786_v35  ;;  %8333 = vmatprep.mubr.msk.f32.mxu1 %vm2665_vm2, %v2606_v40  ;;  %v2605_v17 = vsel %vm2413_vm7, %v8955_v53, %v2509_v51 }
 0x2be   :  { %v2511_v49 = vmul.f32 0.01, %v8956_v14  ;;  %vm2417_vm9 = vcmp.ge.f32.partialorder %v8993_v62, 0.0  ;;  %v2513_v31 = vmul.f32 0.01, %v8993_v62  ;;  %2956 = vmatprep.mubr.f32.mxu0 %v2605_v17  ;;  %vm2415_vm11 = vcmp.ge.f32.partialorder %v8956_v14, 0.0 }
 0x2bf   :  { %v2512_v16 = vmul.f32 0.01, %v8957_v56  ;;  %v1861_v26 = vpop.f32.mrb[120].mxu0  ;;  %v2315_v30 = vpop.f32.mrb[120].mxu1  ;;  %2957 = vmatmul.mubr.f32.gmra.mrb[180].mxu0 %v2604_v18  ;;  %vm2416_vm10 = vcmp.ge.f32.partialorder %v8957_v56, 0.0 }
 0x2c0   :  { %v8958_v7 = vadd.f32 %v1861_v26, %v10778_v44  ;;  %v8994_v29 = vadd.f32 %v2315_v30, %v10782_v38  ;;  %v1863_v13 = vpop.f32.mrb[121].mxu0  ;;  %v2317_v42 = vpop.f32.mrb[121].mxu1  ;;  %v2609_v46 = vsel %vm2417_vm9, %v8993_v62, %v2513_v31  ;;  %v2607_v4 = vsel %vm2415_vm11, %v8956_v14, %v2511_v49  ;;  %v3652_v26 = vld [vmem:[%s12143_s9] sm:$0xff]  ;;  %v3653_v30 = vld [vmem:[%s12143_s9 + $0x8] sm:$0xff] }
 0x2c1   :  { %v8959_v61 = vadd.f32 %v1863_v13, %v10786_v35  ;;  %8334 = vmatmul.mubr.msk.f32.gmra.mrb[154].mxu1 %vm2665_vm2, %v2609_v46  ;;  %v2608_v9 = vsel %vm2416_vm10, %v8957_v56, %v2512_v16  ;;  %v8890_v13 = vpack.c.bf16 %v3653_v30, %v3652_v26 }
 0x2c2   :  { %v2514_v52 = vmul.f32 0.01, %v8958_v7  ;;  %vm2420_vm12 = vcmp.ge.f32.partialorder %v8994_v29, 0.0  ;;  %v2516_v59 = vmul.f32 0.01, %v8994_v29  ;;  %2961 = vmatprep.mubr.f32.mxu0 %v2608_v9  ;;  %vm2418_vm14 = vcmp.ge.f32.partialorder %v8958_v7, 0.0 }
 0x2c3   :  { %v2515_v3 = vmul.f32 0.01, %v8959_v61  ;;  %v1867_v19 = vpop.f32.mrb[122].mxu0  ;;  %v2320_v58 = vpop.f32.mrb[122].mxu1  ;;  %2962 = vmatmul.mubr.f32.gmra.mrb[182].mxu0 %v2607_v4  ;;  %vm2419_vm13 = vcmp.ge.f32.partialorder %v8959_v61, 0.0  ;;  %8891 = vmatprep.subr.bf16.mxu0 %v8890_v13 }
 0x2c4   :  { %v8960_v47 = vadd.f32 %v1867_v19, %v10778_v44  ;;  %v8995_v25 = vadd.f32 %v2320_v58, %v10782_v38  ;;  %v1869_v33 = vpop.f32.mrb[123].mxu0  ;;  %v2322_v43 = vpop.f32.mrb[123].mxu1  ;;  %v2612_v24 = vsel %vm2420_vm12, %v8994_v29, %v2516_v59  ;;  %v2610_v39 = vsel %vm2418_vm14, %v8958_v7, %v2514_v52  ;;  %8893 = vmatpush3.bf16.msra.mxu0 %v8890_v13 }
 0x2c5   :  { %v8961_v57 = vadd.f32 %v1869_v33, %v10786_v35  ;;  %8336 = vmatprep.mubr.msk.f32.mxu1 %vm2665_vm2, %v2612_v24  ;;  %v2611_v28 = vsel %vm2419_vm13, %v8959_v61, %v2515_v3 }
 0x2c6   :  { %v2517_v5 = vmul.f32 0.01, %v8960_v47  ;;  %vm2423_vm15 = vcmp.ge.f32.partialorder %v8995_v25, 0.0  ;;  %v2519_v55 = vmul.f32 0.01, %v8995_v25  ;;  %2966 = vmatprep.mubr.f32.mxu0 %v2611_v28  ;;  %vm2421_vm1 = vcmp.ge.f32.partialorder %v8960_v47, 0.0 }
 0x2c7   :  { %v2518_v6 = vmul.f32 0.01, %v8961_v57  ;;  %v1873_v63 = vpop.f32.mrb[124].mxu0  ;;  %v2325_v10 = vpop.f32.mrb[124].mxu1  ;;  %2967 = vmatmul.mubr.f32.gmra.mrb[184].mxu0 %v2610_v39  ;;  %vm2422_vm0 = vcmp.ge.f32.partialorder %v8961_v57, 0.0 }
 0x2c8   :  { %v8962_v36 = vadd.f32 %v1873_v63, %v10778_v44  ;;  %v8996_v50 = vadd.f32 %v2325_v10, %v10782_v38  ;;  %v1875_v20 = vpop.f32.mrb[125].mxu0  ;;  %v2327_v2 = vpop.f32.mrb[125].mxu1  ;;  %v2615_v37 = vsel %vm2423_vm15, %v8995_v25, %v2519_v55  ;;  %v2613_v0 = vsel %vm2421_vm1, %v8960_v47, %v2517_v5 }
 0x2c9   :  { %v8963_v48 = vadd.f32 %v1875_v20, %v10786_v35  ;;  %8337 = vmatmul.mubr.msk.f32.gmra.mrb[156].mxu1 %vm2665_vm2, %v2615_v37  ;;  %v2614_v41 = vsel %vm2422_vm0, %v8961_v57, %v2518_v6 }
 0x2ca   :  { %v2520_v8 = vmul.f32 0.01, %v8962_v36  ;;  %vm2426_vm3 = vcmp.ge.f32.partialorder %v8996_v50, 0.0  ;;  %v2522_v15 = vmul.f32 0.01, %v8996_v50  ;;  %2971 = vmatprep.mubr.f32.mxu0 %v2614_v41  ;;  %vm2424_vm5 = vcmp.ge.f32.partialorder %v8962_v36, 0.0 }
 0x2cb   :  { %v2521_v23 = vmul.f32 0.01, %v8963_v48  ;;  %v1879_v21 = vpop.f32.mrb[126].mxu0  ;;  %v2330_v1 = vpop.f32.mrb[126].mxu1  ;;  %2972 = vmatmul.mubr.f32.gmra.mrb[186].mxu0 %v2613_v0  ;;  %vm2425_vm4 = vcmp.ge.f32.partialorder %v8963_v48, 0.0 }
 0x2cc   :  { %v8964_v53 = vadd.f32 %v1879_v21, %v10778_v44  ;;  %v8997_v22 = vadd.f32 %v2330_v1, %v10782_v38  ;;  %v1881_v34 = vpop.f32.mrb[127].mxu0  ;;  %v2332_v32 = vpop.f32.mrb[127].mxu1  ;;  %v2618_v45 = vsel %vm2426_vm3, %v8996_v50, %v2522_v15  ;;  %v2616_v62 = vsel %vm2424_vm5, %v8962_v36, %v2520_v8 }
 0x2cd   :  { %v8965_v51 = vadd.f32 %v1881_v34, %v10786_v35  ;;  %8339 = vmatprep.mubr.msk.f32.mxu1 %vm2665_vm2, %v2618_v45  ;;  %v2617_v11 = vsel %vm2425_vm4, %v8963_v48, %v2521_v23  ;;  %v10979_v35 = vld [vmem:[%s12140_s6] ss:$0 sm:$0xff] }
 0x2ce   :  { %v2523_v27 = vmul.f32 0.01, %v8964_v53  ;;  %vm2429_vm6 = vcmp.ge.f32.partialorder %v8997_v22, 0.0  ;;  %v2525_v14 = vmul.f32 0.01, %v8997_v22  ;;  %2976 = vmatprep.mubr.f32.mxu0 %v2617_v11  ;;  %vm2427_vm8 = vcmp.ge.f32.partialorder %v8964_v53, 0.0 }
 0x2cf   :  { %v2524_v12 = vmul.f32 0.01, %v8965_v51  ;;  %2977 = vmatmul.mubr.f32.gmra.mrb[188].mxu0 %v2616_v62  ;;  %vm2428_vm7 = vcmp.ge.f32.partialorder %v8965_v51, 0.0 }
 0x2d0   :  { %v2621_v44 = vsel %vm2429_vm6, %v8997_v22, %v2525_v14  ;;  %v2619_v60 = vsel %vm2427_vm8, %v8964_v53, %v2523_v27 }
 0x2d1   :  { %8340 = vmatmul.mubr.msk.f32.gmra.mrb[158].mxu1 %vm2665_vm2, %v2621_v44  ;;  %v2620_v38 = vsel %vm2428_vm7, %v8965_v51, %v2524_v12 }
 0x2d2   :  { %2981 = vmatprep.mubr.f32.mxu0 %v2620_v38 }
 0x2d3   :  { %2982 = vmatmul.mubr.f32.gmra.mrb[190].mxu0 %v2619_v60 }
 0x32a   :  { %v2828_v40 = vpop.f32.mrb[128].mxu0 }
 0x32b   :  { %v2829_v56 = vadd.f32 %v10979_v35, %v2828_v40  ;;  %v2830_v17 = vpop.f32.mrb[129].mxu0 }
 0x32c   :  { %v8296_v49 = vpop.f32.mrb[128].mxu1 }
 0x32d   :  { %v3053_v31 = vpop.f32.mrb[129].mxu1 }
 0x32e   :  { %v3054_v18 = vadd.f32 %v3053_v31, %v2829_v56  ;;  %v2833_v16 = vpop.f32.mrb[130].mxu0 }
 0x32f   :  { %v2834_v7 = vadd.f32 %v10979_v35, %v2833_v16  ;;  %v2835_v29 = vpop.f32.mrb[131].mxu0 }
 0x330   :  { %v3244_v42 = vmul.f32 0.01, %v3054_v18  ;;  %vm3212_vm9 = vcmp.ge.f32.partialorder %v3054_v18, 0.0 }
 0x331   :  { %v3059_v46 = vadd.f32 %v8296_v49, %v2834_v7 }
 0x332   :  { %v2838_v61 = vpop.f32.mrb[132].mxu0  ;;  %v3276_v9 = vsel %vm3212_vm9, %v3054_v18, %v3244_v42 }
 0x333   :  { %vm3213_vm10 = vcmp.ge.f32.partialorder %v3059_v46, 0.0  ;;  %v3245_v52 = vmul.f32 0.01, %v3059_v46  ;;  %v2839_v59 = vadd.f32 %v10979_v35, %v2838_v61  ;;  %v2840_v4 = vpop.f32.mrb[133].mxu0  ;;  %8374 = vmatprep.mubr.f32.mxu1 %v3276_v9 }
 0x334   :  { %v8299_v3 = vpop.f32.mrb[130].mxu1 }
 0x335   :  { %v3063_v19 = vpop.f32.mrb[131].mxu1  ;;  %v3277_v58 = vsel %vm3213_vm10, %v3059_v46, %v3245_v52 }
 0x336   :  { %v3064_v47 = vadd.f32 %v3063_v19, %v2839_v59  ;;  %v2843_v25 = vpop.f32.mrb[134].mxu0  ;;  %8375 = vmatmul.mubr.f32.vlgmr.msra.gmra.mrb[160].mxu1 %v3277_v58 }
 0x337   :  { %v2844_v33 = vadd.f32 %v10979_v35, %v2843_v25  ;;  %v2845_v43 = vpop.f32.mrb[135].mxu0 }
 0x338   :  { %v3246_v24 = vmul.f32 0.01, %v3064_v47  ;;  %vm3214_vm11 = vcmp.ge.f32.partialorder %v3064_v47, 0.0 }
 0x339   :  { %v3069_v57 = vadd.f32 %v8299_v3, %v2844_v33 }
 0x33a   :  { %v2848_v28 = vpop.f32.mrb[136].mxu0  ;;  %v3278_v5 = vsel %vm3214_vm11, %v3064_v47, %v3246_v24 }
 0x33b   :  { %v2849_v55 = vadd.f32 %v10979_v35, %v2848_v28  ;;  %v2850_v39 = vpop.f32.mrb[137].mxu0  ;;  %8377 = vmatprep.mubr.f32.mxu1 %v3278_v5  ;;  %vm3215_vm12 = vcmp.ge.f32.partialorder %v3069_v57, 0.0  ;;  %v3247_v6 = vmul.f32 0.01, %v3069_v57 }
 0x33c   :  { %v8302_v63 = vpop.f32.mrb[132].mxu1 }
 0x33d   :  { %v3073_v10 = vpop.f32.mrb[133].mxu1  ;;  %v3279_v36 = vsel %vm3215_vm12, %v3069_v57, %v3247_v6 }
 0x33e   :  { %v3074_v50 = vadd.f32 %v3073_v10, %v2849_v55  ;;  %v2853_v20 = vpop.f32.mrb[138].mxu0  ;;  %8378 = vmatmul.mubr.f32.gmra.mrb[162].mxu1 %v3279_v36 }
 0x33f   :  { %v2854_v2 = vadd.f32 %v10979_v35, %v2853_v20  ;;  %v2855_v37 = vpop.f32.mrb[139].mxu0 }
 0x340   :  { %v3248_v48 = vmul.f32 0.01, %v3074_v50  ;;  %vm3216_vm13 = vcmp.ge.f32.partialorder %v3074_v50, 0.0 }
 0x341   :  { %v3079_v41 = vadd.f32 %v8302_v63, %v2854_v2 }
 0x342   :  { %v2858_v8 = vpop.f32.mrb[140].mxu0  ;;  %v3280_v15 = vsel %vm3216_vm13, %v3074_v50, %v3248_v48 }
 0x343   :  { %v2859_v0 = vadd.f32 %v10979_v35, %v2858_v8  ;;  %v2860_v23 = vpop.f32.mrb[141].mxu0  ;;  %8380 = vmatprep.mubr.f32.mxu1 %v3280_v15  ;;  %vm3217_vm14 = vcmp.ge.f32.partialorder %v3079_v41, 0.0  ;;  %v3249_v21 = vmul.f32 0.01, %v3079_v41 }
 0x344   :  { %v8305_v1 = vpop.f32.mrb[134].mxu1 }
 0x345   :  { %v3083_v53 = vpop.f32.mrb[135].mxu1  ;;  %v3281_v22 = vsel %vm3217_vm14, %v3079_v41, %v3249_v21 }
 0x346   :  { %v3084_v34 = vadd.f32 %v3083_v53, %v2859_v0  ;;  %v2863_v32 = vpop.f32.mrb[142].mxu0  ;;  %8381 = vmatmul.mubr.f32.gmra.mrb[164].mxu1 %v3281_v22 }
 0x347   :  { %v2864_v45 = vadd.f32 %v10979_v35, %v2863_v32  ;;  %v2865_v51 = vpop.f32.mrb[143].mxu0 }
 0x348   :  { %v3250_v11 = vmul.f32 0.01, %v3084_v34  ;;  %vm3218_vm15 = vcmp.ge.f32.partialorder %v3084_v34, 0.0 }
 0x349   :  { %v3089_v27 = vadd.f32 %v8305_v1, %v2864_v45 }
 0x34a   :  { %v2868_v14 = vpop.f32.mrb[144].mxu0  ;;  %v3282_v62 = vsel %vm3218_vm15, %v3084_v34, %v3250_v11 }
 0x34b   :  { %v2869_v12 = vadd.f32 %v10979_v35, %v2868_v14  ;;  %v2870_v44 = vpop.f32.mrb[145].mxu0  ;;  %8383 = vmatprep.mubr.f32.mxu1 %v3282_v62  ;;  %vm3219_vm0 = vcmp.ge.f32.partialorder %v3089_v27, 0.0  ;;  %v3251_v38 = vmul.f32 0.01, %v3089_v27 }
 0x34c   :  { %v8308_v60 = vpop.f32.mrb[136].mxu1 }
 0x34d   :  { %v3093_v40 = vpop.f32.mrb[137].mxu1  ;;  %v3283_v56 = vsel %vm3219_vm0, %v3089_v27, %v3251_v38 }
 0x34e   :  { %v3094_v17 = vadd.f32 %v3093_v40, %v2869_v12  ;;  %v2873_v49 = vpop.f32.mrb[146].mxu0  ;;  %8384 = vmatmul.mubr.f32.gmra.mrb[166].mxu1 %v3283_v56 }
 0x34f   :  { %v2874_v31 = vadd.f32 %v10979_v35, %v2873_v49  ;;  %v2875_v18 = vpop.f32.mrb[147].mxu0 }
 0x350   :  { %v3252_v16 = vmul.f32 0.01, %v3094_v17  ;;  %vm3220_vm1 = vcmp.ge.f32.partialorder %v3094_v17, 0.0 }
 0x351   :  { %v3099_v26 = vadd.f32 %v8308_v60, %v2874_v31 }
 0x352   :  { %v2878_v30 = vpop.f32.mrb[148].mxu0  ;;  %v3284_v7 = vsel %vm3220_vm1, %v3094_v17, %v3252_v16 }
 0x353   :  { %v2879_v29 = vadd.f32 %v10979_v35, %v2878_v30  ;;  %v2880_v13 = vpop.f32.mrb[149].mxu0  ;;  %8386 = vmatprep.mubr.f32.mxu1 %v3284_v7  ;;  %vm3221_vm3 = vcmp.ge.f32.partialorder %v3099_v26, 0.0  ;;  %v3253_v42 = vmul.f32 0.01, %v3099_v26 }
 0x354   :  { %v8311_v46 = vpop.f32.mrb[138].mxu1 }
 0x355   :  { %v3103_v61 = vpop.f32.mrb[139].mxu1  ;;  %v3285_v9 = vsel %vm3221_vm3, %v3099_v26, %v3253_v42 }
 0x356   :  { %v3104_v52 = vadd.f32 %v3103_v61, %v2879_v29  ;;  %v2883_v59 = vpop.f32.mrb[150].mxu0  ;;  %8387 = vmatmul.mubr.f32.gmra.mrb[168].mxu1 %v3285_v9 }
 0x357   :  { %v2884_v4 = vadd.f32 %v10979_v35, %v2883_v59  ;;  %v2885_v3 = vpop.f32.mrb[151].mxu0 }
 0x358   :  { %v3254_v19 = vmul.f32 0.01, %v3104_v52  ;;  %vm3222_vm4 = vcmp.ge.f32.partialorder %v3104_v52, 0.0 }
 0x359   :  { %v3109_v58 = vadd.f32 %v8311_v46, %v2884_v4 }
 0x35a   :  { %v2888_v47 = vpop.f32.mrb[152].mxu0  ;;  %v3286_v25 = vsel %vm3222_vm4, %v3104_v52, %v3254_v19 }
 0x35b   :  { %v2889_v33 = vadd.f32 %v10979_v35, %v2888_v47  ;;  %v2890_v43 = vpop.f32.mrb[153].mxu0  ;;  %8389 = vmatprep.mubr.f32.mxu1 %v3286_v25  ;;  %vm3223_vm5 = vcmp.ge.f32.partialorder %v3109_v58, 0.0  ;;  %v3255_v24 = vmul.f32 0.01, %v3109_v58 }
 0x35c   :  { %v8314_v57 = vpop.f32.mrb[140].mxu1 }
 0x35d   :  { %v3113_v28 = vpop.f32.mrb[141].mxu1  ;;  %v3287_v5 = vsel %vm3223_vm5, %v3109_v58, %v3255_v24 }
 0x35e   :  { %v3114_v55 = vadd.f32 %v3113_v28, %v2889_v33  ;;  %v2893_v39 = vpop.f32.mrb[154].mxu0  ;;  %8390 = vmatmul.mubr.f32.gmra.mrb[170].mxu1 %v3287_v5 }
 0x35f   :  { %v2894_v6 = vadd.f32 %v10979_v35, %v2893_v39  ;;  %v2895_v63 = vpop.f32.mrb[155].mxu0 }
 0x360   :  { %v3256_v10 = vmul.f32 0.01, %v3114_v55  ;;  %vm3224_vm6 = vcmp.ge.f32.partialorder %v3114_v55, 0.0 }
 0x361   :  { %v3119_v36 = vadd.f32 %v8314_v57, %v2894_v6 }
 0x362   :  { %v2898_v50 = vpop.f32.mrb[156].mxu0  ;;  %v3288_v20 = vsel %vm3224_vm6, %v3114_v55, %v3256_v10 }
 0x363   :  { %v2899_v2 = vadd.f32 %v10979_v35, %v2898_v50  ;;  %v2900_v37 = vpop.f32.mrb[157].mxu0  ;;  %8392 = vmatprep.mubr.f32.mxu1 %v3288_v20  ;;  %vm3225_vm7 = vcmp.ge.f32.partialorder %v3119_v36, 0.0  ;;  %v3257_v48 = vmul.f32 0.01, %v3119_v36 }
 0x364   :  { %v8317_v41 = vpop.f32.mrb[142].mxu1 }
 0x365   :  { %v3123_v8 = vpop.f32.mrb[143].mxu1  ;;  %v3289_v15 = vsel %vm3225_vm7, %v3119_v36, %v3257_v48 }
 0x366   :  { %v3124_v0 = vadd.f32 %v3123_v8, %v2899_v2  ;;  %v2903_v23 = vpop.f32.mrb[158].mxu0  ;;  %8393 = vmatmul.mubr.f32.gmra.mrb[172].mxu1 %v3289_v15 }
 0x367   :  { %v2904_v21 = vadd.f32 %v10979_v35, %v2903_v23  ;;  %v2905_v1 = vpop.f32.mrb[159].mxu0 }
 0x368   :  { %v3258_v53 = vmul.f32 0.01, %v3124_v0  ;;  %vm3226_vm8 = vcmp.ge.f32.partialorder %v3124_v0, 0.0 }
 0x369   :  { %v3129_v22 = vadd.f32 %v8317_v41, %v2904_v21 }
 0x36a   :  { %v2908_v34 = vpop.f32.mrb[160].mxu0  ;;  %v3290_v32 = vsel %vm3226_vm8, %v3124_v0, %v3258_v53 }
 0x36b   :  { %v2909_v45 = vadd.f32 %v10979_v35, %v2908_v34  ;;  %v2910_v51 = vpop.f32.mrb[161].mxu0  ;;  %8395 = vmatprep.mubr.f32.mxu1 %v3290_v32  ;;  %vm3227_vm9 = vcmp.ge.f32.partialorder %v3129_v22, 0.0  ;;  %v3259_v11 = vmul.f32 0.01, %v3129_v22 }
 0x36c   :  { %v8320_v27 = vpop.f32.mrb[144].mxu1 }
 0x36d   :  { %v3133_v14 = vpop.f32.mrb[145].mxu1  ;;  %v3291_v62 = vsel %vm3227_vm9, %v3129_v22, %v3259_v11 }
 0x36e   :  { %v3134_v12 = vadd.f32 %v3133_v14, %v2909_v45  ;;  %v2913_v44 = vpop.f32.mrb[162].mxu0  ;;  %8396 = vmatmul.mubr.f32.gmra.mrb[174].mxu1 %v3291_v62 }
 0x36f   :  { %v2914_v38 = vadd.f32 %v10979_v35, %v2913_v44  ;;  %v2915_v60 = vpop.f32.mrb[163].mxu0 }
 0x370   :  { %v3260_v40 = vmul.f32 0.01, %v3134_v12  ;;  %vm3228_vm10 = vcmp.ge.f32.partialorder %v3134_v12, 0.0 }
 0x371   :  { %v3139_v56 = vadd.f32 %v8320_v27, %v2914_v38 }
 0x372   :  { %v2918_v17 = vpop.f32.mrb[164].mxu0  ;;  %v3292_v49 = vsel %vm3228_vm10, %v3134_v12, %v3260_v40 }
 0x373   :  { %v2919_v31 = vadd.f32 %v10979_v35, %v2918_v17  ;;  %v2920_v18 = vpop.f32.mrb[165].mxu0  ;;  %8398 = vmatprep.mubr.f32.mxu1 %v3292_v49  ;;  %vm3229_vm11 = vcmp.ge.f32.partialorder %v3139_v56, 0.0  ;;  %v3261_v16 = vmul.f32 0.01, %v3139_v56 }
 0x374   :  { %v8323_v26 = vpop.f32.mrb[146].mxu1 }
 0x375   :  { %v3143_v30 = vpop.f32.mrb[147].mxu1  ;;  %v3293_v7 = vsel %vm3229_vm11, %v3139_v56, %v3261_v16 }
 0x376   :  { %v3144_v29 = vadd.f32 %v3143_v30, %v2919_v31  ;;  %v2923_v13 = vpop.f32.mrb[166].mxu0  ;;  %8399 = vmatmul.mubr.f32.gmra.mrb[176].mxu1 %v3293_v7 }
 0x377   :  { %v2924_v42 = vadd.f32 %v10979_v35, %v2923_v13  ;;  %v2925_v46 = vpop.f32.mrb[167].mxu0 }
 0x378   :  { %v3262_v61 = vmul.f32 0.01, %v3144_v29  ;;  %vm3230_vm12 = vcmp.ge.f32.partialorder %v3144_v29, 0.0 }
 0x379   :  { %v3149_v9 = vadd.f32 %v8323_v26, %v2924_v42 }
 0x37a   :  { %v2928_v52 = vpop.f32.mrb[168].mxu0  ;;  %v3294_v59 = vsel %vm3230_vm12, %v3144_v29, %v3262_v61 }
 0x37b   :  { %v2929_v4 = vadd.f32 %v10979_v35, %v2928_v52  ;;  %v2930_v3 = vpop.f32.mrb[169].mxu0  ;;  %8401 = vmatprep.mubr.f32.mxu1 %v3294_v59  ;;  %vm3231_vm13 = vcmp.ge.f32.partialorder %v3149_v9, 0.0  ;;  %v3263_v19 = vmul.f32 0.01, %v3149_v9 }
 0x37c   :  { %v8326_v58 = vpop.f32.mrb[148].mxu1 }
 0x37d   :  { %v3153_v47 = vpop.f32.mrb[149].mxu1  ;;  %v3295_v25 = vsel %vm3231_vm13, %v3149_v9, %v3263_v19  ;;  %vm3661_vm13 = vcmask 130048  }
 0x37e   :  { %v3154_v33 = vadd.f32 %v3153_v47, %v2929_v4  ;;  %v2933_v43 = vpop.f32.mrb[170].mxu0  ;;  %8402 = vmatmul.mubr.f32.gmra.mrb[178].mxu1 %v3295_v25 }
 0x37f   :  { %v2934_v24 = vadd.f32 %v10979_v35, %v2933_v43  ;;  %v2935_v57 = vpop.f32.mrb[171].mxu0 }
 0x380   :  { %v3264_v28 = vmul.f32 0.01, %v3154_v33  ;;  %vm3232_vm14 = vcmp.ge.f32.partialorder %v3154_v33, 0.0 }
 0x381   :  { %v3159_v5 = vadd.f32 %v8326_v58, %v2934_v24 }
 0x382   :  { %v2938_v55 = vpop.f32.mrb[172].mxu0  ;;  %v3296_v39 = vsel %vm3232_vm14, %v3154_v33, %v3264_v28 }
 0x383   :  { %v2939_v6 = vadd.f32 %v10979_v35, %v2938_v55  ;;  %v2940_v63 = vpop.f32.mrb[173].mxu0  ;;  %8404 = vmatprep.mubr.f32.mxu1 %v3296_v39  ;;  %vm3233_vm15 = vcmp.ge.f32.partialorder %v3159_v5, 0.0  ;;  %v3265_v10 = vmul.f32 0.01, %v3159_v5 }
 0x384   :  { %v8329_v36 = vpop.f32.mrb[150].mxu1 }
 0x385   :  { %v3163_v50 = vpop.f32.mrb[151].mxu1  ;;  %v3297_v20 = vsel %vm3233_vm15, %v3159_v5, %v3265_v10 }
 0x386   :  { %v3164_v2 = vadd.f32 %v3163_v50, %v2939_v6  ;;  %v2943_v37 = vpop.f32.mrb[174].mxu0  ;;  %8405 = vmatmul.mubr.f32.gmra.mrb[180].mxu1 %v3297_v20 }
 0x387   :  { %v2944_v48 = vadd.f32 %v10979_v35, %v2943_v37  ;;  %v2945_v41 = vpop.f32.mrb[175].mxu0 }
 0x388   :  { %v3266_v8 = vmul.f32 0.01, %v3164_v2  ;;  %vm3234_vm0 = vcmp.ge.f32.partialorder %v3164_v2, 0.0  ;;  %v11022_v41 = vld [vmem:[%s12142_s8] ss:$0 sm:$0xff] }
 0x389   :  { %v3169_v15 = vadd.f32 %v8329_v36, %v2944_v48 }
 0x38a   :  { %v2948_v0 = vpop.f32.mrb[176].mxu0  ;;  %v3298_v23 = vsel %vm3234_vm0, %v3164_v2, %v3266_v8 }
 0x38b   :  { %v2949_v21 = vadd.f32 %v10979_v35, %v2948_v0  ;;  %v2950_v1 = vpop.f32.mrb[177].mxu0  ;;  %8407 = vmatprep.mubr.f32.mxu1 %v3298_v23  ;;  %vm3235_vm1 = vcmp.ge.f32.partialorder %v3169_v15, 0.0  ;;  %v3267_v53 = vmul.f32 0.01, %v3169_v15 }
 0x38c   :  { %v8332_v22 = vpop.f32.mrb[152].mxu1 }
 0x38d   :  { %v3173_v34 = vpop.f32.mrb[153].mxu1  ;;  %v3299_v32 = vsel %vm3235_vm1, %v3169_v15, %v3267_v53  ;;  %v4080_v15 = vld [vmem:[%s12145_s11 + $0x8] sm:$0xff] }
 0x38e   :  { %v3174_v45 = vadd.f32 %v3173_v34, %v2949_v21  ;;  %v2953_v51 = vpop.f32.mrb[178].mxu0  ;;  %8408 = vmatmul.mubr.f32.gmra.mrb[182].mxu1 %v3299_v32 }
 0x38f   :  { %v2954_v11 = vadd.f32 %v10979_v35, %v2953_v51  ;;  %v2955_v27 = vpop.f32.mrb[179].mxu0 }
 0x390   :  { %v3268_v14 = vmul.f32 0.01, %v3174_v45  ;;  %vm3236_vm3 = vcmp.ge.f32.partialorder %v3174_v45, 0.0 }
 0x391   :  { %v3179_v62 = vadd.f32 %v8332_v22, %v2954_v11 }
 0x392   :  { %v2958_v12 = vpop.f32.mrb[180].mxu0  ;;  %v3300_v44 = vsel %vm3236_vm3, %v3174_v45, %v3268_v14 }
 0x393   :  { %v2959_v38 = vadd.f32 %v10979_v35, %v2958_v12  ;;  %v2960_v60 = vpop.f32.mrb[181].mxu0  ;;  %8410 = vmatprep.mubr.f32.mxu1 %v3300_v44  ;;  %vm3237_vm4 = vcmp.ge.f32.partialorder %v3179_v62, 0.0  ;;  %v3269_v40 = vmul.f32 0.01, %v3179_v62 }
 0x394   :  { %v8335_v56 = vpop.f32.mrb[154].mxu1 }
 0x395   :  { %v3183_v17 = vpop.f32.mrb[155].mxu1  ;;  %v3301_v49 = vsel %vm3237_vm4, %v3179_v62, %v3269_v40 }
 0x396   :  { %v3184_v31 = vadd.f32 %v3183_v17, %v2959_v38  ;;  %v2963_v18 = vpop.f32.mrb[182].mxu0  ;;  %8411 = vmatmul.mubr.f32.gmra.mrb[184].mxu1 %v3301_v49 }
 0x397   :  { %v2964_v16 = vadd.f32 %v10979_v35, %v2963_v18  ;;  %v2965_v26 = vpop.f32.mrb[183].mxu0 }
 0x398   :  { %v3270_v30 = vmul.f32 0.01, %v3184_v31  ;;  %vm3238_vm5 = vcmp.ge.f32.partialorder %v3184_v31, 0.0 }
 0x399   :  { %v3189_v7 = vadd.f32 %v8335_v56, %v2964_v16 }
 0x39a   :  { %v2968_v29 = vpop.f32.mrb[184].mxu0  ;;  %v3302_v13 = vsel %vm3238_vm5, %v3184_v31, %v3270_v30 }
 0x39b   :  { %v2969_v42 = vadd.f32 %v10979_v35, %v2968_v29  ;;  %v2970_v46 = vpop.f32.mrb[185].mxu0  ;;  %8413 = vmatprep.mubr.f32.mxu1 %v3302_v13  ;;  %vm3239_vm6 = vcmp.ge.f32.partialorder %v3189_v7, 0.0  ;;  %v3271_v61 = vmul.f32 0.01, %v3189_v7 }
 0x39c   :  { %v8338_v9 = vpop.f32.mrb[156].mxu1 }
 0x39d   :  { %v3193_v52 = vpop.f32.mrb[157].mxu1  ;;  %v3303_v59 = vsel %vm3239_vm6, %v3189_v7, %v3271_v61 }
 0x39e   :  { %v3194_v4 = vadd.f32 %v3193_v52, %v2969_v42  ;;  %v2973_v3 = vpop.f32.mrb[186].mxu0  ;;  %8414 = vmatmul.mubr.f32.gmra.mrb[186].mxu1 %v3303_v59 }
 0x39f   :  { %v2974_v19 = vadd.f32 %v10979_v35, %v2973_v3  ;;  %v2975_v58 = vpop.f32.mrb[187].mxu0 }
 0x3a0   :  { %v3272_v47 = vmul.f32 0.01, %v3194_v4  ;;  %vm3240_vm7 = vcmp.ge.f32.partialorder %v3194_v4, 0.0 }
 0x3a1   :  { %v3199_v25 = vadd.f32 %v8338_v9, %v2974_v19 }
 0x3a2   :  { %v2978_v33 = vpop.f32.mrb[188].mxu0  ;;  %v3304_v43 = vsel %vm3240_vm7, %v3194_v4, %v3272_v47 }
 0x3a3   :  { %v2979_v24 = vadd.f32 %v10979_v35, %v2978_v33  ;;  %v2980_v57 = vpop.f32.mrb[189].mxu0  ;;  %8416 = vmatprep.mubr.f32.mxu1 %v3304_v43  ;;  %vm3241_vm8 = vcmp.ge.f32.partialorder %v3199_v25, 0.0  ;;  %v3273_v28 = vmul.f32 0.01, %v3199_v25 }
 0x3a4   :  { %v8341_v5 = vpop.f32.mrb[158].mxu1 }
 0x3a5   :  { %v3203_v55 = vpop.f32.mrb[159].mxu1  ;;  %v3305_v39 = vsel %vm3241_vm8, %v3199_v25, %v3273_v28 }
 0x3a6   :  { %v3204_v6 = vadd.f32 %v3203_v55, %v2979_v24  ;;  %v2983_v63 = vpop.f32.mrb[190].mxu0  ;;  %8417 = vmatmul.mubr.f32.gmra.mrb[188].mxu1 %v3305_v39 }
 0x3a7   :  { %v2984_v10 = vadd.f32 %v10979_v35, %v2983_v63  ;;  %v2985_v36 = vpop.f32.mrb[191].mxu0  ;;  %v4079_v35 = vld [vmem:[%s12145_s11] sm:$0xff] }
 0x3a8   :  { %v3274_v50 = vmul.f32 0.01, %v3204_v6  ;;  %vm3242_vm9 = vcmp.ge.f32.partialorder %v3204_v6, 0.0  ;;  %v8894_v21 = vpack.c.bf16 %v4080_v15, %v4079_v35 }
 0x3a9   :  { %v3209_v20 = vadd.f32 %v8341_v5, %v2984_v10 }
 0x3aa   :  { %v3306_v2 = vsel %vm3242_vm9, %v3204_v6, %v3274_v50  ;;  %8895 = vmatprep.subr.bf16.mxu1 %v8894_v21 }
 0x3ab   :  { %8419 = vmatprep.mubr.f32.mxu1 %v3306_v2  ;;  %vm3243_vm10 = vcmp.ge.f32.partialorder %v3209_v20, 0.0  ;;  %v3275_v37 = vmul.f32 0.01, %v3209_v20  ;;  %8897 = vmatpush3.bf16.msra.mxu1 %v8894_v21 }
 0x3ad   :  { %v3307_v48 = vsel %vm3243_vm10, %v3209_v20, %v3275_v37 }
 0x3ae   :  { %8420 = vmatmul.mubr.f32.gmra.mrb[190].mxu1 %v3307_v48 }
 0x409   :  { %v8376_v8 = vpop.f32.mrb[160].mxu1 }
 0x40a   :  { %v3403_v0 = vadd.f32 %v8376_v8, %v11022_v41  ;;  %v3397_v23 = vpop.f32.mrb[161].mxu1 }
 0x40b   :  { %v3398_v1 = vadd.f32 %v11022_v41, %v3397_v23 }
 0x40c   :  { %v3589_v53 = vmul.f32 0.01, %v3403_v0  ;;  %vm3557_vm11 = vcmp.ge.f32.partialorder %v3403_v0, 0.0 }
 0x40d   :  { %vm3556_vm12 = vcmp.ge.f32.partialorder %v3398_v1, 0.0  ;;  %v3588_v22 = vmul.f32 0.01, %v3398_v1 }
 0x40e   :  { %v3621_v32 = vsel %vm3557_vm11, %v3403_v0, %v3589_v53 }
 0x40f   :  { %v3620_v34 = vsel %vm3556_vm12, %v3398_v1, %v3588_v22 }
 0x410   :  { %8426 = vmatprep.mubr.msk.f32.mxu0 %vm3661_vm13, %v3620_v34 }
 0x411   :  { %v8379_v45 = vpop.f32.mrb[162].mxu1  ;;  %8427 = vmatmul.mubr.msk.f32.vlgmr.msra.gmra.mrb[192].mxu0 %vm3661_vm13, %v3621_v32 }
 0x412   :  { %v3413_v51 = vadd.f32 %v8379_v45, %v11022_v41  ;;  %v3407_v11 = vpop.f32.mrb[163].mxu1 }
 0x413   :  { %v3408_v27 = vadd.f32 %v11022_v41, %v3407_v11 }
 0x414   :  { %v3591_v14 = vmul.f32 0.01, %v3413_v51  ;;  %vm3559_vm14 = vcmp.ge.f32.partialorder %v3413_v51, 0.0 }
 0x415   :  { %vm3558_vm15 = vcmp.ge.f32.partialorder %v3408_v27, 0.0  ;;  %v3590_v62 = vmul.f32 0.01, %v3408_v27 }
 0x416   :  { %v3623_v44 = vsel %vm3559_vm14, %v3413_v51, %v3591_v14 }
 0x417   :  { %v3622_v12 = vsel %vm3558_vm15, %v3408_v27, %v3590_v62 }
 0x418   :  { %8429 = vmatprep.mubr.msk.f32.mxu0 %vm3661_vm13, %v3622_v12 }
 0x419   :  { %v8382_v38 = vpop.f32.mrb[164].mxu1  ;;  %8430 = vmatmul.mubr.msk.f32.gmra.mrb[194].mxu0 %vm3661_vm13, %v3623_v44 }
 0x41a   :  { %v3423_v60 = vadd.f32 %v8382_v38, %v11022_v41  ;;  %v3417_v40 = vpop.f32.mrb[165].mxu1 }
 0x41b   :  { %v3418_v56 = vadd.f32 %v11022_v41, %v3417_v40 }
 0x41c   :  { %v3593_v17 = vmul.f32 0.01, %v3423_v60  ;;  %vm3561_vm0 = vcmp.ge.f32.partialorder %v3423_v60, 0.0 }
 0x41d   :  { %vm3560_vm1 = vcmp.ge.f32.partialorder %v3418_v56, 0.0  ;;  %v3592_v49 = vmul.f32 0.01, %v3418_v56 }
 0x41e   :  { %v3625_v18 = vsel %vm3561_vm0, %v3423_v60, %v3593_v17 }
 0x41f   :  { %v3624_v31 = vsel %vm3560_vm1, %v3418_v56, %v3592_v49 }
 0x420   :  { %8432 = vmatprep.mubr.msk.f32.mxu0 %vm3661_vm13, %v3624_v31 }
 0x421   :  { %v8385_v16 = vpop.f32.mrb[166].mxu1  ;;  %8433 = vmatmul.mubr.msk.f32.gmra.mrb[196].mxu0 %vm3661_vm13, %v3625_v18 }
 0x422   :  { %v3433_v26 = vadd.f32 %v8385_v16, %v11022_v41  ;;  %v3427_v30 = vpop.f32.mrb[167].mxu1 }
 0x423   :  { %v3428_v7 = vadd.f32 %v11022_v41, %v3427_v30 }
 0x424   :  { %v3595_v29 = vmul.f32 0.01, %v3433_v26  ;;  %vm3563_vm3 = vcmp.ge.f32.partialorder %v3433_v26, 0.0 }
 0x425   :  { %vm3562_vm4 = vcmp.ge.f32.partialorder %v3428_v7, 0.0  ;;  %v3594_v13 = vmul.f32 0.01, %v3428_v7 }
 0x426   :  { %v3627_v46 = vsel %vm3563_vm3, %v3433_v26, %v3595_v29 }
 0x427   :  { %v3626_v42 = vsel %vm3562_vm4, %v3428_v7, %v3594_v13 }
 0x428   :  { %8435 = vmatprep.mubr.msk.f32.mxu0 %vm3661_vm13, %v3626_v42 }
 0x429   :  { %v8388_v61 = vpop.f32.mrb[168].mxu1  ;;  %8436 = vmatmul.mubr.msk.f32.gmra.mrb[198].mxu0 %vm3661_vm13, %v3627_v46 }
 0x42a   :  { %v3443_v9 = vadd.f32 %v8388_v61, %v11022_v41  ;;  %v3437_v52 = vpop.f32.mrb[169].mxu1  ;;  %v4081_v61 = vld [vmem:[%s12145_s11 + $0x10] sm:$0xff] }
 0x42b   :  { %v3438_v59 = vadd.f32 %v11022_v41, %v3437_v52 }
 0x42c   :  { %v3597_v4 = vmul.f32 0.01, %v3443_v9  ;;  %vm3565_vm5 = vcmp.ge.f32.partialorder %v3443_v9, 0.0 }
 0x42d   :  { %vm3564_vm6 = vcmp.ge.f32.partialorder %v3438_v59, 0.0  ;;  %v3596_v3 = vmul.f32 0.01, %v3438_v59 }
 0x42e   :  { %v3629_v58 = vsel %vm3565_vm5, %v3443_v9, %v3597_v4  ;;  %v4082_v9 = vld [vmem:[%s12145_s11 + $0x18] sm:$0xff] }
 0x42f   :  { %v3628_v19 = vsel %vm3564_vm6, %v3438_v59, %v3596_v3  ;;  %v8898_v52 = vpack.c.bf16 %v4082_v9, %v4081_v61 }
 0x430   :  { %8438 = vmatprep.mubr.msk.f32.mxu0 %vm3661_vm13, %v3628_v19 }
 0x431   :  { %v8391_v47 = vpop.f32.mrb[170].mxu1  ;;  %8439 = vmatmul.mubr.msk.f32.gmra.mrb[200].mxu0 %vm3661_vm13, %v3629_v58  ;;  %8899 = vmatprep.subr.bf16.mxu1 %v8898_v52 }
 0x432   :  { %v3453_v25 = vadd.f32 %v8391_v47, %v11022_v41  ;;  %v3447_v33 = vpop.f32.mrb[171].mxu1  ;;  %8901 = vmatpush3.bf16.msra.mxu1 %v8898_v52 }
 0x433   :  { %v3448_v43 = vadd.f32 %v11022_v41, %v3447_v33 }
 0x434   :  { %v3599_v24 = vmul.f32 0.01, %v3453_v25  ;;  %vm3567_vm7 = vcmp.ge.f32.partialorder %v3453_v25, 0.0 }
 0x435   :  { %vm3566_vm8 = vcmp.ge.f32.partialorder %v3448_v43, 0.0  ;;  %v3598_v57 = vmul.f32 0.01, %v3448_v43 }
 0x436   :  { %v3631_v5 = vsel %vm3567_vm7, %v3453_v25, %v3599_v24 }
 0x437   :  { %v3630_v28 = vsel %vm3566_vm8, %v3448_v43, %v3598_v57 }
 0x438   :  { %8441 = vmatprep.mubr.msk.f32.mxu0 %vm3661_vm13, %v3630_v28 }
 0x439   :  { %v8394_v55 = vpop.f32.mrb[172].mxu1  ;;  %8442 = vmatmul.mubr.msk.f32.gmra.mrb[202].mxu0 %vm3661_vm13, %v3631_v5 }
 0x43a   :  { %v3463_v39 = vadd.f32 %v8394_v55, %v11022_v41  ;;  %v3457_v6 = vpop.f32.mrb[173].mxu1 }
 0x43b   :  { %v3458_v63 = vadd.f32 %v11022_v41, %v3457_v6 }
 0x43c   :  { %v3601_v10 = vmul.f32 0.01, %v3463_v39  ;;  %vm3569_vm9 = vcmp.ge.f32.partialorder %v3463_v39, 0.0 }
 0x43d   :  { %vm3568_vm10 = vcmp.ge.f32.partialorder %v3458_v63, 0.0  ;;  %v3600_v36 = vmul.f32 0.01, %v3458_v63 }
 0x43e   :  { %v3633_v20 = vsel %vm3569_vm9, %v3463_v39, %v3601_v10 }
 0x43f   :  { %v3632_v50 = vsel %vm3568_vm10, %v3458_v63, %v3600_v36 }
 0x440   :  { %8444 = vmatprep.mubr.msk.f32.mxu0 %vm3661_vm13, %v3632_v50 }
 0x441   :  { %v8397_v2 = vpop.f32.mrb[174].mxu1  ;;  %8445 = vmatmul.mubr.msk.f32.gmra.mrb[204].mxu0 %vm3661_vm13, %v3633_v20 }
 0x442   :  { %v3473_v37 = vadd.f32 %v8397_v2, %v11022_v41  ;;  %v3467_v48 = vpop.f32.mrb[175].mxu1 }
 0x443   :  { %v3468_v8 = vadd.f32 %v11022_v41, %v3467_v48 }
 0x444   :  { %v3603_v35 = vmul.f32 0.01, %v3473_v37  ;;  %vm3571_vm11 = vcmp.ge.f32.partialorder %v3473_v37, 0.0 }
 0x445   :  { %vm3570_vm12 = vcmp.ge.f32.partialorder %v3468_v8, 0.0  ;;  %v3602_v15 = vmul.f32 0.01, %v3468_v8 }
 0x446   :  { %v3635_v23 = vsel %vm3571_vm11, %v3473_v37, %v3603_v35 }
 0x447   :  { %v3634_v0 = vsel %vm3570_vm12, %v3468_v8, %v3602_v15 }
 0x448   :  { %8447 = vmatprep.mubr.msk.f32.mxu0 %vm3661_vm13, %v3634_v0 }
 0x449   :  { %v8400_v21 = vpop.f32.mrb[176].mxu1  ;;  %8448 = vmatmul.mubr.msk.f32.gmra.mrb[206].mxu0 %vm3661_vm13, %v3635_v23 }
 0x44a   :  { %v3483_v1 = vadd.f32 %v8400_v21, %v11022_v41  ;;  %v3477_v53 = vpop.f32.mrb[177].mxu1 }
 0x44b   :  { %v3478_v22 = vadd.f32 %v11022_v41, %v3477_v53 }
 0x44c   :  { %v3605_v34 = vmul.f32 0.01, %v3483_v1  ;;  %vm3573_vm14 = vcmp.ge.f32.partialorder %v3483_v1, 0.0 }
 0x44d   :  { %vm3572_vm15 = vcmp.ge.f32.partialorder %v3478_v22, 0.0  ;;  %v3604_v32 = vmul.f32 0.01, %v3478_v22 }
 0x44e   :  { %v3637_v51 = vsel %vm3573_vm14, %v3483_v1, %v3605_v34 }
 0x44f   :  { %v3636_v45 = vsel %vm3572_vm15, %v3478_v22, %v3604_v32  ;;  %v11103_v32 = vld [vmem:[%s12144_s10] ss:$0 sm:$0xff]  ;;  %s9163_s10 = smov [#allocation3]  }
 0x450   :  { %8450 = vmatprep.mubr.msk.f32.mxu0 %vm3661_vm13, %v3636_v45  ;;  %s7892_s16 = sshll.u32 %s9163_s10, 4  ;;  %s7893_s16 = int_to_ptr.vmem [resolvable:$true] %s7892_s16 }
 0x451   :  { %v8403_v11 = vpop.f32.mrb[178].mxu1  ;;  %8451 = vmatmul.mubr.msk.f32.gmra.mrb[208].mxu0 %vm3661_vm13, %v3637_v51  ;;  %s9135_s5 = scalar_lea.vmem %s7893_s16, 32  ;;  %p9140_p1 = scmp.lt.s32.totalorder %s7893_s16, %s7893_s16 }
 0x452   :  { %v3493_v27 = vadd.f32 %v8403_v11, %v11022_v41  ;;  %v3487_v14 = vpop.f32.mrb[179].mxu1  ;;  %p9136_p0 = scmp.ne.s32.totalorder %s7893_s16, %s9135_s5  ;;  %p9141_p2 = scmp.lt.s32.totalorder %s9135_s5, %s9135_s5 }
 0x453   :  { %v3488_v62 = vadd.f32 %v11022_v41, %v3487_v14 }
 0x454   :  { %v3607_v12 = vmul.f32 0.01, %v3493_v27  ;;  %vm3575_vm0 = vcmp.ge.f32.partialorder %v3493_v27, 0.0  ;;  %p9142_p3 = por %p9141_p2, %p9140_p1 }
 0x455   :  { %vm3574_vm1 = vcmp.ge.f32.partialorder %v3488_v62, 0.0  ;;  %v3606_v44 = vmul.f32 0.01, %v3488_v62 }
 0x456   :  { %v3639_v60 = vsel %vm3575_vm0, %v3493_v27, %v3607_v12  ;;  %p9143_p4 = pnand %p9142_p3, %p9136_p0 }
 0x457   :  { %v3638_v38 = vsel %vm3574_vm1, %v3488_v62, %v3606_v44 }
 0x458   :  { %8453 = vmatprep.mubr.msk.f32.mxu0 %vm3661_vm13, %v3638_v38 }
 0x459   :  { %v8406_v40 = vpop.f32.mrb[180].mxu1  ;;  %8454 = vmatmul.mubr.msk.f32.gmra.mrb[210].mxu0 %vm3661_vm13, %v3639_v60 }
 0x45a   :  { %v3503_v56 = vadd.f32 %v8406_v40, %v11022_v41  ;;  %v3497_v17 = vpop.f32.mrb[181].mxu1 }
 0x45b   :  { %v3498_v49 = vadd.f32 %v11022_v41, %v3497_v17 }
 0x45c   :  { %v3609_v31 = vmul.f32 0.01, %v3503_v56  ;;  %vm3577_vm3 = vcmp.ge.f32.partialorder %v3503_v56, 0.0 }
 0x45d   :  { %vm3576_vm4 = vcmp.ge.f32.partialorder %v3498_v49, 0.0  ;;  %v3608_v18 = vmul.f32 0.01, %v3498_v49 }
 0x45e   :  { %v3641_v26 = vsel %vm3577_vm3, %v3503_v56, %v3609_v31 }
 0x45f   :  { %v3640_v16 = vsel %vm3576_vm4, %v3498_v49, %v3608_v18 }
 0x460   :  { %8456 = vmatprep.mubr.msk.f32.mxu0 %vm3661_vm13, %v3640_v16 }
 0x461   :  { %v8409_v30 = vpop.f32.mrb[182].mxu1  ;;  %8457 = vmatmul.mubr.msk.f32.gmra.mrb[212].mxu0 %vm3661_vm13, %v3641_v26 }
 0x462   :  { %v3513_v7 = vadd.f32 %v8409_v30, %v11022_v41  ;;  %v3507_v29 = vpop.f32.mrb[183].mxu1 }
 0x463   :  { %v3508_v13 = vadd.f32 %v11022_v41, %v3507_v29 }
 0x464   :  { %v3611_v42 = vmul.f32 0.01, %v3513_v7  ;;  %vm3579_vm5 = vcmp.ge.f32.partialorder %v3513_v7, 0.0 }
 0x465   :  { %vm3578_vm6 = vcmp.ge.f32.partialorder %v3508_v13, 0.0  ;;  %v3610_v46 = vmul.f32 0.01, %v3508_v13 }
 0x466   :  { %v3643_v4 = vsel %vm3579_vm5, %v3513_v7, %v3611_v42 }
 0x467   :  { %v3642_v59 = vsel %vm3578_vm6, %v3508_v13, %v3610_v46 }
 0x468   :  { %8459 = vmatprep.mubr.msk.f32.mxu0 %vm3661_vm13, %v3642_v59 }
 0x469   :  { %v8412_v3 = vpop.f32.mrb[184].mxu1  ;;  %8460 = vmatmul.mubr.msk.f32.gmra.mrb[214].mxu0 %vm3661_vm13, %v3643_v4 }
 0x46a   :  { %v3523_v19 = vadd.f32 %v8412_v3, %v11022_v41  ;;  %v3517_v58 = vpop.f32.mrb[185].mxu1 }
 0x46b   :  { %v3518_v47 = vadd.f32 %v11022_v41, %v3517_v58 }
 0x46c   :  { %v3613_v25 = vmul.f32 0.01, %v3523_v19  ;;  %vm3581_vm7 = vcmp.ge.f32.partialorder %v3523_v19, 0.0 }
 0x46d   :  { %vm3580_vm8 = vcmp.ge.f32.partialorder %v3518_v47, 0.0  ;;  %v3612_v33 = vmul.f32 0.01, %v3518_v47 }
 0x46e   :  { %v3645_v24 = vsel %vm3581_vm7, %v3523_v19, %v3613_v25 }
 0x46f   :  { %v3644_v43 = vsel %vm3580_vm8, %v3518_v47, %v3612_v33 }
 0x470   :  { %8462 = vmatprep.mubr.msk.f32.mxu0 %vm3661_vm13, %v3644_v43 }
 0x471   :  { %v8415_v57 = vpop.f32.mrb[186].mxu1  ;;  %8463 = vmatmul.mubr.msk.f32.gmra.mrb[216].mxu0 %vm3661_vm13, %v3645_v24 }
 0x472   :  { %v3533_v28 = vadd.f32 %v8415_v57, %v11022_v41  ;;  %v3527_v5 = vpop.f32.mrb[187].mxu1 }
 0x473   :  { %v3528_v55 = vadd.f32 %v11022_v41, %v3527_v5 }
 0x474   :  { %v3615_v39 = vmul.f32 0.01, %v3533_v28  ;;  %vm3583_vm9 = vcmp.ge.f32.partialorder %v3533_v28, 0.0 }
 0x475   :  { %vm3582_vm10 = vcmp.ge.f32.partialorder %v3528_v55, 0.0  ;;  %v3614_v6 = vmul.f32 0.01, %v3528_v55 }
 0x476   :  { %v3647_v10 = vsel %vm3583_vm9, %v3533_v28, %v3615_v39 }
 0x477   :  { %v3646_v63 = vsel %vm3582_vm10, %v3528_v55, %v3614_v6 }
 0x478   :  { %8465 = vmatprep.mubr.msk.f32.mxu0 %vm3661_vm13, %v3646_v63 }
 0x479   :  { %v8418_v36 = vpop.f32.mrb[188].mxu1  ;;  %8466 = vmatmul.mubr.msk.f32.gmra.mrb[218].mxu0 %vm3661_vm13, %v3647_v10 }
 0x47a   :  { %v3543_v50 = vadd.f32 %v8418_v36, %v11022_v41  ;;  %v3537_v20 = vpop.f32.mrb[189].mxu1 }
 0x47b   :  { %v3538_v2 = vadd.f32 %v11022_v41, %v3537_v20 }
 0x47c   :  { %v3617_v37 = vmul.f32 0.01, %v3543_v50  ;;  %vm3585_vm11 = vcmp.ge.f32.partialorder %v3543_v50, 0.0 }
 0x47d   :  { %vm3584_vm12 = vcmp.ge.f32.partialorder %v3538_v2, 0.0  ;;  %v3616_v48 = vmul.f32 0.01, %v3538_v2 }
 0x47e   :  { %v3649_v35 = vsel %vm3585_vm11, %v3543_v50, %v3617_v37 }
 0x47f   :  { %v3648_v8 = vsel %vm3584_vm12, %v3538_v2, %v3616_v48 }
 0x480   :  { %8468 = vmatprep.mubr.msk.f32.mxu0 %vm3661_vm13, %v3648_v8 }
 0x481   :  { %v8421_v15 = vpop.f32.mrb[190].mxu1  ;;  %8469 = vmatmul.mubr.msk.f32.gmra.mrb[220].mxu0 %vm3661_vm13, %v3649_v35 }
 0x482   :  { %v3553_v0 = vadd.f32 %v8421_v15, %v11022_v41  ;;  %v3547_v23 = vpop.f32.mrb[191].mxu1 }
 0x483   :  { %v3548_v21 = vadd.f32 %v11022_v41, %v3547_v23 }
 0x484   :  { %v3619_v1 = vmul.f32 0.01, %v3553_v0  ;;  %vm3587_vm14 = vcmp.ge.f32.partialorder %v3553_v0, 0.0 }
 0x485   :  { %vm3586_vm15 = vcmp.ge.f32.partialorder %v3548_v21, 0.0  ;;  %v3618_v53 = vmul.f32 0.01, %v3548_v21 }
 0x486   :  { %v3651_v34 = vsel %vm3587_vm14, %v3553_v0, %v3619_v1 }
 0x487   :  { %v3650_v22 = vsel %vm3586_vm15, %v3548_v21, %v3618_v53 }
 0x488   :  { %8471 = vmatprep.mubr.msk.f32.mxu0 %vm3661_vm13, %v3650_v22 }
 0x489   :  { %8472 = vmatmul.mubr.msk.f32.gmra.mrb[222].mxu0 %vm3661_vm13, %v3651_v34 }
 0x4e4   :  { %v8428_v45 = vpop.f32.mrb[192].mxu0 }
 0x4e5   :  { %v3830_v51 = vadd.f32 %v8428_v45, %v11103_v32  ;;  %v3824_v11 = vpop.f32.mrb[193].mxu0 }
 0x4e6   :  { %v3825_v41 = vadd.f32 %v11103_v32, %v3824_v11 }
 0x4e7   :  { %v4016_v27 = vmul.f32 0.01, %v3830_v51  ;;  %vm3984_vm0 = vcmp.ge.f32.partialorder %v3830_v51, 0.0 }
 0x4e8   :  { %vm3983_vm1 = vcmp.ge.f32.partialorder %v3825_v41, 0.0  ;;  %v4015_v14 = vmul.f32 0.01, %v3825_v41 }
 0x4e9   :  { %v4048_v12 = vsel %vm3984_vm0, %v3830_v51, %v4016_v27 }
 0x4ea   :  { %v4047_v62 = vsel %vm3983_vm1, %v3825_v41, %v4015_v14 }
 0x4eb   :  { %8482 = vmatprep.mubr.msk.f32.mxu1 %vm2665_vm2, %v4047_v62 }
 0x4ec   :  { %v8431_v44 = vpop.f32.mrb[194].mxu0  ;;  %8483 = vmatmul.mubr.msk.f32.vlgmr.msra.gmra.mrb[192].mxu1 %vm2665_vm2, %v4048_v12 }
 0x4ed   :  { %v3840_v38 = vadd.f32 %v8431_v44, %v11103_v32  ;;  %v3834_v60 = vpop.f32.mrb[195].mxu0 }
 0x4ee   :  { %v3835_v40 = vadd.f32 %v11103_v32, %v3834_v60 }
 0x4ef   :  { %v4018_v56 = vmul.f32 0.01, %v3840_v38  ;;  %vm3986_vm13 = vcmp.ge.f32.partialorder %v3840_v38, 0.0 }
 0x4f0   :  { %vm3985_vm3 = vcmp.ge.f32.partialorder %v3835_v40, 0.0  ;;  %v4017_v17 = vmul.f32 0.01, %v3835_v40 }
 0x4f1   :  { %v4050_v31 = vsel %vm3986_vm13, %v3840_v38, %v4018_v56 }
 0x4f2   :  { %v4049_v49 = vsel %vm3985_vm3, %v3835_v40, %v4017_v17 }
 0x4f3   :  { %8485 = vmatprep.mubr.msk.f32.mxu1 %vm2665_vm2, %v4049_v49 }
 0x4f4   :  { %v8434_v18 = vpop.f32.mrb[196].mxu0  ;;  %8486 = vmatmul.mubr.msk.f32.gmra.mrb[194].mxu1 %vm2665_vm2, %v4050_v31 }
 0x4f5   :  { %v3850_v16 = vadd.f32 %v8434_v18, %v11103_v32  ;;  %v3844_v26 = vpop.f32.mrb[197].mxu0 }
 0x4f6   :  { %v3845_v30 = vadd.f32 %v11103_v32, %v3844_v26 }
 0x4f7   :  { %v4020_v7 = vmul.f32 0.01, %v3850_v16  ;;  %vm3988_vm4 = vcmp.ge.f32.partialorder %v3850_v16, 0.0 }
 0x4f8   :  { %vm3987_vm5 = vcmp.ge.f32.partialorder %v3845_v30, 0.0  ;;  %v4019_v29 = vmul.f32 0.01, %v3845_v30 }
 0x4f9   :  { %v4052_v42 = vsel %vm3988_vm4, %v3850_v16, %v4020_v7 }
 0x4fa   :  { %v4051_v13 = vsel %vm3987_vm5, %v3845_v30, %v4019_v29 }
 0x4fb   :  { %8488 = vmatprep.mubr.msk.f32.mxu1 %vm2665_vm2, %v4051_v13 }
 0x4fc   :  { %v8437_v46 = vpop.f32.mrb[198].mxu0  ;;  %8489 = vmatmul.mubr.msk.f32.gmra.mrb[196].mxu1 %vm2665_vm2, %v4052_v42 }
 0x4fd   :  { %v3860_v61 = vadd.f32 %v8437_v46, %v11103_v32  ;;  %v3854_v9 = vpop.f32.mrb[199].mxu0 }
 0x4fe   :  { %v3855_v52 = vadd.f32 %v11103_v32, %v3854_v9 }
 0x4ff   :  { %v4022_v59 = vmul.f32 0.01, %v3860_v61  ;;  %vm3990_vm6 = vcmp.ge.f32.partialorder %v3860_v61, 0.0 }
 0x500   :  { %vm3989_vm7 = vcmp.ge.f32.partialorder %v3855_v52, 0.0  ;;  %v4021_v4 = vmul.f32 0.01, %v3855_v52 }
 0x501   :  { %v4054_v19 = vsel %vm3990_vm6, %v3860_v61, %v4022_v59 }
 0x502   :  { %v4053_v3 = vsel %vm3989_vm7, %v3855_v52, %v4021_v4 }
 0x503   :  { %8491 = vmatprep.mubr.msk.f32.mxu1 %vm2665_vm2, %v4053_v3 }
 0x504   :  { %v8440_v58 = vpop.f32.mrb[200].mxu0  ;;  %8492 = vmatmul.mubr.msk.f32.gmra.mrb[198].mxu1 %vm2665_vm2, %v4054_v19 }
 0x505   :  { %v3870_v47 = vadd.f32 %v8440_v58, %v11103_v32  ;;  %v3864_v25 = vpop.f32.mrb[201].mxu0 }
 0x506   :  { %v3865_v33 = vadd.f32 %v11103_v32, %v3864_v25 }
 0x507   :  { %v4024_v43 = vmul.f32 0.01, %v3870_v47  ;;  %vm3992_vm8 = vcmp.ge.f32.partialorder %v3870_v47, 0.0 }
 0x508   :  { %vm3991_vm9 = vcmp.ge.f32.partialorder %v3865_v33, 0.0  ;;  %v4023_v24 = vmul.f32 0.01, %v3865_v33 }
 0x509   :  { %v4056_v28 = vsel %vm3992_vm8, %v3870_v47, %v4024_v43 }
 0x50a   :  { %v4055_v57 = vsel %vm3991_vm9, %v3865_v33, %v4023_v24 }
 0x50b   :  { %8494 = vmatprep.mubr.msk.f32.mxu1 %vm2665_vm2, %v4055_v57 }
 0x50c   :  { %v8443_v5 = vpop.f32.mrb[202].mxu0  ;;  %8495 = vmatmul.mubr.msk.f32.gmra.mrb[200].mxu1 %vm2665_vm2, %v4056_v28 }
 0x50d   :  { %v3880_v55 = vadd.f32 %v8443_v5, %v11103_v32  ;;  %v3874_v39 = vpop.f32.mrb[203].mxu0 }
 0x50e   :  { %v3875_v6 = vadd.f32 %v11103_v32, %v3874_v39 }
 0x50f   :  { %v4026_v63 = vmul.f32 0.01, %v3880_v55  ;;  %vm3994_vm10 = vcmp.ge.f32.partialorder %v3880_v55, 0.0 }
 0x510   :  { %vm3993_vm11 = vcmp.ge.f32.partialorder %v3875_v6, 0.0  ;;  %v4025_v10 = vmul.f32 0.01, %v3875_v6 }
 0x511   :  { %v4058_v50 = vsel %vm3994_vm10, %v3880_v55, %v4026_v63 }
 0x512   :  { %v4057_v36 = vsel %vm3993_vm11, %v3875_v6, %v4025_v10 }
 0x513   :  { %8497 = vmatprep.mubr.msk.f32.mxu1 %vm2665_vm2, %v4057_v36 }
 0x514   :  { %v8446_v20 = vpop.f32.mrb[204].mxu0  ;;  %8498 = vmatmul.mubr.msk.f32.gmra.mrb[202].mxu1 %vm2665_vm2, %v4058_v50 }
 0x515   :  { %v3890_v2 = vadd.f32 %v8446_v20, %v11103_v32  ;;  %v3884_v37 = vpop.f32.mrb[205].mxu0 }
 0x516   :  { %v3885_v48 = vadd.f32 %v11103_v32, %v3884_v37 }
 0x517   :  { %v4028_v8 = vmul.f32 0.01, %v3890_v2  ;;  %vm3996_vm12 = vcmp.ge.f32.partialorder %v3890_v2, 0.0 }
 0x518   :  { %vm3995_vm14 = vcmp.ge.f32.partialorder %v3885_v48, 0.0  ;;  %v4027_v35 = vmul.f32 0.01, %v3885_v48 }
 0x519   :  { %v4060_v0 = vsel %vm3996_vm12, %v3890_v2, %v4028_v8 }
 0x51a   :  { %v4059_v15 = vsel %vm3995_vm14, %v3885_v48, %v4027_v35  ;;  %v9161_v35 = vmov 0  }
 0x51b   :  { %8500 = vmatprep.mubr.msk.f32.mxu1 %vm2665_vm2, %v4059_v15  ;;  %9131 = vset.pattern.permute.xlu0 %v9161_v35 }
 0x51c   :  { %v8449_v23 = vpop.f32.mrb[206].mxu0  ;;  %8501 = vmatmul.mubr.msk.f32.gmra.mrb[204].mxu1 %vm2665_vm2, %v4060_v0  ;;  %9132 = vset.pattern.permute.xlu1 %v9161_v35 }
 0x51d   :  { %v3900_v21 = vadd.f32 %v8449_v23, %v11103_v32  ;;  %v3894_v1 = vpop.f32.mrb[207].mxu0 }
 0x51e   :  { %v3895_v53 = vadd.f32 %v11103_v32, %v3894_v1 }
 0x51f   :  { %v4030_v22 = vmul.f32 0.01, %v3900_v21  ;;  %vm3998_vm15 = vcmp.ge.f32.partialorder %v3900_v21, 0.0 }
 0x520   :  { %vm3997_vm0 = vcmp.ge.f32.partialorder %v3895_v53, 0.0  ;;  %v4029_v34 = vmul.f32 0.01, %v3895_v53 }
 0x521   :  { %v4062_v51 = vsel %vm3998_vm15, %v3900_v21, %v4030_v22 }
 0x522   :  { %v4061_v45 = vsel %vm3997_vm0, %v3895_v53, %v4029_v34 }
 0x523   :  { %8503 = vmatprep.mubr.msk.f32.mxu1 %vm2665_vm2, %v4061_v45 }
 0x524   :  { %v8452_v11 = vpop.f32.mrb[208].mxu0  ;;  %8504 = vmatmul.mubr.msk.f32.gmra.mrb[206].mxu1 %vm2665_vm2, %v4062_v51 }
 0x525   :  { %v3910_v41 = vadd.f32 %v8452_v11, %v11103_v32  ;;  %v3904_v27 = vpop.f32.mrb[209].mxu0 }
 0x526   :  { %v3905_v14 = vadd.f32 %v11103_v32, %v3904_v27 }
 0x527   :  { %v4032_v62 = vmul.f32 0.01, %v3910_v41  ;;  %vm4000_vm1 = vcmp.ge.f32.partialorder %v3910_v41, 0.0 }
 0x528   :  { %vm3999_vm13 = vcmp.ge.f32.partialorder %v3905_v14, 0.0  ;;  %v4031_v12 = vmul.f32 0.01, %v3905_v14 }
 0x529   :  { %v4064_v38 = vsel %vm4000_vm1, %v3910_v41, %v4032_v62 }
 0x52a   :  { %v4063_v44 = vsel %vm3999_vm13, %v3905_v14, %v4031_v12  ;;  %v9162_v14 = vmov 1966171168   ;;  %vm7693_vm13 = vcmask 195712  }
 0x52b   :  { %8506 = vmatprep.mubr.msk.f32.mxu1 %vm2665_vm2, %v4063_v44  ;;  %v4445_v62 = vunpack.c.l.s4 %v9162_v14  ;;  %v11169_v44 = vld [vmem:[#allocation2] ss:$0 sm:$0xff] }
 0x52c   :  { %v8455_v60 = vpop.f32.mrb[210].mxu0  ;;  %8507 = vmatmul.mubr.msk.f32.gmra.mrb[208].mxu1 %vm2665_vm2, %v4064_v38 }
 0x52d   :  { %v3920_v40 = vadd.f32 %v8455_v60, %v11103_v32  ;;  %v3914_v56 = vpop.f32.mrb[211].mxu0  ;;  %v4446_v12 = vunpack.c.0.s8 %v4445_v62 }
 0x52e   :  { %v3915_v17 = vadd.f32 %v11103_v32, %v3914_v56 }
 0x52f   :  { %v4034_v49 = vmul.f32 0.01, %v3920_v40  ;;  %vm4002_vm3 = vcmp.ge.f32.partialorder %v3920_v40, 0.0  ;;  %v11172_v38 = vsub.s32 %v4446_v12, %v12187_v54 }
 0x530   :  { %vm4001_vm4 = vcmp.ge.f32.partialorder %v3915_v17, 0.0  ;;  %v4033_v31 = vmul.f32 0.01, %v3915_v17 }
 0x531   :  { %v4066_v16 = vsel %vm4002_vm3, %v3920_v40, %v4034_v49  ;;  %vm7700_vm3 = vcmask 261312  }
 0x532   :  { %v4065_v18 = vsel %vm4001_vm4, %v3915_v17, %v4033_v31  ;;  %vm7707_vm4 = vcmask 326912  }
 0x533   :  { %8509 = vmatprep.mubr.msk.f32.mxu1 %vm2665_vm2, %v4065_v18 }
 0x534   :  { %v8458_v26 = vpop.f32.mrb[212].mxu0  ;;  %8510 = vmatmul.mubr.msk.f32.gmra.mrb[210].mxu1 %vm2665_vm2, %v4066_v16 }
 0x535   :  { %v3930_v30 = vadd.f32 %v8458_v26, %v11103_v32  ;;  %v3924_v7 = vpop.f32.mrb[213].mxu0 }
 0x536   :  { %v3925_v29 = vadd.f32 %v11103_v32, %v3924_v7 }
 0x537   :  { %v4036_v13 = vmul.f32 0.01, %v3930_v30  ;;  %vm4004_vm5 = vcmp.ge.f32.partialorder %v3930_v30, 0.0 }
 0x538   :  { %vm4003_vm6 = vcmp.ge.f32.partialorder %v3925_v29, 0.0  ;;  %v4035_v42 = vmul.f32 0.01, %v3925_v29 }
 0x539   :  { %v4068_v61 = vsel %vm4004_vm5, %v3930_v30, %v4036_v13  ;;  %vm7714_vm5 = vcmask 392512  }
 0x53a   :  { %v4067_v46 = vsel %vm4003_vm6, %v3925_v29, %v4035_v42  ;;  %vm7721_vm6 = vcmask 458112  }
 0x53b   :  { %8512 = vmatprep.mubr.msk.f32.mxu1 %vm2665_vm2, %v4067_v46 }
 0x53c   :  { %v8461_v9 = vpop.f32.mrb[214].mxu0  ;;  %8513 = vmatmul.mubr.msk.f32.gmra.mrb[212].mxu1 %vm2665_vm2, %v4068_v61 }
 0x53d   :  { %v3940_v52 = vadd.f32 %v8461_v9, %v11103_v32  ;;  %v3934_v59 = vpop.f32.mrb[215].mxu0 }
 0x53e   :  { %v3935_v4 = vadd.f32 %v11103_v32, %v3934_v59 }
 0x53f   :  { %v4038_v3 = vmul.f32 0.01, %v3940_v52  ;;  %vm4006_vm7 = vcmp.ge.f32.partialorder %v3940_v52, 0.0 }
 0x540   :  { %vm4005_vm8 = vcmp.ge.f32.partialorder %v3935_v4, 0.0  ;;  %v4037_v19 = vmul.f32 0.01, %v3935_v4 }
 0x541   :  { %v4070_v47 = vsel %vm4006_vm7, %v3940_v52, %v4038_v3  ;;  %vm7728_vm7 = vcmask 523712  }
 0x542   :  { %v4069_v58 = vsel %vm4005_vm8, %v3935_v4, %v4037_v19  ;;  %vm7735_vm8 = vcmask 589312  }
 0x543   :  { %8515 = vmatprep.mubr.msk.f32.mxu1 %vm2665_vm2, %v4069_v58 }
 0x544   :  { %v8464_v25 = vpop.f32.mrb[216].mxu0  ;;  %8516 = vmatmul.mubr.msk.f32.gmra.mrb[214].mxu1 %vm2665_vm2, %v4070_v47 }
 0x545   :  { %v3950_v33 = vadd.f32 %v8464_v25, %v11103_v32  ;;  %v3944_v43 = vpop.f32.mrb[217].mxu0 }
 0x546   :  { %v3945_v24 = vadd.f32 %v11103_v32, %v3944_v43 }
 0x547   :  { %v4040_v57 = vmul.f32 0.01, %v3950_v33  ;;  %vm4008_vm9 = vcmp.ge.f32.partialorder %v3950_v33, 0.0 }
 0x548   :  { %vm4007_vm10 = vcmp.ge.f32.partialorder %v3945_v24, 0.0  ;;  %v4039_v28 = vmul.f32 0.01, %v3945_v24 }
 0x549   :  { %v4072_v55 = vsel %vm4008_vm9, %v3950_v33, %v4040_v57  ;;  %vm7742_vm9 = vcmask 654912  }
 0x54a   :  { %v4071_v5 = vsel %vm4007_vm10, %v3945_v24, %v4039_v28  ;;  %vm7749_vm10 = vcmask 720512  }
 0x54b   :  { %8518 = vmatprep.mubr.msk.f32.mxu1 %vm2665_vm2, %v4071_v5 }
 0x54c   :  { %v8467_v39 = vpop.f32.mrb[218].mxu0  ;;  %8519 = vmatmul.mubr.msk.f32.gmra.mrb[216].mxu1 %vm2665_vm2, %v4072_v55 }
 0x54d   :  { %v3960_v6 = vadd.f32 %v8467_v39, %v11103_v32  ;;  %v3954_v63 = vpop.f32.mrb[219].mxu0 }
 0x54e   :  { %v3955_v10 = vadd.f32 %v11103_v32, %v3954_v63 }
 0x54f   :  { %v4042_v36 = vmul.f32 0.01, %v3960_v6  ;;  %vm4010_vm11 = vcmp.ge.f32.partialorder %v3960_v6, 0.0 }
 0x550   :  { %vm4009_vm12 = vcmp.ge.f32.partialorder %v3955_v10, 0.0  ;;  %v4041_v50 = vmul.f32 0.01, %v3955_v10 }
 0x551   :  { %v4074_v2 = vsel %vm4010_vm11, %v3960_v6, %v4042_v36  ;;  %vm7756_vm11 = vcmask 786112  }
 0x552   :  { %v4073_v20 = vsel %vm4009_vm12, %v3955_v10, %v4041_v50  ;;  %vm7763_vm12 = vcmask 851712  }
 0x553   :  { %8521 = vmatprep.mubr.msk.f32.mxu1 %vm2665_vm2, %v4073_v20 }
 0x554   :  { %v8470_v37 = vpop.f32.mrb[220].mxu0  ;;  %8522 = vmatmul.mubr.msk.f32.gmra.mrb[218].mxu1 %vm2665_vm2, %v4074_v2 }
 0x555   :  { %v3970_v48 = vadd.f32 %v8470_v37, %v11103_v32  ;;  %v3964_v8 = vpop.f32.mrb[221].mxu0 }
 0x556   :  { %v3965_v15 = vadd.f32 %v11103_v32, %v3964_v8 }
 0x557   :  { %v4044_v0 = vmul.f32 0.01, %v3970_v48  ;;  %vm4012_vm14 = vcmp.ge.f32.partialorder %v3970_v48, 0.0 }
 0x558   :  { %vm4011_vm15 = vcmp.ge.f32.partialorder %v3965_v15, 0.0  ;;  %v4043_v23 = vmul.f32 0.01, %v3965_v15 }
 0x559   :  { %v4076_v1 = vsel %vm4012_vm14, %v3970_v48, %v4044_v0  ;;  %vm7770_vm14 = vcmask 917312  }
 0x55a   :  { %v4075_v21 = vsel %vm4011_vm15, %v3965_v15, %v4043_v23  ;;  %vm7777_vm15 = vcmask 982912  }
 0x55b   :  { %8524 = vmatprep.mubr.msk.f32.mxu1 %vm2665_vm2, %v4075_v21 }
 0x55c   :  { %v8473_v53 = vpop.f32.mrb[222].mxu0  ;;  %8525 = vmatmul.mubr.msk.f32.gmra.mrb[220].mxu1 %vm2665_vm2, %v4076_v1 }
 0x55d   :  { %v3980_v22 = vadd.f32 %v8473_v53, %v11103_v32  ;;  %v3974_v34 = vpop.f32.mrb[223].mxu0 }
 0x55e   :  { %v3975_v45 = vadd.f32 %v11103_v32, %v3974_v34 }
 0x55f   :  { %v4046_v51 = vmul.f32 0.01, %v3980_v22  ;;  %vm4014_vm0 = vcmp.ge.f32.partialorder %v3980_v22, 0.0 }
 0x560   :  { %vm4013_vm1 = vcmp.ge.f32.partialorder %v3975_v45, 0.0  ;;  %v4045_v11 = vmul.f32 0.01, %v3975_v45 }
 0x561   :  { %v4078_v27 = vsel %vm4014_vm0, %v3980_v22, %v4046_v51  ;;  %vm7784_vm0 = vcmask 1048512  }
 0x562   :  { %v4077_v41 = vsel %vm4013_vm1, %v3975_v45, %v4045_v11 }
 0x563   :  { %8527 = vmatprep.mubr.msk.f32.mxu1 %vm2665_vm2, %v4077_v41 }
 0x564   :  { %8528 = vmatmul.mubr.msk.f32.gmra.mrb[222].mxu1 %vm2665_vm2, %v4078_v27  ;;  %vm7686_vm2 = vcmask 130112  }
 0x5bf   :  { %v8484_v60 = vpop.f32.mrb[192].mxu1 }
 0x5c0   :  { %v4258_v32 = vadd.f32 %v8484_v60, %v11169_v44  ;;  %v4252_v40 = vpop.f32.mrb[193].mxu1 }
 0x5c1   :  { %v4253_v56 = vadd.f32 %v11169_v44, %v4252_v40 }
 0x5c2   :  { %v4492_v17 = vcombine.high %v4258_v32, %v4258_v32  ;;  %v4499_v49 = vrot.slane %v4258_v32, %v11172_v38 }
 0x5c3   :  { %v4443_v31 = vcombine.high %v4253_v56, %v4253_v56  ;;  %v4450_v18 = vrot.slane %v4253_v56, %v11172_v38 }
 0x5c4   :  { %v4506_v16 = vrot.slane %v4492_v17, %v11172_v38  ;;  %v4507_v26 = vcombine.high %v4499_v49, %v4499_v49  ;;  %v4515_v59 = vrot.slane %v4499_v49, %v11172_v38 }
 0x5c5   :  { %v4457_v30 = vrot.slane %v4443_v31, %v11172_v38  ;;  %v4458_v7 = vcombine.high %v4450_v18, %v4450_v18  ;;  %v4466_v43 = vrot.slane %v4450_v18, %v11172_v38 }
 0x5c6   :  { %v4508_v29 = vcombine.high %v4506_v16, %v4506_v16  ;;  %v4529_v13 = vrot.slane %v4507_v26, %v11172_v38  ;;  %v4522_v19 = vrot.slane %v4506_v16, %v11172_v38 }
 0x5c7   :  { %v4459_v42 = vcombine.high %v4457_v30, %v4457_v30  ;;  %v8487_v46 = vpop.f32.mrb[194].mxu1  ;;  %v4480_v4 = vrot.slane %v4458_v7, %v11172_v38  ;;  %v11194_v39 = vrot.slane %v4457_v30, %v11172_v38 }
 0x5c8   :  { %v4536_v61 = vrot.slane %v4508_v29, %v11172_v38  ;;  %v4268_v9 = vadd.f32 %v8487_v46, %v11169_v44  ;;  %v4262_v52 = vpop.f32.mrb[195].mxu1  ;;  %v6060_v25 = vcombine.low %v4515_v59, %v4529_v13  ;;  %v8070_v33 = vcombine.high %v4515_v59, %v4529_v13 }
 0x5c9   :  { %v4263_v3 = vadd.f32 %v11169_v44, %v4262_v52  ;;  %v11190_v24 = vrot.slane %v4459_v42, %v11172_v38  ;;  %v6011_v6 = vcombine.low %v4466_v43, %v4480_v4  ;;  %v8068_v10 = vcombine.high %v4466_v43, %v4480_v4 }
 0x5ca   :  { %v4590_v58 = vcombine.high %v4268_v9, %v4268_v9  ;;  %v4597_v47 = vrot.slane %v4268_v9, %v11172_v38  ;;  %v6062_v57 = vcombine.low %v4522_v19, %v4536_v61  ;;  %v8071_v28 = vcombine.high %v4522_v19, %v4536_v61 }
 0x5cb   :  { %v4541_v55 = vcombine.high %v4263_v3, %v4263_v3  ;;  %v4548_v63 = vrot.slane %v4263_v3, %v11172_v38  ;;  %v6013_v20 = vcombine.low %v11194_v39, %v11190_v24  ;;  %v8069_v2 = vcombine.high %v11194_v39, %v11190_v24 }
 0x5cc   :  { %v4604_v5 = vrot.slane %v4590_v58, %v11172_v38  ;;  %v4605_v36 = vcombine.high %v4597_v47, %v4597_v47  ;;  %v6070_v15 = vrot.slane %v6060_v25, %v11172_v38  ;;  %v6077_v0 = vrot.slane %v8070_v33, %v11172_v38 }
 0x5cd   :  { %v4555_v50 = vrot.slane %v4541_v55, %v11172_v38  ;;  %v4556_v48 = vcombine.high %v4548_v63, %v4548_v63  ;;  %v6084_v23 = vrot.slane %v6062_v57, %v11172_v38  ;;  %v6091_v21 = vrot.slane %v8071_v28, %v11172_v38 }
 0x5ce   :  { %v4606_v37 = vcombine.high %v4604_v5, %v4604_v5  ;;  %v11207_v1 = vrot.slane %v6011_v6, %v11172_v38  ;;  %v11212_v45 = vrot.slane %v8068_v10, %v11172_v38  ;;  %v11215_v51 = vrot.slane %v4597_v47, %v11172_v38 }
 0x5cf   :  { %v8490_v8 = vpop.f32.mrb[196].mxu1  ;;  %v4557_v53 = vcombine.high %v4555_v50, %v4555_v50  ;;  %v11218_v11 = vrot.slane %v4604_v5, %v11172_v38  ;;  %v4627_v41 = vrot.slane %v4605_v36, %v11172_v38  ;;  %v4578_v14 = vrot.slane %v4556_v48, %v11172_v38 }
 0x5d0   :  { %v4272_v35 = vpop.f32.mrb[197].mxu1  ;;  %v4278_v22 = vadd.f32 %v8490_v8, %v11169_v44  ;;  %v11222_v27 = vrot.slane %v4606_v37, %v11172_v38  ;;  %v6092_v40 = vcombine.low %v6070_v15, %v6077_v0  ;;  %v6093_v56 = vcombine.low %v6084_v23, %v6091_v21 }
 0x5d1   :  { %v4273_v34 = vadd.f32 %v11169_v44, %v4272_v35  ;;  %v4564_v17 = vrot.slane %v4548_v63, %v11172_v38  ;;  %v11229_v49 = vrot.slane %v4557_v53, %v11172_v38  ;;  %v6158_v16 = vcombine.low %v11215_v51, %v4627_v41 }
 0x5d2   :  { %v4688_v62 = vcombine.high %v4278_v22, %v4278_v22  ;;  %v4695_v12 = vrot.slane %v4278_v22, %v11172_v38  ;;  %v8074_v26 = vcombine.high %v11215_v51, %v4627_v41  ;;  %v6160_v29 = vcombine.low %v11218_v11, %v11222_v27 }
 0x5d3   :  { %v4639_v60 = vcombine.high %v4273_v34, %v4273_v34  ;;  %v4646_v32 = vrot.slane %v4273_v34, %v11172_v38  ;;  %v11238_v13 = vrot.slane %v4555_v50, %v11172_v38  ;;  %v6109_v42 = vcombine.low %v4564_v17, %v4578_v14 }
 0x5d4   :  { %v4702_v31 = vrot.slane %v4688_v62, %v11172_v38  ;;  %v4703_v18 = vcombine.high %v4695_v12, %v4695_v12  ;;  %v8072_v46 = vcombine.high %v4564_v17, %v4578_v14  ;;  %v6100_v59 = vrot.slane %v6092_v40, %v11172_v38 }
 0x5d5   :  { %v4653_v30 = vrot.slane %v4639_v60, %v11172_v38  ;;  %v4654_v7 = vcombine.high %v4646_v32, %v4646_v32  ;;  %v6107_v4 = vrot.slane %v6093_v56, %v11172_v38  ;;  %v8075_v19 = vcombine.high %v11218_v11, %v11222_v27 }
 0x5d6   :  { %v4704_v9 = vcombine.high %v4702_v31, %v4702_v31  ;;  %v4725_v52 = vrot.slane %v4703_v18, %v11172_v38  ;;  %v6111_v58 = vcombine.low %v11238_v13, %v11229_v49  ;;  %v8073_v47 = vcombine.high %v11238_v13, %v11229_v49 }
 0x5d7   :  { %v8493_v61 = vpop.f32.mrb[198].mxu1  ;;  %v4711_v33 = vrot.slane %v4695_v12, %v11172_v38  ;;  %v4655_v43 = vcombine.high %v4653_v30, %v4653_v30  ;;  %v4676_v57 = vrot.slane %v4654_v7, %v11172_v38  ;;  %v6108_v28 = vcombine.low %v6100_v59, %v6107_v4 }
 0x5d8   :  { %v4282_v3 = vpop.f32.mrb[199].mxu1  ;;  %v4288_v25 = vadd.f32 %v8493_v61, %v11169_v44  ;;  %v11253_v5 = vrot.slane %v6109_v42, %v11172_v38  ;;  %v11256_v55 = vrot.slane %v8072_v46, %v11172_v38  ;;  %v11259_v6 = vrot.slane %v4702_v31, %v11172_v38 }
 0x5d9   :  { %v4662_v63 = vrot.slane %v4646_v32, %v11172_v38  ;;  %v11263_v10 = vrot.slane %v4704_v9, %v11172_v38  ;;  %v6256_v36 = vcombine.low %v4711_v33, %v4725_v52  ;;  %v8078_v50 = vcombine.high %v4711_v33, %v4725_v52  ;;  %7583 = vperm.xlu0 %9131, %v6108_v28  }
 0x5da   :  { %v11266_v37 = vrot.slane %v4653_v30, %v11172_v38  ;;  %v4786_v48 = vcombine.high %v4288_v25, %v4288_v25  ;;  %v4793_v8 = vrot.slane %v4288_v25, %v11172_v38  ;;  %v4283_v35 = vadd.f32 %v11169_v44, %v4282_v3 }
 0x5db   :  { %v6035_v15 = vrot.slane %v6013_v20, %v11172_v38  ;;  %v11275_v0 = vrot.slane %v4655_v43, %v11172_v38  ;;  %v6207_v23 = vcombine.low %v4662_v63, %v4676_v57  ;;  %v6042_v21 = vrot.slane %v8069_v2, %v11172_v38 }
 0x5dc   :  { %v6043_v53 = vcombine.low %v11207_v1, %v11212_v45  ;;  %v8076_v22 = vcombine.high %v4662_v63, %v4676_v57  ;;  %v4800_v34 = vrot.slane %v4786_v48, %v11172_v38  ;;  %v4801_v51 = vcombine.high %v4793_v8, %v4793_v8 }
 0x5dd   :  { %v4737_v11 = vcombine.high %v4283_v35, %v4283_v35  ;;  %v4744_v20 = vrot.slane %v4283_v35, %v11172_v38  ;;  %v6044_v27 = vcombine.low %v6035_v15, %v6042_v21  ;;  %v6168_v14 = vrot.slane %v6158_v16, %v11172_v38 }
 0x5de   :  { %v6175_v62 = vrot.slane %v8074_v26, %v11172_v38  ;;  %v6258_v24 = vcombine.low %v11259_v6, %v11263_v10  ;;  %v8079_v39 = vcombine.high %v11259_v6, %v11263_v10  ;;  %v6051_v2 = vrot.slane %v6043_v53, %v11172_v38 }
 0x5df   :  { %v8496_v41 = vpop.f32.mrb[200].mxu1  ;;  %v6182_v1 = vrot.slane %v6160_v29, %v11172_v38  ;;  %v4802_v45 = vcombine.high %v4800_v34, %v4800_v34  ;;  %v4823_v60 = vrot.slane %v4801_v51, %v11172_v38  ;;  %v6058_v32 = vrot.slane %v6044_v27, %v11172_v38 }
 0x5e0   :  { %v4292_v12 = vpop.f32.mrb[201].mxu1  ;;  %v6189_v40 = vrot.slane %v8075_v19, %v11172_v38  ;;  %v11297_v56 = vrot.slane %v6256_v36, %v11172_v38  ;;  %v11300_v17 = vrot.slane %v8078_v50, %v11172_v38  ;;  %v6209_v31 = vcombine.low %v11266_v37, %v11275_v0 }
 0x5e1   :  { %v4751_v18 = vrot.slane %v4737_v11, %v11172_v38  ;;  %v4809_v16 = vrot.slane %v4793_v8, %v11172_v38  ;;  %v4752_v26 = vcombine.high %v4744_v20, %v4744_v20  ;;  %v6059_v30 = vcombine.low %v6051_v2, %v6058_v32 }
 0x5e2   :  { %v6190_v7 = vcombine.low %v6168_v14, %v6175_v62  ;;  %v8077_v29 = vcombine.high %v11266_v37, %v11275_v0  ;;  %v11309_v42 = vrot.slane %v6207_v23, %v11172_v38  ;;  %v11312_v46 = vrot.slane %v8076_v22, %v11172_v38 }
 0x5e3   :  { %v11315_v61 = vrot.slane %v4800_v34, %v11172_v38  ;;  %v11318_v9 = vrot.slane %v4802_v45, %v11172_v38  ;;  %v6354_v52 = vcombine.low %v4809_v16, %v4823_v60  ;;  %v4760_v59 = vrot.slane %v4744_v20, %v11172_v38  ;;  %7580 = vperm.xlu0 %9131, %v6059_v30  }
 0x5e4   :  { %v6191_v4 = vcombine.low %v6182_v1, %v6189_v40  ;;  %v8082_v3 = vcombine.high %v4809_v16, %v4823_v60  ;;  %v4753_v19 = vcombine.high %v4751_v18, %v4751_v18  ;;  %v4298_v25 = vadd.f32 %v8496_v41, %v11169_v44 }
 0x5e5   :  { %v4293_v33 = vadd.f32 %v11169_v44, %v4292_v12  ;;  %v11324_v57 = vrot.slane %v4751_v18, %v11172_v38  ;;  %v4774_v28 = vrot.slane %v4752_v26, %v11172_v38  ;;  %v6198_v6 = vrot.slane %v6190_v7, %v11172_v38 }
 0x5e6   :  { %v6133_v63 = vrot.slane %v6111_v58, %v11172_v38  ;;  %v6205_v36 = vrot.slane %v6191_v4, %v11172_v38  ;;  %v4884_v50 = vcombine.high %v4298_v25, %v4298_v25  ;;  %v4891_v48 = vrot.slane %v4298_v25, %v11172_v38 }
 0x5e7   :  { %v8499_v43 = vpop.f32.mrb[202].mxu1  ;;  %v4835_v8 = vcombine.high %v4293_v33, %v4293_v33  ;;  %v6356_v35 = vcombine.low %v11315_v61, %v11318_v9  ;;  %v4842_v15 = vrot.slane %v4293_v33, %v11172_v38  ;;  %v6140_v23 = vrot.slane %v8073_v47, %v11172_v38 }
 0x5e8   :  { %v4302_v10 = vpop.f32.mrb[203].mxu1  ;;  %v6141_v58 = vcombine.low %v11253_v5, %v11256_v55  ;;  %v11344_v21 = vrot.slane %v4753_v19, %v11172_v38  ;;  %v6206_v53 = vcombine.low %v6198_v6, %v6205_v36  ;;  %v4898_v22 = vrot.slane %v4884_v50, %v11172_v38 }
 0x5e9   :  { %v4899_v34 = vcombine.high %v4891_v48, %v4891_v48  ;;  %v8083_v51 = vcombine.high %v11315_v61, %v11318_v9  ;;  %v6305_v11 = vcombine.low %v4760_v59, %v4774_v28  ;;  %v8080_v41 = vcombine.high %v4760_v59, %v4774_v28 }
 0x5ea   :  { %v6142_v20 = vcombine.low %v6133_v63, %v6140_v23  ;;  %v11350_v27 = vrot.slane %v6354_v52, %v11172_v38  ;;  %v11353_v49 = vrot.slane %v8082_v3, %v11172_v38  ;;  %7589 = vperm.xlu1 %9132, %v6206_v53   ;;  %v4849_v13 = vrot.slane %v4835_v8, %v11172_v38 }
 0x5eb   :  { %v4850_v47 = vcombine.high %v4842_v15, %v4842_v15  ;;  %v4900_v5 = vcombine.high %v4898_v22, %v4898_v22  ;;  %v11357_v55 = vrot.slane %v4899_v34, %v11172_v38  ;;  %v6149_v14 = vrot.slane %v6141_v58, %v11172_v38 }
 0x5ec   :  { %v6156_v62 = vrot.slane %v6142_v20, %v11172_v38  ;;  %v6307_v12 = vcombine.low %v11324_v57, %v11344_v21  ;;  %v8081_v2 = vcombine.high %v11324_v57, %v11344_v21  ;;  %v6280_v1 = vrot.slane %v6258_v24, %v11172_v38 }
 0x5ed   :  { %v6287_v45 = vrot.slane %v8079_v39, %v11172_v38  ;;  %v11370_v32 = vrot.slane %v6305_v11, %v11172_v38  ;;  %v11373_v40 = vrot.slane %v8080_v41, %v11172_v38  ;;  %v4907_v18 = vrot.slane %v4891_v48, %v11172_v38 }
 0x5ee   :  { %v6157_v16 = vcombine.low %v6149_v14, %v6156_v62  ;;  %v11379_v30 = vrot.slane %v4898_v22, %v11172_v38  ;;  %v4851_v7 = vcombine.high %v4849_v13, %v4849_v13  ;;  %v4858_v24 = vrot.slane %v4842_v15, %v11172_v38 }
 0x5ef   :  { %v11367_v60 = vpop.f32.mrb[204].mxu1  ;;  %v11383_v39 = vrot.slane %v4849_v13, %v11172_v38  ;;  %v11386_v61 = vrot.slane %v4900_v5, %v11172_v38  ;;  %v6452_v9 = vcombine.low %v4907_v18, %v11357_v55  ;;  %v8086_v52 = vcombine.high %v4907_v18, %v11357_v55 }
 0x5f0   :  { %v11376_v26 = vpop.f32.mrb[205].mxu1  ;;  %v4872_v59 = vrot.slane %v4850_v47, %v11172_v38  ;;  %7586 = vperm.xlu1 %9132, %v6157_v16   ;;  %v6288_v4 = vcombine.low %v11297_v56, %v11300_v17  ;;  %v6289_v3 = vcombine.low %v6280_v1, %v6287_v45  ;;  %v6231_v19 = vrot.slane %v6209_v31, %v11172_v38 }
 0x5f1   :  { %v6238_v25 = vrot.slane %v8077_v29, %v11172_v38  ;;  %v6239_v33 = vcombine.low %v11309_v42, %v11312_v46  ;;  %v4308_v28 = vadd.f32 %v8499_v43, %v11169_v44  ;;  %v4303_v6 = vadd.f32 %v11169_v44, %v4302_v10 }
 0x5f2   :  { %v6378_v56 = vrot.slane %v6356_v35, %v11172_v38  ;;  %v6296_v17 = vrot.slane %v6288_v4, %v11172_v38  ;;  %v6303_v63 = vrot.slane %v6289_v3, %v11172_v38  ;;  %v6385_v31 = vrot.slane %v8083_v51, %v11172_v38 }
 0x5f3   :  { %v6240_v36 = vcombine.low %v6231_v19, %v6238_v25  ;;  %v6247_v50 = vrot.slane %v6239_v33, %v11172_v38  ;;  %v4982_v37 = vcombine.high %v4308_v28, %v4308_v28  ;;  %v4989_v0 = vrot.slane %v4308_v28, %v11172_v38 }
 0x5f4   :  { %v4933_v29 = vcombine.high %v4303_v6, %v4303_v6  ;;  %v6304_v42 = vcombine.low %v6296_v17, %v6303_v63  ;;  %v4940_v43 = vrot.slane %v4303_v6, %v11172_v38  ;;  %v6386_v10 = vcombine.low %v11350_v27, %v11353_v49 }
 0x5f5   :  { %v6254_v46 = vrot.slane %v6240_v36, %v11172_v38  ;;  %v11418_v8 = vrot.slane %v4851_v7, %v11172_v38  ;;  %v6403_v35 = vcombine.low %v4858_v24, %v4872_v59  ;;  %v4996_v15 = vrot.slane %v4982_v37, %v11172_v38 }
 0x5f6   :  { %v4997_v23 = vcombine.high %v4989_v0, %v4989_v0  ;;  %v8084_v53 = vcombine.high %v4858_v24, %v4872_v59  ;;  %7595 = vperm.xlu1 %9132, %v6304_v42   ;;  %v4947_v34 = vrot.slane %v4933_v29, %v11172_v38  ;;  %v6387_v51 = vcombine.low %v6378_v56, %v6385_v31 }
 0x5f7   :  { %v11415_v48 = vpop.f32.mrb[206].mxu1  ;;  %v6255_v22 = vcombine.low %v6247_v50, %v6254_v46  ;;  %v6454_v11 = vcombine.low %v11379_v30, %v11386_v61  ;;  %v8087_v41 = vcombine.high %v11379_v30, %v11386_v61  ;;  %v6462_v20 = vrot.slane %v6452_v9, %v11172_v38 }
 0x5f8   :  { %v11421_v58 = vpop.f32.mrb[207].mxu1  ;;  %v4948_v27 = vcombine.high %v4940_v43, %v4940_v43  ;;  %v4998_v49 = vcombine.high %v4996_v15, %v4996_v15  ;;  %v5019_v13 = vrot.slane %v4997_v23, %v11172_v38  ;;  %v6394_v47 = vrot.slane %v6386_v10, %v11172_v38 }
 0x5f9   :  { %7592 = vperm.xlu0 %9131, %v6255_v22   ;;  %v6401_v5 = vrot.slane %v6387_v51, %v11172_v38  ;;  %v6469_v55 = vrot.slane %v8086_v52, %v11172_v38  ;;  %v6405_v14 = vcombine.low %v11383_v39, %v11418_v8  ;;  %v8085_v62 = vcombine.high %v11383_v39, %v11418_v8 }
 0x5fa   :  { %v11438_v1 = vrot.slane %v6403_v35, %v11172_v38  ;;  %v11441_v45 = vrot.slane %v8084_v53, %v11172_v38  ;;  %v5005_v18 = vrot.slane %v4989_v0, %v11172_v38  ;;  %v4949_v16 = vcombine.high %v4947_v34, %v4947_v34 }
 0x5fb   :  { %v6402_v30 = vcombine.low %v6394_v47, %v6401_v5  ;;  %v11445_v7 = vrot.slane %v4996_v15, %v11172_v38  ;;  %v4956_v24 = vrot.slane %v4940_v43, %v11172_v38  ;;  %v4970_v61 = vrot.slane %v4948_v27, %v11172_v38 }
 0x5fc   :  { %v6329_v39 = vrot.slane %v6307_v12, %v11172_v38  ;;  %v11454_v9 = vrot.slane %v4998_v49, %v11172_v38  ;;  %v6550_v52 = vcombine.low %v5005_v18, %v5019_v13  ;;  %v8090_v59 = vcombine.high %v5005_v18, %v5019_v13 }
 0x5fd   :  { %v11457_v4 = vrot.slane %v4947_v34, %v11172_v38  ;;  %7601 = vperm.xlu1 %9132, %v6402_v30   ;;  %v6336_v19 = vrot.slane %v8081_v2, %v11172_v38  ;;  %v6337_v25 = vcombine.low %v11370_v32, %v11373_v40  ;;  %v4318_v12 = vadd.f32 %v11367_v60, %v11169_v44 }
 0x5fe   :  { %v4313_v33 = vadd.f32 %v11169_v44, %v11376_v26  ;;  %v11474_v6 = vrot.slane %v4949_v16, %v11172_v38  ;;  %v6476_v56 = vrot.slane %v6454_v11, %v11172_v38  ;;  %v6483_v17 = vrot.slane %v8087_v41, %v11172_v38 }
 0x5ff   :  { %v11459_v3 = vpop.f32.mrb[208].mxu1  ;;  %v6484_v57 = vcombine.low %v6462_v20, %v6469_v55  ;;  %v6501_v21 = vcombine.low %v4956_v24, %v4970_v61  ;;  %v6338_v2 = vcombine.low %v6329_v39, %v6336_v19  ;;  %v5080_v63 = vcombine.high %v4318_v12, %v4318_v12 }
 0x600   :  { %v11471_v28 = vpop.f32.mrb[209].mxu1  ;;  %v5087_v32 = vrot.slane %v4318_v12, %v11172_v38  ;;  %v8088_v40 = vcombine.high %v4956_v24, %v4970_v61  ;;  %v5031_v60 = vcombine.high %v4313_v33, %v4313_v33  ;;  %v5038_v36 = vrot.slane %v4313_v33, %v11172_v38 }
 0x601   :  { %v6485_v26 = vcombine.low %v6476_v56, %v6483_v17  ;;  %v6345_v31 = vrot.slane %v6337_v25, %v11172_v38  ;;  %v6352_v50 = vrot.slane %v6338_v2, %v11172_v38  ;;  %v5094_v37 = vrot.slane %v5080_v63, %v11172_v38 }
 0x602   :  { %v5095_v0 = vcombine.high %v5087_v32, %v5087_v32  ;;  %v6552_v29 = vcombine.low %v11445_v7, %v11454_v9  ;;  %v5045_v42 = vrot.slane %v5031_v60, %v11172_v38  ;;  %v6492_v46 = vrot.slane %v6484_v57, %v11172_v38 }
 0x603   :  { %v6499_v43 = vrot.slane %v6485_v26, %v11172_v38  ;;  %v8091_v10 = vcombine.high %v11445_v7, %v11454_v9  ;;  %v6560_v8 = vrot.slane %v6550_v52, %v11172_v38  ;;  %v6567_v35 = vrot.slane %v8090_v59, %v11172_v38 }
 0x604   :  { %v6353_v15 = vcombine.low %v6345_v31, %v6352_v50  ;;  %v5096_v23 = vcombine.high %v5094_v37, %v5094_v37  ;;  %v11493_v53 = vrot.slane %v5095_v0, %v11172_v38  ;;  %v5046_v22 = vcombine.high %v5038_v36, %v5038_v36 }
 0x605   :  { %v6500_v34 = vcombine.low %v6492_v46, %v6499_v43  ;;  %v6503_v11 = vcombine.low %v11457_v4, %v11474_v6  ;;  %v5047_v41 = vcombine.high %v5045_v42, %v5045_v42  ;;  %v6427_v20 = vrot.slane %v6405_v14, %v11172_v38 }
 0x606   :  { %7598 = vperm.xlu0 %9131, %v6353_v15   ;;  %v6434_v27 = vrot.slane %v8085_v62, %v11172_v38  ;;  %v8089_v13 = vcombine.high %v11457_v4, %v11474_v6  ;;  %v11506_v47 = vrot.slane %v6501_v21, %v11172_v38  ;;  %v5103_v5 = vrot.slane %v5087_v32, %v11172_v38 }
 0x607   :  { %v11495_v51 = vpop.f32.mrb[210].mxu1  ;;  %7607 = vperm.xlu1 %9132, %v6500_v34   ;;  %v6435_v55 = vcombine.low %v11438_v1, %v11441_v45  ;;  %v11512_v18 = vrot.slane %v8088_v40, %v11172_v38  ;;  %v11515_v14 = vrot.slane %v5094_v37, %v11172_v38  ;;  %v5054_v62 = vrot.slane %v5038_v36, %v11172_v38 }
 0x608   :  { %v11501_v49 = vpop.f32.mrb[211].mxu1  ;;  %v11519_v16 = vrot.slane %v5045_v42, %v11172_v38  ;;  %v11522_v30 = vrot.slane %v5096_v23, %v11172_v38  ;;  %v6648_v7 = vcombine.low %v5103_v5, %v11493_v53  ;;  %v8094_v24 = vcombine.high %v5103_v5, %v11493_v53 }
 0x609   :  { %v5068_v1 = vrot.slane %v5046_v22, %v11172_v38  ;;  %v11528_v45 = vrot.slane %v5047_v41, %v11172_v38  ;;  %v6436_v61 = vcombine.low %v6427_v20, %v6434_v27  ;;  %v4328_v39 = vadd.f32 %v11415_v48, %v11169_v44 }
 0x60a   :  { %v4323_v9 = vadd.f32 %v11169_v44, %v11421_v58  ;;  %v6443_v52 = vrot.slane %v6435_v55, %v11172_v38  ;;  %v6574_v59 = vrot.slane %v6552_v29, %v11172_v38  ;;  %v6581_v19 = vrot.slane %v8091_v10, %v11172_v38 }
 0x60b   :  { %v6582_v25 = vcombine.low %v6560_v8, %v6567_v35  ;;  %v6450_v12 = vrot.slane %v6436_v61, %v11172_v38  ;;  %v5178_v33 = vcombine.high %v4328_v39, %v4328_v39  ;;  %v5185_v56 = vrot.slane %v4328_v39, %v11172_v38 }
 0x60c   :  { %v5129_v17 = vcombine.high %v4323_v9, %v4323_v9  ;;  %v6599_v57 = vcombine.low %v5054_v62, %v5068_v1  ;;  %v5136_v21 = vrot.slane %v4323_v9, %v11172_v38  ;;  %v6583_v48 = vcombine.low %v6574_v59, %v6581_v19 }
 0x60d   :  { %v4338_v58 = vadd.f32 %v11459_v3, %v11169_v44  ;;  %v8092_v63 = vcombine.high %v5054_v62, %v5068_v1  ;;  %v6451_v32 = vcombine.low %v6443_v52, %v6450_v12  ;;  %v5192_v40 = vrot.slane %v5178_v33, %v11172_v38 }
 0x60e   :  { %v5193_v60 = vcombine.high %v5185_v56, %v5185_v56  ;;  %v5143_v26 = vrot.slane %v5129_v17, %v11172_v38  ;;  %v5144_v31 = vcombine.high %v5136_v21, %v5136_v21  ;;  %v6590_v50 = vrot.slane %v6582_v25, %v11172_v38 }
 0x60f   :  { %v11542_v2 = vpop.f32.mrb[212].mxu1  ;;  %v6597_v37 = vrot.slane %v6583_v48, %v11172_v38  ;;  %v6650_v0 = vcombine.low %v11515_v14, %v11522_v30  ;;  %v8095_v3 = vcombine.high %v11515_v14, %v11522_v30  ;;  %7604 = vperm.xlu0 %9131, %v6451_v32   ;;  %v5194_v29 = vcombine.high %v5192_v40, %v5192_v40 }
 0x610   :  { %v11545_v36 = vpop.f32.mrb[213].mxu1  ;;  %v5215_v42 = vrot.slane %v5193_v60, %v11172_v38  ;;  %v11556_v46 = vrot.slane %v6648_v7, %v11172_v38  ;;  %v5145_v43 = vcombine.high %v5143_v26, %v5143_v26  ;;  %v5276_v8 = vcombine.high %v4338_v58, %v4338_v58 }
 0x611   :  { %v6598_v10 = vcombine.low %v6590_v50, %v6597_v37  ;;  %v5201_v35 = vrot.slane %v5185_v56, %v11172_v38  ;;  %v11560_v15 = vrot.slane %v5194_v29, %v11172_v38  ;;  %v11563_v23 = vrot.slane %v5144_v31, %v11172_v38 }
 0x612   :  { %v5283_v53 = vrot.slane %v4338_v58, %v11172_v38  ;;  %v6665_v22 = vrot.slane %v8094_v24, %v11172_v38  ;;  %v6601_v34 = vcombine.low %v11519_v16, %v11528_v45  ;;  %v8093_v41 = vcombine.high %v11519_v16, %v11528_v45 }
 0x613   :  { %v5152_v20 = vrot.slane %v5136_v21, %v11172_v38  ;;  %v11573_v27 = vrot.slane %v5192_v40, %v11172_v38  ;;  %v6746_v5 = vcombine.low %v5201_v35, %v5215_v42  ;;  %v8098_v55 = vcombine.high %v5201_v35, %v5215_v42  ;;  %7613 = vperm.xlu0 %9131, %v6598_v10  }
 0x614   :  { %v11576_v14 = vrot.slane %v5145_v43, %v11172_v38  ;;  %v11579_v62 = vrot.slane %v6599_v57, %v11172_v38  ;;  %v11582_v30 = vrot.slane %v8092_v63, %v11172_v38  ;;  %v11585_v7 = vrot.slane %v5143_v26, %v11172_v38 }
 0x615   :  { %v5290_v24 = vrot.slane %v5276_v8, %v11172_v38  ;;  %v6748_v61 = vcombine.low %v11573_v27, %v11560_v15  ;;  %v6697_v39 = vcombine.low %v5152_v20, %v11563_v23  ;;  %v8096_v9 = vcombine.high %v5152_v20, %v11563_v23 }
 0x616   :  { %v5291_v52 = vcombine.high %v5283_v53, %v5283_v53  ;;  %v4333_v19 = vadd.f32 %v11169_v44, %v11471_v28  ;;  %v6525_v25 = vrot.slane %v6503_v11, %v11172_v38  ;;  %v6532_v12 = vrot.slane %v8089_v13, %v11172_v38 }
 0x617   :  { %v11588_v1 = vpop.f32.mrb[214].mxu1  ;;  %v6533_v33 = vcombine.low %v11506_v47, %v11512_v18  ;;  %v8099_v56 = vcombine.high %v11573_v27, %v11560_v15  ;;  %v11611_v17 = vrot.slane %v6746_v5, %v11172_v38  ;;  %v11614_v28 = vrot.slane %v8098_v55, %v11172_v38 }
 0x618   :  { %v11594_v59 = vpop.f32.mrb[215].mxu1  ;;  %v6699_v11 = vcombine.low %v11585_v7, %v11576_v14  ;;  %v5292_v57 = vcombine.high %v5290_v24, %v5290_v24  ;;  %v5227_v21 = vcombine.high %v4333_v19, %v4333_v19  ;;  %v5234_v4 = vrot.slane %v4333_v19, %v11172_v38 }
 0x619   :  { %v6534_v6 = vcombine.low %v6525_v25, %v6532_v12  ;;  %v8097_v13 = vcombine.high %v11585_v7, %v11576_v14  ;;  %v11622_v47 = vrot.slane %v6697_v39, %v11172_v38  ;;  %v5313_v18 = vrot.slane %v5291_v52, %v11172_v38 }
 0x61a   :  { %v6672_v48 = vrot.slane %v6650_v0, %v11172_v38  ;;  %v5241_v58 = vrot.slane %v5227_v21, %v11172_v38  ;;  %v5242_v63 = vcombine.high %v5234_v4, %v5234_v4  ;;  %v6541_v32 = vrot.slane %v6533_v33, %v11172_v38 }
 0x61b   :  { %v6548_v40 = vrot.slane %v6534_v6, %v11172_v38  ;;  %v6679_v60 = vrot.slane %v8095_v3, %v11172_v38  ;;  %v6680_v26 = vcombine.low %v11556_v46, %v6665_v22  ;;  %v4348_v31 = vadd.f32 %v11495_v51, %v11169_v44 }
 0x61c   :  { %v4343_v50 = vadd.f32 %v11169_v44, %v11501_v49  ;;  %v5299_v37 = vrot.slane %v5283_v53, %v11172_v38  ;;  %v5320_v0 = vrot.slane %v5292_v57, %v11172_v38  ;;  %v5243_v29 = vcombine.high %v5241_v58, %v5241_v58 }
 0x61d   :  { %v6549_v42 = vcombine.low %v6541_v32, %v6548_v40  ;;  %v5264_v10 = vrot.slane %v5242_v63, %v11172_v38  ;;  %v6681_v8 = vcombine.low %v6672_v48, %v6679_v60  ;;  %v5374_v3 = vcombine.high %v4348_v31, %v4348_v31 }
 0x61e   :  { %v5381_v46 = vrot.slane %v4348_v31, %v11172_v38  ;;  %v5306_v51 = vrot.slane %v5290_v24, %v11172_v38  ;;  %v6844_v23 = vcombine.low %v5299_v37, %v5313_v18  ;;  %v5250_v49 = vrot.slane %v5234_v4, %v11172_v38 }
 0x61f   :  { %v11637_v43 = vpop.f32.mrb[216].mxu1  ;;  %7610 = vperm.xlu0 %9131, %v6549_v42   ;;  %v5325_v53 = vcombine.high %v4343_v50, %v4343_v50  ;;  %v6688_v22 = vrot.slane %v6680_v26, %v11172_v38  ;;  %v6695_v20 = vrot.slane %v6681_v8, %v11172_v38  ;;  %v5388_v5 = vrot.slane %v5374_v3, %v11172_v38 }
 0x620   :  { %v11641_v35 = vpop.f32.mrb[217].mxu1  ;;  %v5389_v55 = vcombine.high %v5381_v46, %v5381_v46  ;;  %v11649_v39 = vrot.slane %v8096_v9, %v11172_v38  ;;  %v8102_v52 = vcombine.high %v5299_v37, %v5313_v18  ;;  %v6846_v19 = vcombine.low %v5306_v51, %v5320_v0 }
 0x621   :  { %v11652_v25 = vrot.slane %v5243_v29, %v11172_v38  ;;  %v6795_v24 = vcombine.low %v5250_v49, %v5264_v10  ;;  %v8100_v12 = vcombine.high %v5250_v49, %v5264_v10  ;;  %v6696_v33 = vcombine.low %v6688_v22, %v6695_v20 }
 0x622   :  { %v5390_v57 = vcombine.high %v5388_v5, %v5388_v5  ;;  %v5332_v21 = vrot.slane %v4343_v50, %v11172_v38  ;;  %v5339_v4 = vrot.slane %v5325_v53, %v11172_v38  ;;  %v6623_v6 = vrot.slane %v6601_v34, %v11172_v38 }
 0x623   :  { %v6630_v9 = vrot.slane %v8093_v41, %v11172_v38  ;;  %v8103_v18 = vcombine.high %v5306_v51, %v5320_v0  ;;  %v6854_v48 = vrot.slane %v6844_v23, %v11172_v38  ;;  %v11666_v63 = vrot.slane %v5241_v58, %v11172_v38  ;;  %7619 = vperm.xlu0 %9131, %v6696_v33  }
 0x624   :  { %v5411_v32 = vrot.slane %v5389_v55, %v11172_v38  ;;  %v6861_v40 = vrot.slane %v8102_v52, %v11172_v38  ;;  %v5397_v60 = vrot.slane %v5381_v46, %v11172_v38  ;;  %v5340_v26 = vcombine.high %v5332_v21, %v5332_v21 }
 0x625   :  { %v6631_v34 = vcombine.low %v11579_v62, %v11582_v30  ;;  %v6797_v16 = vcombine.low %v11666_v63, %v11652_v25  ;;  %v8101_v45 = vcombine.high %v11666_v63, %v11652_v25  ;;  %v11680_v41 = vrot.slane %v6795_v24, %v11172_v38 }
 0x626   :  { %v11683_v58 = vrot.slane %v8100_v12, %v11172_v38  ;;  %v11688_v37 = vrot.slane %v5388_v5, %v11172_v38  ;;  %v5418_v62 = vrot.slane %v5390_v57, %v11172_v38  ;;  %v5341_v30 = vcombine.high %v5339_v4, %v5339_v4 }
 0x627   :  { %v11673_v31 = vpop.f32.mrb[218].mxu1  ;;  %v6632_v0 = vcombine.low %v6623_v6, %v6630_v9  ;;  %v6942_v29 = vcombine.low %v5397_v60, %v5411_v32  ;;  %v5362_v42 = vrot.slane %v5340_v26, %v11172_v38  ;;  %v4358_v10 = vadd.f32 %v11542_v2, %v11169_v44 }
 0x628   :  { %v11685_v50 = vpop.f32.mrb[219].mxu1  ;;  %v4353_v8 = vadd.f32 %v11169_v44, %v11545_v36  ;;  %v5348_v3 = vrot.slane %v5332_v21, %v11172_v38  ;;  %v6639_v46 = vrot.slane %v6631_v34, %v11172_v38  ;;  %v6868_v51 = vrot.slane %v6846_v19, %v11172_v38 }
 0x629   :  { %v6875_v23 = vrot.slane %v8103_v18, %v11172_v38  ;;  %v6646_v49 = vrot.slane %v6632_v0, %v11172_v38  ;;  %v5472_v53 = vcombine.high %v4358_v10, %v4358_v10  ;;  %v5479_v22 = vrot.slane %v4358_v10, %v11172_v38 }
 0x62a   :  { %v5423_v20 = vcombine.high %v4353_v8, %v4353_v8  ;;  %v8106_v5 = vcombine.high %v5397_v60, %v5411_v32  ;;  %v11703_v2 = vrot.slane %v5341_v30, %v11172_v38  ;;  %v5430_v36 = vrot.slane %v4353_v8, %v11172_v38 }
 0x62b   :  { %v6876_v55 = vcombine.low %v6854_v48, %v6861_v40  ;;  %v6893_v52 = vcombine.low %v5348_v3, %v5362_v42  ;;  %v6647_v25 = vcombine.low %v6639_v46, %v6646_v49  ;;  %v5486_v24 = vrot.slane %v5472_v53, %v11172_v38 }
 0x62c   :  { %v5487_v19 = vcombine.high %v5479_v22, %v5479_v22  ;;  %v11708_v12 = vrot.slane %v5339_v4, %v11172_v38  ;;  %v8104_v33 = vcombine.high %v5348_v3, %v5362_v42  ;;  %v5437_v57 = vrot.slane %v5423_v20, %v11172_v38 }
 0x62d   :  { %v6877_v21 = vcombine.low %v6868_v51, %v6875_v23  ;;  %v6944_v9 = vcombine.low %v11688_v37, %v5418_v62  ;;  %v8107_v18 = vcombine.high %v11688_v37, %v5418_v62  ;;  %v6952_v48 = vrot.slane %v6942_v29, %v11172_v38  ;;  %7616 = vperm.xlu0 %9131, %v6647_v25  }
 0x62e   :  { %v5438_v63 = vcombine.high %v5430_v36, %v5430_v36  ;;  %v5488_v40 = vcombine.high %v5486_v24, %v5486_v24  ;;  %v5509_v4 = vrot.slane %v5487_v19, %v11172_v38  ;;  %v6884_v60 = vrot.slane %v6876_v55, %v11172_v38 }
 0x62f   :  { %v11711_v6 = vpop.f32.mrb[220].mxu1  ;;  %v6891_v26 = vrot.slane %v6877_v21, %v11172_v38  ;;  %v6959_v34 = vrot.slane %v8106_v5, %v11172_v38  ;;  %v6895_v30 = vcombine.low %v11708_v12, %v11703_v2  ;;  %v8105_v37 = vcombine.high %v11708_v12, %v11703_v2 }
 0x630   :  { %v11716_v32 = vpop.f32.mrb[221].mxu1  ;;  %v11727_v62 = vrot.slane %v6893_v52, %v11172_v38  ;;  %v11730_v0 = vrot.slane %v8104_v33, %v11172_v38  ;;  %v5495_v29 = vrot.slane %v5479_v22, %v11172_v38  ;;  %v5439_v42 = vcombine.high %v5437_v57, %v5437_v57 }
 0x631   :  { %v6892_v10 = vcombine.low %v6884_v60, %v6891_v26  ;;  %v11734_v8 = vrot.slane %v5486_v24, %v11172_v38  ;;  %v5446_v3 = vrot.slane %v5430_v36, %v11172_v38  ;;  %v5460_v46 = vrot.slane %v5438_v63, %v11172_v38 }
 0x632   :  { %v6819_v51 = vrot.slane %v6797_v16, %v11172_v38  ;;  %v11740_v23 = vrot.slane %v5488_v40, %v11172_v38  ;;  %v7040_v49 = vcombine.low %v5495_v29, %v5509_v4  ;;  %v8110_v53 = vcombine.high %v5495_v29, %v5509_v4 }
 0x633   :  { %v11743_v20 = vrot.slane %v5437_v57, %v11172_v38  ;;  %7631 = vperm.xlu1 %9132, %v6892_v10   ;;  %v6826_v22 = vrot.slane %v8101_v45, %v11172_v38  ;;  %v6827_v5 = vcombine.low %v11680_v41, %v11683_v58  ;;  %v4368_v2 = vadd.f32 %v11588_v1, %v11169_v44 }
 0x634   :  { %v4363_v16 = vadd.f32 %v11169_v44, %v11594_v59  ;;  %v11753_v36 = vrot.slane %v5439_v42, %v11172_v38  ;;  %v6966_v55 = vrot.slane %v6944_v9, %v11172_v38  ;;  %v6973_v52 = vrot.slane %v8107_v18, %v11172_v38 }
 0x635   :  { %v6974_v25 = vcombine.low %v6952_v48, %v6959_v34  ;;  %v6991_v45 = vcombine.low %v5446_v3, %v5460_v46  ;;  %v6828_v19 = vcombine.low %v6819_v51, %v6826_v22  ;;  %v5570_v12 = vcombine.high %v4368_v2, %v4368_v2 }
 0x636   :  { %v5577_v41 = vrot.slane %v4368_v2, %v11172_v38  ;;  %v8108_v1 = vcombine.high %v5446_v3, %v5460_v46  ;;  %v5521_v33 = vcombine.high %v4363_v16, %v4363_v16  ;;  %v5528_v44 = vrot.slane %v4363_v16, %v11172_v38 }
 0x637   :  { %v11757_v24 = vpop.f32.mrb[222].mxu1  ;;  %v6975_v59 = vcombine.low %v6966_v55, %v6973_v52  ;;  %v6835_v57 = vrot.slane %v6827_v5, %v11172_v38  ;;  %v6842_v21 = vrot.slane %v6828_v19, %v11172_v38  ;;  %v5584_v9 = vrot.slane %v5570_v12, %v11172_v38 }
 0x638   :  { %v11760_v58 = vpop.f32.mrb[223].mxu1  ;;  %v5585_v18 = vcombine.high %v5577_v41, %v5577_v41  ;;  %v7042_v48 = vcombine.low %v11734_v8, %v11740_v23  ;;  %v5535_v63 = vrot.slane %v5521_v33, %v11172_v38  ;;  %v6982_v40 = vrot.slane %v6974_v25, %v11172_v38 }
 0x639   :  { %v6989_v4 = vrot.slane %v6975_v59, %v11172_v38  ;;  %v8111_v60 = vcombine.high %v11734_v8, %v11740_v23  ;;  %v7050_v26 = vrot.slane %v7040_v49, %v11172_v38  ;;  %v7057_v34 = vrot.slane %v8110_v53, %v11172_v38 }
 0x63a   :  { %v6843_v29 = vcombine.low %v6835_v57, %v6842_v21  ;;  %v5586_v42 = vcombine.high %v5584_v9, %v5584_v9  ;;  %v5607_v10 = vrot.slane %v5585_v18, %v11172_v38  ;;  %v5536_v3 = vcombine.high %v5528_v44, %v5528_v44 }
 0x63b   :  { %v6990_v46 = vcombine.low %v6982_v40, %v6989_v4  ;;  %v6993_v51 = vcombine.low %v11743_v20, %v11753_v36  ;;  %v5537_v22 = vcombine.high %v5535_v63, %v5535_v63  ;;  %v6917_v5 = vrot.slane %v6895_v30, %v11172_v38 }
 0x63c   :  { %7628 = vperm.xlu0 %9131, %v6843_v29   ;;  %v6924_v2 = vrot.slane %v8105_v37, %v11172_v38  ;;  %v8109_v8 = vcombine.high %v11743_v20, %v11753_v36  ;;  %v11783_v23 = vrot.slane %v6991_v45, %v11172_v38  ;;  %v5593_v49 = vrot.slane %v5577_v41, %v11172_v38 }
 0x63d   :  { %7637 = vperm.xlu1 %9132, %v6990_v46   ;;  %v6925_v53 = vcombine.low %v11727_v62, %v11730_v0  ;;  %v7008_v16 = vrot.slane %v8108_v1, %v11172_v38  ;;  %v11790_v55 = vrot.slane %v5584_v9, %v11172_v38  ;;  %v5544_v30 = vrot.slane %v5528_v44, %v11172_v38  ;;  %v11799_v62 = vld [vmem:[#allocation2] ss:$0 sm:$0xff] }
 0x63e   :  { %v11794_v37 = vrot.slane %v5535_v63, %v11172_v38  ;;  %v5614_v20 = vrot.slane %v5586_v42, %v11172_v38  ;;  %v7138_v36 = vcombine.low %v5593_v49, %v5607_v10  ;;  %v8114_v52 = vcombine.high %v5593_v49, %v5607_v10 }
 0x63f   :  { %v5558_v25 = vrot.slane %v5536_v3, %v11172_v38  ;;  %v5565_v45 = vrot.slane %v5537_v22, %v11172_v38  ;;  %v6926_v19 = vcombine.low %v6917_v5, %v6924_v2  ;;  %v4378_v0 = vadd.f32 %v11799_v62, %v11637_v43 }
 0x640   :  { %v4373_v12 = vadd.f32 %v11799_v62, %v11641_v35  ;;  %v6933_v41 = vrot.slane %v6925_v53, %v11172_v38  ;;  %v7064_v1 = vrot.slane %v7042_v48, %v11172_v38  ;;  %v7071_v33 = vrot.slane %v8111_v60, %v11172_v38 }
 0x641   :  { %v7072_v44 = vcombine.low %v7050_v26, %v7057_v34  ;;  %v6940_v59 = vrot.slane %v6926_v19, %v11172_v38  ;;  %v5668_v57 = vcombine.high %v4378_v0, %v4378_v0  ;;  %v5675_v21 = vrot.slane %v4378_v0, %v11172_v38 }
 0x642   :  { %v5619_v9 = vcombine.high %v4373_v12, %v4373_v12  ;;  %v7089_v18 = vcombine.low %v5544_v30, %v5558_v25  ;;  %v5626_v63 = vrot.slane %v4373_v12, %v11172_v38  ;;  %v7073_v43 = vcombine.low %v7064_v1, %v7071_v33 }
 0x643   :  { %v7015_v40 = vrot.slane %v6993_v51, %v11172_v38  ;;  %v6941_v35 = vcombine.low %v6933_v41, %v6940_v59  ;;  %v5682_v4 = vrot.slane %v5668_v57, %v11172_v38  ;;  %v5683_v29 = vcombine.high %v5675_v21, %v5675_v21 }
 0x644   :  { %v7022_v48 = vrot.slane %v8109_v8, %v11172_v38  ;;  %v7140_v60 = vcombine.low %v11790_v55, %v5614_v20  ;;  %v8112_v26 = vcombine.high %v5544_v30, %v5558_v25  ;;  %v7080_v34 = vrot.slane %v7072_v44, %v11172_v38 }
 0x645   :  { %v7087_v42 = vrot.slane %v7073_v43, %v11172_v38  ;;  %v8115_v10 = vcombine.high %v11790_v55, %v5614_v20  ;;  %v7148_v3 = vrot.slane %v7138_v36, %v11172_v38  ;;  %7634 = vperm.xlu0 %9131, %v6941_v35   ;;  %v5633_v46 = vrot.slane %v5619_v9, %v11172_v38 }
 0x646   :  { %v5634_v51 = vcombine.high %v5626_v63, %v5626_v63  ;;  %v5684_v22 = vcombine.high %v5682_v4, %v5682_v4  ;;  %v5705_v5 = vrot.slane %v5683_v29, %v11172_v38  ;;  %v7023_v8 = vcombine.low %v11783_v23, %v7008_v16 }
 0x647   :  { %v7088_v2 = vcombine.low %v7080_v34, %v7087_v42  ;;  %v7155_v49 = vrot.slane %v8114_v52, %v11172_v38  ;;  %v7091_v53 = vcombine.low %v11794_v37, %v5565_v45  ;;  %v8113_v30 = vcombine.high %v11794_v37, %v5565_v45 }
 0x648   :  { %v7024_v25 = vcombine.low %v7015_v40, %v7022_v48  ;;  %v7099_v55 = vrot.slane %v7089_v18, %v11172_v38  ;;  %v7106_v20 = vrot.slane %v8112_v26, %v11172_v38  ;;  %v5691_v36 = vrot.slane %v5675_v21, %v11172_v38 }
 0x649   :  { %v5642_v19 = vrot.slane %v5626_v63, %v11172_v38  ;;  %7643 = vperm.xlu1 %9132, %v7088_v2   ;;  %v11830_v0 = vrot.slane %v5682_v4, %v11172_v38  ;;  %v5635_v23 = vcombine.high %v5633_v46, %v5633_v46  ;;  %v11833_v16 = vrot.slane %v5633_v46, %v11172_v38 }
 0x64a   :  { %v5656_v52 = vrot.slane %v5634_v51, %v11172_v38  ;;  %v5712_v37 = vrot.slane %v5684_v22, %v11172_v38  ;;  %v7236_v45 = vcombine.low %v5691_v36, %v5705_v5  ;;  %v8118_v12 = vcombine.high %v5691_v36, %v5705_v5 }
 0x64b   :  { %v7031_v41 = vrot.slane %v7023_v8, %v11172_v38  ;;  %v7038_v1 = vrot.slane %v7024_v25, %v11172_v38  ;;  %v4388_v33 = vadd.f32 %v11799_v62, %v11673_v31  ;;  %v4383_v44 = vadd.f32 %v11799_v62, %v11685_v50 }
 0x64c   :  { %v7162_v59 = vrot.slane %v7140_v60, %v11172_v38  ;;  %v7169_v57 = vrot.slane %v8115_v10, %v11172_v38  ;;  %v7170_v21 = vcombine.low %v7148_v3, %v7155_v49  ;;  %v7113_v9 = vrot.slane %v7091_v53, %v11172_v38 }
 0x64d   :  { %v7120_v18 = vrot.slane %v8113_v30, %v11172_v38  ;;  %v7039_v63 = vcombine.low %v7031_v41, %v7038_v1  ;;  %v5766_v43 = vcombine.high %v4388_v33, %v4388_v33  ;;  %v5773_v40 = vrot.slane %v4388_v33, %v11172_v38 }
 0x64e   :  { %v5717_v35 = vcombine.high %v4383_v44, %v4383_v44  ;;  %v5663_v4 = vrot.slane %v5635_v23, %v11172_v38  ;;  %v7187_v31 = vcombine.low %v5642_v19, %v5656_v52  ;;  %v5724_v29 = vrot.slane %v4383_v44, %v11172_v38 }
 0x64f   :  { %v7171_v50 = vcombine.low %v7162_v59, %v7169_v57  ;;  %v7238_v48 = vcombine.low %v11830_v0, %v5712_v37  ;;  %v8116_v60 = vcombine.high %v5642_v19, %v5656_v52  ;;  %7640 = vperm.xlu0 %9131, %v7039_v63   ;;  %v5780_v26 = vrot.slane %v5766_v43, %v11172_v38 }
 0x650   :  { %v5781_v34 = vcombine.high %v5773_v40, %v5773_v40  ;;  %v5731_v42 = vrot.slane %v5717_v35, %v11172_v38  ;;  %v7178_v10 = vrot.slane %v7170_v21, %v11172_v38  ;;  %v7122_v46 = vcombine.low %v7113_v9, %v7120_v18 }
 0x651   :  { %v7185_v3 = vrot.slane %v7171_v50, %v11172_v38  ;;  %v8119_v51 = vcombine.high %v11830_v0, %v5712_v37  ;;  %v7246_v22 = vrot.slane %v7236_v45, %v11172_v38  ;;  %v5732_v5 = vcombine.high %v5724_v29, %v5724_v29 }
 0x652   :  { %v7121_v2 = vcombine.low %v7099_v55, %v7106_v20  ;;  %v7253_v8 = vrot.slane %v8118_v12, %v11172_v38  ;;  %v5782_v49 = vcombine.high %v5780_v26, %v5780_v26  ;;  %v5803_v53 = vrot.slane %v5781_v34, %v11172_v38 }
 0x653   :  { %v7186_v30 = vcombine.low %v7178_v10, %v7185_v3  ;;  %v7189_v25 = vcombine.low %v11833_v16, %v5663_v4  ;;  %v8117_v36 = vcombine.high %v11833_v16, %v5663_v4  ;;  %v7197_v19 = vrot.slane %v7187_v31, %v11172_v38 }
 0x654   :  { %v7204_v23 = vrot.slane %v8116_v60, %v11172_v38  ;;  %v5789_v0 = vrot.slane %v5773_v40, %v11172_v38  ;;  %v5733_v52 = vcombine.high %v5731_v42, %v5731_v42  ;;  %v7136_v55 = vrot.slane %v7122_v46, %v11172_v38 }
 0x655   :  { %7649 = vperm.xlu1 %9132, %v7186_v30   ;;  %v4398_v20 = vadd.f32 %v11799_v62, %v11711_v6  ;;  %v11868_v37 = vrot.slane %v5780_v26, %v11172_v38  ;;  %v5740_v45 = vrot.slane %v5724_v29, %v11172_v38  ;;  %v5754_v16 = vrot.slane %v5732_v5, %v11172_v38 }
 0x656   :  { %v7129_v12 = vrot.slane %v7121_v2, %v11172_v38  ;;  %v11874_v41 = vrot.slane %v5782_v49, %v11172_v38  ;;  %v7334_v1 = vcombine.low %v5789_v0, %v5803_v53  ;;  %v8122_v33 = vcombine.high %v5789_v0, %v5803_v53 }
 0x657   :  { %v11877_v44 = vrot.slane %v5731_v42, %v11172_v38  ;;  %v5864_v57 = vcombine.high %v4398_v20, %v4398_v20  ;;  %v5871_v6 = vrot.slane %v4398_v20, %v11172_v38  ;;  %v4393_v21 = vadd.f32 %v11799_v62, %v11716_v32 }
 0x658   :  { %v7137_v59 = vcombine.low %v7129_v12, %v7136_v55  ;;  %v11883_v9 = vrot.slane %v5733_v52, %v11172_v38  ;;  %v7260_v18 = vrot.slane %v7238_v48, %v11172_v38  ;;  %v7267_v63 = vrot.slane %v8119_v51, %v11172_v38 }
 0x659   :  { %v7268_v43 = vcombine.low %v7246_v22, %v7253_v8  ;;  %v7285_v40 = vcombine.low %v5740_v45, %v5754_v16  ;;  %v5878_v35 = vrot.slane %v5864_v57, %v11172_v38  ;;  %v5879_v4 = vcombine.high %v5871_v6, %v5871_v6 }
 0x65a   :  { %7646 = vperm.xlu0 %9131, %v7137_v59   ;;  %v5815_v31 = vcombine.high %v4393_v21, %v4393_v21  ;;  %v5822_v29 = vrot.slane %v4393_v21, %v11172_v38  ;;  %v7269_v50 = vcombine.low %v7260_v18, %v7267_v63  ;;  %v7211_v60 = vrot.slane %v7189_v25, %v11172_v38 }
 0x65b   :  { %v7218_v32 = vrot.slane %v8117_v36, %v11172_v38  ;;  %v7336_v26 = vcombine.low %v11868_v37, %v11874_v41  ;;  %v8123_v48 = vcombine.high %v11868_v37, %v11874_v41  ;;  %v8120_v34 = vcombine.high %v5740_v45, %v5754_v16 }
 0x65c   :  { %v5829_v42 = vrot.slane %v5815_v31, %v11172_v38  ;;  %v5880_v10 = vcombine.high %v5878_v35, %v5878_v35  ;;  %v5901_v3 = vrot.slane %v5879_v4, %v11172_v38  ;;  %v7276_v46 = vrot.slane %v7268_v43, %v11172_v38 }
 0x65d   :  { %v7283_v51 = vrot.slane %v7269_v50, %v11172_v38  ;;  %v11900_v22 = vrot.slane %v7334_v1, %v11172_v38  ;;  %v11903_v5 = vrot.slane %v8122_v33, %v11172_v38  ;;  %v7287_v2 = vcombine.low %v11877_v44, %v11883_v9 }
 0x65e   :  { %v7219_v8 = vcombine.low %v7197_v19, %v7204_v23  ;;  %v5887_v49 = vrot.slane %v5871_v6, %v11172_v38  ;;  %v5830_v53 = vcombine.high %v5822_v29, %v5822_v29  ;;  %v7220_v25 = vcombine.low %v7211_v60, %v7218_v32 }
 0x65f   :  { %v7284_v30 = vcombine.low %v7276_v46, %v7283_v51  ;;  %v8121_v36 = vcombine.high %v11877_v44, %v11883_v9  ;;  %v11911_v0 = vrot.slane %v7285_v40, %v11172_v38  ;;  %v11914_v52 = vrot.slane %v8120_v34, %v11172_v38 }
 0x660   :  { %v5831_v55 = vcombine.high %v5829_v42, %v5829_v42  ;;  %v11917_v20 = vrot.slane %v5878_v35, %v11172_v38  ;;  %v11920_v19 = vrot.slane %v5880_v10, %v11172_v38  ;;  %v7432_v23 = vcombine.low %v5887_v49, %v5901_v3 }
 0x661   :  { %v5838_v37 = vrot.slane %v5822_v29, %v11172_v38  ;;  %7655 = vperm.xlu1 %9132, %v7284_v30   ;;  %v7227_v45 = vrot.slane %v7219_v8, %v11172_v38  ;;  %v7234_v16 = vrot.slane %v7220_v25, %v11172_v38  ;;  %v4408_v12 = vadd.f32 %v11799_v62, %v11757_v24 }
 0x662   :  { %v4403_v41 = vadd.f32 %v11799_v62, %v11760_v58  ;;  %v8126_v1 = vcombine.high %v5887_v49, %v5901_v3  ;;  %v11930_v33 = vrot.slane %v5829_v42, %v11172_v38  ;;  %v5852_v59 = vrot.slane %v5830_v53, %v11172_v38 }
 0x663   :  { %v6721_v57 = vrot.slane %v6699_v11, %v11172_v38  ;;  %v11938_v6 = vrot.slane %v5831_v55, %v11172_v38  ;;  %v7235_v21 = vcombine.low %v7227_v45, %v7234_v16  ;;  %v5962_v18 = vcombine.high %v4408_v12, %v4408_v12 }
 0x664   :  { %v5913_v24 = vcombine.high %v4403_v41, %v4403_v41  ;;  %v7434_v58 = vcombine.low %v11917_v20, %v11920_v19  ;;  %v5920_v62 = vrot.slane %v4403_v41, %v11172_v38  ;;  %v6728_v63 = vrot.slane %v8097_v13, %v11172_v38 }
 0x665   :  { %v6729_v43 = vcombine.low %v11622_v47, %v11649_v39  ;;  %v8127_v11 = vcombine.high %v11917_v20, %v11920_v19  ;;  %v11952_v40 = vrot.slane %v7432_v23, %v11172_v38  ;;  %7652 = vperm.xlu0 %9131, %v7235_v21   ;;  %v5976_v35 = vrot.slane %v5962_v18, %v11172_v38 }
 0x666   :  { %v5927_v4 = vrot.slane %v5913_v24, %v11172_v38  ;;  %v11957_v31 = vrot.slane %v8126_v1, %v11172_v38  ;;  %v7383_v29 = vcombine.low %v5838_v37, %v5852_v59  ;;  %v5928_v14 = vcombine.high %v5920_v62, %v5920_v62 }
 0x667   :  { %v6730_v7 = vcombine.low %v6721_v57, %v6728_v63  ;;  %v8124_v13 = vcombine.high %v5838_v37, %v5852_v59  ;;  %v7385_v47 = vcombine.low %v11930_v33, %v11938_v6  ;;  %v5969_v39 = vrot.slane %v4408_v12, %v11172_v38 }
 0x668   :  { %v5929_v50 = vcombine.high %v5927_v4, %v5927_v4  ;;  %v5978_v60 = vcombine.high %v5976_v35, %v5976_v35  ;;  %v5950_v32 = vrot.slane %v5928_v14, %v11172_v38  ;;  %v6737_v34 = vrot.slane %v6729_v43, %v11172_v38 }
 0x669   :  { %v6744_v42 = vrot.slane %v6730_v7, %v11172_v38  ;;  %v8125_v10 = vcombine.high %v11930_v33, %v11938_v6  ;;  %v7358_v46 = vrot.slane %v7336_v26, %v11172_v38  ;;  %v7365_v51 = vrot.slane %v8123_v48, %v11172_v38 }
 0x66a   :  { %v5957_v3 = vrot.slane %v5929_v50, %v11172_v38  ;;  %v5936_v8 = vrot.slane %v5920_v62, %v11172_v38  ;;  %v5943_v49 = vrot.slane %v5927_v4, %v11172_v38  ;;  %v7366_v30 = vcombine.low %v11900_v22, %v11903_v5 }
 0x66b   :  { %v6745_v53 = vcombine.low %v6737_v34, %v6744_v42  ;;  %v7393_v25 = vrot.slane %v7383_v29, %v11172_v38  ;;  %v7400_v55 = vrot.slane %v8124_v13, %v11172_v38  ;;  %v5977_v20 = vcombine.high %v5969_v39, %v5969_v39 }
 0x66c   :  { %v5992_v19 = vrot.slane %v5976_v35, %v11172_v38  ;;  %v6006_v23 = vrot.slane %v5978_v60, %v11172_v38  ;;  %v7481_v26 = vcombine.low %v5936_v8, %v5950_v32  ;;  %v7483_v37 = vcombine.low %v5943_v49, %v5957_v3 }
 0x66d   :  { %v8129_v48 = vcombine.high %v5943_v49, %v5957_v3  ;;  %7622 = vperm.xlu0 %9131, %v6745_v53   ;;  %v7367_v45 = vcombine.low %v7358_v46, %v7365_v51  ;;  %v7374_v16 = vrot.slane %v7366_v30, %v11172_v38  ;;  %v6770_v22 = vrot.slane %v6748_v61, %v11172_v38 }
 0x66e   :  { %v6777_v5 = vrot.slane %v8099_v56, %v11172_v38  ;;  %v6778_v12 = vcombine.low %v11611_v17, %v11614_v28  ;;  %v7309_v41 = vrot.slane %v7287_v2, %v11172_v38  ;;  %v7316_v1 = vrot.slane %v8121_v36, %v11172_v38 }
 0x66f   :  { %v7317_v61 = vcombine.low %v11911_v0, %v11914_v52  ;;  %v7381_v33 = vrot.slane %v7367_v45, %v11172_v38  ;;  %v7456_v27 = vrot.slane %v7434_v58, %v11172_v38  ;;  %v7463_v56 = vrot.slane %v8127_v11, %v11172_v38 }
 0x670   :  { %v6779_v15 = vcombine.low %v6770_v22, %v6777_v5  ;;  %v8128_v17 = vcombine.high %v5936_v8, %v5950_v32  ;;  %v6786_v28 = vrot.slane %v6778_v12, %v11172_v38  ;;  %v7318_v59 = vcombine.low %v7309_v41, %v7316_v1 }
 0x671   :  { %v7464_v2 = vcombine.low %v11952_v40, %v11957_v31  ;;  %v7382_v57 = vcombine.low %v7374_v16, %v7381_v33  ;;  %v7465_v9 = vcombine.low %v7456_v27, %v7463_v56  ;;  %v7407_v36 = vrot.slane %v7385_v47, %v11172_v38 }
 0x672   :  { %v6793_v44 = vrot.slane %v6779_v15, %v11172_v38  ;;  %v5999_v0 = vrot.slane %v5977_v20, %v11172_v38  ;;  %v7325_v52 = vrot.slane %v7317_v61, %v11172_v38  ;;  %v7332_v6 = vrot.slane %v7318_v59, %v11172_v38 }
 0x673   :  { %v7414_v21 = vrot.slane %v8125_v10, %v11172_v38  ;;  %7661 = vperm.xlu1 %9132, %v7382_v57   ;;  %v7479_v24 = vrot.slane %v7465_v9, %v11172_v38  ;;  %v7505_v58 = vrot.slane %v7483_v37, %v11172_v38  ;;  %v7512_v62 = vrot.slane %v8129_v48, %v11172_v38  ;;  %v7590_v37 = vpop.permute.xlu1 %7589 }
 0x674   :  { %v6794_v18 = vcombine.low %v6786_v28, %v6793_v44  ;;  %v5985_v63 = vrot.slane %v5969_v39, %v11172_v38  ;;  %v7532_v43 = vcombine.low %v5992_v19, %v6006_v23  ;;  %v8131_v11 = vcombine.high %v5992_v19, %v6006_v23  ;;  %v7584_v19 = vpop.permute.xlu0 %7583 }
 0x675   :  { %v7491_v40 = vrot.slane %v7481_v26, %v11172_v38  ;;  %v7498_v35 = vrot.slane %v8128_v17, %v11172_v38  ;;  %v7333_v4 = vcombine.low %v7325_v52, %v7332_v6  ;;  %v7472_v31 = vrot.slane %v7464_v2, %v11172_v38 }
 0x676   :  { %7625 = vperm.xlu0 %9131, %v6794_v18   ;;  %v7416_v29 = vcombine.low %v7407_v36, %v7414_v21  ;;  %v7530_v14 = vcombine.low %v5985_v63, %v5999_v0  ;;  %v8130_v7 = vcombine.high %v5985_v63, %v5999_v0  ;;  %v7415_v47 = vcombine.low %v7393_v25, %v7400_v55 }
 0x677   :  { %7658 = vperm.xlu1 %9132, %v7333_v4   ;;  %v7480_v13 = vcombine.low %v7472_v31, %v7479_v24  ;;  %v7514_v50 = vcombine.low %v7505_v58, %v7512_v62  ;;  %v7513_v39 = vcombine.low %v7491_v40, %v7498_v35  ;;  %v7554_v32 = vrot.slane %v7532_v43, %v11172_v38  ;;  %v7587_v16 = vpop.permute.xlu1 %7586 }
 0x678   :  { %v7430_v60 = vrot.slane %v7416_v29, %v11172_v38  ;;  %v7561_v34 = vrot.slane %v8131_v11, %v11172_v38  ;;  %v7540_v42 = vrot.slane %v7530_v14, %v11172_v38  ;;  %v7547_v10 = vrot.slane %v8130_v7, %v11172_v38  ;;  %v7581_v23 = vpop.permute.xlu0 %7580 }
 0x679   :  { %v7423_v3 = vrot.slane %v7415_v47, %v11172_v38  ;;  %v7528_v46 = vrot.slane %v7514_v50, %v11172_v38  ;;  %v7521_v8 = vrot.slane %v7513_v39, %v11172_v38  ;;  %v12191_v15 = vlaneseq }
 0x67a   :  { %v7563_v49 = vcombine.low %v7554_v32, %v7561_v34  ;;  %v7562_v30 = vcombine.low %v7540_v42, %v7547_v10 }
 0x67b   :  { %7667 = vperm.xlu1 %9132, %v7480_v13   ;;  %v7431_v51 = vcombine.low %v7423_v3, %v7430_v60  ;;  %v7529_v53 = vcombine.low %v7521_v8, %v7528_v46  ;;  %v12034_v5 = vpop.permute.xlu1 %7595  ;;  %v12045_v27 = vand.u32 127, %v12191_v15  ;;  %vm7883_vm1 = vcmp.lt.s32.totalorder %v12191_v15, 256 }
 0x67c   :  { %v7577_v25 = vrot.slane %v7563_v49, %v11172_v38  ;;  %v7570_v55 = vrot.slane %v7562_v30, %v11172_v38  ;;  %v7593_v26 = vpop.permute.xlu0 %7592 }
 0x67d   :  { %v7688_v28 = vadd.s32 4294967280, %v12045_v27  ;;  %v7681_v59 = vadd.s32 4294967288, %v12045_v27  ;;  %v7679_v57 = vsub.s32 %v12045_v27, %v12187_v54  ;;  %v7695_v44 = vadd.s32 4294967272, %v12045_v27 }
 0x67e   :  { %v7578_v20 = vcombine.low %v7570_v55, %v7577_v25  ;;  %v7702_v0 = vadd.s32 4294967264, %v12045_v27  ;;  %v7716_v40 = vadd.s32 4294967248, %v12045_v27  ;;  %v7709_v4 = vadd.s32 4294967256, %v12045_v27 }
 0x67f   :  { %7664 = vperm.xlu1 %9132, %v7431_v51   ;;  %v12038_v41 = vpop.permute.xlu1 %7601  ;;  %v7691_v36 = vsub.s32 %v7688_v28, %v12187_v54  ;;  %v7684_v52 = vsub.s32 %v7681_v59, %v12187_v54  ;;  %v7680_v21 = vrot.slane %v7581_v23, %v7679_v57  ;;  %v7698_v18 = vsub.s32 %v7695_v44, %v12187_v54 }
 0x680   :  { %v7705_v62 = vsub.s32 %v7702_v0, %v12187_v54  ;;  %v7723_v14 = vadd.s32 4294967240, %v12045_v27  ;;  %v7719_v39 = vsub.s32 %v7716_v40, %v12187_v54  ;;  %v7730_v32 = vadd.s32 4294967232, %v12045_v27 }
 0x681   :  { %v7692_v58 = vrot.slane %v7587_v16, %v7691_v36  ;;  %v7685_v11 = vrot.slane %v7584_v19, %v7684_v52  ;;  %v7699_v13 = vrot.slane %v7590_v37, %v7698_v18  ;;  %v7712_v10 = vsub.s32 %v7709_v4, %v12187_v54 }
 0x682   :  { %v7706_v50 = vrot.slane %v7593_v26, %v7705_v62  ;;  %v7726_v8 = vsub.s32 %v7723_v14, %v12187_v54  ;;  %v7744_v30 = vadd.s32 4294967216, %v12045_v27  ;;  %v7737_v37 = vadd.s32 4294967224, %v12045_v27 }
 0x683   :  { %7670 = vperm.xlu1 %9132, %v7529_v53   ;;  %v7687_v29 = vsel %vm7686_vm2, %v7685_v11, %v7680_v21  ;;  %v7713_v26 = vrot.slane %v12034_v5, %v7712_v10 }
 0x684   :  { %v7694_v47 = vsel %vm7693_vm13, %v7692_v58, %v7687_v29  ;;  %v7779_v29 = vadd.s32 4294967176, %v12045_v27 }
 0x685   :  { %v12028_v48 = vpop.permute.xlu0 %7598  ;;  %v7701_v51 = vsel %vm7700_vm3, %v7699_v13, %v7694_v47 }
 0x686   :  { %v12040_v1 = vpop.permute.xlu1 %7607  ;;  %v7708_v53 = vsel %vm7707_vm4, %v7706_v50, %v7701_v51  ;;  %v7720_v55 = vrot.slane %v12028_v48, %v7719_v39  ;;  %v7747_v48 = vsub.s32 %v7744_v30, %v12187_v54 }
 0x687   :  { %7673 = vperm.xlu1 %9132, %v7578_v20   ;;  %v7733_v20 = vsub.s32 %v7730_v32, %v12187_v54  ;;  %v7715_v59 = vsel %vm7714_vm5, %v7713_v26, %v7708_v53 }
 0x688   :  { %v7722_v44 = vsel %vm7721_vm6, %v7720_v55, %v7715_v59 }
 0x68e   :  { %v12030_v45 = vpop.permute.xlu0 %7604 }
 0x68f   :  { %v7734_v5 = vrot.slane %v12030_v45, %v7733_v20 }
 0x692   :  { %v12032_v22 = vpop.permute.xlu0 %7613 }
 0x69e   :  { %v12036_v12 = vpop.permute.xlu0 %7610 }
 0x6a2   :  { %v12042_v61 = vpop.permute.xlu0 %7619 }
 0x6ac   :  { %v12047_v56 = vpop.permute.xlu0 %7616 }
 0x6b2   :  { %v7632_v33 = vpop.permute.xlu1 %7631 }
 0x6b3   :  { %v7793_v63 = vrot.slane %v7632_v33, %v7684_v52 }
 0x6bb   :  { %v7629_v2 = vpop.permute.xlu0 %7628 }
 0x6bc   :  { %v7638_v17 = vpop.permute.xlu1 %7637  ;;  %v7789_v43 = vrot.slane %v7629_v2, %v7679_v57  ;;  %v7758_v2 = vadd.s32 4294967200, %v12045_v27 }
 0x6bd   :  { %v7803_v3 = vrot.slane %v7638_v17, %v7698_v18  ;;  %v7727_v17 = vrot.slane %v12038_v41, %v7726_v8  ;;  %v7751_v41 = vadd.s32 4294967208, %v12045_v27 }
 0x6be   :  { %v7794_v60 = vsel %vm7686_vm2, %v7793_v63, %v7789_v43  ;;  %v7761_v58 = vsub.s32 %v7758_v2, %v12187_v54  ;;  %v7748_v43 = vrot.slane %v12036_v12, %v7747_v48 }
 0x6bf   :  { %v7729_v18 = vsel %vm7728_vm7, %v7727_v17, %v7722_v44  ;;  %v7754_v4 = vsub.s32 %v7751_v41, %v12187_v54 }
 0x6c0   :  { %v7736_v63 = vsel %vm7735_vm8, %v7734_v5, %v7729_v18 }
 0x6c4   :  { %v7635_v6 = vpop.permute.xlu0 %7634 }
 0x6c5   :  { %v7798_v35 = vrot.slane %v7635_v6, %v7691_v36  ;;  %v7765_v6 = vadd.s32 4294967192, %v12045_v27 }
 0x6c7   :  { %v7799_v34 = vsel %vm7693_vm13, %v7798_v35, %v7794_v60  ;;  %v7762_v60 = vrot.slane %v12047_v56, %v7761_v58 }
 0x6c8   :  { %v7644_v9 = vpop.permute.xlu1 %7643  ;;  %v7804_v25 = vsel %vm7700_vm3, %v7803_v3, %v7799_v34  ;;  %v7782_v34 = vsub.s32 %v7779_v29, %v12187_v54 }
 0x6c9   :  { %v7813_v16 = vrot.slane %v7644_v9, %v7712_v10  ;;  %v7740_v9 = vsub.s32 %v7737_v37, %v12187_v54 }
 0x6ce   :  { %v7641_v31 = vpop.permute.xlu0 %7640 }
 0x6cf   :  { %v7808_v42 = vrot.slane %v7641_v31, %v7705_v62  ;;  %v7772_v62 = vadd.s32 4294967184, %v12045_v27  ;;  %v7768_v27 = vsub.s32 %v7765_v6, %v12187_v54 }
 0x6d1   :  { %v7809_v19 = vsel %vm7707_vm4, %v7808_v42, %v7804_v25  ;;  %v7775_v47 = vsub.s32 %v7772_v62, %v12187_v54 }
 0x6d2   :  { %v7814_v57 = vsel %vm7714_vm5, %v7813_v16, %v7809_v19 }
 0x6d4   :  { %v12058_v24 = vpop.permute.xlu1 %7649 }
 0x6d5   :  { %v7823_v52 = vrot.slane %v12058_v24, %v7726_v8  ;;  %v7741_v24 = vrot.slane %v12040_v1, %v7740_v9 }
 0x6d7   :  { %v7743_v13 = vsel %vm7742_vm9, %v7741_v24, %v7736_v63 }
 0x6d8   :  { %v7750_v50 = vsel %vm7749_vm10, %v7748_v43, %v7743_v13 }
 0x6d9   :  { %v7647_v46 = vpop.permute.xlu0 %7646 }
 0x6da   :  { %v7818_v23 = vrot.slane %v7647_v46, %v7719_v39 }
 0x6dc   :  { %v7819_v36 = vsel %vm7721_vm6, %v7818_v23, %v7814_v57 }
 0x6dd   :  { %v7824_v45 = vsel %vm7728_vm7, %v7823_v52, %v7819_v36 }
 0x6e0   :  { %v12065_v7 = vpop.permute.xlu1 %7655 }
 0x6e1   :  { %v7833_v31 = vrot.slane %v12065_v7, %v7740_v9  ;;  %v7755_v7 = vrot.slane %v12032_v22, %v7754_v4  ;;  %v7769_v22 = vrot.slane %v12042_v61, %v7768_v27 }
 0x6e3   :  { %v7757_v3 = vsel %vm7756_vm11, %v7755_v7, %v7750_v50 }
 0x6e4   :  { %v7653_v33 = vpop.permute.xlu0 %7652  ;;  %v7764_v56 = vsel %vm7763_vm12, %v7762_v60, %v7757_v3 }
 0x6e5   :  { %v7828_v0 = vrot.slane %v7653_v33, %v7733_v20  ;;  %v7771_v25 = vsel %vm7770_vm14, %v7769_v22, %v7764_v56 }
 0x6e7   :  { %v7829_v11 = vsel %vm7735_vm8, %v7828_v0, %v7824_v45 }
 0x6e8   :  { %v7834_v12 = vsel %vm7742_vm9, %v7833_v31, %v7829_v11 }
 0x6ec   :  { %v7623_v40 = vpop.permute.xlu0 %7622 }
 0x6ed   :  { %v7776_v51 = vrot.slane %v7623_v40, %v7775_v47 }
 0x6ef   :  { %v7778_v19 = vsel %vm7777_vm15, %v7776_v51, %v7771_v25 }
 0x6f2   :  { %v12075_v49 = vpop.permute.xlu1 %7661 }
 0x6f3   :  { %v7843_v32 = vrot.slane %v12075_v49, %v7754_v4 }
 0x6f5   :  { %v7626_v42 = vpop.permute.xlu0 %7625 }
 0x6f6   :  { %v7659_v28 = vpop.permute.xlu1 %7658  ;;  %v7783_v30 = vrot.slane %v7626_v42, %v7782_v34 }
 0x6f7   :  { %v7838_v35 = vrot.slane %v7659_v28, %v7747_v48 }
 0x6f8   :  { %v7785_v26 = vsel %vm7784_vm0, %v7783_v30, %v7778_v19 }
 0x6f9   :  { %v7839_v1 = vsel %vm7749_vm10, %v7838_v35, %v7834_v12 }
 0x6fa   :  { %v7668_v21 = vpop.permute.xlu1 %7667  ;;  %v7844_v46 = vsel %vm7756_vm11, %v7843_v32, %v7839_v1 }
 0x6fb   :  { %v7853_v49 = vrot.slane %v7668_v21, %v7768_v27 }
 0x6fe   :  { %v7665_v14 = vpop.permute.xlu1 %7664 }
 0x6ff   :  { %v7848_v39 = vrot.slane %v7665_v14, %v7761_v58 }
 0x701   :  { %v7849_v8 = vsel %vm7763_vm12, %v7848_v39, %v7844_v46 }
 0x702   :  { %v7671_v10 = vpop.permute.xlu1 %7670  ;;  %v7854_v55 = vsel %vm7770_vm14, %v7853_v49, %v7849_v8 }
 0x703   :  { %v7858_v53 = vrot.slane %v7671_v10, %v7775_v47 }
 0x705   :  { %v7859_v23 = vsel %vm7777_vm15, %v7858_v53, %v7854_v55 }
 0x706   :  { %v7674_v54 = vpop.permute.xlu1 %7673 }
 0x707   :  { %v7863_v20 = vrot.slane %v7674_v54, %v7782_v34 }
 0x709   :  { %v7864_v37 = vsel %vm7784_vm0, %v7863_v20, %v7859_v23 }
 0x70a   :  { %v7865_v16 = vcombine.low %v7785_v26, %v7864_v37 }
 0x70c   :  { %v7872_v33 = vrot.slane %v7865_v16, %v11172_v38 }
 0x70e   :  { %v7879_v61 = vrot.slane %v7872_v33, %v11172_v38 }
 0x710   :  { %7885 = vst.msk [vmem:[#allocation3] sm:$0x3] %vm7883_vm1, %v7879_v61 }
 0x711   :  { %9146 = shalt.err (!%p9143_p4)
}
 0x712   :  { %s9147_s1 = scalar_lea.hbm %s12147_s13, 32 }
 0x713   :  { %p9148_p5 = scmp.ne.s32.totalorder %s12147_s13, %s9147_s1  ;;  %p9151_p6 = scmp.lt.u32.totalorder %s9147_s1, %s12147_s13 }
 0x715   :  { %p9153_p7 = pnand %p9151_p6, %p9148_p5 }
 0x717   :  { %9156 = shalt.err (!%p9153_p7)
}
 0x718   :  { %7895 = dma.vmem_to_hbm [thread:$0]  %s7893_s16, 32, %s12147_s13, [#allocation4]  }
 0x719   :  { %9157 = dma.done.wait [#allocation4], 32  }
 0x71a   :  { %9158 = vsyncadd [#allocation4], 4294967264 }
 0x71b   :  { %7899 = vsyncpa [#allocation4], 1 }

</bundles_post_ra>
